<compile_context>
chip_gen: v5e
topology: v5e:2x2
jax: 0.10.0
libtpu: 0.0.40
codegen_flags: <defaults>
</compile_context>

<pallas_src>
import functools

import jax
import jax.numpy as jnp
from jax.experimental import pallas as pl
from jax.experimental.pallas import tpu as pltpu


# ----------------------------------------------------------------------------
# BiGRIL kernel: grid = (batch, direction); time recurrence inside (fori_loop)
# ----------------------------------------------------------------------------
_W_NAMES = (
    "h0",
    "w_fs", "b_fs",                              # first-stage readout   H -> DIN
    "w_din_x", "w_din_h",                        # decoder lin_in (mask part + bias hoisted)
    "w_dgc", "b_dgc",                            # decoder graph conv, fused over {A1, A2}
    "w_dlo_g", "w_dlo_h", "b_dlo",               # decoder lin_out (split over [gc, h])
    "w_dro_o", "w_dro_h", "b_dro",               # decoder read_out (split over rep=[o, h])
    "w_gxh", "w_ghc",                            # fused GCGRU gate weights (mask part hoisted)
)


def bigril_kernel(x_ref, m_ref, a_cat_ref, a_blk_ref, dinm_ref, gm_ref,
                  h0_ref, w_fs_ref, b_fs_ref,
                  w_din_x_ref, w_din_h_ref,
                  w_dgc_ref, b_dgc_ref,
                  w_dlo_g_ref, w_dlo_h_ref, b_dlo_ref,
                  w_dro_o_ref, w_dro_h_ref, b_dro_ref,
                  w_gxh_ref, w_ghc_ref,
                  prelu_ref,
                  rep_ref):
    S, N, _ = x_ref.shape
    H = w_din_h_ref.shape[-1]
    d = pl.program_id(1)                      # 0 = forward in time, 1 = backward in time
    alpha = prelu_ref[d]                      # PReLU slope, scalar read from SMEM

    def mm(a, w):                              # channel / graph matmul on the MXU
        return jnp.dot(a, w, preferred_element_type=jnp.float32)

    a_cat = a_cat_ref[...]                     # (2N, N)  = [A1 ; A2]   (row-stacked)
    a_blk = a_blk_ref[...]                     # (2N, 2N) = blockdiag(A1, A2)

    # per-direction weights, loaded once (full-resident refs, indexed by direction)
    h0 = h0_ref[d]
    w_fs, b_fs = w_fs_ref[d], b_fs_ref[d]
    w_din_x, w_din_h = w_din_x_ref[d], w_din_h_ref[d]
    w_dgc, b_dgc = w_dgc_ref[d], b_dgc_ref[d]
    w_dlo_g, w_dlo_h, b_dlo = w_dlo_g_ref[d], w_dlo_h_ref[d], b_dlo_ref[d]
    w_dro_o, w_dro_h, b_dro = w_dro_o_ref[d], w_dro_h_ref[d], b_dro_ref[d]
    w_gxh = w_gxh_ref[d]                       # (4*(DIN+H), 3H)
    w_ghc = w_ghc_ref[d]                       # (4H, H)

    def diff_cat(v):
        """Lane-concat of the 4 diffusion terms [A1 v | A1^2 v | A2 v | A2^2 v]."""
        y1 = mm(a_cat, v)                      # (2N, C): [A1 v ; A2 v]
        y2 = mm(a_blk, y1)                     # (2N, C): [A1^2 v ; A2^2 v]
        return jnp.concatenate([y1[:N], y2[:N], y1[N:], y2[N:]], axis=-1)

    def step(s, h):
        t = s + d * (S - 1 - 2 * s)            # fwd reads time s ; bwd reads time S-1-s

        x_t = x_ref[t]                         # (N, DIN)
        m_t = m_ref[t]                         # (N, DIN) float mask

        # ---- 1) first-stage prediction from current state + fill
        xhat1 = mm(h, w_fs) + b_fs
        xf1 = m_t * x_t + (1.0 - m_t) * xhat1  # blend form: exact for binary masks, robust to soft

        # ---- 2) spatial decoder (order=1, support_len=2, no attention)
        dx = mm(xf1, w_din_x) + mm(h, w_din_h) + dinm_ref[t]           # m part + bias hoisted
        y = mm(a_cat, dx)                                              # (2N, H)
        gc = mm(jnp.concatenate([y[:N], y[N:]], axis=-1), w_dgc) + b_dgc
        o = mm(gc, w_dlo_g) + mm(h, w_dlo_h) + b_dlo
        o = jnp.where(o >= 0.0, o, alpha * o)                          # PReLU
        xhat2 = mm(o, w_dro_o) + mm(h, w_dro_h) + b_dro

        # representation rep = [o, h] (h = pre-update state, as in the reference decoder);
        # stored in recurrence order, backward direction is flipped once in the wrapper.
        rep_ref[s] = jnp.concatenate([o, h], axis=-1)                  # (N, 2H)

        # ---- 3) GCGRU cell (kernel_size=2 diffusion conv, mask part + biases hoisted)
        xf2 = m_t * xf1 + (1.0 - m_t) * xhat2
        exh = diff_cat(jnp.concatenate([xf2, h], axis=-1))             # (N, 4*(DIN+H))
        pre = mm(exh, w_gxh) + gm_ref[t]                               # (N, 3H): [r | u | c]
        ru = jax.nn.sigmoid(pre[:, :2 * H])
        r, u = ru[:, :H], ru[:, H:]
        erh = diff_cat(r * h)                                          # (N, 4H)
        c = jnp.tanh(pre[:, 2 * H:] + mm(erh, w_ghc))
        return u * h + (1.0 - u) * c           # layer_norm=False -> identity

    _ = jax.lax.fori_loop(0, S, step, h0, unroll=True if S <= 8 else 4)


def run_bigril(x4, m4, a_cat, a_blk, dinm, gm, gp):
    """x4, m4: (B,S,N,DIN); a_cat: (2N,N); a_blk: (2N,2N);
    dinm: (2,B,S,N,H); gm: (2,B,S,N,3H); gp: direction-stacked GRIL params."""
    B, S, N, DIN = x4.shape
    H = gp["w_din_x"].shape[-1]
    weights = [gp[k] for k in _W_NAMES]

    def full(a):                               # resident for the whole grid (no re-DMA)
        return pl.BlockSpec(a.shape, lambda b, d, _nd=a.ndim: (0,) * _nd)

    in_specs = (
        [pl.BlockSpec((None, S, N, DIN), lambda b, d: (b, 0, 0, 0)),          # x
         pl.BlockSpec((None, S, N, DIN), lambda b, d: (b, 0, 0, 0)),          # mask
         full(a_cat), full(a_blk),
         pl.BlockSpec((None, None, S, N, H), lambda b, d: (d, b, 0, 0, 0)),   # hoisted lin_in(m)
         pl.BlockSpec((None, None, S, N, 3 * H), lambda b, d: (d, b, 0, 0, 0))]  # hoisted gates(m)
        + [full(w) for w in weights]
        + [pl.BlockSpec(memory_space=pltpu.MemorySpace.SMEM)]                 # PReLU slopes (2,)
    )
    out_spec = pl.BlockSpec((None, None, S, N, 2 * H), lambda b, d: (d, b, 0, 0, 0))

    return pl.pallas_call(
        bigril_kernel,
        grid=(B, 2),                           # (batch, direction) -> megacore-parallel on v7x
        in_specs=in_specs,
        out_specs=out_spec,
        out_shape=jax.ShapeDtypeStruct((2, B, S, N, 2 * H), jnp.float32),
        compiler_params=pltpu.CompilerParams(
            dimension_semantics=("parallel", "parallel")),
    )(x4, m4, a_cat, a_blk, dinm, gm, *weights, gp["prelu"])


# ----------------------------------------------------------------------------
# BiGRIL merge MLP (Conv 1x1 -> ReLU -> Dropout(eval: identity) -> Conv 1x1),
# gridded over row tiles; W1 pre-split so the concat tensor never exists.
# ----------------------------------------------------------------------------
def merge_kernel(rep_f_ref, rep_b_ref, m_ref, emb_ref,
                 w1_f_ref, w1_b_ref, w1_m_ref, w2_ref, b2_ref, out_ref):
    def mm(a, w):
        return jnp.dot(a, w, preferred_element_type=jnp.float32)

    hid = (mm(rep_f_ref[...], w1_f_ref[...]) + mm(rep_b_ref[...], w1_b_ref[...])
           + mm(m_ref[...], w1_m_ref[...]) + emb_ref[...])     # emb @ W1_e + b1 pre-folded
    hid = jnp.maximum(hid, 0.0)                                 # ReLU; ff_dropout identity (eval)
    # TODO(synk): DIN=4 last dim means lane-sparse output stores; fine at this size.
    out_ref[...] = mm(hid, w2_ref[...]) + b2_ref[...]


def run_merge(rep_f, rep_b, m_rows, emb_b1, mp, n_nodes):
    rows, two_h = rep_f.shape
    din = m_rows.shape[-1]
    groups = rows // n_nodes                   # = B * S (rows are ordered (b, s, n))

    tb = groups                                # largest divisor giving <=1024-row, 8-aligned tiles
    for cand in range(1, groups + 1):
        if groups % cand == 0 and cand * n_nodes <= 1024 and (cand * n_nodes) % 8 == 0:
            tb = cand
    tr = tb * n_nodes
    emb_tile = jnp.tile(emb_b1, (tb, 1))       # (tr, d_ff), identical for every tile

    def rows_spec(c):
        return pl.BlockSpec((tr, c), lambda i: (i, 0))

    def full(a):
        return pl.BlockSpec(a.shape, lambda i, _nd=a.ndim: (0,) * _nd)

    return pl.pallas_call(
        merge_kernel,
        grid=(rows // tr,),
        in_specs=[rows_spec(two_h), rows_spec(two_h), rows_spec(din),
                  full(emb_tile), full(mp["w1_f"]), full(mp["w1_b"]),
                  full(mp["w1_m"]), full(mp["w2"]), full(mp["b2"])],
        out_specs=rows_spec(din),
        out_shape=jax.ShapeDtypeStruct((rows, din), jnp.float32),
        compiler_params=pltpu.CompilerParams(dimension_semantics=("parallel",)),
    )(rep_f, rep_b, m_rows, emb_tile, mp["w1_f"], mp["w1_b"], mp["w1_m"], mp["w2"], mp["b2"])


# ----------------------------------------------------------------------------
# Glue (plain JAX): support normalization, mask-work hoisting, orchestration
# ----------------------------------------------------------------------------
def compute_supports(adj):
    """Row-normalized fwd/bwd supports (SpatialConvOrderK.compute_support)."""
    eps = 1e-8
    a_fwd = adj / (adj.sum(1, keepdims=True) + eps)
    a_bwd = adj.T / (adj.T.sum(1, keepdims=True) + eps)
    return a_fwd.astype(jnp.float32), a_bwd.astype(jnp.float32)


def _expand_like_torch(t, batch_size, steps):
    # mirrors the dynamic reshape handling in GRINet.forward
    if t.ndim == 2:
        return jnp.broadcast_to(t[None, None], (batch_size, steps) + t.shape)
    if t.ndim == 3:
        return jnp.broadcast_to(t[None], (batch_size,) + t.shape)
    if t.ndim == 4:
        return t
    return t.reshape(batch_size, steps, -1, t.shape[-1])


def grinet_forward(params, x, adj, mask, batch_size, steps):
    """Eval-mode GRINet forward: returns the imputation of shape (b, s, n, c)."""
    x4 = _expand_like_torch(x, batch_size, steps).astype(jnp.float32)   # (B, S, N, DIN)
    m4 = _expand_like_torch(mask, batch_size, steps).astype(jnp.float32)
    B, S, N, DIN = x4.shape

    gp = params["gril"]
    H = gp["w_din_x"].shape[-1]

    a1, a2 = compute_supports(adj.astype(jnp.float32))                  # (N, N) each
    a_cat = jnp.concatenate([a1, a2], axis=0)                           # (2N, N)
    a_blk = jnp.zeros((2 * N, 2 * N), jnp.float32)
    a_blk = a_blk.at[:N, :N].set(a1).at[N:, N:].set(a2)                 # blockdiag(A1, A2)

    # ---- mask-only work hoisted out of the recurrence (batched XLA matmuls) ----
    # decoder lin_in contribution of the mask channels (+ bias folded)
    dinm = (jnp.einsum("bsnd,zdh->zbsnh", m4, gp["w_din_m"])
            + gp["b_din"].reshape(2, 1, 1, 1, H))                       # (2, B, S, N, H)
    # GCGRU gate contribution of the mask channels over the 4 diffusion terms (+ biases folded);
    # term order matches the kernel: (A1, A1^2, A2, A2^2)
    m_a1 = jnp.einsum("wn,bsnd->bswd", a1, m4)
    m_a2 = jnp.einsum("wn,bsnd->bswd", a2, m4)
    m_terms = jnp.stack([m_a1, jnp.einsum("wn,bsnd->bswd", a1, m_a1),
                         m_a2, jnp.einsum("wn,bsnd->bswd", a2, m_a2)], axis=0)
    gate_bias = jnp.concatenate([gp["b_ru"], gp["b_c"]], axis=-1)       # (2, 1, 3H)
    gm = (jnp.einsum("kbsnd,zkdh->zbsnh", m_terms, gp["w_gm"])
          + gate_bias.reshape(2, 1, 1, 1, 3 * H))                       # (2, B, S, N, 3H)

    # ---- both GRIL directions (direction + batch on the grid) ----
    rep = run_bigril(x4, m4, a_cat, a_blk, dinm, gm, gp)                # (2, B, S, N, 2H)

    rep_f = rep[0].reshape(B * S * N, 2 * H)
    rep_b = jnp.flip(rep[1], axis=1).reshape(B * S * N, 2 * H)          # undo recurrence order
    m_rows = m4.reshape(B * S * N, DIN)

    mp = params["merge"]
    emb_b1 = params["emb"] @ mp["w1_e"] + mp["b1"]                      # (N, d_ff), b1 folded

    imput = run_merge(rep_f, rep_b, m_rows, emb_b1, mp, n_nodes=N)      # (B*S*N, DIN)
    return imput.reshape(B, S, N, DIN)                                  # (b, s, n, c)


# ----------------------------------------------------------------------------
# Deterministic synthetic parameters (pre-fused / pre-split weight layouts)
# ----------------------------------------------------------------------------
def init_params(key, n_nodes, d_in, d_hidden, d_ff, d_emb):
    H, DIN = d_hidden, d_in
    keys = iter(jax.random.split(key, 128))

    def w(shape, scale=0.1):
        return (scale * jax.random.normal(next(keys), shape)).astype(jnp.float32)

    def gril_dir():
        # Fused GCGRU gate weight over the 4 diffusion terms (A1, A1^2, A2, A2^2):
        # rows per term = [x_filled channels (DIN) | h channels (H)], columns = [r | u | c].
        # The h rows contribute zero to the candidate columns (candidate uses r*h via w_ghc).
        blocks = []
        for _ in range(4):
            gx_k = w((DIN, 3 * H))
            gh_k = jnp.concatenate([w((H, 2 * H)), jnp.zeros((H, H), jnp.float32)], axis=-1)
            blocks.append(jnp.concatenate([gx_k, gh_k], axis=0))
        w_gxh = jnp.concatenate(blocks, axis=0)                          # (4*(DIN+H), 3H)
        w_ghc = jnp.concatenate([w((H, H)) for _ in range(4)], axis=0)   # (4H, H)
        return dict(
            h0=w((n_nodes, H), 1.0 / (H ** 0.5)),
            w_fs=w((H, DIN)), b_fs=w((1, DIN)),
            w_din_x=w((DIN, H)), w_din_m=w((DIN, H)), w_din_h=w((H, H)), b_din=w((1, H)),
            w_dgc=jnp.concatenate([w((H, H)), w((H, H))], axis=0), b_dgc=w((1, H)),  # (2H, H)
            w_dlo_g=w((H, H)), w_dlo_h=w((H, H)), b_dlo=w((1, H)),
            w_dro_o=w((H, DIN)), w_dro_h=w((H, DIN)), b_dro=w((1, DIN)),
            w_gxh=w_gxh, w_ghc=w_ghc,
            w_gm=w((4, DIN, 3 * H)),                                     # mask part (hoisted)
            b_ru=w((1, 2 * H)), b_c=w((1, H)),
            prelu=jnp.asarray(0.25, jnp.float32),
        )

    fwd, bwd = gril_dir(), gril_dir()
    gril = {k: jnp.stack([fwd[k], bwd[k]], axis=0) for k in fwd}         # leading dim = direction

    merge = dict(
        w1_f=w((2 * H, d_ff)), w1_b=w((2 * H, d_ff)),                    # per-direction rep blocks
        w1_m=w((DIN, d_ff)), w1_e=w((d_emb, d_ff)), b1=w((1, d_ff)),
        w2=w((d_ff, DIN)), b2=w((1, DIN)),
    )
    return dict(gril=gril, emb=w((n_nodes, d_emb), 1.0), merge=merge)


# ----------------------------------------------------------------------------
if __name__ == "__main__":
    B, S, N, DIN = 2, 8, 16, 4          # batch, steps (window), nodes, features
    H, DFF, DEMB = 32, 32, 8            # d_hidden, d_ff, d_emb

    key = jax.random.PRNGKey(0)
    kp, kx, km, ka = jax.random.split(key, 4)

    params = init_params(kp, N, DIN, H, DFF, DEMB)
    x = jax.random.normal(kx, (B, S, N, DIN), jnp.float32)
    mask = (jax.random.uniform(km, (B, S, N, DIN)) > 0.25).astype(jnp.float32)
    adj = jax.random.uniform(ka, (N, N), jnp.float32) * (1.0 - jnp.eye(N, dtype=jnp.float32))

    fwd_fn = jax.jit(functools.partial(grinet_forward, batch_size=B, steps=S))
    out = fwd_fn(params, x, adj, mask)
    jax.block_until_ready(out)
    assert out.shape == (B, S, N, DIN), out.shape
    print("KERNEL_OK")
</pallas_src>

<mosaic_0001>
module attributes {stable_mosaic.version = 11 : i64} {
  func.func @bigril_kernel(%arg0: i32, %arg1: i32, %arg2: memref<1x8x16x4xf32, #tpu.memory_space<vmem>>, %arg3: memref<1x8x16x4xf32, #tpu.memory_space<vmem>>, %arg4: memref<32x16xf32, #tpu.memory_space<vmem>>, %arg5: memref<32x32xf32, #tpu.memory_space<vmem>>, %arg6: memref<1x1x8x16x32xf32, #tpu.memory_space<vmem>>, %arg7: memref<1x1x8x16x96xf32, #tpu.memory_space<vmem>>, %arg8: memref<2x16x32xf32, #tpu.memory_space<vmem>>, %arg9: memref<2x32x4xf32, #tpu.memory_space<vmem>>, %arg10: memref<2x1x4xf32, #tpu.memory_space<vmem>>, %arg11: memref<2x4x32xf32, #tpu.memory_space<vmem>>, %arg12: memref<2x32x32xf32, #tpu.memory_space<vmem>>, %arg13: memref<2x64x32xf32, #tpu.memory_space<vmem>>, %arg14: memref<2x1x32xf32, #tpu.memory_space<vmem>>, %arg15: memref<2x32x32xf32, #tpu.memory_space<vmem>>, %arg16: memref<2x32x32xf32, #tpu.memory_space<vmem>>, %arg17: memref<2x1x32xf32, #tpu.memory_space<vmem>>, %arg18: memref<2x32x4xf32, #tpu.memory_space<vmem>>, %arg19: memref<2x32x4xf32, #tpu.memory_space<vmem>>, %arg20: memref<2x1x4xf32, #tpu.memory_space<vmem>>, %arg21: memref<2x144x96xf32, #tpu.memory_space<vmem>>, %arg22: memref<2x128x32xf32, #tpu.memory_space<vmem>>, %arg23: memref<2xf32, #tpu.memory_space<smem>>, %arg24: memref<1x1x8x16x64xf32, #tpu.memory_space<vmem>>) attributes {dimension_semantics = [#tpu.dimension_semantics<parallel>, #tpu.dimension_semantics<parallel>], iteration_bounds = array<i64: 2, 2>, scalar_prefetch = 0 : i64, scratch_operands = 0 : i64, tpu.core_type = #tpu.core_type<tc>, window_params = [{transform_indices = @transform_0, window_bounds = array<i64: 1, 8, 16, 4>}, {transform_indices = @transform_1, window_bounds = array<i64: 1, 8, 16, 4>}, {pipeline_mode = #tpu.pipeline_mode<synchronous>, transform_indices = @transform_2, window_bounds = array<i64: 32, 16>}, {pipeline_mode = #tpu.pipeline_mode<synchronous>, transform_indices = @transform_3, window_bounds = array<i64: 32, 32>}, {transform_indices = @transform_4, window_bounds = array<i64: 1, 1, 8, 16, 32>}, {transform_indices = @transform_5, window_bounds = array<i64: 1, 1, 8, 16, 96>}, {pipeline_mode = #tpu.pipeline_mode<synchronous>, transform_indices = @transform_6, window_bounds = array<i64: 2, 16, 32>}, {pipeline_mode = #tpu.pipeline_mode<synchronous>, transform_indices = @transform_7, window_bounds = array<i64: 2, 32, 4>}, {pipeline_mode = #tpu.pipeline_mode<synchronous>, transform_indices = @transform_8, window_bounds = array<i64: 2, 1, 4>}, {pipeline_mode = #tpu.pipeline_mode<synchronous>, transform_indices = @transform_9, window_bounds = array<i64: 2, 4, 32>}, {pipeline_mode = #tpu.pipeline_mode<synchronous>, transform_indices = @transform_10, window_bounds = array<i64: 2, 32, 32>}, {pipeline_mode = #tpu.pipeline_mode<synchronous>, transform_indices = @transform_11, window_bounds = array<i64: 2, 64, 32>}, {pipeline_mode = #tpu.pipeline_mode<synchronous>, transform_indices = @transform_12, window_bounds = array<i64: 2, 1, 32>}, {pipeline_mode = #tpu.pipeline_mode<synchronous>, transform_indices = @transform_13, window_bounds = array<i64: 2, 32, 32>}, {pipeline_mode = #tpu.pipeline_mode<synchronous>, transform_indices = @transform_14, window_bounds = array<i64: 2, 32, 32>}, {pipeline_mode = #tpu.pipeline_mode<synchronous>, transform_indices = @transform_15, window_bounds = array<i64: 2, 1, 32>}, {pipeline_mode = #tpu.pipeline_mode<synchronous>, transform_indices = @transform_16, window_bounds = array<i64: 2, 32, 4>}, {pipeline_mode = #tpu.pipeline_mode<synchronous>, transform_indices = @transform_17, window_bounds = array<i64: 2, 32, 4>}, {pipeline_mode = #tpu.pipeline_mode<synchronous>, transform_indices = @transform_18, window_bounds = array<i64: 2, 1, 4>}, {pipeline_mode = #tpu.pipeline_mode<synchronous>, transform_indices = @transform_19, window_bounds = array<i64: 2, 144, 96>}, {pipeline_mode = #tpu.pipeline_mode<synchronous>, transform_indices = @transform_20, window_bounds = array<i64: 2, 128, 32>}, {transform_indices = @transform_21, window_bounds = array<i64: 2>}, {transform_indices = @transform_22, window_bounds = array<i64: 1, 1, 8, 16, 64>}]} {
    %0 = arith.index_cast %arg1 : i32 to index
    %1 = memref.load %arg23[%0] : memref<2xf32, #tpu.memory_space<smem>>
    %c0 = arith.constant 0 : index
    %c0_0 = arith.constant 0 : index
    %2 = vector.load %arg4[%c0, %c0_0] : memref<32x16xf32, #tpu.memory_space<vmem>>, vector<32x16xf32>
    %c0_1 = arith.constant 0 : index
    %c0_2 = arith.constant 0 : index
    %3 = vector.load %arg5[%c0_1, %c0_2] : memref<32x32xf32, #tpu.memory_space<vmem>>, vector<32x32xf32>
    %4 = arith.index_cast %arg1 : i32 to index
    %c0_3 = arith.constant 0 : index
    %c0_4 = arith.constant 0 : index
    %5 = vector.load %arg8[%4, %c0_3, %c0_4] : memref<2x16x32xf32, #tpu.memory_space<vmem>>, vector<1x16x32xf32>
    %6 = vector.shape_cast %5 : vector<1x16x32xf32> to vector<16x32xf32>
    %7 = arith.index_cast %arg1 : i32 to index
    %c0_5 = arith.constant 0 : index
    %c0_6 = arith.constant 0 : index
    %8 = vector.load %arg9[%7, %c0_5, %c0_6] : memref<2x32x4xf32, #tpu.memory_space<vmem>>, vector<1x32x4xf32>
    %9 = vector.shape_cast %8 : vector<1x32x4xf32> to vector<32x4xf32>
    %10 = arith.index_cast %arg1 : i32 to index
    %c0_7 = arith.constant 0 : index
    %c0_8 = arith.constant 0 : index
    %11 = vector.load %arg10[%10, %c0_7, %c0_8] : memref<2x1x4xf32, #tpu.memory_space<vmem>>, vector<1x1x4xf32>
    %12 = vector.shape_cast %11 : vector<1x1x4xf32> to vector<1x4xf32>
    %13 = arith.index_cast %arg1 : i32 to index
    %c0_9 = arith.constant 0 : index
    %c0_10 = arith.constant 0 : index
    %14 = vector.load %arg11[%13, %c0_9, %c0_10] : memref<2x4x32xf32, #tpu.memory_space<vmem>>, vector<1x4x32xf32>
    %15 = vector.shape_cast %14 : vector<1x4x32xf32> to vector<4x32xf32>
    %16 = arith.index_cast %arg1 : i32 to index
    %c0_11 = arith.constant 0 : index
    %c0_12 = arith.constant 0 : index
    %17 = vector.load %arg12[%16, %c0_11, %c0_12] : memref<2x32x32xf32, #tpu.memory_space<vmem>>, vector<1x32x32xf32>
    %18 = vector.shape_cast %17 : vector<1x32x32xf32> to vector<32x32xf32>
    %19 = arith.index_cast %arg1 : i32 to index
    %c0_13 = arith.constant 0 : index
    %c0_14 = arith.constant 0 : index
    %20 = vector.load %arg13[%19, %c0_13, %c0_14] : memref<2x64x32xf32, #tpu.memory_space<vmem>>, vector<1x64x32xf32>
    %21 = vector.shape_cast %20 : vector<1x64x32xf32> to vector<64x32xf32>
    %22 = arith.index_cast %arg1 : i32 to index
    %c0_15 = arith.constant 0 : index
    %c0_16 = arith.constant 0 : index
    %23 = vector.load %arg14[%22, %c0_15, %c0_16] : memref<2x1x32xf32, #tpu.memory_space<vmem>>, vector<1x1x32xf32>
    %24 = vector.shape_cast %23 : vector<1x1x32xf32> to vector<1x32xf32>
    %25 = arith.index_cast %arg1 : i32 to index
    %c0_17 = arith.constant 0 : index
    %c0_18 = arith.constant 0 : index
    %26 = vector.load %arg15[%25, %c0_17, %c0_18] : memref<2x32x32xf32, #tpu.memory_space<vmem>>, vector<1x32x32xf32>
    %27 = vector.shape_cast %26 : vector<1x32x32xf32> to vector<32x32xf32>
    %28 = arith.index_cast %arg1 : i32 to index
    %c0_19 = arith.constant 0 : index
    %c0_20 = arith.constant 0 : index
    %29 = vector.load %arg16[%28, %c0_19, %c0_20] : memref<2x32x32xf32, #tpu.memory_space<vmem>>, vector<1x32x32xf32>
    %30 = vector.shape_cast %29 : vector<1x32x32xf32> to vector<32x32xf32>
    %31 = arith.index_cast %arg1 : i32 to index
    %c0_21 = arith.constant 0 : index
    %c0_22 = arith.constant 0 : index
    %32 = vector.load %arg17[%31, %c0_21, %c0_22] : memref<2x1x32xf32, #tpu.memory_space<vmem>>, vector<1x1x32xf32>
    %33 = vector.shape_cast %32 : vector<1x1x32xf32> to vector<1x32xf32>
    %34 = arith.index_cast %arg1 : i32 to index
    %c0_23 = arith.constant 0 : index
    %c0_24 = arith.constant 0 : index
    %35 = vector.load %arg18[%34, %c0_23, %c0_24] : memref<2x32x4xf32, #tpu.memory_space<vmem>>, vector<1x32x4xf32>
    %36 = vector.shape_cast %35 : vector<1x32x4xf32> to vector<32x4xf32>
    %37 = arith.index_cast %arg1 : i32 to index
    %c0_25 = arith.constant 0 : index
    %c0_26 = arith.constant 0 : index
    %38 = vector.load %arg19[%37, %c0_25, %c0_26] : memref<2x32x4xf32, #tpu.memory_space<vmem>>, vector<1x32x4xf32>
    %39 = vector.shape_cast %38 : vector<1x32x4xf32> to vector<32x4xf32>
    %40 = arith.index_cast %arg1 : i32 to index
    %c0_27 = arith.constant 0 : index
    %c0_28 = arith.constant 0 : index
    %41 = vector.load %arg20[%40, %c0_27, %c0_28] : memref<2x1x4xf32, #tpu.memory_space<vmem>>, vector<1x1x4xf32>
    %42 = vector.shape_cast %41 : vector<1x1x4xf32> to vector<1x4xf32>
    %43 = arith.index_cast %arg1 : i32 to index
    %c0_29 = arith.constant 0 : index
    %c0_30 = arith.constant 0 : index
    %44 = vector.load %arg21[%43, %c0_29, %c0_30] : memref<2x144x96xf32, #tpu.memory_space<vmem>>, vector<1x144x96xf32>
    %45 = vector.shape_cast %44 : vector<1x144x96xf32> to vector<144x96xf32>
    %46 = arith.index_cast %arg1 : i32 to index
    %c0_31 = arith.constant 0 : index
    %c0_32 = arith.constant 0 : index
    %47 = vector.load %arg22[%46, %c0_31, %c0_32] : memref<2x128x32xf32, #tpu.memory_space<vmem>>, vector<1x128x32xf32>
    %48 = vector.shape_cast %47 : vector<1x128x32xf32> to vector<128x32xf32>
    %c0_i32 = arith.constant 0 : i32
    %c2_i32 = arith.constant 2 : i32
    %49 = arith.muli %c2_i32, %c0_i32 : i32
    %c7_i32 = arith.constant 7 : i32
    %50 = arith.subi %c7_i32, %49 : i32
    %51 = arith.muli %arg1, %50 : i32
    %52 = arith.addi %c0_i32, %51 : i32
    %c0_33 = arith.constant 0 : index
    %53 = arith.index_cast %52 : i32 to index
    %c0_34 = arith.constant 0 : index
    %c0_35 = arith.constant 0 : index
    %54 = vector.load %arg2[%c0_33, %53, %c0_34, %c0_35] : memref<1x8x16x4xf32, #tpu.memory_space<vmem>>, vector<1x1x16x4xf32>
    %55 = vector.shape_cast %54 : vector<1x1x16x4xf32> to vector<16x4xf32>
    %c0_36 = arith.constant 0 : index
    %56 = arith.index_cast %52 : i32 to index
    %c0_37 = arith.constant 0 : index
    %c0_38 = arith.constant 0 : index
    %57 = vector.load %arg3[%c0_36, %56, %c0_37, %c0_38] : memref<1x8x16x4xf32, #tpu.memory_space<vmem>>, vector<1x1x16x4xf32>
    %58 = vector.shape_cast %57 : vector<1x1x16x4xf32> to vector<16x4xf32>
    %cst = arith.constant dense<0.000000e+00> : vector<16x4xf32>
    %59 = tpu.matmul %6, %9, %cst {dimension_numbers = #tpu.dot_dimension_numbers<[1], [0], [0], [1], [0, 0, 1, 1], [], []>} : vector<16x32xf32>, vector<32x4xf32>, vector<16x4xf32> -> vector<16x4xf32>
    %60 = vector.broadcast %12 : vector<1x4xf32> to vector<16x4xf32>
    %61 = arith.addf %59, %60 : vector<16x4xf32>
    %62 = arith.mulf %58, %55 : vector<16x4xf32>
    %cst_39 = arith.constant 1.000000e+00 : f32
    %63 = vector.broadcast %cst_39 : f32 to vector<16x4xf32>
    %64 = arith.subf %63, %58 : vector<16x4xf32>
    %65 = arith.mulf %64, %61 : vector<16x4xf32>
    %66 = arith.addf %62, %65 : vector<16x4xf32>
    %cst_40 = arith.constant dense<0.000000e+00> : vector<16x32xf32>
    %67 = tpu.matmul %66, %15, %cst_40 {dimension_numbers = #tpu.dot_dimension_numbers<[1], [0], [0], [1], [0, 0, 1, 1], [], []>} : vector<16x4xf32>, vector<4x32xf32>, vector<16x32xf32> -> vector<16x32xf32>
    %cst_41 = arith.constant dense<0.000000e+00> : vector<16x32xf32>
    %68 = tpu.matmul %6, %18, %cst_41 {dimension_numbers = #tpu.dot_dimension_numbers<[1], [0], [0], [1], [0, 0, 1, 1], [], []>} : vector<16x32xf32>, vector<32x32xf32>, vector<16x32xf32> -> vector<16x32xf32>
    %69 = arith.addf %67, %68 : vector<16x32xf32>
    %c0_42 = arith.constant 0 : index
    %c0_43 = arith.constant 0 : index
    %70 = arith.index_cast %52 : i32 to index
    %c0_44 = arith.constant 0 : index
    %c0_45 = arith.constant 0 : index
    %71 = vector.load %arg6[%c0_42, %c0_43, %70, %c0_44, %c0_45] : memref<1x1x8x16x32xf32, #tpu.memory_space<vmem>>, vector<1x1x1x16x32xf32>
    %72 = vector.shape_cast %71 : vector<1x1x1x16x32xf32> to vector<16x32xf32>
    %73 = arith.addf %69, %72 : vector<16x32xf32>
    %cst_46 = arith.constant dense<0.000000e+00> : vector<32x32xf32>
    %74 = tpu.matmul %2, %73, %cst_46 {dimension_numbers = #tpu.dot_dimension_numbers<[1], [0], [0], [1], [0, 0, 1, 1], [], []>} : vector<32x16xf32>, vector<16x32xf32>, vector<32x32xf32> -> vector<32x32xf32>
    %75 = vector.extract_strided_slice %74 {offsets = [0, 0], sizes = [16, 32], strides = [1, 1]} : vector<32x32xf32> to vector<16x32xf32>
    %76 = vector.extract_strided_slice %74 {offsets = [16, 0], sizes = [16, 32], strides = [1, 1]} : vector<32x32xf32> to vector<16x32xf32>
    %77 = tpu.concatenate %75, %76 in 1 : vector<16x32xf32>, vector<16x32xf32> -> vector<16x64xf32>
    %cst_47 = arith.constant dense<0.000000e+00> : vector<16x32xf32>
    %78 = tpu.matmul %77, %21, %cst_47 {dimension_numbers = #tpu.dot_dimension_numbers<[1], [0], [0], [1], [0, 0, 1, 1], [], []>} : vector<16x64xf32>, vector<64x32xf32>, vector<16x32xf32> -> vector<16x32xf32>
    %79 = vector.broadcast %24 : vector<1x32xf32> to vector<16x32xf32>
    %80 = arith.addf %78, %79 : vector<16x32xf32>
    %cst_48 = arith.constant dense<0.000000e+00> : vector<16x32xf32>
    %81 = tpu.matmul %80, %27, %cst_48 {dimension_numbers = #tpu.dot_dimension_numbers<[1], [0], [0], [1], [0, 0, 1, 1], [], []>} : vector<16x32xf32>, vector<32x32xf32>, vector<16x32xf32> -> vector<16x32xf32>
    %cst_49 = arith.constant dense<0.000000e+00> : vector<16x32xf32>
    %82 = tpu.matmul %6, %30, %cst_49 {dimension_numbers = #tpu.dot_dimension_numbers<[1], [0], [0], [1], [0, 0, 1, 1], [], []>} : vector<16x32xf32>, vector<32x32xf32>, vector<16x32xf32> -> vector<16x32xf32>
    %83 = arith.addf %81, %82 : vector<16x32xf32>
    %84 = vector.broadcast %33 : vector<1x32xf32> to vector<16x32xf32>
    %85 = arith.addf %83, %84 : vector<16x32xf32>
    %cst_50 = arith.constant 0.000000e+00 : f32
    %86 = vector.broadcast %cst_50 : f32 to vector<16x32xf32>
    %87 = arith.cmpf oge, %85, %86 : vector<16x32xf32>
    %88 = vector.broadcast %1 : f32 to vector<16x32xf32>
    %89 = arith.mulf %88, %85 : vector<16x32xf32>
    %90 = arith.select %87, %85, %89 : vector<16x32xi1>, vector<16x32xf32>
    %cst_51 = arith.constant dense<0.000000e+00> : vector<16x4xf32>
    %91 = tpu.matmul %90, %36, %cst_51 {dimension_numbers = #tpu.dot_dimension_numbers<[1], [0], [0], [1], [0, 0, 1, 1], [], []>} : vector<16x32xf32>, vector<32x4xf32>, vector<16x4xf32> -> vector<16x4xf32>
    %cst_52 = arith.constant dense<0.000000e+00> : vector<16x4xf32>
    %92 = tpu.matmul %6, %39, %cst_52 {dimension_numbers = #tpu.dot_dimension_numbers<[1], [0], [0], [1], [0, 0, 1, 1], [], []>} : vector<16x32xf32>, vector<32x4xf32>, vector<16x4xf32> -> vector<16x4xf32>
    %93 = arith.addf %91, %92 : vector<16x4xf32>
    %94 = vector.broadcast %42 : vector<1x4xf32> to vector<16x4xf32>
    %95 = arith.addf %93, %94 : vector<16x4xf32>
    %96 = tpu.concatenate %90, %6 in 1 : vector<16x32xf32>, vector<16x32xf32> -> vector<16x64xf32>
    %c0_53 = arith.constant 0 : index
    %c0_54 = arith.constant 0 : index
    %97 = arith.index_cast %c0_i32 : i32 to index
    %c0_55 = arith.constant 0 : index
    %c0_56 = arith.constant 0 : index
    %98 = vector.load %arg24[%c0_53, %c0_54, %97, %c0_55, %c0_56] : memref<1x1x8x16x64xf32, #tpu.memory_space<vmem>>, vector<1x1x1x16x64xf32>
    %99 = vector.shape_cast %98 : vector<1x1x1x16x64xf32> to vector<16x64xf32>
    %100 = vector.shape_cast %96 : vector<16x64xf32> to vector<1x1x1x16x64xf32>
    tpu.vector_store %arg24[%c0_53, %c0_54, %97, %c0_55, %c0_56], %100 {strides = array<i32>} : memref<1x1x8x16x64xf32, #tpu.memory_space<vmem>>, vector<1x1x1x16x64xf32>,
    %101 = arith.mulf %58, %66 : vector<16x4xf32>
    %cst_57 = arith.constant 1.000000e+00 : f32
    %102 = vector.broadcast %cst_57 : f32 to vector<16x4xf32>
    %103 = arith.subf %102, %58 : vector<16x4xf32>
    %104 = arith.mulf %103, %95 : vector<16x4xf32>
    %105 = arith.addf %101, %104 : vector<16x4xf32>
    %106 = tpu.concatenate %105, %6 in 1 : vector<16x4xf32>, vector<16x32xf32> -> vector<16x36xf32>
    %cst_58 = arith.constant dense<0.000000e+00> : vector<32x36xf32>
    %107 = tpu.matmul %2, %106, %cst_58 {dimension_numbers = #tpu.dot_dimension_numbers<[1], [0], [0], [1], [0, 0, 1, 1], [], []>} : vector<32x16xf32>, vector<16x36xf32>, vector<32x36xf32> -> vector<32x36xf32>
    %cst_59 = arith.constant dense<0.000000e+00> : vector<32x36xf32>
    %108 = tpu.matmul %3, %107, %cst_59 {dimension_numbers = #tpu.dot_dimension_numbers<[1], [0], [0], [1], [0, 0, 1, 1], [], []>} : vector<32x32xf32>, vector<32x36xf32>, vector<32x36xf32> -> vector<32x36xf32>
    %109 = vector.extract_strided_slice %107 {offsets = [0, 0], sizes = [16, 36], strides = [1, 1]} : vector<32x36xf32> to vector<16x36xf32>
    %110 = vector.extract_strided_slice %108 {offsets = [0, 0], sizes = [16, 36], strides = [1, 1]} : vector<32x36xf32> to vector<16x36xf32>
    %111 = vector.extract_strided_slice %107 {offsets = [16, 0], sizes = [16, 36], strides = [1, 1]} : vector<32x36xf32> to vector<16x36xf32>
    %112 = vector.extract_strided_slice %108 {offsets = [16, 0], sizes = [16, 36], strides = [1, 1]} : vector<32x36xf32> to vector<16x36xf32>
    %113 = tpu.concatenate %109, %110, %111, %112 in 1 : vector<16x36xf32>, vector<16x36xf32>, vector<16x36xf32>, vector<16x36xf32> -> vector<16x144xf32>
    %cst_60 = arith.constant dense<0.000000e+00> : vector<16x96xf32>
    %114 = tpu.matmul %113, %45, %cst_60 {dimension_numbers = #tpu.dot_dimension_numbers<[1], [0], [0], [1], [0, 0, 1, 1], [], []>} : vector<16x144xf32>, vector<144x96xf32>, vector<16x96xf32> -> vector<16x96xf32>
    %c0_61 = arith.constant 0 : index
    %c0_62 = arith.constant 0 : index
    %115 = arith.index_cast %52 : i32 to index
    %c0_63 = arith.constant 0 : index
    %c0_64 = arith.constant 0 : index
    %116 = vector.load %arg7[%c0_61, %c0_62, %115, %c0_63, %c0_64] : memref<1x1x8x16x96xf32, #tpu.memory_space<vmem>>, vector<1x1x1x16x96xf32>
    %117 = vector.shape_cast %116 : vector<1x1x1x16x96xf32> to vector<16x96xf32>
    %118 = arith.addf %114, %117 : vector<16x96xf32>
    %119 = vector.extract_strided_slice %118 {offsets = [0, 0], sizes = [16, 64], strides = [1, 1]} : vector<16x96xf32> to vector<16x64xf32>
    %120 = arith.negf %119 : vector<16x64xf32>
    %121 = math.exp %120 : vector<16x64xf32>
    %cst_65 = arith.constant 1.000000e+00 : f32
    %122 = vector.broadcast %cst_65 : f32 to vector<16x64xf32>
    %123 = arith.addf %122, %121 : vector<16x64xf32>
    %124 = arith.divf %122, %123 : vector<16x64xf32>
    %125 = vector.extract_strided_slice %124 {offsets = [0, 0], sizes = [16, 32], strides = [1, 1]} : vector<16x64xf32> to vector<16x32xf32>
    %126 = vector.extract_strided_slice %124 {offsets = [0, 32], sizes = [16, 32], strides = [1, 1]} : vector<16x64xf32> to vector<16x32xf32>
    %127 = arith.mulf %125, %6 : vector<16x32xf32>
    %cst_66 = arith.constant dense<0.000000e+00> : vector<32x32xf32>
    %128 = tpu.matmul %2, %127, %cst_66 {dimension_numbers = #tpu.dot_dimension_numbers<[1], [0], [0], [1], [0, 0, 1, 1], [], []>} : vector<32x16xf32>, vector<16x32xf32>, vector<32x32xf32> -> vector<32x32xf32>
    %cst_67 = arith.constant dense<0.000000e+00> : vector<32x32xf32>
    %129 = tpu.matmul %3, %128, %cst_67 {dimension_numbers = #tpu.dot_dimension_numbers<[1], [0], [0], [1], [0, 0, 1, 1], [], []>} : vector<32x32xf32>, vector<32x32xf32>, vector<32x32xf32> -> vector<32x32xf32>
    %130 = vector.extract_strided_slice %128 {offsets = [0, 0], sizes = [16, 32], strides = [1, 1]} : vector<32x32xf32> to vector<16x32xf32>
    %131 = vector.extract_strided_slice %129 {offsets = [0, 0], sizes = [16, 32], strides = [1, 1]} : vector<32x32xf32> to vector<16x32xf32>
    %132 = vector.extract_strided_slice %128 {offsets = [16, 0], sizes = [16, 32], strides = [1, 1]} : vector<32x32xf32> to vector<16x32xf32>
    %133 = vector.extract_strided_slice %129 {offsets = [16, 0], sizes = [16, 32], strides = [1, 1]} : vector<32x32xf32> to vector<16x32xf32>
    %134 = tpu.concatenate %130, %131, %132, %133 in 1 : vector<16x32xf32>, vector<16x32xf32>, vector<16x32xf32>, vector<16x32xf32> -> vector<16x128xf32>
    %135 = vector.extract_strided_slice %118 {offsets = [0, 64], sizes = [16, 32], strides = [1, 1]} : vector<16x96xf32> to vector<16x32xf32>
    %cst_68 = arith.constant dense<0.000000e+00> : vector<16x32xf32>
    %136 = tpu.matmul %134, %48, %cst_68 {dimension_numbers = #tpu.dot_dimension_numbers<[1], [0], [0], [1], [0, 0, 1, 1], [], []>} : vector<16x128xf32>, vector<128x32xf32>, vector<16x32xf32> -> vector<16x32xf32>
    %137 = arith.addf %135, %136 : vector<16x32xf32>
    %138 = math.tanh %137 : vector<16x32xf32>
    %139 = arith.mulf %126, %6 : vector<16x32xf32>
    %cst_69 = arith.constant 1.000000e+00 : f32
    %140 = vector.broadcast %cst_69 : f32 to vector<16x32xf32>
    %141 = arith.subf %140, %126 : vector<16x32xf32>
    %142 = arith.mulf %141, %138 : vector<16x32xf32>
    %143 = arith.addf %139, %142 : vector<16x32xf32>
    %c1_i32 = arith.constant 1 : i32
    %c2_i32_70 = arith.constant 2 : i32
    %144 = arith.muli %c2_i32_70, %c1_i32 : i32
    %c7_i32_71 = arith.constant 7 : i32
    %145 = arith.subi %c7_i32_71, %144 : i32
    %146 = arith.muli %arg1, %145 : i32
    %147 = arith.addi %c1_i32, %146 : i32
    %c0_72 = arith.constant 0 : index
    %148 = arith.index_cast %147 : i32 to index
    %c0_73 = arith.constant 0 : index
    %c0_74 = arith.constant 0 : index
    %149 = vector.load %arg2[%c0_72, %148, %c0_73, %c0_74] : memref<1x8x16x4xf32, #tpu.memory_space<vmem>>, vector<1x1x16x4xf32>
    %150 = vector.shape_cast %149 : vector<1x1x16x4xf32> to vector<16x4xf32>
    %c0_75 = arith.constant 0 : index
    %151 = arith.index_cast %147 : i32 to index
    %c0_76 = arith.constant 0 : index
    %c0_77 = arith.constant 0 : index
    %152 = vector.load %arg3[%c0_75, %151, %c0_76, %c0_77] : memref<1x8x16x4xf32, #tpu.memory_space<vmem>>, vector<1x1x16x4xf32>
    %153 = vector.shape_cast %152 : vector<1x1x16x4xf32> to vector<16x4xf32>
    %cst_78 = arith.constant dense<0.000000e+00> : vector<16x4xf32>
    %154 = tpu.matmul %143, %9, %cst_78 {dimension_numbers = #tpu.dot_dimension_numbers<[1], [0], [0], [1], [0, 0, 1, 1], [], []>} : vector<16x32xf32>, vector<32x4xf32>, vector<16x4xf32> -> vector<16x4xf32>
    %155 = vector.broadcast %12 : vector<1x4xf32> to vector<16x4xf32>
    %156 = arith.addf %154, %155 : vector<16x4xf32>
    %157 = arith.mulf %153, %150 : vector<16x4xf32>
    %cst_79 = arith.constant 1.000000e+00 : f32
    %158 = vector.broadcast %cst_79 : f32 to vector<16x4xf32>
    %159 = arith.subf %158, %153 : vector<16x4xf32>
    %160 = arith.mulf %159, %156 : vector<16x4xf32>
    %161 = arith.addf %157, %160 : vector<16x4xf32>
    %cst_80 = arith.constant dense<0.000000e+00> : vector<16x32xf32>
    %162 = tpu.matmul %161, %15, %cst_80 {dimension_numbers = #tpu.dot_dimension_numbers<[1], [0], [0], [1], [0, 0, 1, 1], [], []>} : vector<16x4xf32>, vector<4x32xf32>, vector<16x32xf32> -> vector<16x32xf32>
    %cst_81 = arith.constant dense<0.000000e+00> : vector<16x32xf32>
    %163 = tpu.matmul %143, %18, %cst_81 {dimension_numbers = #tpu.dot_dimension_numbers<[1], [0], [0], [1], [0, 0, 1, 1], [], []>} : vector<16x32xf32>, vector<32x32xf32>, vector<16x32xf32> -> vector<16x32xf32>
    %164 = arith.addf %162, %163 : vector<16x32xf32>
    %c0_82 = arith.constant 0 : index
    %c0_83 = arith.constant 0 : index
    %165 = arith.index_cast %147 : i32 to index
    %c0_84 = arith.constant 0 : index
    %c0_85 = arith.constant 0 : index
    %166 = vector.load %arg6[%c0_82, %c0_83, %165, %c0_84, %c0_85] : memref<1x1x8x16x32xf32, #tpu.memory_space<vmem>>, vector<1x1x1x16x32xf32>
    %167 = vector.shape_cast %166 : vector<1x1x1x16x32xf32> to vector<16x32xf32>
    %168 = arith.addf %164, %167 : vector<16x32xf32>
    %cst_86 = arith.constant dense<0.000000e+00> : vector<32x32xf32>
    %169 = tpu.matmul %2, %168, %cst_86 {dimension_numbers = #tpu.dot_dimension_numbers<[1], [0], [0], [1], [0, 0, 1, 1], [], []>} : vector<32x16xf32>, vector<16x32xf32>, vector<32x32xf32> -> vector<32x32xf32>
    %170 = vector.extract_strided_slice %169 {offsets = [0, 0], sizes = [16, 32], strides = [1, 1]} : vector<32x32xf32> to vector<16x32xf32>
    %171 = vector.extract_strided_slice %169 {offsets = [16, 0], sizes = [16, 32], strides = [1, 1]} : vector<32x32xf32> to vector<16x32xf32>
    %172 = tpu.concatenate %170, %171 in 1 : vector<16x32xf32>, vector<16x32xf32> -> vector<16x64xf32>
    %cst_87 = arith.constant dense<0.000000e+00> : vector<16x32xf32>
    %173 = tpu.matmul %172, %21, %cst_87 {dimension_numbers = #tpu.dot_dimension_numbers<[1], [0], [0], [1], [0, 0, 1, 1], [], []>} : vector<16x64xf32>, vector<64x32xf32>, vector<16x32xf32> -> vector<16x32xf32>
    %174 = vector.broadcast %24 : vector<1x32xf32> to vector<16x32xf32>
    %175 = arith.addf %173, %174 : vector<16x32xf32>
    %cst_88 = arith.constant dense<0.000000e+00> : vector<16x32xf32>
    %176 = tpu.matmul %175, %27, %cst_88 {dimension_numbers = #tpu.dot_dimension_numbers<[1], [0], [0], [1], [0, 0, 1, 1], [], []>} : vector<16x32xf32>, vector<32x32xf32>, vector<16x32xf32> -> vector<16x32xf32>
    %cst_89 = arith.constant dense<0.000000e+00> : vector<16x32xf32>
    %177 = tpu.matmul %143, %30, %cst_89 {dimension_numbers = #tpu.dot_dimension_numbers<[1], [0], [0], [1], [0, 0, 1, 1], [], []>} : vector<16x32xf32>, vector<32x32xf32>, vector<16x32xf32> -> vector<16x32xf32>
    %178 = arith.addf %176, %177 : vector<16x32xf32>
    %179 = vector.broadcast %33 : vector<1x32xf32> to vector<16x32xf32>
    %180 = arith.addf %178, %179 : vector<16x32xf32>
    %cst_90 = arith.constant 0.000000e+00 : f32
    %181 = vector.broadcast %cst_90 : f32 to vector<16x32xf32>
    %182 = arith.cmpf oge, %180, %181 : vector<16x32xf32>
    %183 = vector.broadcast %1 : f32 to vector<16x32xf32>
    %184 = arith.mulf %183, %180 : vector<16x32xf32>
    %185 = arith.select %182, %180, %184 : vector<16x32xi1>, vector<16x32xf32>
    %cst_91 = arith.constant dense<0.000000e+00> : vector<16x4xf32>
    %186 = tpu.matmul %185, %36, %cst_91 {dimension_numbers = #tpu.dot_dimension_numbers<[1], [0], [0], [1], [0, 0, 1, 1], [], []>} : vector<16x32xf32>, vector<32x4xf32>, vector<16x4xf32> -> vector<16x4xf32>
    %cst_92 = arith.constant dense<0.000000e+00> : vector<16x4xf32>
    %187 = tpu.matmul %143, %39, %cst_92 {dimension_numbers = #tpu.dot_dimension_numbers<[1], [0], [0], [1], [0, 0, 1, 1], [], []>} : vector<16x32xf32>, vector<32x4xf32>, vector<16x4xf32> -> vector<16x4xf32>
    %188 = arith.addf %186, %187 : vector<16x4xf32>
    %189 = vector.broadcast %42 : vector<1x4xf32> to vector<16x4xf32>
    %190 = arith.addf %188, %189 : vector<16x4xf32>
    %191 = tpu.concatenate %185, %143 in 1 : vector<16x32xf32>, vector<16x32xf32> -> vector<16x64xf32>
    %c0_93 = arith.constant 0 : index
    %c0_94 = arith.constant 0 : index
    %192 = arith.index_cast %c1_i32 : i32 to index
    %c0_95 = arith.constant 0 : index
    %c0_96 = arith.constant 0 : index
    %193 = vector.load %arg24[%c0_93, %c0_94, %192, %c0_95, %c0_96] : memref<1x1x8x16x64xf32, #tpu.memory_space<vmem>>, vector<1x1x1x16x64xf32>
    %194 = vector.shape_cast %193 : vector<1x1x1x16x64xf32> to vector<16x64xf32>
    %195 = vector.shape_cast %191 : vector<16x64xf32> to vector<1x1x1x16x64xf32>
    tpu.vector_store %arg24[%c0_93, %c0_94, %192, %c0_95, %c0_96], %195 {strides = array<i32>} : memref<1x1x8x16x64xf32, #tpu.memory_space<vmem>>, vector<1x1x1x16x64xf32>,
    %196 = arith.mulf %153, %161 : vector<16x4xf32>
    %cst_97 = arith.constant 1.000000e+00 : f32
    %197 = vector.broadcast %cst_97 : f32 to vector<16x4xf32>
    %198 = arith.subf %197, %153 : vector<16x4xf32>
    %199 = arith.mulf %198, %190 : vector<16x4xf32>
    %200 = arith.addf %196, %199 : vector<16x4xf32>
    %201 = tpu.concatenate %200, %143 in 1 : vector<16x4xf32>, vector<16x32xf32> -> vector<16x36xf32>
    %cst_98 = arith.constant dense<0.000000e+00> : vector<32x36xf32>
    %202 = tpu.matmul %2, %201, %cst_98 {dimension_numbers = #tpu.dot_dimension_numbers<[1], [0], [0], [1], [0, 0, 1, 1], [], []>} : vector<32x16xf32>, vector<16x36xf32>, vector<32x36xf32> -> vector<32x36xf32>
    %cst_99 = arith.constant dense<0.000000e+00> : vector<32x36xf32>
    %203 = tpu.matmul %3, %202, %cst_99 {dimension_numbers = #tpu.dot_dimension_numbers<[1], [0], [0], [1], [0, 0, 1, 1], [], []>} : vector<32x32xf32>, vector<32x36xf32>, vector<32x36xf32> -> vector<32x36xf32>
    %204 = vector.extract_strided_slice %202 {offsets = [0, 0], sizes = [16, 36], strides = [1, 1]} : vector<32x36xf32> to vector<16x36xf32>
    %205 = vector.extract_strided_slice %203 {offsets = [0, 0], sizes = [16, 36], strides = [1, 1]} : vector<32x36xf32> to vector<16x36xf32>
    %206 = vector.extract_strided_slice %202 {offsets = [16, 0], sizes = [16, 36], strides = [1, 1]} : vector<32x36xf32> to vector<16x36xf32>
    %207 = vector.extract_strided_slice %203 {offsets = [16, 0], sizes = [16, 36], strides = [1, 1]} : vector<32x36xf32> to vector<16x36xf32>
    %208 = tpu.concatenate %204, %205, %206, %207 in 1 : vector<16x36xf32>, vector<16x36xf32>, vector<16x36xf32>, vector<16x36xf32> -> vector<16x144xf32>
    %cst_100 = arith.constant dense<0.000000e+00> : vector<16x96xf32>
    %209 = tpu.matmul %208, %45, %cst_100 {dimension_numbers = #tpu.dot_dimension_numbers<[1], [0], [0], [1], [0, 0, 1, 1], [], []>} : vector<16x144xf32>, vector<144x96xf32>, vector<16x96xf32> -> vector<16x96xf32>
    %c0_101 = arith.constant 0 : index
    %c0_102 = arith.constant 0 : index
    %210 = arith.index_cast %147 : i32 to index
    %c0_103 = arith.constant 0 : index
    %c0_104 = arith.constant 0 : index
    %211 = vector.load %arg7[%c0_101, %c0_102, %210, %c0_103, %c0_104] : memref<1x1x8x16x96xf32, #tpu.memory_space<vmem>>, vector<1x1x1x16x96xf32>
    %212 = vector.shape_cast %211 : vector<1x1x1x16x96xf32> to vector<16x96xf32>
    %213 = arith.addf %209, %212 : vector<16x96xf32>
    %214 = vector.extract_strided_slice %213 {offsets = [0, 0], sizes = [16, 64], strides = [1, 1]} : vector<16x96xf32> to vector<16x64xf32>
    %215 = arith.negf %214 : vector<16x64xf32>
    %216 = math.exp %215 : vector<16x64xf32>
    %cst_105 = arith.constant 1.000000e+00 : f32
    %217 = vector.broadcast %cst_105 : f32 to vector<16x64xf32>
    %218 = arith.addf %217, %216 : vector<16x64xf32>
    %219 = arith.divf %217, %218 : vector<16x64xf32>
    %220 = vector.extract_strided_slice %219 {offsets = [0, 0], sizes = [16, 32], strides = [1, 1]} : vector<16x64xf32> to vector<16x32xf32>
    %221 = vector.extract_strided_slice %219 {offsets = [0, 32], sizes = [16, 32], strides = [1, 1]} : vector<16x64xf32> to vector<16x32xf32>
    %222 = arith.mulf %220, %143 : vector<16x32xf32>
    %cst_106 = arith.constant dense<0.000000e+00> : vector<32x32xf32>
    %223 = tpu.matmul %2, %222, %cst_106 {dimension_numbers = #tpu.dot_dimension_numbers<[1], [0], [0], [1], [0, 0, 1, 1], [], []>} : vector<32x16xf32>, vector<16x32xf32>, vector<32x32xf32> -> vector<32x32xf32>
    %cst_107 = arith.constant dense<0.000000e+00> : vector<32x32xf32>
    %224 = tpu.matmul %3, %223, %cst_107 {dimension_numbers = #tpu.dot_dimension_numbers<[1], [0], [0], [1], [0, 0, 1, 1], [], []>} : vector<32x32xf32>, vector<32x32xf32>, vector<32x32xf32> -> vector<32x32xf32>
    %225 = vector.extract_strided_slice %223 {offsets = [0, 0], sizes = [16, 32], strides = [1, 1]} : vector<32x32xf32> to vector<16x32xf32>
    %226 = vector.extract_strided_slice %224 {offsets = [0, 0], sizes = [16, 32], strides = [1, 1]} : vector<32x32xf32> to vector<16x32xf32>
    %227 = vector.extract_strided_slice %223 {offsets = [16, 0], sizes = [16, 32], strides = [1, 1]} : vector<32x32xf32> to vector<16x32xf32>
    %228 = vector.extract_strided_slice %224 {offsets = [16, 0], sizes = [16, 32], strides = [1, 1]} : vector<32x32xf32> to vector<16x32xf32>
    %229 = tpu.concatenate %225, %226, %227, %228 in 1 : vector<16x32xf32>, vector<16x32xf32>, vector<16x32xf32>, vector<16x32xf32> -> vector<16x128xf32>
    %230 = vector.extract_strided_slice %213 {offsets = [0, 64], sizes = [16, 32], strides = [1, 1]} : vector<16x96xf32> to vector<16x32xf32>
    %cst_108 = arith.constant dense<0.000000e+00> : vector<16x32xf32>
    %231 = tpu.matmul %229, %48, %cst_108 {dimension_numbers = #tpu.dot_dimension_numbers<[1], [0], [0], [1], [0, 0, 1, 1], [], []>} : vector<16x128xf32>, vector<128x32xf32>, vector<16x32xf32> -> vector<16x32xf32>
    %232 = arith.addf %230, %231 : vector<16x32xf32>
    %233 = math.tanh %232 : vector<16x32xf32>
    %234 = arith.mulf %221, %143 : vector<16x32xf32>
    %cst_109 = arith.constant 1.000000e+00 : f32
    %235 = vector.broadcast %cst_109 : f32 to vector<16x32xf32>
    %236 = arith.subf %235, %221 : vector<16x32xf32>
    %237 = arith.mulf %236, %233 : vector<16x32xf32>
    %238 = arith.addf %234, %237 : vector<16x32xf32>
    %c2_i32_110 = arith.constant 2 : i32
    %c2_i32_111 = arith.constant 2 : i32
    %239 = arith.muli %c2_i32_111, %c2_i32_110 : i32
    %c7_i32_112 = arith.constant 7 : i32
    %240 = arith.subi %c7_i32_112, %239 : i32
    %241 = arith.muli %arg1, %240 : i32
    %242 = arith.addi %c2_i32_110, %241 : i32
    %c0_113 = arith.constant 0 : index
    %243 = arith.index_cast %242 : i32 to index
    %c0_114 = arith.constant 0 : index
    %c0_115 = arith.constant 0 : index
    %244 = vector.load %arg2[%c0_113, %243, %c0_114, %c0_115] : memref<1x8x16x4xf32, #tpu.memory_space<vmem>>, vector<1x1x16x4xf32>
    %245 = vector.shape_cast %244 : vector<1x1x16x4xf32> to vector<16x4xf32>
    %c0_116 = arith.constant 0 : index
    %246 = arith.index_cast %242 : i32 to index
    %c0_117 = arith.constant 0 : index
    %c0_118 = arith.constant 0 : index
    %247 = vector.load %arg3[%c0_116, %246, %c0_117, %c0_118] : memref<1x8x16x4xf32, #tpu.memory_space<vmem>>, vector<1x1x16x4xf32>
    %248 = vector.shape_cast %247 : vector<1x1x16x4xf32> to vector<16x4xf32>
    %cst_119 = arith.constant dense<0.000000e+00> : vector<16x4xf32>
    %249 = tpu.matmul %238, %9, %cst_119 {dimension_numbers = #tpu.dot_dimension_numbers<[1], [0], [0], [1], [0, 0, 1, 1], [], []>} : vector<16x32xf32>, vector<32x4xf32>, vector<16x4xf32> -> vector<16x4xf32>
    %250 = vector.broadcast %12 : vector<1x4xf32> to vector<16x4xf32>
    %251 = arith.addf %249, %250 : vector<16x4xf32>
    %252 = arith.mulf %248, %245 : vector<16x4xf32>
    %cst_120 = arith.constant 1.000000e+00 : f32
    %253 = vector.broadcast %cst_120 : f32 to vector<16x4xf32>
    %254 = arith.subf %253, %248 : vector<16x4xf32>
    %255 = arith.mulf %254, %251 : vector<16x4xf32>
    %256 = arith.addf %252, %255 : vector<16x4xf32>
    %cst_121 = arith.constant dense<0.000000e+00> : vector<16x32xf32>
    %257 = tpu.matmul %256, %15, %cst_121 {dimension_numbers = #tpu.dot_dimension_numbers<[1], [0], [0], [1], [0, 0, 1, 1], [], []>} : vector<16x4xf32>, vector<4x32xf32>, vector<16x32xf32> -> vector<16x32xf32>
    %cst_122 = arith.constant dense<0.000000e+00> : vector<16x32xf32>
    %258 = tpu.matmul %238, %18, %cst_122 {dimension_numbers = #tpu.dot_dimension_numbers<[1], [0], [0], [1], [0, 0, 1, 1], [], []>} : vector<16x32xf32>, vector<32x32xf32>, vector<16x32xf32> -> vector<16x32xf32>
    %259 = arith.addf %257, %258 : vector<16x32xf32>
    %c0_123 = arith.constant 0 : index
    %c0_124 = arith.constant 0 : index
    %260 = arith.index_cast %242 : i32 to index
    %c0_125 = arith.constant 0 : index
    %c0_126 = arith.constant 0 : index
    %261 = vector.load %arg6[%c0_123, %c0_124, %260, %c0_125, %c0_126] : memref<1x1x8x16x32xf32, #tpu.memory_space<vmem>>, vector<1x1x1x16x32xf32>
    %262 = vector.shape_cast %261 : vector<1x1x1x16x32xf32> to vector<16x32xf32>
    %263 = arith.addf %259, %262 : vector<16x32xf32>
    %cst_127 = arith.constant dense<0.000000e+00> : vector<32x32xf32>
    %264 = tpu.matmul %2, %263, %cst_127 {dimension_numbers = #tpu.dot_dimension_numbers<[1], [0], [0], [1], [0, 0, 1, 1], [], []>} : vector<32x16xf32>, vector<16x32xf32>, vector<32x32xf32> -> vector<32x32xf32>
    %265 = vector.extract_strided_slice %264 {offsets = [0, 0], sizes = [16, 32], strides = [1, 1]} : vector<32x32xf32> to vector<16x32xf32>
    %266 = vector.extract_strided_slice %264 {offsets = [16, 0], sizes = [16, 32], strides = [1, 1]} : vector<32x32xf32> to vector<16x32xf32>
    %267 = tpu.concatenate %265, %266 in 1 : vector<16x32xf32>, vector<16x32xf32> -> vector<16x64xf32>
    %cst_128 = arith.constant dense<0.000000e+00> : vector<16x32xf32>
    %268 = tpu.matmul %267, %21, %cst_128 {dimension_numbers = #tpu.dot_dimension_numbers<[1], [0], [0], [1], [0, 0, 1, 1], [], []>} : vector<16x64xf32>, vector<64x32xf32>, vector<16x32xf32> -> vector<16x32xf32>
    %269 = vector.broadcast %24 : vector<1x32xf32> to vector<16x32xf32>
    %270 = arith.addf %268, %269 : vector<16x32xf32>
    %cst_129 = arith.constant dense<0.000000e+00> : vector<16x32xf32>
    %271 = tpu.matmul %270, %27, %cst_129 {dimension_numbers = #tpu.dot_dimension_numbers<[1], [0], [0], [1], [0, 0, 1, 1], [], []>} : vector<16x32xf32>, vector<32x32xf32>, vector<16x32xf32> -> vector<16x32xf32>
    %cst_130 = arith.constant dense<0.000000e+00> : vector<16x32xf32>
    %272 = tpu.matmul %238, %30, %cst_130 {dimension_numbers = #tpu.dot_dimension_numbers<[1], [0], [0], [1], [0, 0, 1, 1], [], []>} : vector<16x32xf32>, vector<32x32xf32>, vector<16x32xf32> -> vector<16x32xf32>
    %273 = arith.addf %271, %272 : vector<16x32xf32>
    %274 = vector.broadcast %33 : vector<1x32xf32> to vector<16x32xf32>
    %275 = arith.addf %273, %274 : vector<16x32xf32>
    %cst_131 = arith.constant 0.000000e+00 : f32
    %276 = vector.broadcast %cst_131 : f32 to vector<16x32xf32>
    %277 = arith.cmpf oge, %275, %276 : vector<16x32xf32>
    %278 = vector.broadcast %1 : f32 to vector<16x32xf32>
    %279 = arith.mulf %278, %275 : vector<16x32xf32>
    %280 = arith.select %277, %275, %279 : vector<16x32xi1>, vector<16x32xf32>
    %cst_132 = arith.constant dense<0.000000e+00> : vector<16x4xf32>
    %281 = tpu.matmul %280, %36, %cst_132 {dimension_numbers = #tpu.dot_dimension_numbers<[1], [0], [0], [1], [0, 0, 1, 1], [], []>} : vector<16x32xf32>, vector<32x4xf32>, vector<16x4xf32> -> vector<16x4xf32>
    %cst_133 = arith.constant dense<0.000000e+00> : vector<16x4xf32>
    %282 = tpu.matmul %238, %39, %cst_133 {dimension_numbers = #tpu.dot_dimension_numbers<[1], [0], [0], [1], [0, 0, 1, 1], [], []>} : vector<16x32xf32>, vector<32x4xf32>, vector<16x4xf32> -> vector<16x4xf32>
    %283 = arith.addf %281, %282 : vector<16x4xf32>
    %284 = vector.broadcast %42 : vector<1x4xf32> to vector<16x4xf32>
    %285 = arith.addf %283, %284 : vector<16x4xf32>
    %286 = tpu.concatenate %280, %238 in 1 : vector<16x32xf32>, vector<16x32xf32> -> vector<16x64xf32>
    %c0_134 = arith.constant 0 : index
    %c0_135 = arith.constant 0 : index
    %287 = arith.index_cast %c2_i32_110 : i32 to index
    %c0_136 = arith.constant 0 : index
    %c0_137 = arith.constant 0 : index
    %288 = vector.load %arg24[%c0_134, %c0_135, %287, %c0_136, %c0_137] : memref<1x1x8x16x64xf32, #tpu.memory_space<vmem>>, vector<1x1x1x16x64xf32>
    %289 = vector.shape_cast %288 : vector<1x1x1x16x64xf32> to vector<16x64xf32>
    %290 = vector.shape_cast %286 : vector<16x64xf32> to vector<1x1x1x16x64xf32>
    tpu.vector_store %arg24[%c0_134, %c0_135, %287, %c0_136, %c0_137], %290 {strides = array<i32>} : memref<1x1x8x16x64xf32, #tpu.memory_space<vmem>>, vector<1x1x1x16x64xf32>,
    %291 = arith.mulf %248, %256 : vector<16x4xf32>
    %cst_138 = arith.constant 1.000000e+00 : f32
    %292 = vector.broadcast %cst_138 : f32 to vector<16x4xf32>
    %293 = arith.subf %292, %248 : vector<16x4xf32>
    %294 = arith.mulf %293, %285 : vector<16x4xf32>
    %295 = arith.addf %291, %294 : vector<16x4xf32>
    %296 = tpu.concatenate %295, %238 in 1 : vector<16x4xf32>, vector<16x32xf32> -> vector<16x36xf32>
    %cst_139 = arith.constant dense<0.000000e+00> : vector<32x36xf32>
    %297 = tpu.matmul %2, %296, %cst_139 {dimension_numbers = #tpu.dot_dimension_numbers<[1], [0], [0], [1], [0, 0, 1, 1], [], []>} : vector<32x16xf32>, vector<16x36xf32>, vector<32x36xf32> -> vector<32x36xf32>
    %cst_140 = arith.constant dense<0.000000e+00> : vector<32x36xf32>
    %298 = tpu.matmul %3, %297, %cst_140 {dimension_numbers = #tpu.dot_dimension_numbers<[1], [0], [0], [1], [0, 0, 1, 1], [], []>} : vector<32x32xf32>, vector<32x36xf32>, vector<32x36xf32> -> vector<32x36xf32>
    %299 = vector.extract_strided_slice %297 {offsets = [0, 0], sizes = [16, 36], strides = [1, 1]} : vector<32x36xf32> to vector<16x36xf32>
    %300 = vector.extract_strided_slice %298 {offsets = [0, 0], sizes = [16, 36], strides = [1, 1]} : vector<32x36xf32> to vector<16x36xf32>
    %301 = vector.extract_strided_slice %297 {offsets = [16, 0], sizes = [16, 36], strides = [1, 1]} : vector<32x36xf32> to vector<16x36xf32>
    %302 = vector.extract_strided_slice %298 {offsets = [16, 0], sizes = [16, 36], strides = [1, 1]} : vector<32x36xf32> to vector<16x36xf32>
    %303 = tpu.concatenate %299, %300, %301, %302 in 1 : vector<16x36xf32>, vector<16x36xf32>, vector<16x36xf32>, vector<16x36xf32> -> vector<16x144xf32>
    %cst_141 = arith.constant dense<0.000000e+00> : vector<16x96xf32>
    %304 = tpu.matmul %303, %45, %cst_141 {dimension_numbers = #tpu.dot_dimension_numbers<[1], [0], [0], [1], [0, 0, 1, 1], [], []>} : vector<16x144xf32>, vector<144x96xf32>, vector<16x96xf32> -> vector<16x96xf32>
    %c0_142 = arith.constant 0 : index
    %c0_143 = arith.constant 0 : index
    %305 = arith.index_cast %242 : i32 to index
    %c0_144 = arith.constant 0 : index
    %c0_145 = arith.constant 0 : index
    %306 = vector.load %arg7[%c0_142, %c0_143, %305, %c0_144, %c0_145] : memref<1x1x8x16x96xf32, #tpu.memory_space<vmem>>, vector<1x1x1x16x96xf32>
    %307 = vector.shape_cast %306 : vector<1x1x1x16x96xf32> to vector<16x96xf32>
    %308 = arith.addf %304, %307 : vector<16x96xf32>
    %309 = vector.extract_strided_slice %308 {offsets = [0, 0], sizes = [16, 64], strides = [1, 1]} : vector<16x96xf32> to vector<16x64xf32>
    %310 = arith.negf %309 : vector<16x64xf32>
    %311 = math.exp %310 : vector<16x64xf32>
    %cst_146 = arith.constant 1.000000e+00 : f32
    %312 = vector.broadcast %cst_146 : f32 to vector<16x64xf32>
    %313 = arith.addf %312, %311 : vector<16x64xf32>
    %314 = arith.divf %312, %313 : vector<16x64xf32>
    %315 = vector.extract_strided_slice %314 {offsets = [0, 0], sizes = [16, 32], strides = [1, 1]} : vector<16x64xf32> to vector<16x32xf32>
    %316 = vector.extract_strided_slice %314 {offsets = [0, 32], sizes = [16, 32], strides = [1, 1]} : vector<16x64xf32> to vector<16x32xf32>
    %317 = arith.mulf %315, %238 : vector<16x32xf32>
    %cst_147 = arith.constant dense<0.000000e+00> : vector<32x32xf32>
    %318 = tpu.matmul %2, %317, %cst_147 {dimension_numbers = #tpu.dot_dimension_numbers<[1], [0], [0], [1], [0, 0, 1, 1], [], []>} : vector<32x16xf32>, vector<16x32xf32>, vector<32x32xf32> -> vector<32x32xf32>
    %cst_148 = arith.constant dense<0.000000e+00> : vector<32x32xf32>
    %319 = tpu.matmul %3, %318, %cst_148 {dimension_numbers = #tpu.dot_dimension_numbers<[1], [0], [0], [1], [0, 0, 1, 1], [], []>} : vector<32x32xf32>, vector<32x32xf32>, vector<32x32xf32> -> vector<32x32xf32>
    %320 = vector.extract_strided_slice %318 {offsets = [0, 0], sizes = [16, 32], strides = [1, 1]} : vector<32x32xf32> to vector<16x32xf32>
    %321 = vector.extract_strided_slice %319 {offsets = [0, 0], sizes = [16, 32], strides = [1, 1]} : vector<32x32xf32> to vector<16x32xf32>
    %322 = vector.extract_strided_slice %318 {offsets = [16, 0], sizes = [16, 32], strides = [1, 1]} : vector<32x32xf32> to vector<16x32xf32>
    %323 = vector.extract_strided_slice %319 {offsets = [16, 0], sizes = [16, 32], strides = [1, 1]} : vector<32x32xf32> to vector<16x32xf32>
    %324 = tpu.concatenate %320, %321, %322, %323 in 1 : vector<16x32xf32>, vector<16x32xf32>, vector<16x32xf32>, vector<16x32xf32> -> vector<16x128xf32>
    %325 = vector.extract_strided_slice %308 {offsets = [0, 64], sizes = [16, 32], strides = [1, 1]} : vector<16x96xf32> to vector<16x32xf32>
    %cst_149 = arith.constant dense<0.000000e+00> : vector<16x32xf32>
    %326 = tpu.matmul %324, %48, %cst_149 {dimension_numbers = #tpu.dot_dimension_numbers<[1], [0], [0], [1], [0, 0, 1, 1], [], []>} : vector<16x128xf32>, vector<128x32xf32>, vector<16x32xf32> -> vector<16x32xf32>
    %327 = arith.addf %325, %326 : vector<16x32xf32>
    %328 = math.tanh %327 : vector<16x32xf32>
    %329 = arith.mulf %316, %238 : vector<16x32xf32>
    %cst_150 = arith.constant 1.000000e+00 : f32
    %330 = vector.broadcast %cst_150 : f32 to vector<16x32xf32>
    %331 = arith.subf %330, %316 : vector<16x32xf32>
    %332 = arith.mulf %331, %328 : vector<16x32xf32>
    %333 = arith.addf %329, %332 : vector<16x32xf32>
    %c3_i32 = arith.constant 3 : i32
    %c2_i32_151 = arith.constant 2 : i32
    %334 = arith.muli %c2_i32_151, %c3_i32 : i32
    %c7_i32_152 = arith.constant 7 : i32
    %335 = arith.subi %c7_i32_152, %334 : i32
    %336 = arith.muli %arg1, %335 : i32
    %337 = arith.addi %c3_i32, %336 : i32
    %c0_153 = arith.constant 0 : index
    %338 = arith.index_cast %337 : i32 to index
    %c0_154 = arith.constant 0 : index
    %c0_155 = arith.constant 0 : index
    %339 = vector.load %arg2[%c0_153, %338, %c0_154, %c0_155] : memref<1x8x16x4xf32, #tpu.memory_space<vmem>>, vector<1x1x16x4xf32>
    %340 = vector.shape_cast %339 : vector<1x1x16x4xf32> to vector<16x4xf32>
    %c0_156 = arith.constant 0 : index
    %341 = arith.index_cast %337 : i32 to index
    %c0_157 = arith.constant 0 : index
    %c0_158 = arith.constant 0 : index
    %342 = vector.load %arg3[%c0_156, %341, %c0_157, %c0_158] : memref<1x8x16x4xf32, #tpu.memory_space<vmem>>, vector<1x1x16x4xf32>
    %343 = vector.shape_cast %342 : vector<1x1x16x4xf32> to vector<16x4xf32>
    %cst_159 = arith.constant dense<0.000000e+00> : vector<16x4xf32>
    %344 = tpu.matmul %333, %9, %cst_159 {dimension_numbers = #tpu.dot_dimension_numbers<[1], [0], [0], [1], [0, 0, 1, 1], [], []>} : vector<16x32xf32>, vector<32x4xf32>, vector<16x4xf32> -> vector<16x4xf32>
    %345 = vector.broadcast %12 : vector<1x4xf32> to vector<16x4xf32>
    %346 = arith.addf %344, %345 : vector<16x4xf32>
    %347 = arith.mulf %343, %340 : vector<16x4xf32>
    %cst_160 = arith.constant 1.000000e+00 : f32
    %348 = vector.broadcast %cst_160 : f32 to vector<16x4xf32>
    %349 = arith.subf %348, %343 : vector<16x4xf32>
    %350 = arith.mulf %349, %346 : vector<16x4xf32>
    %351 = arith.addf %347, %350 : vector<16x4xf32>
    %cst_161 = arith.constant dense<0.000000e+00> : vector<16x32xf32>
    %352 = tpu.matmul %351, %15, %cst_161 {dimension_numbers = #tpu.dot_dimension_numbers<[1], [0], [0], [1], [0, 0, 1, 1], [], []>} : vector<16x4xf32>, vector<4x32xf32>, vector<16x32xf32> -> vector<16x32xf32>
    %cst_162 = arith.constant dense<0.000000e+00> : vector<16x32xf32>
    %353 = tpu.matmul %333, %18, %cst_162 {dimension_numbers = #tpu.dot_dimension_numbers<[1], [0], [0], [1], [0, 0, 1, 1], [], []>} : vector<16x32xf32>, vector<32x32xf32>, vector<16x32xf32> -> vector<16x32xf32>
    %354 = arith.addf %352, %353 : vector<16x32xf32>
    %c0_163 = arith.constant 0 : index
    %c0_164 = arith.constant 0 : index
    %355 = arith.index_cast %337 : i32 to index
    %c0_165 = arith.constant 0 : index
    %c0_166 = arith.constant 0 : index
    %356 = vector.load %arg6[%c0_163, %c0_164, %355, %c0_165, %c0_166] : memref<1x1x8x16x32xf32, #tpu.memory_space<vmem>>, vector<1x1x1x16x32xf32>
    %357 = vector.shape_cast %356 : vector<1x1x1x16x32xf32> to vector<16x32xf32>
    %358 = arith.addf %354, %357 : vector<16x32xf32>
    %cst_167 = arith.constant dense<0.000000e+00> : vector<32x32xf32>
    %359 = tpu.matmul %2, %358, %cst_167 {dimension_numbers = #tpu.dot_dimension_numbers<[1], [0], [0], [1], [0, 0, 1, 1], [], []>} : vector<32x16xf32>, vector<16x32xf32>, vector<32x32xf32> -> vector<32x32xf32>
    %360 = vector.extract_strided_slice %359 {offsets = [0, 0], sizes = [16, 32], strides = [1, 1]} : vector<32x32xf32> to vector<16x32xf32>
    %361 = vector.extract_strided_slice %359 {offsets = [16, 0], sizes = [16, 32], strides = [1, 1]} : vector<32x32xf32> to vector<16x32xf32>
    %362 = tpu.concatenate %360, %361 in 1 : vector<16x32xf32>, vector<16x32xf32> -> vector<16x64xf32>
    %cst_168 = arith.constant dense<0.000000e+00> : vector<16x32xf32>
    %363 = tpu.matmul %362, %21, %cst_168 {dimension_numbers = #tpu.dot_dimension_numbers<[1], [0], [0], [1], [0, 0, 1, 1], [], []>} : vector<16x64xf32>, vector<64x32xf32>, vector<16x32xf32> -> vector<16x32xf32>
    %364 = vector.broadcast %24 : vector<1x32xf32> to vector<16x32xf32>
    %365 = arith.addf %363, %364 : vector<16x32xf32>
    %cst_169 = arith.constant dense<0.000000e+00> : vector<16x32xf32>
    %366 = tpu.matmul %365, %27, %cst_169 {dimension_numbers = #tpu.dot_dimension_numbers<[1], [0], [0], [1], [0, 0, 1, 1], [], []>} : vector<16x32xf32>, vector<32x32xf32>, vector<16x32xf32> -> vector<16x32xf32>
    %cst_170 = arith.constant dense<0.000000e+00> : vector<16x32xf32>
    %367 = tpu.matmul %333, %30, %cst_170 {dimension_numbers = #tpu.dot_dimension_numbers<[1], [0], [0], [1], [0, 0, 1, 1], [], []>} : vector<16x32xf32>, vector<32x32xf32>, vector<16x32xf32> -> vector<16x32xf32>
    %368 = arith.addf %366, %367 : vector<16x32xf32>
    %369 = vector.broadcast %33 : vector<1x32xf32> to vector<16x32xf32>
    %370 = arith.addf %368, %369 : vector<16x32xf32>
    %cst_171 = arith.constant 0.000000e+00 : f32
    %371 = vector.broadcast %cst_171 : f32 to vector<16x32xf32>
    %372 = arith.cmpf oge, %370, %371 : vector<16x32xf32>
    %373 = vector.broadcast %1 : f32 to vector<16x32xf32>
    %374 = arith.mulf %373, %370 : vector<16x32xf32>
    %375 = arith.select %372, %370, %374 : vector<16x32xi1>, vector<16x32xf32>
    %cst_172 = arith.constant dense<0.000000e+00> : vector<16x4xf32>
    %376 = tpu.matmul %375, %36, %cst_172 {dimension_numbers = #tpu.dot_dimension_numbers<[1], [0], [0], [1], [0, 0, 1, 1], [], []>} : vector<16x32xf32>, vector<32x4xf32>, vector<16x4xf32> -> vector<16x4xf32>
    %cst_173 = arith.constant dense<0.000000e+00> : vector<16x4xf32>
    %377 = tpu.matmul %333, %39, %cst_173 {dimension_numbers = #tpu.dot_dimension_numbers<[1], [0], [0], [1], [0, 0, 1, 1], [], []>} : vector<16x32xf32>, vector<32x4xf32>, vector<16x4xf32> -> vector<16x4xf32>
    %378 = arith.addf %376, %377 : vector<16x4xf32>
    %379 = vector.broadcast %42 : vector<1x4xf32> to vector<16x4xf32>
    %380 = arith.addf %378, %379 : vector<16x4xf32>
    %381 = tpu.concatenate %375, %333 in 1 : vector<16x32xf32>, vector<16x32xf32> -> vector<16x64xf32>
    %c0_174 = arith.constant 0 : index
    %c0_175 = arith.constant 0 : index
    %382 = arith.index_cast %c3_i32 : i32 to index
    %c0_176 = arith.constant 0 : index
    %c0_177 = arith.constant 0 : index
    %383 = vector.load %arg24[%c0_174, %c0_175, %382, %c0_176, %c0_177] : memref<1x1x8x16x64xf32, #tpu.memory_space<vmem>>, vector<1x1x1x16x64xf32>
    %384 = vector.shape_cast %383 : vector<1x1x1x16x64xf32> to vector<16x64xf32>
    %385 = vector.shape_cast %381 : vector<16x64xf32> to vector<1x1x1x16x64xf32>
    tpu.vector_store %arg24[%c0_174, %c0_175, %382, %c0_176, %c0_177], %385 {strides = array<i32>} : memref<1x1x8x16x64xf32, #tpu.memory_space<vmem>>, vector<1x1x1x16x64xf32>,
    %386 = arith.mulf %343, %351 : vector<16x4xf32>
    %cst_178 = arith.constant 1.000000e+00 : f32
    %387 = vector.broadcast %cst_178 : f32 to vector<16x4xf32>
    %388 = arith.subf %387, %343 : vector<16x4xf32>
    %389 = arith.mulf %388, %380 : vector<16x4xf32>
    %390 = arith.addf %386, %389 : vector<16x4xf32>
    %391 = tpu.concatenate %390, %333 in 1 : vector<16x4xf32>, vector<16x32xf32> -> vector<16x36xf32>
    %cst_179 = arith.constant dense<0.000000e+00> : vector<32x36xf32>
    %392 = tpu.matmul %2, %391, %cst_179 {dimension_numbers = #tpu.dot_dimension_numbers<[1], [0], [0], [1], [0, 0, 1, 1], [], []>} : vector<32x16xf32>, vector<16x36xf32>, vector<32x36xf32> -> vector<32x36xf32>
    %cst_180 = arith.constant dense<0.000000e+00> : vector<32x36xf32>
    %393 = tpu.matmul %3, %392, %cst_180 {dimension_numbers = #tpu.dot_dimension_numbers<[1], [0], [0], [1], [0, 0, 1, 1], [], []>} : vector<32x32xf32>, vector<32x36xf32>, vector<32x36xf32> -> vector<32x36xf32>
    %394 = vector.extract_strided_slice %392 {offsets = [0, 0], sizes = [16, 36], strides = [1, 1]} : vector<32x36xf32> to vector<16x36xf32>
    %395 = vector.extract_strided_slice %393 {offsets = [0, 0], sizes = [16, 36], strides = [1, 1]} : vector<32x36xf32> to vector<16x36xf32>
    %396 = vector.extract_strided_slice %392 {offsets = [16, 0], sizes = [16, 36], strides = [1, 1]} : vector<32x36xf32> to vector<16x36xf32>
    %397 = vector.extract_strided_slice %393 {offsets = [16, 0], sizes = [16, 36], strides = [1, 1]} : vector<32x36xf32> to vector<16x36xf32>
    %398 = tpu.concatenate %394, %395, %396, %397 in 1 : vector<16x36xf32>, vector<16x36xf32>, vector<16x36xf32>, vector<16x36xf32> -> vector<16x144xf32>
    %cst_181 = arith.constant dense<0.000000e+00> : vector<16x96xf32>
    %399 = tpu.matmul %398, %45, %cst_181 {dimension_numbers = #tpu.dot_dimension_numbers<[1], [0], [0], [1], [0, 0, 1, 1], [], []>} : vector<16x144xf32>, vector<144x96xf32>, vector<16x96xf32> -> vector<16x96xf32>
    %c0_182 = arith.constant 0 : index
    %c0_183 = arith.constant 0 : index
    %400 = arith.index_cast %337 : i32 to index
    %c0_184 = arith.constant 0 : index
    %c0_185 = arith.constant 0 : index
    %401 = vector.load %arg7[%c0_182, %c0_183, %400, %c0_184, %c0_185] : memref<1x1x8x16x96xf32, #tpu.memory_space<vmem>>, vector<1x1x1x16x96xf32>
    %402 = vector.shape_cast %401 : vector<1x1x1x16x96xf32> to vector<16x96xf32>
    %403 = arith.addf %399, %402 : vector<16x96xf32>
    %404 = vector.extract_strided_slice %403 {offsets = [0, 0], sizes = [16, 64], strides = [1, 1]} : vector<16x96xf32> to vector<16x64xf32>
    %405 = arith.negf %404 : vector<16x64xf32>
    %406 = math.exp %405 : vector<16x64xf32>
    %cst_186 = arith.constant 1.000000e+00 : f32
    %407 = vector.broadcast %cst_186 : f32 to vector<16x64xf32>
    %408 = arith.addf %407, %406 : vector<16x64xf32>
    %409 = arith.divf %407, %408 : vector<16x64xf32>
    %410 = vector.extract_strided_slice %409 {offsets = [0, 0], sizes = [16, 32], strides = [1, 1]} : vector<16x64xf32> to vector<16x32xf32>
    %411 = vector.extract_strided_slice %409 {offsets = [0, 32], sizes = [16, 32], strides = [1, 1]} : vector<16x64xf32> to vector<16x32xf32>
    %412 = arith.mulf %410, %333 : vector<16x32xf32>
    %cst_187 = arith.constant dense<0.000000e+00> : vector<32x32xf32>
    %413 = tpu.matmul %2, %412, %cst_187 {dimension_numbers = #tpu.dot_dimension_numbers<[1], [0], [0], [1], [0, 0, 1, 1], [], []>} : vector<32x16xf32>, vector<16x32xf32>, vector<32x32xf32> -> vector<32x32xf32>
    %cst_188 = arith.constant dense<0.000000e+00> : vector<32x32xf32>
    %414 = tpu.matmul %3, %413, %cst_188 {dimension_numbers = #tpu.dot_dimension_numbers<[1], [0], [0], [1], [0, 0, 1, 1], [], []>} : vector<32x32xf32>, vector<32x32xf32>, vector<32x32xf32> -> vector<32x32xf32>
    %415 = vector.extract_strided_slice %413 {offsets = [0, 0], sizes = [16, 32], strides = [1, 1]} : vector<32x32xf32> to vector<16x32xf32>
    %416 = vector.extract_strided_slice %414 {offsets = [0, 0], sizes = [16, 32], strides = [1, 1]} : vector<32x32xf32> to vector<16x32xf32>
    %417 = vector.extract_strided_slice %413 {offsets = [16, 0], sizes = [16, 32], strides = [1, 1]} : vector<32x32xf32> to vector<16x32xf32>
    %418 = vector.extract_strided_slice %414 {offsets = [16, 0], sizes = [16, 32], strides = [1, 1]} : vector<32x32xf32> to vector<16x32xf32>
    %419 = tpu.concatenate %415, %416, %417, %418 in 1 : vector<16x32xf32>, vector<16x32xf32>, vector<16x32xf32>, vector<16x32xf32> -> vector<16x128xf32>
    %420 = vector.extract_strided_slice %403 {offsets = [0, 64], sizes = [16, 32], strides = [1, 1]} : vector<16x96xf32> to vector<16x32xf32>
    %cst_189 = arith.constant dense<0.000000e+00> : vector<16x32xf32>
    %421 = tpu.matmul %419, %48, %cst_189 {dimension_numbers = #tpu.dot_dimension_numbers<[1], [0], [0], [1], [0, 0, 1, 1], [], []>} : vector<16x128xf32>, vector<128x32xf32>, vector<16x32xf32> -> vector<16x32xf32>
    %422 = arith.addf %420, %421 : vector<16x32xf32>
    %423 = math.tanh %422 : vector<16x32xf32>
    %424 = arith.mulf %411, %333 : vector<16x32xf32>
    %cst_190 = arith.constant 1.000000e+00 : f32
    %425 = vector.broadcast %cst_190 : f32 to vector<16x32xf32>
    %426 = arith.subf %425, %411 : vector<16x32xf32>
    %427 = arith.mulf %426, %423 : vector<16x32xf32>
    %428 = arith.addf %424, %427 : vector<16x32xf32>
    %c4_i32 = arith.constant 4 : i32
    %c2_i32_191 = arith.constant 2 : i32
    %429 = arith.muli %c2_i32_191, %c4_i32 : i32
    %c7_i32_192 = arith.constant 7 : i32
    %430 = arith.subi %c7_i32_192, %429 : i32
    %431 = arith.muli %arg1, %430 : i32
    %432 = arith.addi %c4_i32, %431 : i32
    %c0_193 = arith.constant 0 : index
    %433 = arith.index_cast %432 : i32 to index
    %c0_194 = arith.constant 0 : index
    %c0_195 = arith.constant 0 : index
    %434 = vector.load %arg2[%c0_193, %433, %c0_194, %c0_195] : memref<1x8x16x4xf32, #tpu.memory_space<vmem>>, vector<1x1x16x4xf32>
    %435 = vector.shape_cast %434 : vector<1x1x16x4xf32> to vector<16x4xf32>
    %c0_196 = arith.constant 0 : index
    %436 = arith.index_cast %432 : i32 to index
    %c0_197 = arith.constant 0 : index
    %c0_198 = arith.constant 0 : index
    %437 = vector.load %arg3[%c0_196, %436, %c0_197, %c0_198] : memref<1x8x16x4xf32, #tpu.memory_space<vmem>>, vector<1x1x16x4xf32>
    %438 = vector.shape_cast %437 : vector<1x1x16x4xf32> to vector<16x4xf32>
    %cst_199 = arith.constant dense<0.000000e+00> : vector<16x4xf32>
    %439 = tpu.matmul %428, %9, %cst_199 {dimension_numbers = #tpu.dot_dimension_numbers<[1], [0], [0], [1], [0, 0, 1, 1], [], []>} : vector<16x32xf32>, vector<32x4xf32>, vector<16x4xf32> -> vector<16x4xf32>
    %440 = vector.broadcast %12 : vector<1x4xf32> to vector<16x4xf32>
    %441 = arith.addf %439, %440 : vector<16x4xf32>
    %442 = arith.mulf %438, %435 : vector<16x4xf32>
    %cst_200 = arith.constant 1.000000e+00 : f32
    %443 = vector.broadcast %cst_200 : f32 to vector<16x4xf32>
    %444 = arith.subf %443, %438 : vector<16x4xf32>
    %445 = arith.mulf %444, %441 : vector<16x4xf32>
    %446 = arith.addf %442, %445 : vector<16x4xf32>
    %cst_201 = arith.constant dense<0.000000e+00> : vector<16x32xf32>
    %447 = tpu.matmul %446, %15, %cst_201 {dimension_numbers = #tpu.dot_dimension_numbers<[1], [0], [0], [1], [0, 0, 1, 1], [], []>} : vector<16x4xf32>, vector<4x32xf32>, vector<16x32xf32> -> vector<16x32xf32>
    %cst_202 = arith.constant dense<0.000000e+00> : vector<16x32xf32>
    %448 = tpu.matmul %428, %18, %cst_202 {dimension_numbers = #tpu.dot_dimension_numbers<[1], [0], [0], [1], [0, 0, 1, 1], [], []>} : vector<16x32xf32>, vector<32x32xf32>, vector<16x32xf32> -> vector<16x32xf32>
    %449 = arith.addf %447, %448 : vector<16x32xf32>
    %c0_203 = arith.constant 0 : index
    %c0_204 = arith.constant 0 : index
    %450 = arith.index_cast %432 : i32 to index
    %c0_205 = arith.constant 0 : index
    %c0_206 = arith.constant 0 : index
    %451 = vector.load %arg6[%c0_203, %c0_204, %450, %c0_205, %c0_206] : memref<1x1x8x16x32xf32, #tpu.memory_space<vmem>>, vector<1x1x1x16x32xf32>
    %452 = vector.shape_cast %451 : vector<1x1x1x16x32xf32> to vector<16x32xf32>
    %453 = arith.addf %449, %452 : vector<16x32xf32>
    %cst_207 = arith.constant dense<0.000000e+00> : vector<32x32xf32>
    %454 = tpu.matmul %2, %453, %cst_207 {dimension_numbers = #tpu.dot_dimension_numbers<[1], [0], [0], [1], [0, 0, 1, 1], [], []>} : vector<32x16xf32>, vector<16x32xf32>, vector<32x32xf32> -> vector<32x32xf32>
    %455 = vector.extract_strided_slice %454 {offsets = [0, 0], sizes = [16, 32], strides = [1, 1]} : vector<32x32xf32> to vector<16x32xf32>
    %456 = vector.extract_strided_slice %454 {offsets = [16, 0], sizes = [16, 32], strides = [1, 1]} : vector<32x32xf32> to vector<16x32xf32>
    %457 = tpu.concatenate %455, %456 in 1 : vector<16x32xf32>, vector<16x32xf32> -> vector<16x64xf32>
    %cst_208 = arith.constant dense<0.000000e+00> : vector<16x32xf32>
    %458 = tpu.matmul %457, %21, %cst_208 {dimension_numbers = #tpu.dot_dimension_numbers<[1], [0], [0], [1], [0, 0, 1, 1], [], []>} : vector<16x64xf32>, vector<64x32xf32>, vector<16x32xf32> -> vector<16x32xf32>
    %459 = vector.broadcast %24 : vector<1x32xf32> to vector<16x32xf32>
    %460 = arith.addf %458, %459 : vector<16x32xf32>
    %cst_209 = arith.constant dense<0.000000e+00> : vector<16x32xf32>
    %461 = tpu.matmul %460, %27, %cst_209 {dimension_numbers = #tpu.dot_dimension_numbers<[1], [0], [0], [1], [0, 0, 1, 1], [], []>} : vector<16x32xf32>, vector<32x32xf32>, vector<16x32xf32> -> vector<16x32xf32>
    %cst_210 = arith.constant dense<0.000000e+00> : vector<16x32xf32>
    %462 = tpu.matmul %428, %30, %cst_210 {dimension_numbers = #tpu.dot_dimension_numbers<[1], [0], [0], [1], [0, 0, 1, 1], [], []>} : vector<16x32xf32>, vector<32x32xf32>, vector<16x32xf32> -> vector<16x32xf32>
    %463 = arith.addf %461, %462 : vector<16x32xf32>
    %464 = vector.broadcast %33 : vector<1x32xf32> to vector<16x32xf32>
    %465 = arith.addf %463, %464 : vector<16x32xf32>
    %cst_211 = arith.constant 0.000000e+00 : f32
    %466 = vector.broadcast %cst_211 : f32 to vector<16x32xf32>
    %467 = arith.cmpf oge, %465, %466 : vector<16x32xf32>
    %468 = vector.broadcast %1 : f32 to vector<16x32xf32>
    %469 = arith.mulf %468, %465 : vector<16x32xf32>
    %470 = arith.select %467, %465, %469 : vector<16x32xi1>, vector<16x32xf32>
    %cst_212 = arith.constant dense<0.000000e+00> : vector<16x4xf32>
    %471 = tpu.matmul %470, %36, %cst_212 {dimension_numbers = #tpu.dot_dimension_numbers<[1], [0], [0], [1], [0, 0, 1, 1], [], []>} : vector<16x32xf32>, vector<32x4xf32>, vector<16x4xf32> -> vector<16x4xf32>
    %cst_213 = arith.constant dense<0.000000e+00> : vector<16x4xf32>
    %472 = tpu.matmul %428, %39, %cst_213 {dimension_numbers = #tpu.dot_dimension_numbers<[1], [0], [0], [1], [0, 0, 1, 1], [], []>} : vector<16x32xf32>, vector<32x4xf32>, vector<16x4xf32> -> vector<16x4xf32>
    %473 = arith.addf %471, %472 : vector<16x4xf32>
    %474 = vector.broadcast %42 : vector<1x4xf32> to vector<16x4xf32>
    %475 = arith.addf %473, %474 : vector<16x4xf32>
    %476 = tpu.concatenate %470, %428 in 1 : vector<16x32xf32>, vector<16x32xf32> -> vector<16x64xf32>
    %c0_214 = arith.constant 0 : index
    %c0_215 = arith.constant 0 : index
    %477 = arith.index_cast %c4_i32 : i32 to index
    %c0_216 = arith.constant 0 : index
    %c0_217 = arith.constant 0 : index
    %478 = vector.load %arg24[%c0_214, %c0_215, %477, %c0_216, %c0_217] : memref<1x1x8x16x64xf32, #tpu.memory_space<vmem>>, vector<1x1x1x16x64xf32>
    %479 = vector.shape_cast %478 : vector<1x1x1x16x64xf32> to vector<16x64xf32>
    %480 = vector.shape_cast %476 : vector<16x64xf32> to vector<1x1x1x16x64xf32>
    tpu.vector_store %arg24[%c0_214, %c0_215, %477, %c0_216, %c0_217], %480 {strides = array<i32>} : memref<1x1x8x16x64xf32, #tpu.memory_space<vmem>>, vector<1x1x1x16x64xf32>,
    %481 = arith.mulf %438, %446 : vector<16x4xf32>
    %cst_218 = arith.constant 1.000000e+00 : f32
    %482 = vector.broadcast %cst_218 : f32 to vector<16x4xf32>
    %483 = arith.subf %482, %438 : vector<16x4xf32>
    %484 = arith.mulf %483, %475 : vector<16x4xf32>
    %485 = arith.addf %481, %484 : vector<16x4xf32>
    %486 = tpu.concatenate %485, %428 in 1 : vector<16x4xf32>, vector<16x32xf32> -> vector<16x36xf32>
    %cst_219 = arith.constant dense<0.000000e+00> : vector<32x36xf32>
    %487 = tpu.matmul %2, %486, %cst_219 {dimension_numbers = #tpu.dot_dimension_numbers<[1], [0], [0], [1], [0, 0, 1, 1], [], []>} : vector<32x16xf32>, vector<16x36xf32>, vector<32x36xf32> -> vector<32x36xf32>
    %cst_220 = arith.constant dense<0.000000e+00> : vector<32x36xf32>
    %488 = tpu.matmul %3, %487, %cst_220 {dimension_numbers = #tpu.dot_dimension_numbers<[1], [0], [0], [1], [0, 0, 1, 1], [], []>} : vector<32x32xf32>, vector<32x36xf32>, vector<32x36xf32> -> vector<32x36xf32>
    %489 = vector.extract_strided_slice %487 {offsets = [0, 0], sizes = [16, 36], strides = [1, 1]} : vector<32x36xf32> to vector<16x36xf32>
    %490 = vector.extract_strided_slice %488 {offsets = [0, 0], sizes = [16, 36], strides = [1, 1]} : vector<32x36xf32> to vector<16x36xf32>
    %491 = vector.extract_strided_slice %487 {offsets = [16, 0], sizes = [16, 36], strides = [1, 1]} : vector<32x36xf32> to vector<16x36xf32>
    %492 = vector.extract_strided_slice %488 {offsets = [16, 0], sizes = [16, 36], strides = [1, 1]} : vector<32x36xf32> to vector<16x36xf32>
    %493 = tpu.concatenate %489, %490, %491, %492 in 1 : vector<16x36xf32>, vector<16x36xf32>, vector<16x36xf32>, vector<16x36xf32> -> vector<16x144xf32>
    %cst_221 = arith.constant dense<0.000000e+00> : vector<16x96xf32>
    %494 = tpu.matmul %493, %45, %cst_221 {dimension_numbers = #tpu.dot_dimension_numbers<[1], [0], [0], [1], [0, 0, 1, 1], [], []>} : vector<16x144xf32>, vector<144x96xf32>, vector<16x96xf32> -> vector<16x96xf32>
    %c0_222 = arith.constant 0 : index
    %c0_223 = arith.constant 0 : index
    %495 = arith.index_cast %432 : i32 to index
    %c0_224 = arith.constant 0 : index
    %c0_225 = arith.constant 0 : index
    %496 = vector.load %arg7[%c0_222, %c0_223, %495, %c0_224, %c0_225] : memref<1x1x8x16x96xf32, #tpu.memory_space<vmem>>, vector<1x1x1x16x96xf32>
    %497 = vector.shape_cast %496 : vector<1x1x1x16x96xf32> to vector<16x96xf32>
    %498 = arith.addf %494, %497 : vector<16x96xf32>
    %499 = vector.extract_strided_slice %498 {offsets = [0, 0], sizes = [16, 64], strides = [1, 1]} : vector<16x96xf32> to vector<16x64xf32>
    %500 = arith.negf %499 : vector<16x64xf32>
    %501 = math.exp %500 : vector<16x64xf32>
    %cst_226 = arith.constant 1.000000e+00 : f32
    %502 = vector.broadcast %cst_226 : f32 to vector<16x64xf32>
    %503 = arith.addf %502, %501 : vector<16x64xf32>
    %504 = arith.divf %502, %503 : vector<16x64xf32>
    %505 = vector.extract_strided_slice %504 {offsets = [0, 0], sizes = [16, 32], strides = [1, 1]} : vector<16x64xf32> to vector<16x32xf32>
    %506 = vector.extract_strided_slice %504 {offsets = [0, 32], sizes = [16, 32], strides = [1, 1]} : vector<16x64xf32> to vector<16x32xf32>
    %507 = arith.mulf %505, %428 : vector<16x32xf32>
    %cst_227 = arith.constant dense<0.000000e+00> : vector<32x32xf32>
    %508 = tpu.matmul %2, %507, %cst_227 {dimension_numbers = #tpu.dot_dimension_numbers<[1], [0], [0], [1], [0, 0, 1, 1], [], []>} : vector<32x16xf32>, vector<16x32xf32>, vector<32x32xf32> -> vector<32x32xf32>
    %cst_228 = arith.constant dense<0.000000e+00> : vector<32x32xf32>
    %509 = tpu.matmul %3, %508, %cst_228 {dimension_numbers = #tpu.dot_dimension_numbers<[1], [0], [0], [1], [0, 0, 1, 1], [], []>} : vector<32x32xf32>, vector<32x32xf32>, vector<32x32xf32> -> vector<32x32xf32>
    %510 = vector.extract_strided_slice %508 {offsets = [0, 0], sizes = [16, 32], strides = [1, 1]} : vector<32x32xf32> to vector<16x32xf32>
    %511 = vector.extract_strided_slice %509 {offsets = [0, 0], sizes = [16, 32], strides = [1, 1]} : vector<32x32xf32> to vector<16x32xf32>
    %512 = vector.extract_strided_slice %508 {offsets = [16, 0], sizes = [16, 32], strides = [1, 1]} : vector<32x32xf32> to vector<16x32xf32>
    %513 = vector.extract_strided_slice %509 {offsets = [16, 0], sizes = [16, 32], strides = [1, 1]} : vector<32x32xf32> to vector<16x32xf32>
    %514 = tpu.concatenate %510, %511, %512, %513 in 1 : vector<16x32xf32>, vector<16x32xf32>, vector<16x32xf32>, vector<16x32xf32> -> vector<16x128xf32>
    %515 = vector.extract_strided_slice %498 {offsets = [0, 64], sizes = [16, 32], strides = [1, 1]} : vector<16x96xf32> to vector<16x32xf32>
    %cst_229 = arith.constant dense<0.000000e+00> : vector<16x32xf32>
    %516 = tpu.matmul %514, %48, %cst_229 {dimension_numbers = #tpu.dot_dimension_numbers<[1], [0], [0], [1], [0, 0, 1, 1], [], []>} : vector<16x128xf32>, vector<128x32xf32>, vector<16x32xf32> -> vector<16x32xf32>
    %517 = arith.addf %515, %516 : vector<16x32xf32>
    %518 = math.tanh %517 : vector<16x32xf32>
    %519 = arith.mulf %506, %428 : vector<16x32xf32>
    %cst_230 = arith.constant 1.000000e+00 : f32
    %520 = vector.broadcast %cst_230 : f32 to vector<16x32xf32>
    %521 = arith.subf %520, %506 : vector<16x32xf32>
    %522 = arith.mulf %521, %518 : vector<16x32xf32>
    %523 = arith.addf %519, %522 : vector<16x32xf32>
    %c5_i32 = arith.constant 5 : i32
    %c2_i32_231 = arith.constant 2 : i32
    %524 = arith.muli %c2_i32_231, %c5_i32 : i32
    %c7_i32_232 = arith.constant 7 : i32
    %525 = arith.subi %c7_i32_232, %524 : i32
    %526 = arith.muli %arg1, %525 : i32
    %527 = arith.addi %c5_i32, %526 : i32
    %c0_233 = arith.constant 0 : index
    %528 = arith.index_cast %527 : i32 to index
    %c0_234 = arith.constant 0 : index
    %c0_235 = arith.constant 0 : index
    %529 = vector.load %arg2[%c0_233, %528, %c0_234, %c0_235] : memref<1x8x16x4xf32, #tpu.memory_space<vmem>>, vector<1x1x16x4xf32>
    %530 = vector.shape_cast %529 : vector<1x1x16x4xf32> to vector<16x4xf32>
    %c0_236 = arith.constant 0 : index
    %531 = arith.index_cast %527 : i32 to index
    %c0_237 = arith.constant 0 : index
    %c0_238 = arith.constant 0 : index
    %532 = vector.load %arg3[%c0_236, %531, %c0_237, %c0_238] : memref<1x8x16x4xf32, #tpu.memory_space<vmem>>, vector<1x1x16x4xf32>
    %533 = vector.shape_cast %532 : vector<1x1x16x4xf32> to vector<16x4xf32>
    %cst_239 = arith.constant dense<0.000000e+00> : vector<16x4xf32>
    %534 = tpu.matmul %523, %9, %cst_239 {dimension_numbers = #tpu.dot_dimension_numbers<[1], [0], [0], [1], [0, 0, 1, 1], [], []>} : vector<16x32xf32>, vector<32x4xf32>, vector<16x4xf32> -> vector<16x4xf32>
    %535 = vector.broadcast %12 : vector<1x4xf32> to vector<16x4xf32>
    %536 = arith.addf %534, %535 : vector<16x4xf32>
    %537 = arith.mulf %533, %530 : vector<16x4xf32>
    %cst_240 = arith.constant 1.000000e+00 : f32
    %538 = vector.broadcast %cst_240 : f32 to vector<16x4xf32>
    %539 = arith.subf %538, %533 : vector<16x4xf32>
    %540 = arith.mulf %539, %536 : vector<16x4xf32>
    %541 = arith.addf %537, %540 : vector<16x4xf32>
    %cst_241 = arith.constant dense<0.000000e+00> : vector<16x32xf32>
    %542 = tpu.matmul %541, %15, %cst_241 {dimension_numbers = #tpu.dot_dimension_numbers<[1], [0], [0], [1], [0, 0, 1, 1], [], []>} : vector<16x4xf32>, vector<4x32xf32>, vector<16x32xf32> -> vector<16x32xf32>
    %cst_242 = arith.constant dense<0.000000e+00> : vector<16x32xf32>
    %543 = tpu.matmul %523, %18, %cst_242 {dimension_numbers = #tpu.dot_dimension_numbers<[1], [0], [0], [1], [0, 0, 1, 1], [], []>} : vector<16x32xf32>, vector<32x32xf32>, vector<16x32xf32> -> vector<16x32xf32>
    %544 = arith.addf %542, %543 : vector<16x32xf32>
    %c0_243 = arith.constant 0 : index
    %c0_244 = arith.constant 0 : index
    %545 = arith.index_cast %527 : i32 to index
    %c0_245 = arith.constant 0 : index
    %c0_246 = arith.constant 0 : index
    %546 = vector.load %arg6[%c0_243, %c0_244, %545, %c0_245, %c0_246] : memref<1x1x8x16x32xf32, #tpu.memory_space<vmem>>, vector<1x1x1x16x32xf32>
    %547 = vector.shape_cast %546 : vector<1x1x1x16x32xf32> to vector<16x32xf32>
    %548 = arith.addf %544, %547 : vector<16x32xf32>
    %cst_247 = arith.constant dense<0.000000e+00> : vector<32x32xf32>
    %549 = tpu.matmul %2, %548, %cst_247 {dimension_numbers = #tpu.dot_dimension_numbers<[1], [0], [0], [1], [0, 0, 1, 1], [], []>} : vector<32x16xf32>, vector<16x32xf32>, vector<32x32xf32> -> vector<32x32xf32>
    %550 = vector.extract_strided_slice %549 {offsets = [0, 0], sizes = [16, 32], strides = [1, 1]} : vector<32x32xf32> to vector<16x32xf32>
    %551 = vector.extract_strided_slice %549 {offsets = [16, 0], sizes = [16, 32], strides = [1, 1]} : vector<32x32xf32> to vector<16x32xf32>
    %552 = tpu.concatenate %550, %551 in 1 : vector<16x32xf32>, vector<16x32xf32> -> vector<16x64xf32>
    %cst_248 = arith.constant dense<0.000000e+00> : vector<16x32xf32>
    %553 = tpu.matmul %552, %21, %cst_248 {dimension_numbers = #tpu.dot_dimension_numbers<[1], [0], [0], [1], [0, 0, 1, 1], [], []>} : vector<16x64xf32>, vector<64x32xf32>, vector<16x32xf32> -> vector<16x32xf32>
    %554 = vector.broadcast %24 : vector<1x32xf32> to vector<16x32xf32>
    %555 = arith.addf %553, %554 : vector<16x32xf32>
    %cst_249 = arith.constant dense<0.000000e+00> : vector<16x32xf32>
    %556 = tpu.matmul %555, %27, %cst_249 {dimension_numbers = #tpu.dot_dimension_numbers<[1], [0], [0], [1], [0, 0, 1, 1], [], []>} : vector<16x32xf32>, vector<32x32xf32>, vector<16x32xf32> -> vector<16x32xf32>
    %cst_250 = arith.constant dense<0.000000e+00> : vector<16x32xf32>
    %557 = tpu.matmul %523, %30, %cst_250 {dimension_numbers = #tpu.dot_dimension_numbers<[1], [0], [0], [1], [0, 0, 1, 1], [], []>} : vector<16x32xf32>, vector<32x32xf32>, vector<16x32xf32> -> vector<16x32xf32>
    %558 = arith.addf %556, %557 : vector<16x32xf32>
    %559 = vector.broadcast %33 : vector<1x32xf32> to vector<16x32xf32>
    %560 = arith.addf %558, %559 : vector<16x32xf32>
    %cst_251 = arith.constant 0.000000e+00 : f32
    %561 = vector.broadcast %cst_251 : f32 to vector<16x32xf32>
    %562 = arith.cmpf oge, %560, %561 : vector<16x32xf32>
    %563 = vector.broadcast %1 : f32 to vector<16x32xf32>
    %564 = arith.mulf %563, %560 : vector<16x32xf32>
    %565 = arith.select %562, %560, %564 : vector<16x32xi1>, vector<16x32xf32>
    %cst_252 = arith.constant dense<0.000000e+00> : vector<16x4xf32>
    %566 = tpu.matmul %565, %36, %cst_252 {dimension_numbers = #tpu.dot_dimension_numbers<[1], [0], [0], [1], [0, 0, 1, 1], [], []>} : vector<16x32xf32>, vector<32x4xf32>, vector<16x4xf32> -> vector<16x4xf32>
    %cst_253 = arith.constant dense<0.000000e+00> : vector<16x4xf32>
    %567 = tpu.matmul %523, %39, %cst_253 {dimension_numbers = #tpu.dot_dimension_numbers<[1], [0], [0], [1], [0, 0, 1, 1], [], []>} : vector<16x32xf32>, vector<32x4xf32>, vector<16x4xf32> -> vector<16x4xf32>
    %568 = arith.addf %566, %567 : vector<16x4xf32>
    %569 = vector.broadcast %42 : vector<1x4xf32> to vector<16x4xf32>
    %570 = arith.addf %568, %569 : vector<16x4xf32>
    %571 = tpu.concatenate %565, %523 in 1 : vector<16x32xf32>, vector<16x32xf32> -> vector<16x64xf32>
    %c0_254 = arith.constant 0 : index
    %c0_255 = arith.constant 0 : index
    %572 = arith.index_cast %c5_i32 : i32 to index
    %c0_256 = arith.constant 0 : index
    %c0_257 = arith.constant 0 : index
    %573 = vector.load %arg24[%c0_254, %c0_255, %572, %c0_256, %c0_257] : memref<1x1x8x16x64xf32, #tpu.memory_space<vmem>>, vector<1x1x1x16x64xf32>
    %574 = vector.shape_cast %573 : vector<1x1x1x16x64xf32> to vector<16x64xf32>
    %575 = vector.shape_cast %571 : vector<16x64xf32> to vector<1x1x1x16x64xf32>
    tpu.vector_store %arg24[%c0_254, %c0_255, %572, %c0_256, %c0_257], %575 {strides = array<i32>} : memref<1x1x8x16x64xf32, #tpu.memory_space<vmem>>, vector<1x1x1x16x64xf32>,
    %576 = arith.mulf %533, %541 : vector<16x4xf32>
    %cst_258 = arith.constant 1.000000e+00 : f32
    %577 = vector.broadcast %cst_258 : f32 to vector<16x4xf32>
    %578 = arith.subf %577, %533 : vector<16x4xf32>
    %579 = arith.mulf %578, %570 : vector<16x4xf32>
    %580 = arith.addf %576, %579 : vector<16x4xf32>
    %581 = tpu.concatenate %580, %523 in 1 : vector<16x4xf32>, vector<16x32xf32> -> vector<16x36xf32>
    %cst_259 = arith.constant dense<0.000000e+00> : vector<32x36xf32>
    %582 = tpu.matmul %2, %581, %cst_259 {dimension_numbers = #tpu.dot_dimension_numbers<[1], [0], [0], [1], [0, 0, 1, 1], [], []>} : vector<32x16xf32>, vector<16x36xf32>, vector<32x36xf32> -> vector<32x36xf32>
    %cst_260 = arith.constant dense<0.000000e+00> : vector<32x36xf32>
    %583 = tpu.matmul %3, %582, %cst_260 {dimension_numbers = #tpu.dot_dimension_numbers<[1], [0], [0], [1], [0, 0, 1, 1], [], []>} : vector<32x32xf32>, vector<32x36xf32>, vector<32x36xf32> -> vector<32x36xf32>
    %584 = vector.extract_strided_slice %582 {offsets = [0, 0], sizes = [16, 36], strides = [1, 1]} : vector<32x36xf32> to vector<16x36xf32>
    %585 = vector.extract_strided_slice %583 {offsets = [0, 0], sizes = [16, 36], strides = [1, 1]} : vector<32x36xf32> to vector<16x36xf32>
    %586 = vector.extract_strided_slice %582 {offsets = [16, 0], sizes = [16, 36], strides = [1, 1]} : vector<32x36xf32> to vector<16x36xf32>
    %587 = vector.extract_strided_slice %583 {offsets = [16, 0], sizes = [16, 36], strides = [1, 1]} : vector<32x36xf32> to vector<16x36xf32>
    %588 = tpu.concatenate %584, %585, %586, %587 in 1 : vector<16x36xf32>, vector<16x36xf32>, vector<16x36xf32>, vector<16x36xf32> -> vector<16x144xf32>
    %cst_261 = arith.constant dense<0.000000e+00> : vector<16x96xf32>
    %589 = tpu.matmul %588, %45, %cst_261 {dimension_numbers = #tpu.dot_dimension_numbers<[1], [0], [0], [1], [0, 0, 1, 1], [], []>} : vector<16x144xf32>, vector<144x96xf32>, vector<16x96xf32> -> vector<16x96xf32>
    %c0_262 = arith.constant 0 : index
    %c0_263 = arith.constant 0 : index
    %590 = arith.index_cast %527 : i32 to index
    %c0_264 = arith.constant 0 : index
    %c0_265 = arith.constant 0 : index
    %591 = vector.load %arg7[%c0_262, %c0_263, %590, %c0_264, %c0_265] : memref<1x1x8x16x96xf32, #tpu.memory_space<vmem>>, vector<1x1x1x16x96xf32>
    %592 = vector.shape_cast %591 : vector<1x1x1x16x96xf32> to vector<16x96xf32>
    %593 = arith.addf %589, %592 : vector<16x96xf32>
    %594 = vector.extract_strided_slice %593 {offsets = [0, 0], sizes = [16, 64], strides = [1, 1]} : vector<16x96xf32> to vector<16x64xf32>
    %595 = arith.negf %594 : vector<16x64xf32>
    %596 = math.exp %595 : vector<16x64xf32>
    %cst_266 = arith.constant 1.000000e+00 : f32
    %597 = vector.broadcast %cst_266 : f32 to vector<16x64xf32>
    %598 = arith.addf %597, %596 : vector<16x64xf32>
    %599 = arith.divf %597, %598 : vector<16x64xf32>
    %600 = vector.extract_strided_slice %599 {offsets = [0, 0], sizes = [16, 32], strides = [1, 1]} : vector<16x64xf32> to vector<16x32xf32>
    %601 = vector.extract_strided_slice %599 {offsets = [0, 32], sizes = [16, 32], strides = [1, 1]} : vector<16x64xf32> to vector<16x32xf32>
    %602 = arith.mulf %600, %523 : vector<16x32xf32>
    %cst_267 = arith.constant dense<0.000000e+00> : vector<32x32xf32>
    %603 = tpu.matmul %2, %602, %cst_267 {dimension_numbers = #tpu.dot_dimension_numbers<[1], [0], [0], [1], [0, 0, 1, 1], [], []>} : vector<32x16xf32>, vector<16x32xf32>, vector<32x32xf32> -> vector<32x32xf32>
    %cst_268 = arith.constant dense<0.000000e+00> : vector<32x32xf32>
    %604 = tpu.matmul %3, %603, %cst_268 {dimension_numbers = #tpu.dot_dimension_numbers<[1], [0], [0], [1], [0, 0, 1, 1], [], []>} : vector<32x32xf32>, vector<32x32xf32>, vector<32x32xf32> -> vector<32x32xf32>
    %605 = vector.extract_strided_slice %603 {offsets = [0, 0], sizes = [16, 32], strides = [1, 1]} : vector<32x32xf32> to vector<16x32xf32>
    %606 = vector.extract_strided_slice %604 {offsets = [0, 0], sizes = [16, 32], strides = [1, 1]} : vector<32x32xf32> to vector<16x32xf32>
    %607 = vector.extract_strided_slice %603 {offsets = [16, 0], sizes = [16, 32], strides = [1, 1]} : vector<32x32xf32> to vector<16x32xf32>
    %608 = vector.extract_strided_slice %604 {offsets = [16, 0], sizes = [16, 32], strides = [1, 1]} : vector<32x32xf32> to vector<16x32xf32>
    %609 = tpu.concatenate %605, %606, %607, %608 in 1 : vector<16x32xf32>, vector<16x32xf32>, vector<16x32xf32>, vector<16x32xf32> -> vector<16x128xf32>
    %610 = vector.extract_strided_slice %593 {offsets = [0, 64], sizes = [16, 32], strides = [1, 1]} : vector<16x96xf32> to vector<16x32xf32>
    %cst_269 = arith.constant dense<0.000000e+00> : vector<16x32xf32>
    %611 = tpu.matmul %609, %48, %cst_269 {dimension_numbers = #tpu.dot_dimension_numbers<[1], [0], [0], [1], [0, 0, 1, 1], [], []>} : vector<16x128xf32>, vector<128x32xf32>, vector<16x32xf32> -> vector<16x32xf32>
    %612 = arith.addf %610, %611 : vector<16x32xf32>
    %613 = math.tanh %612 : vector<16x32xf32>
    %614 = arith.mulf %601, %523 : vector<16x32xf32>
    %cst_270 = arith.constant 1.000000e+00 : f32
    %615 = vector.broadcast %cst_270 : f32 to vector<16x32xf32>
    %616 = arith.subf %615, %601 : vector<16x32xf32>
    %617 = arith.mulf %616, %613 : vector<16x32xf32>
    %618 = arith.addf %614, %617 : vector<16x32xf32>
    %c6_i32 = arith.constant 6 : i32
    %c2_i32_271 = arith.constant 2 : i32
    %619 = arith.muli %c2_i32_271, %c6_i32 : i32
    %c7_i32_272 = arith.constant 7 : i32
    %620 = arith.subi %c7_i32_272, %619 : i32
    %621 = arith.muli %arg1, %620 : i32
    %622 = arith.addi %c6_i32, %621 : i32
    %c0_273 = arith.constant 0 : index
    %623 = arith.index_cast %622 : i32 to index
    %c0_274 = arith.constant 0 : index
    %c0_275 = arith.constant 0 : index
    %624 = vector.load %arg2[%c0_273, %623, %c0_274, %c0_275] : memref<1x8x16x4xf32, #tpu.memory_space<vmem>>, vector<1x1x16x4xf32>
    %625 = vector.shape_cast %624 : vector<1x1x16x4xf32> to vector<16x4xf32>
    %c0_276 = arith.constant 0 : index
    %626 = arith.index_cast %622 : i32 to index
    %c0_277 = arith.constant 0 : index
    %c0_278 = arith.constant 0 : index
    %627 = vector.load %arg3[%c0_276, %626, %c0_277, %c0_278] : memref<1x8x16x4xf32, #tpu.memory_space<vmem>>, vector<1x1x16x4xf32>
    %628 = vector.shape_cast %627 : vector<1x1x16x4xf32> to vector<16x4xf32>
    %cst_279 = arith.constant dense<0.000000e+00> : vector<16x4xf32>
    %629 = tpu.matmul %618, %9, %cst_279 {dimension_numbers = #tpu.dot_dimension_numbers<[1], [0], [0], [1], [0, 0, 1, 1], [], []>} : vector<16x32xf32>, vector<32x4xf32>, vector<16x4xf32> -> vector<16x4xf32>
    %630 = vector.broadcast %12 : vector<1x4xf32> to vector<16x4xf32>
    %631 = arith.addf %629, %630 : vector<16x4xf32>
    %632 = arith.mulf %628, %625 : vector<16x4xf32>
    %cst_280 = arith.constant 1.000000e+00 : f32
    %633 = vector.broadcast %cst_280 : f32 to vector<16x4xf32>
    %634 = arith.subf %633, %628 : vector<16x4xf32>
    %635 = arith.mulf %634, %631 : vector<16x4xf32>
    %636 = arith.addf %632, %635 : vector<16x4xf32>
    %cst_281 = arith.constant dense<0.000000e+00> : vector<16x32xf32>
    %637 = tpu.matmul %636, %15, %cst_281 {dimension_numbers = #tpu.dot_dimension_numbers<[1], [0], [0], [1], [0, 0, 1, 1], [], []>} : vector<16x4xf32>, vector<4x32xf32>, vector<16x32xf32> -> vector<16x32xf32>
    %cst_282 = arith.constant dense<0.000000e+00> : vector<16x32xf32>
    %638 = tpu.matmul %618, %18, %cst_282 {dimension_numbers = #tpu.dot_dimension_numbers<[1], [0], [0], [1], [0, 0, 1, 1], [], []>} : vector<16x32xf32>, vector<32x32xf32>, vector<16x32xf32> -> vector<16x32xf32>
    %639 = arith.addf %637, %638 : vector<16x32xf32>
    %c0_283 = arith.constant 0 : index
    %c0_284 = arith.constant 0 : index
    %640 = arith.index_cast %622 : i32 to index
    %c0_285 = arith.constant 0 : index
    %c0_286 = arith.constant 0 : index
    %641 = vector.load %arg6[%c0_283, %c0_284, %640, %c0_285, %c0_286] : memref<1x1x8x16x32xf32, #tpu.memory_space<vmem>>, vector<1x1x1x16x32xf32>
    %642 = vector.shape_cast %641 : vector<1x1x1x16x32xf32> to vector<16x32xf32>
    %643 = arith.addf %639, %642 : vector<16x32xf32>
    %cst_287 = arith.constant dense<0.000000e+00> : vector<32x32xf32>
    %644 = tpu.matmul %2, %643, %cst_287 {dimension_numbers = #tpu.dot_dimension_numbers<[1], [0], [0], [1], [0, 0, 1, 1], [], []>} : vector<32x16xf32>, vector<16x32xf32>, vector<32x32xf32> -> vector<32x32xf32>
    %645 = vector.extract_strided_slice %644 {offsets = [0, 0], sizes = [16, 32], strides = [1, 1]} : vector<32x32xf32> to vector<16x32xf32>
    %646 = vector.extract_strided_slice %644 {offsets = [16, 0], sizes = [16, 32], strides = [1, 1]} : vector<32x32xf32> to vector<16x32xf32>
    %647 = tpu.concatenate %645, %646 in 1 : vector<16x32xf32>, vector<16x32xf32> -> vector<16x64xf32>
    %cst_288 = arith.constant dense<0.000000e+00> : vector<16x32xf32>
    %648 = tpu.matmul %647, %21, %cst_288 {dimension_numbers = #tpu.dot_dimension_numbers<[1], [0], [0], [1], [0, 0, 1, 1], [], []>} : vector<16x64xf32>, vector<64x32xf32>, vector<16x32xf32> -> vector<16x32xf32>
    %649 = vector.broadcast %24 : vector<1x32xf32> to vector<16x32xf32>
    %650 = arith.addf %648, %649 : vector<16x32xf32>
    %cst_289 = arith.constant dense<0.000000e+00> : vector<16x32xf32>
    %651 = tpu.matmul %650, %27, %cst_289 {dimension_numbers = #tpu.dot_dimension_numbers<[1], [0], [0], [1], [0, 0, 1, 1], [], []>} : vector<16x32xf32>, vector<32x32xf32>, vector<16x32xf32> -> vector<16x32xf32>
    %cst_290 = arith.constant dense<0.000000e+00> : vector<16x32xf32>
    %652 = tpu.matmul %618, %30, %cst_290 {dimension_numbers = #tpu.dot_dimension_numbers<[1], [0], [0], [1], [0, 0, 1, 1], [], []>} : vector<16x32xf32>, vector<32x32xf32>, vector<16x32xf32> -> vector<16x32xf32>
    %653 = arith.addf %651, %652 : vector<16x32xf32>
    %654 = vector.broadcast %33 : vector<1x32xf32> to vector<16x32xf32>
    %655 = arith.addf %653, %654 : vector<16x32xf32>
    %cst_291 = arith.constant 0.000000e+00 : f32
    %656 = vector.broadcast %cst_291 : f32 to vector<16x32xf32>
    %657 = arith.cmpf oge, %655, %656 : vector<16x32xf32>
    %658 = vector.broadcast %1 : f32 to vector<16x32xf32>
    %659 = arith.mulf %658, %655 : vector<16x32xf32>
    %660 = arith.select %657, %655, %659 : vector<16x32xi1>, vector<16x32xf32>
    %cst_292 = arith.constant dense<0.000000e+00> : vector<16x4xf32>
    %661 = tpu.matmul %660, %36, %cst_292 {dimension_numbers = #tpu.dot_dimension_numbers<[1], [0], [0], [1], [0, 0, 1, 1], [], []>} : vector<16x32xf32>, vector<32x4xf32>, vector<16x4xf32> -> vector<16x4xf32>
    %cst_293 = arith.constant dense<0.000000e+00> : vector<16x4xf32>
    %662 = tpu.matmul %618, %39, %cst_293 {dimension_numbers = #tpu.dot_dimension_numbers<[1], [0], [0], [1], [0, 0, 1, 1], [], []>} : vector<16x32xf32>, vector<32x4xf32>, vector<16x4xf32> -> vector<16x4xf32>
    %663 = arith.addf %661, %662 : vector<16x4xf32>
    %664 = vector.broadcast %42 : vector<1x4xf32> to vector<16x4xf32>
    %665 = arith.addf %663, %664 : vector<16x4xf32>
    %666 = tpu.concatenate %660, %618 in 1 : vector<16x32xf32>, vector<16x32xf32> -> vector<16x64xf32>
    %c0_294 = arith.constant 0 : index
    %c0_295 = arith.constant 0 : index
    %667 = arith.index_cast %c6_i32 : i32 to index
    %c0_296 = arith.constant 0 : index
    %c0_297 = arith.constant 0 : index
    %668 = vector.load %arg24[%c0_294, %c0_295, %667, %c0_296, %c0_297] : memref<1x1x8x16x64xf32, #tpu.memory_space<vmem>>, vector<1x1x1x16x64xf32>
    %669 = vector.shape_cast %668 : vector<1x1x1x16x64xf32> to vector<16x64xf32>
    %670 = vector.shape_cast %666 : vector<16x64xf32> to vector<1x1x1x16x64xf32>
    tpu.vector_store %arg24[%c0_294, %c0_295, %667, %c0_296, %c0_297], %670 {strides = array<i32>} : memref<1x1x8x16x64xf32, #tpu.memory_space<vmem>>, vector<1x1x1x16x64xf32>,
    %671 = arith.mulf %628, %636 : vector<16x4xf32>
    %cst_298 = arith.constant 1.000000e+00 : f32
    %672 = vector.broadcast %cst_298 : f32 to vector<16x4xf32>
    %673 = arith.subf %672, %628 : vector<16x4xf32>
    %674 = arith.mulf %673, %665 : vector<16x4xf32>
    %675 = arith.addf %671, %674 : vector<16x4xf32>
    %676 = tpu.concatenate %675, %618 in 1 : vector<16x4xf32>, vector<16x32xf32> -> vector<16x36xf32>
    %cst_299 = arith.constant dense<0.000000e+00> : vector<32x36xf32>
    %677 = tpu.matmul %2, %676, %cst_299 {dimension_numbers = #tpu.dot_dimension_numbers<[1], [0], [0], [1], [0, 0, 1, 1], [], []>} : vector<32x16xf32>, vector<16x36xf32>, vector<32x36xf32> -> vector<32x36xf32>
    %cst_300 = arith.constant dense<0.000000e+00> : vector<32x36xf32>
    %678 = tpu.matmul %3, %677, %cst_300 {dimension_numbers = #tpu.dot_dimension_numbers<[1], [0], [0], [1], [0, 0, 1, 1], [], []>} : vector<32x32xf32>, vector<32x36xf32>, vector<32x36xf32> -> vector<32x36xf32>
    %679 = vector.extract_strided_slice %677 {offsets = [0, 0], sizes = [16, 36], strides = [1, 1]} : vector<32x36xf32> to vector<16x36xf32>
    %680 = vector.extract_strided_slice %678 {offsets = [0, 0], sizes = [16, 36], strides = [1, 1]} : vector<32x36xf32> to vector<16x36xf32>
    %681 = vector.extract_strided_slice %677 {offsets = [16, 0], sizes = [16, 36], strides = [1, 1]} : vector<32x36xf32> to vector<16x36xf32>
    %682 = vector.extract_strided_slice %678 {offsets = [16, 0], sizes = [16, 36], strides = [1, 1]} : vector<32x36xf32> to vector<16x36xf32>
    %683 = tpu.concatenate %679, %680, %681, %682 in 1 : vector<16x36xf32>, vector<16x36xf32>, vector<16x36xf32>, vector<16x36xf32> -> vector<16x144xf32>
    %cst_301 = arith.constant dense<0.000000e+00> : vector<16x96xf32>
    %684 = tpu.matmul %683, %45, %cst_301 {dimension_numbers = #tpu.dot_dimension_numbers<[1], [0], [0], [1], [0, 0, 1, 1], [], []>} : vector<16x144xf32>, vector<144x96xf32>, vector<16x96xf32> -> vector<16x96xf32>
    %c0_302 = arith.constant 0 : index
    %c0_303 = arith.constant 0 : index
    %685 = arith.index_cast %622 : i32 to index
    %c0_304 = arith.constant 0 : index
    %c0_305 = arith.constant 0 : index
    %686 = vector.load %arg7[%c0_302, %c0_303, %685, %c0_304, %c0_305] : memref<1x1x8x16x96xf32, #tpu.memory_space<vmem>>, vector<1x1x1x16x96xf32>
    %687 = vector.shape_cast %686 : vector<1x1x1x16x96xf32> to vector<16x96xf32>
    %688 = arith.addf %684, %687 : vector<16x96xf32>
    %689 = vector.extract_strided_slice %688 {offsets = [0, 0], sizes = [16, 64], strides = [1, 1]} : vector<16x96xf32> to vector<16x64xf32>
    %690 = arith.negf %689 : vector<16x64xf32>
    %691 = math.exp %690 : vector<16x64xf32>
    %cst_306 = arith.constant 1.000000e+00 : f32
    %692 = vector.broadcast %cst_306 : f32 to vector<16x64xf32>
    %693 = arith.addf %692, %691 : vector<16x64xf32>
    %694 = arith.divf %692, %693 : vector<16x64xf32>
    %695 = vector.extract_strided_slice %694 {offsets = [0, 0], sizes = [16, 32], strides = [1, 1]} : vector<16x64xf32> to vector<16x32xf32>
    %696 = vector.extract_strided_slice %694 {offsets = [0, 32], sizes = [16, 32], strides = [1, 1]} : vector<16x64xf32> to vector<16x32xf32>
    %697 = arith.mulf %695, %618 : vector<16x32xf32>
    %cst_307 = arith.constant dense<0.000000e+00> : vector<32x32xf32>
    %698 = tpu.matmul %2, %697, %cst_307 {dimension_numbers = #tpu.dot_dimension_numbers<[1], [0], [0], [1], [0, 0, 1, 1], [], []>} : vector<32x16xf32>, vector<16x32xf32>, vector<32x32xf32> -> vector<32x32xf32>
    %cst_308 = arith.constant dense<0.000000e+00> : vector<32x32xf32>
    %699 = tpu.matmul %3, %698, %cst_308 {dimension_numbers = #tpu.dot_dimension_numbers<[1], [0], [0], [1], [0, 0, 1, 1], [], []>} : vector<32x32xf32>, vector<32x32xf32>, vector<32x32xf32> -> vector<32x32xf32>
    %700 = vector.extract_strided_slice %698 {offsets = [0, 0], sizes = [16, 32], strides = [1, 1]} : vector<32x32xf32> to vector<16x32xf32>
    %701 = vector.extract_strided_slice %699 {offsets = [0, 0], sizes = [16, 32], strides = [1, 1]} : vector<32x32xf32> to vector<16x32xf32>
    %702 = vector.extract_strided_slice %698 {offsets = [16, 0], sizes = [16, 32], strides = [1, 1]} : vector<32x32xf32> to vector<16x32xf32>
    %703 = vector.extract_strided_slice %699 {offsets = [16, 0], sizes = [16, 32], strides = [1, 1]} : vector<32x32xf32> to vector<16x32xf32>
    %704 = tpu.concatenate %700, %701, %702, %703 in 1 : vector<16x32xf32>, vector<16x32xf32>, vector<16x32xf32>, vector<16x32xf32> -> vector<16x128xf32>
    %705 = vector.extract_strided_slice %688 {offsets = [0, 64], sizes = [16, 32], strides = [1, 1]} : vector<16x96xf32> to vector<16x32xf32>
    %cst_309 = arith.constant dense<0.000000e+00> : vector<16x32xf32>
    %706 = tpu.matmul %704, %48, %cst_309 {dimension_numbers = #tpu.dot_dimension_numbers<[1], [0], [0], [1], [0, 0, 1, 1], [], []>} : vector<16x128xf32>, vector<128x32xf32>, vector<16x32xf32> -> vector<16x32xf32>
    %707 = arith.addf %705, %706 : vector<16x32xf32>
    %708 = math.tanh %707 : vector<16x32xf32>
    %709 = arith.mulf %696, %618 : vector<16x32xf32>
    %cst_310 = arith.constant 1.000000e+00 : f32
    %710 = vector.broadcast %cst_310 : f32 to vector<16x32xf32>
    %711 = arith.subf %710, %696 : vector<16x32xf32>
    %712 = arith.mulf %711, %708 : vector<16x32xf32>
    %713 = arith.addf %709, %712 : vector<16x32xf32>
    %c7_i32_311 = arith.constant 7 : i32
    %c2_i32_312 = arith.constant 2 : i32
    %714 = arith.muli %c2_i32_312, %c7_i32_311 : i32
    %c7_i32_313 = arith.constant 7 : i32
    %715 = arith.subi %c7_i32_313, %714 : i32
    %716 = arith.muli %arg1, %715 : i32
    %717 = arith.addi %c7_i32_311, %716 : i32
    %c0_314 = arith.constant 0 : index
    %718 = arith.index_cast %717 : i32 to index
    %c0_315 = arith.constant 0 : index
    %c0_316 = arith.constant 0 : index
    %719 = vector.load %arg2[%c0_314, %718, %c0_315, %c0_316] : memref<1x8x16x4xf32, #tpu.memory_space<vmem>>, vector<1x1x16x4xf32>
    %720 = vector.shape_cast %719 : vector<1x1x16x4xf32> to vector<16x4xf32>
    %c0_317 = arith.constant 0 : index
    %721 = arith.index_cast %717 : i32 to index
    %c0_318 = arith.constant 0 : index
    %c0_319 = arith.constant 0 : index
    %722 = vector.load %arg3[%c0_317, %721, %c0_318, %c0_319] : memref<1x8x16x4xf32, #tpu.memory_space<vmem>>, vector<1x1x16x4xf32>
    %723 = vector.shape_cast %722 : vector<1x1x16x4xf32> to vector<16x4xf32>
    %cst_320 = arith.constant dense<0.000000e+00> : vector<16x4xf32>
    %724 = tpu.matmul %713, %9, %cst_320 {dimension_numbers = #tpu.dot_dimension_numbers<[1], [0], [0], [1], [0, 0, 1, 1], [], []>} : vector<16x32xf32>, vector<32x4xf32>, vector<16x4xf32> -> vector<16x4xf32>
    %725 = vector.broadcast %12 : vector<1x4xf32> to vector<16x4xf32>
    %726 = arith.addf %724, %725 : vector<16x4xf32>
    %727 = arith.mulf %723, %720 : vector<16x4xf32>
    %cst_321 = arith.constant 1.000000e+00 : f32
    %728 = vector.broadcast %cst_321 : f32 to vector<16x4xf32>
    %729 = arith.subf %728, %723 : vector<16x4xf32>
    %730 = arith.mulf %729, %726 : vector<16x4xf32>
    %731 = arith.addf %727, %730 : vector<16x4xf32>
    %cst_322 = arith.constant dense<0.000000e+00> : vector<16x32xf32>
    %732 = tpu.matmul %731, %15, %cst_322 {dimension_numbers = #tpu.dot_dimension_numbers<[1], [0], [0], [1], [0, 0, 1, 1], [], []>} : vector<16x4xf32>, vector<4x32xf32>, vector<16x32xf32> -> vector<16x32xf32>
    %cst_323 = arith.constant dense<0.000000e+00> : vector<16x32xf32>
    %733 = tpu.matmul %713, %18, %cst_323 {dimension_numbers = #tpu.dot_dimension_numbers<[1], [0], [0], [1], [0, 0, 1, 1], [], []>} : vector<16x32xf32>, vector<32x32xf32>, vector<16x32xf32> -> vector<16x32xf32>
    %734 = arith.addf %732, %733 : vector<16x32xf32>
    %c0_324 = arith.constant 0 : index
    %c0_325 = arith.constant 0 : index
    %735 = arith.index_cast %717 : i32 to index
    %c0_326 = arith.constant 0 : index
    %c0_327 = arith.constant 0 : index
    %736 = vector.load %arg6[%c0_324, %c0_325, %735, %c0_326, %c0_327] : memref<1x1x8x16x32xf32, #tpu.memory_space<vmem>>, vector<1x1x1x16x32xf32>
    %737 = vector.shape_cast %736 : vector<1x1x1x16x32xf32> to vector<16x32xf32>
    %738 = arith.addf %734, %737 : vector<16x32xf32>
    %cst_328 = arith.constant dense<0.000000e+00> : vector<32x32xf32>
    %739 = tpu.matmul %2, %738, %cst_328 {dimension_numbers = #tpu.dot_dimension_numbers<[1], [0], [0], [1], [0, 0, 1, 1], [], []>} : vector<32x16xf32>, vector<16x32xf32>, vector<32x32xf32> -> vector<32x32xf32>
    %740 = vector.extract_strided_slice %739 {offsets = [0, 0], sizes = [16, 32], strides = [1, 1]} : vector<32x32xf32> to vector<16x32xf32>
    %741 = vector.extract_strided_slice %739 {offsets = [16, 0], sizes = [16, 32], strides = [1, 1]} : vector<32x32xf32> to vector<16x32xf32>
    %742 = tpu.concatenate %740, %741 in 1 : vector<16x32xf32>, vector<16x32xf32> -> vector<16x64xf32>
    %cst_329 = arith.constant dense<0.000000e+00> : vector<16x32xf32>
    %743 = tpu.matmul %742, %21, %cst_329 {dimension_numbers = #tpu.dot_dimension_numbers<[1], [0], [0], [1], [0, 0, 1, 1], [], []>} : vector<16x64xf32>, vector<64x32xf32>, vector<16x32xf32> -> vector<16x32xf32>
    %744 = vector.broadcast %24 : vector<1x32xf32> to vector<16x32xf32>
    %745 = arith.addf %743, %744 : vector<16x32xf32>
    %cst_330 = arith.constant dense<0.000000e+00> : vector<16x32xf32>
    %746 = tpu.matmul %745, %27, %cst_330 {dimension_numbers = #tpu.dot_dimension_numbers<[1], [0], [0], [1], [0, 0, 1, 1], [], []>} : vector<16x32xf32>, vector<32x32xf32>, vector<16x32xf32> -> vector<16x32xf32>
    %cst_331 = arith.constant dense<0.000000e+00> : vector<16x32xf32>
    %747 = tpu.matmul %713, %30, %cst_331 {dimension_numbers = #tpu.dot_dimension_numbers<[1], [0], [0], [1], [0, 0, 1, 1], [], []>} : vector<16x32xf32>, vector<32x32xf32>, vector<16x32xf32> -> vector<16x32xf32>
    %748 = arith.addf %746, %747 : vector<16x32xf32>
    %749 = vector.broadcast %33 : vector<1x32xf32> to vector<16x32xf32>
    %750 = arith.addf %748, %749 : vector<16x32xf32>
    %cst_332 = arith.constant 0.000000e+00 : f32
    %751 = vector.broadcast %cst_332 : f32 to vector<16x32xf32>
    %752 = arith.cmpf oge, %750, %751 : vector<16x32xf32>
    %753 = vector.broadcast %1 : f32 to vector<16x32xf32>
    %754 = arith.mulf %753, %750 : vector<16x32xf32>
    %755 = arith.select %752, %750, %754 : vector<16x32xi1>, vector<16x32xf32>
    %cst_333 = arith.constant dense<0.000000e+00> : vector<16x4xf32>
    %756 = tpu.matmul %755, %36, %cst_333 {dimension_numbers = #tpu.dot_dimension_numbers<[1], [0], [0], [1], [0, 0, 1, 1], [], []>} : vector<16x32xf32>, vector<32x4xf32>, vector<16x4xf32> -> vector<16x4xf32>
    %cst_334 = arith.constant dense<0.000000e+00> : vector<16x4xf32>
    %757 = tpu.matmul %713, %39, %cst_334 {dimension_numbers = #tpu.dot_dimension_numbers<[1], [0], [0], [1], [0, 0, 1, 1], [], []>} : vector<16x32xf32>, vector<32x4xf32>, vector<16x4xf32> -> vector<16x4xf32>
    %758 = arith.addf %756, %757 : vector<16x4xf32>
    %759 = vector.broadcast %42 : vector<1x4xf32> to vector<16x4xf32>
    %760 = arith.addf %758, %759 : vector<16x4xf32>
    %761 = tpu.concatenate %755, %713 in 1 : vector<16x32xf32>, vector<16x32xf32> -> vector<16x64xf32>
    %c0_335 = arith.constant 0 : index
    %c0_336 = arith.constant 0 : index
    %762 = arith.index_cast %c7_i32_311 : i32 to index
    %c0_337 = arith.constant 0 : index
    %c0_338 = arith.constant 0 : index
    %763 = vector.load %arg24[%c0_335, %c0_336, %762, %c0_337, %c0_338] : memref<1x1x8x16x64xf32, #tpu.memory_space<vmem>>, vector<1x1x1x16x64xf32>
    %764 = vector.shape_cast %763 : vector<1x1x1x16x64xf32> to vector<16x64xf32>
    %765 = vector.shape_cast %761 : vector<16x64xf32> to vector<1x1x1x16x64xf32>
    tpu.vector_store %arg24[%c0_335, %c0_336, %762, %c0_337, %c0_338], %765 {strides = array<i32>} : memref<1x1x8x16x64xf32, #tpu.memory_space<vmem>>, vector<1x1x1x16x64xf32>,
    %766 = arith.mulf %723, %731 : vector<16x4xf32>
    %cst_339 = arith.constant 1.000000e+00 : f32
    %767 = vector.broadcast %cst_339 : f32 to vector<16x4xf32>
    %768 = arith.subf %767, %723 : vector<16x4xf32>
    %769 = arith.mulf %768, %760 : vector<16x4xf32>
    %770 = arith.addf %766, %769 : vector<16x4xf32>
    %771 = tpu.concatenate %770, %713 in 1 : vector<16x4xf32>, vector<16x32xf32> -> vector<16x36xf32>
    %cst_340 = arith.constant dense<0.000000e+00> : vector<32x36xf32>
    %772 = tpu.matmul %2, %771, %cst_340 {dimension_numbers = #tpu.dot_dimension_numbers<[1], [0], [0], [1], [0, 0, 1, 1], [], []>} : vector<32x16xf32>, vector<16x36xf32>, vector<32x36xf32> -> vector<32x36xf32>
    %cst_341 = arith.constant dense<0.000000e+00> : vector<32x36xf32>
    %773 = tpu.matmul %3, %772, %cst_341 {dimension_numbers = #tpu.dot_dimension_numbers<[1], [0], [0], [1], [0, 0, 1, 1], [], []>} : vector<32x32xf32>, vector<32x36xf32>, vector<32x36xf32> -> vector<32x36xf32>
    %774 = vector.extract_strided_slice %772 {offsets = [0, 0], sizes = [16, 36], strides = [1, 1]} : vector<32x36xf32> to vector<16x36xf32>
    %775 = vector.extract_strided_slice %773 {offsets = [0, 0], sizes = [16, 36], strides = [1, 1]} : vector<32x36xf32> to vector<16x36xf32>
    %776 = vector.extract_strided_slice %772 {offsets = [16, 0], sizes = [16, 36], strides = [1, 1]} : vector<32x36xf32> to vector<16x36xf32>
    %777 = vector.extract_strided_slice %773 {offsets = [16, 0], sizes = [16, 36], strides = [1, 1]} : vector<32x36xf32> to vector<16x36xf32>
    %778 = tpu.concatenate %774, %775, %776, %777 in 1 : vector<16x36xf32>, vector<16x36xf32>, vector<16x36xf32>, vector<16x36xf32> -> vector<16x144xf32>
    %cst_342 = arith.constant dense<0.000000e+00> : vector<16x96xf32>
    %779 = tpu.matmul %778, %45, %cst_342 {dimension_numbers = #tpu.dot_dimension_numbers<[1], [0], [0], [1], [0, 0, 1, 1], [], []>} : vector<16x144xf32>, vector<144x96xf32>, vector<16x96xf32> -> vector<16x96xf32>
    %c0_343 = arith.constant 0 : index
    %c0_344 = arith.constant 0 : index
    %780 = arith.index_cast %717 : i32 to index
    %c0_345 = arith.constant 0 : index
    %c0_346 = arith.constant 0 : index
    %781 = vector.load %arg7[%c0_343, %c0_344, %780, %c0_345, %c0_346] : memref<1x1x8x16x96xf32, #tpu.memory_space<vmem>>, vector<1x1x1x16x96xf32>
    %782 = vector.shape_cast %781 : vector<1x1x1x16x96xf32> to vector<16x96xf32>
    %783 = arith.addf %779, %782 : vector<16x96xf32>
    %784 = vector.extract_strided_slice %783 {offsets = [0, 0], sizes = [16, 64], strides = [1, 1]} : vector<16x96xf32> to vector<16x64xf32>
    %785 = arith.negf %784 : vector<16x64xf32>
    %786 = math.exp %785 : vector<16x64xf32>
    %cst_347 = arith.constant 1.000000e+00 : f32
    %787 = vector.broadcast %cst_347 : f32 to vector<16x64xf32>
    %788 = arith.addf %787, %786 : vector<16x64xf32>
    %789 = arith.divf %787, %788 : vector<16x64xf32>
    %790 = vector.extract_strided_slice %789 {offsets = [0, 0], sizes = [16, 32], strides = [1, 1]} : vector<16x64xf32> to vector<16x32xf32>
    %791 = vector.extract_strided_slice %789 {offsets = [0, 32], sizes = [16, 32], strides = [1, 1]} : vector<16x64xf32> to vector<16x32xf32>
    %792 = arith.mulf %790, %713 : vector<16x32xf32>
    %cst_348 = arith.constant dense<0.000000e+00> : vector<32x32xf32>
    %793 = tpu.matmul %2, %792, %cst_348 {dimension_numbers = #tpu.dot_dimension_numbers<[1], [0], [0], [1], [0, 0, 1, 1], [], []>} : vector<32x16xf32>, vector<16x32xf32>, vector<32x32xf32> -> vector<32x32xf32>
    %cst_349 = arith.constant dense<0.000000e+00> : vector<32x32xf32>
    %794 = tpu.matmul %3, %793, %cst_349 {dimension_numbers = #tpu.dot_dimension_numbers<[1], [0], [0], [1], [0, 0, 1, 1], [], []>} : vector<32x32xf32>, vector<32x32xf32>, vector<32x32xf32> -> vector<32x32xf32>
    %795 = vector.extract_strided_slice %793 {offsets = [0, 0], sizes = [16, 32], strides = [1, 1]} : vector<32x32xf32> to vector<16x32xf32>
    %796 = vector.extract_strided_slice %794 {offsets = [0, 0], sizes = [16, 32], strides = [1, 1]} : vector<32x32xf32> to vector<16x32xf32>
    %797 = vector.extract_strided_slice %793 {offsets = [16, 0], sizes = [16, 32], strides = [1, 1]} : vector<32x32xf32> to vector<16x32xf32>
    %798 = vector.extract_strided_slice %794 {offsets = [16, 0], sizes = [16, 32], strides = [1, 1]} : vector<32x32xf32> to vector<16x32xf32>
    %799 = tpu.concatenate %795, %796, %797, %798 in 1 : vector<16x32xf32>, vector<16x32xf32>, vector<16x32xf32>, vector<16x32xf32> -> vector<16x128xf32>
    %800 = vector.extract_strided_slice %783 {offsets = [0, 64], sizes = [16, 32], strides = [1, 1]} : vector<16x96xf32> to vector<16x32xf32>
    %cst_350 = arith.constant dense<0.000000e+00> : vector<16x32xf32>
    %801 = tpu.matmul %799, %48, %cst_350 {dimension_numbers = #tpu.dot_dimension_numbers<[1], [0], [0], [1], [0, 0, 1, 1], [], []>} : vector<16x128xf32>, vector<128x32xf32>, vector<16x32xf32> -> vector<16x32xf32>
    %802 = arith.addf %800, %801 : vector<16x32xf32>
    %803 = math.tanh %802 : vector<16x32xf32>
    %804 = arith.mulf %791, %713 : vector<16x32xf32>
    %cst_351 = arith.constant 1.000000e+00 : f32
    %805 = vector.broadcast %cst_351 : f32 to vector<16x32xf32>
    %806 = arith.subf %805, %791 : vector<16x32xf32>
    %807 = arith.mulf %806, %803 : vector<16x32xf32>
    %808 = arith.addf %804, %807 : vector<16x32xf32>
    %c8_i32 = arith.constant 8 : i32
    return
  }
  func.func @transform_0(%arg0: i32, %arg1: i32) -> (i32, i32, i32, i32) {
    %c0_i32 = arith.constant 0 : i32
    %c0_i32_0 = arith.constant 0 : i32
    %c0_i32_1 = arith.constant 0 : i32
    %c0_i32_2 = arith.constant 0 : i32
    return %arg0, %c0_i32, %c0_i32_0, %c0_i32_1 : i32, i32, i32, i32
  }
  func.func @transform_1(%arg0: i32, %arg1: i32) -> (i32, i32, i32, i32) {
    %c0_i32 = arith.constant 0 : i32
    %c0_i32_0 = arith.constant 0 : i32
    %c0_i32_1 = arith.constant 0 : i32
    %c0_i32_2 = arith.constant 0 : i32
    return %arg0, %c0_i32, %c0_i32_0, %c0_i32_1 : i32, i32, i32, i32
  }
  func.func @transform_2(%arg0: i32, %arg1: i32) -> (i32, i32) {
    %c0_i32 = arith.constant 0 : i32
    %c0_i32_0 = arith.constant 0 : i32
    %c0_i32_1 = arith.constant 0 : i32
    return %c0_i32, %c0_i32_0 : i32, i32
  }
  func.func @transform_3(%arg0: i32, %arg1: i32) -> (i32, i32) {
    %c0_i32 = arith.constant 0 : i32
    %c0_i32_0 = arith.constant 0 : i32
    %c0_i32_1 = arith.constant 0 : i32
    return %c0_i32, %c0_i32_0 : i32, i32
  }
  func.func @transform_4(%arg0: i32, %arg1: i32) -> (i32, i32, i32, i32, i32) {
    %c0_i32 = arith.constant 0 : i32
    %c0_i32_0 = arith.constant 0 : i32
    %c0_i32_1 = arith.constant 0 : i32
    %c0_i32_2 = arith.constant 0 : i32
    return %arg1, %arg0, %c0_i32, %c0_i32_0, %c0_i32_1 : i32, i32, i32, i32, i32
  }
  func.func @transform_5(%arg0: i32, %arg1: i32) -> (i32, i32, i32, i32, i32) {
    %c0_i32 = arith.constant 0 : i32
    %c0_i32_0 = arith.constant 0 : i32
    %c0_i32_1 = arith.constant 0 : i32
    %c0_i32_2 = arith.constant 0 : i32
    return %arg1, %arg0, %c0_i32, %c0_i32_0, %c0_i32_1 : i32, i32, i32, i32, i32
  }
  func.func @transform_6(%arg0: i32, %arg1: i32) -> (i32, i32, i32) {
    %c0_i32 = arith.constant 0 : i32
    %c0_i32_0 = arith.constant 0 : i32
    %c0_i32_1 = arith.constant 0 : i32
    %c0_i32_2 = arith.constant 0 : i32
    return %c0_i32, %c0_i32_0, %c0_i32_1 : i32, i32, i32
  }
  func.func @transform_7(%arg0: i32, %arg1: i32) -> (i32, i32, i32) {
    %c0_i32 = arith.constant 0 : i32
    %c0_i32_0 = arith.constant 0 : i32
    %c0_i32_1 = arith.constant 0 : i32
    %c0_i32_2 = arith.constant 0 : i32
    return %c0_i32, %c0_i32_0, %c0_i32_1 : i32, i32, i32
  }
  func.func @transform_8(%arg0: i32, %arg1: i32) -> (i32, i32, i32) {
    %c0_i32 = arith.constant 0 : i32
    %c0_i32_0 = arith.constant 0 : i32
    %c0_i32_1 = arith.constant 0 : i32
    %c0_i32_2 = arith.constant 0 : i32
    return %c0_i32, %c0_i32_0, %c0_i32_1 : i32, i32, i32
  }
  func.func @transform_9(%arg0: i32, %arg1: i32) -> (i32, i32, i32) {
    %c0_i32 = arith.constant 0 : i32
    %c0_i32_0 = arith.constant 0 : i32
    %c0_i32_1 = arith.constant 0 : i32
    %c0_i32_2 = arith.constant 0 : i32
    return %c0_i32, %c0_i32_0, %c0_i32_1 : i32, i32, i32
  }
  func.func @transform_10(%arg0: i32, %arg1: i32) -> (i32, i32, i32) {
    %c0_i32 = arith.constant 0 : i32
    %c0_i32_0 = arith.constant 0 : i32
    %c0_i32_1 = arith.constant 0 : i32
    %c0_i32_2 = arith.constant 0 : i32
    return %c0_i32, %c0_i32_0, %c0_i32_1 : i32, i32, i32
  }
  func.func @transform_11(%arg0: i32, %arg1: i32) -> (i32, i32, i32) {
    %c0_i32 = arith.constant 0 : i32
    %c0_i32_0 = arith.constant 0 : i32
    %c0_i32_1 = arith.constant 0 : i32
    %c0_i32_2 = arith.constant 0 : i32
    return %c0_i32, %c0_i32_0, %c0_i32_1 : i32, i32, i32
  }
  func.func @transform_12(%arg0: i32, %arg1: i32) -> (i32, i32, i32) {
    %c0_i32 = arith.constant 0 : i32
    %c0_i32_0 = arith.constant 0 : i32
    %c0_i32_1 = arith.constant 0 : i32
    %c0_i32_2 = arith.constant 0 : i32
    return %c0_i32, %c0_i32_0, %c0_i32_1 : i32, i32, i32
  }
  func.func @transform_13(%arg0: i32, %arg1: i32) -> (i32, i32, i32) {
    %c0_i32 = arith.constant 0 : i32
    %c0_i32_0 = arith.constant 0 : i32
    %c0_i32_1 = arith.constant 0 : i32
    %c0_i32_2 = arith.constant 0 : i32
    return %c0_i32, %c0_i32_0, %c0_i32_1 : i32, i32, i32
  }
  func.func @transform_14(%arg0: i32, %arg1: i32) -> (i32, i32, i32) {
    %c0_i32 = arith.constant 0 : i32
    %c0_i32_0 = arith.constant 0 : i32
    %c0_i32_1 = arith.constant 0 : i32
    %c0_i32_2 = arith.constant 0 : i32
    return %c0_i32, %c0_i32_0, %c0_i32_1 : i32, i32, i32
  }
  func.func @transform_15(%arg0: i32, %arg1: i32) -> (i32, i32, i32) {
    %c0_i32 = arith.constant 0 : i32
    %c0_i32_0 = arith.constant 0 : i32
    %c0_i32_1 = arith.constant 0 : i32
    %c0_i32_2 = arith.constant 0 : i32
    return %c0_i32, %c0_i32_0, %c0_i32_1 : i32, i32, i32
  }
  func.func @transform_16(%arg0: i32, %arg1: i32) -> (i32, i32, i32) {
    %c0_i32 = arith.constant 0 : i32
    %c0_i32_0 = arith.constant 0 : i32
    %c0_i32_1 = arith.constant 0 : i32
    %c0_i32_2 = arith.constant 0 : i32
    return %c0_i32, %c0_i32_0, %c0_i32_1 : i32, i32, i32
  }
  func.func @transform_17(%arg0: i32, %arg1: i32) -> (i32, i32, i32) {
    %c0_i32 = arith.constant 0 : i32
    %c0_i32_0 = arith.constant 0 : i32
    %c0_i32_1 = arith.constant 0 : i32
    %c0_i32_2 = arith.constant 0 : i32
    return %c0_i32, %c0_i32_0, %c0_i32_1 : i32, i32, i32
  }
  func.func @transform_18(%arg0: i32, %arg1: i32) -> (i32, i32, i32) {
    %c0_i32 = arith.constant 0 : i32
    %c0_i32_0 = arith.constant 0 : i32
    %c0_i32_1 = arith.constant 0 : i32
    %c0_i32_2 = arith.constant 0 : i32
    return %c0_i32, %c0_i32_0, %c0_i32_1 : i32, i32, i32
  }
  func.func @transform_19(%arg0: i32, %arg1: i32) -> (i32, i32, i32) {
    %c0_i32 = arith.constant 0 : i32
    %c0_i32_0 = arith.constant 0 : i32
    %c0_i32_1 = arith.constant 0 : i32
    %c0_i32_2 = arith.constant 0 : i32
    return %c0_i32, %c0_i32_0, %c0_i32_1 : i32, i32, i32
  }
  func.func @transform_20(%arg0: i32, %arg1: i32) -> (i32, i32, i32) {
    %c0_i32 = arith.constant 0 : i32
    %c0_i32_0 = arith.constant 0 : i32
    %c0_i32_1 = arith.constant 0 : i32
    %c0_i32_2 = arith.constant 0 : i32
    return %c0_i32, %c0_i32_0, %c0_i32_1 : i32, i32, i32
  }
  func.func @transform_21(%arg0: i32, %arg1: i32) -> i32 {
    %c0_i32 = arith.constant 0 : i32
    %c0_i32_0 = arith.constant 0 : i32
    return %c0_i32 : i32
  }
  func.func @transform_22(%arg0: i32, %arg1: i32) -> (i32, i32, i32, i32, i32) {
    %c0_i32 = arith.constant 0 : i32
    %c0_i32_0 = arith.constant 0 : i32
    %c0_i32_1 = arith.constant 0 : i32
    %c0_i32_2 = arith.constant 0 : i32
    return %arg1, %arg0, %c0_i32, %c0_i32_0, %c0_i32_1 : i32, i32, i32, i32, i32
  }
}

module attributes {stable_mosaic.version = 11 : i64} {
  func.func @merge_kernel(%arg0: i32, %arg1: memref<256x64xf32, #tpu.memory_space<vmem>>, %arg2: memref<256x64xf32, #tpu.memory_space<vmem>>, %arg3: memref<256x4xf32, #tpu.memory_space<vmem>>, %arg4: memref<256x32xf32, #tpu.memory_space<vmem>>, %arg5: memref<64x32xf32, #tpu.memory_space<vmem>>, %arg6: memref<64x32xf32, #tpu.memory_space<vmem>>, %arg7: memref<4x32xf32, #tpu.memory_space<vmem>>, %arg8: memref<32x4xf32, #tpu.memory_space<vmem>>, %arg9: memref<1x4xf32, #tpu.memory_space<vmem>>, %arg10: memref<256x4xf32, #tpu.memory_space<vmem>>) attributes {dimension_semantics = [#tpu.dimension_semantics<parallel>], iteration_bounds = array<i64: 1>, scalar_prefetch = 0 : i64, scratch_operands = 0 : i64, tpu.core_type = #tpu.core_type<tc>, window_params = [{transform_indices = @transform_0, window_bounds = array<i64: 256, 64>}, {transform_indices = @transform_1, window_bounds = array<i64: 256, 64>}, {transform_indices = @transform_2, window_bounds = array<i64: 256, 4>}, {pipeline_mode = #tpu.pipeline_mode<synchronous>, transform_indices = @transform_3, window_bounds = array<i64: 256, 32>}, {pipeline_mode = #tpu.pipeline_mode<synchronous>, transform_indices = @transform_4, window_bounds = array<i64: 64, 32>}, {pipeline_mode = #tpu.pipeline_mode<synchronous>, transform_indices = @transform_5, window_bounds = array<i64: 64, 32>}, {pipeline_mode = #tpu.pipeline_mode<synchronous>, transform_indices = @transform_6, window_bounds = array<i64: 4, 32>}, {pipeline_mode = #tpu.pipeline_mode<synchronous>, transform_indices = @transform_7, window_bounds = array<i64: 32, 4>}, {pipeline_mode = #tpu.pipeline_mode<synchronous>, transform_indices = @transform_8, window_bounds = array<i64: 1, 4>}, {transform_indices = @transform_9, window_bounds = array<i64: 256, 4>}]} {
    %c0 = arith.constant 0 : index
    %c0_0 = arith.constant 0 : index
    %0 = vector.load %arg1[%c0, %c0_0] : memref<256x64xf32, #tpu.memory_space<vmem>>, vector<256x64xf32>
    %c0_1 = arith.constant 0 : index
    %c0_2 = arith.constant 0 : index
    %1 = vector.load %arg5[%c0_1, %c0_2] : memref<64x32xf32, #tpu.memory_space<vmem>>, vector<64x32xf32>
    %cst = arith.constant dense<0.000000e+00> : vector<256x32xf32>
    %2 = tpu.matmul %0, %1, %cst {dimension_numbers = #tpu.dot_dimension_numbers<[1], [0], [0], [1], [0, 0, 1, 1], [], []>} : vector<256x64xf32>, vector<64x32xf32>, vector<256x32xf32> -> vector<256x32xf32>
    %c0_3 = arith.constant 0 : index
    %c0_4 = arith.constant 0 : index
    %3 = vector.load %arg2[%c0_3, %c0_4] : memref<256x64xf32, #tpu.memory_space<vmem>>, vector<256x64xf32>
    %c0_5 = arith.constant 0 : index
    %c0_6 = arith.constant 0 : index
    %4 = vector.load %arg6[%c0_5, %c0_6] : memref<64x32xf32, #tpu.memory_space<vmem>>, vector<64x32xf32>
    %cst_7 = arith.constant dense<0.000000e+00> : vector<256x32xf32>
    %5 = tpu.matmul %3, %4, %cst_7 {dimension_numbers = #tpu.dot_dimension_numbers<[1], [0], [0], [1], [0, 0, 1, 1], [], []>} : vector<256x64xf32>, vector<64x32xf32>, vector<256x32xf32> -> vector<256x32xf32>
    %6 = arith.addf %2, %5 : vector<256x32xf32>
    %c0_8 = arith.constant 0 : index
    %c0_9 = arith.constant 0 : index
    %7 = vector.load %arg3[%c0_8, %c0_9] : memref<256x4xf32, #tpu.memory_space<vmem>>, vector<256x4xf32>
    %c0_10 = arith.constant 0 : index
    %c0_11 = arith.constant 0 : index
    %8 = vector.load %arg7[%c0_10, %c0_11] : memref<4x32xf32, #tpu.memory_space<vmem>>, vector<4x32xf32>
    %cst_12 = arith.constant dense<0.000000e+00> : vector<256x32xf32>
    %9 = tpu.matmul %7, %8, %cst_12 {dimension_numbers = #tpu.dot_dimension_numbers<[1], [0], [0], [1], [0, 0, 1, 1], [], []>} : vector<256x4xf32>, vector<4x32xf32>, vector<256x32xf32> -> vector<256x32xf32>
    %10 = arith.addf %6, %9 : vector<256x32xf32>
    %c0_13 = arith.constant 0 : index
    %c0_14 = arith.constant 0 : index
    %11 = vector.load %arg4[%c0_13, %c0_14] : memref<256x32xf32, #tpu.memory_space<vmem>>, vector<256x32xf32>
    %12 = arith.addf %10, %11 : vector<256x32xf32>
    %cst_15 = arith.constant 0.000000e+00 : f32
    %13 = vector.broadcast %cst_15 : f32 to vector<256x32xf32>
    %14 = arith.maximumf %12, %13 : vector<256x32xf32>
    %c0_16 = arith.constant 0 : index
    %c0_17 = arith.constant 0 : index
    %15 = vector.load %arg8[%c0_16, %c0_17] : memref<32x4xf32, #tpu.memory_space<vmem>>, vector<32x4xf32>
    %cst_18 = arith.constant dense<0.000000e+00> : vector<256x4xf32>
    %16 = tpu.matmul %14, %15, %cst_18 {dimension_numbers = #tpu.dot_dimension_numbers<[1], [0], [0], [1], [0, 0, 1, 1], [], []>} : vector<256x32xf32>, vector<32x4xf32>, vector<256x4xf32> -> vector<256x4xf32>
    %c0_19 = arith.constant 0 : index
    %c0_20 = arith.constant 0 : index
    %17 = vector.load %arg9[%c0_19, %c0_20] : memref<1x4xf32, #tpu.memory_space<vmem>>, vector<1x4xf32>
    %18 = vector.broadcast %17 : vector<1x4xf32> to vector<256x4xf32>
    %19 = arith.addf %16, %18 : vector<256x4xf32>
    %c0_21 = arith.constant 0 : index
    %c0_22 = arith.constant 0 : index
    %20 = vector.load %arg10[%c0_21, %c0_22] : memref<256x4xf32, #tpu.memory_space<vmem>>, vector<256x4xf32>
    tpu.vector_store %arg10[%c0_21, %c0_22], %19 {strides = array<i32>} : memref<256x4xf32, #tpu.memory_space<vmem>>, vector<256x4xf32>,
    return
  }
  func.func @transform_0(%arg0: i32) -> (i32, i32) {
    %c0_i32 = arith.constant 0 : i32
    %c0_i32_0 = arith.constant 0 : i32
    return %arg0, %c0_i32 : i32, i32
  }
  func.func @transform_1(%arg0: i32) -> (i32, i32) {
    %c0_i32 = arith.constant 0 : i32
    %c0_i32_0 = arith.constant 0 : i32
    return %arg0, %c0_i32 : i32, i32
  }
  func.func @transform_2(%arg0: i32) -> (i32, i32) {
    %c0_i32 = arith.constant 0 : i32
    %c0_i32_0 = arith.constant 0 : i32
    return %arg0, %c0_i32 : i32, i32
  }
  func.func @transform_3(%arg0: i32) -> (i32, i32) {
    %c0_i32 = arith.constant 0 : i32
    %c0_i32_0 = arith.constant 0 : i32
    %c0_i32_1 = arith.constant 0 : i32
    return %c0_i32, %c0_i32_0 : i32, i32
  }
  func.func @transform_4(%arg0: i32) -> (i32, i32) {
    %c0_i32 = arith.constant 0 : i32
    %c0_i32_0 = arith.constant 0 : i32
    %c0_i32_1 = arith.constant 0 : i32
    return %c0_i32, %c0_i32_0 : i32, i32
  }
  func.func @transform_5(%arg0: i32) -> (i32, i32) {
    %c0_i32 = arith.constant 0 : i32
    %c0_i32_0 = arith.constant 0 : i32
    %c0_i32_1 = arith.constant 0 : i32
    return %c0_i32, %c0_i32_0 : i32, i32
  }
  func.func @transform_6(%arg0: i32) -> (i32, i32) {
    %c0_i32 = arith.constant 0 : i32
    %c0_i32_0 = arith.constant 0 : i32
    %c0_i32_1 = arith.constant 0 : i32
    return %c0_i32, %c0_i32_0 : i32, i32
  }
  func.func @transform_7(%arg0: i32) -> (i32, i32) {
    %c0_i32 = arith.constant 0 : i32
    %c0_i32_0 = arith.constant 0 : i32
    %c0_i32_1 = arith.constant 0 : i32
    return %c0_i32, %c0_i32_0 : i32, i32
  }
  func.func @transform_8(%arg0: i32) -> (i32, i32) {
    %c0_i32 = arith.constant 0 : i32
    %c0_i32_0 = arith.constant 0 : i32
    %c0_i32_1 = arith.constant 0 : i32
    return %c0_i32, %c0_i32_0 : i32, i32
  }
  func.func @transform_9(%arg0: i32) -> (i32, i32) {
    %c0_i32 = arith.constant 0 : i32
    %c0_i32_0 = arith.constant 0 : i32
    return %arg0, %c0_i32 : i32, i32
  }
}

</mosaic_0001>

<bundles_post_ra>
// kernel: grinet_forward.3
= control target key start
LH: loop header
LB: loop body
LE: loop exit
PB: predicated region body
PF: predicated region fallthrough
CT: control target
= control target key end

     0   :  { %vm661_vm0 = vcmask 1043456   ;;  %vm564_vm1 = vcmask 31744   ;;  %vm112_vm2 = vcmask 523264   ;;  %vm914_vm3 = vcmask 261120   ;;  %s2080_s5 = inlined_call_operand.vmem [shape: f32[64,32], index: 5, kind: input, shape index: {}]   ;;  %s2081_s4 = inlined_call_operand.vmem [shape: f32[64,32], index: 4, kind: input, shape index: {}]   ;;  %s2082_s6 = inlined_call_operand.vmem [shape: f32[4,32], index: 6, kind: input, shape index: {}]   ;;  %s2083_s2 = inlined_call_operand.vmem [shape: f32[256,4], index: 2, kind: input, shape index: {}]   ;;  %s2084_s1 = inlined_call_operand.vmem [shape: f32[256,64], index: 1, kind: input, shape index: {}]   ;;  %s2085_s0 = inlined_call_operand.vmem [shape: f32[256,64], index: 0, kind: input, shape index: {}]   ;;  %s2086_s7 = inlined_call_operand.vmem [shape: f32[32,4], index: 7, kind: input, shape index: {}]   ;;  %s2087_s3 = inlined_call_operand.vmem [shape: f32[256,32], index: 3, kind: input, shape index: {}]   ;;  %s2088_s8 = inlined_call_operand.vmem [shape: f32[1,4], index: 8, kind: input, shape index: {}]   ;;  %s2089_s9 = inlined_call_operand.vmem [shape: f32[256,4], index: 9, kind: output, shape index: {}]  }
   0x1   :  { %v111_v0 = vld [vmem:[%s2080_s5 + $0x38] sm:$0xff]  ;;  %v110_v2 = vld [vmem:[%s2080_s5 + $0x30] sm:$0xff]  ;;  %v109_v4 = vld [vmem:[%s2080_s5 + $0x28] sm:$0xff] }
   0x2   :  { %v71_v1 = vld [vmem:[%s2081_s4 + $0x38] sm:$0xff]  ;;  %217 = vmatpush.msra.mxu0 %v111_v0  ;;  %v70_v3 = vld [vmem:[%s2081_s4 + $0x30] sm:$0xff]  ;;  %v69_v5 = vld [vmem:[%s2081_s4 + $0x28] sm:$0xff] }
   0x3   :  { %426 = vmatpush.msra.mxu1 %v71_v1  ;;  %v108_v6 = vld [vmem:[%s2080_s5 + $0x20] sm:$0xff]  ;;  %v107_v10 = vld [vmem:[%s2080_s5 + $0x18] sm:$0xff]  ;;  %v106_v12 = vld [vmem:[%s2080_s5 + $0x10] sm:$0xff] }
   0x4   :  { %218 = vmatpush.msra.mxu0 %v110_v2  ;;  %v68_v7 = vld [vmem:[%s2081_s4 + $0x20] sm:$0xff]  ;;  %v67_v11 = vld [vmem:[%s2081_s4 + $0x18] sm:$0xff]  ;;  %v66_v13 = vld [vmem:[%s2081_s4 + $0x10] sm:$0xff] }
   0x5   :  { %427 = vmatpush.msra.mxu1 %v70_v3  ;;  %v563_v8 = vld [vmem:[%s2082_s6] sm:$0xf]  ;;  %v105_v14 = vld [vmem:[%s2080_s5 + $0x8] sm:$0xff]  ;;  %v533_v23 = vld [vmem:[%s2083_s2 + $0x10] sm:$0xff] }
   0x6   :  { %219 = vmatpush.msra.mxu0 %v109_v4  ;;  %v531_v9 = vld [vmem:[%s2083_s2] sm:$0xff]  ;;  %1224 = vmatpush.msk.msra.mxu2 %vm661_vm0, %v563_v8  ;;  %v65_v15 = vld [vmem:[%s2081_s4 + $0x8] sm:$0xff]  ;;  %v74_v24 = vld [vmem:[%s2084_s1 + $0x10] sm:$0xff] }
   0x7   :  { %428 = vmatpush.msra.mxu1 %v69_v5  ;;  %1225 = vmatmul.msk.f32.vlgmr.msra.gmra.mxu2 %vm564_vm1, %v531_v9  ;;  %v104_v16 = vld [vmem:[%s2080_s5] sm:$0xff]  ;;  %v532_v20 = vld [vmem:[%s2083_s2 + $0x8] sm:$0xff]  ;;  %v34_v25 = vld [vmem:[%s2085_s0 + $0x10] sm:$0xff] }
   0x8   :  { %220 = vmatpush.msra.mxu0 %v108_v6  ;;  %v64_v17 = vld [vmem:[%s2081_s4] sm:$0xff]  ;;  %v73_v21 = vld [vmem:[%s2084_s1 + $0x8] sm:$0xff]  ;;  %v534_v26 = vld [vmem:[%s2083_s2 + $0x18] sm:$0xff] }
   0x9   :  { %429 = vmatpush.msra.mxu1 %v68_v7  ;;  %v72_v18 = vld [vmem:[%s2084_s1] sm:$0xff]  ;;  %v33_v22 = vld [vmem:[%s2085_s0 + $0x8] sm:$0xff]  ;;  %v75_v27 = vld [vmem:[%s2084_s1 + $0x18] sm:$0xff] }
   0xa   :  { %221 = vmatpush.msra.mxu0 %v107_v10  ;;  %v32_v19 = vld [vmem:[%s2085_s0] sm:$0xff]  ;;  %v35_v28 = vld [vmem:[%s2085_s0 + $0x18] sm:$0xff]  ;;  %v536_v32 = vld [vmem:[%s2083_s2 + $0x28] sm:$0xff] }
   0xb   :  { %430 = vmatpush.msra.mxu1 %v67_v11  ;;  %v535_v29 = vld [vmem:[%s2083_s2 + $0x20] sm:$0xff]  ;;  %v77_v33 = vld [vmem:[%s2084_s1 + $0x28] sm:$0xff]  ;;  %v537_v35 = vld [vmem:[%s2083_s2 + $0x30] sm:$0xff] }
   0xc   :  { %222 = vmatpush.msra.mxu0 %v106_v12  ;;  %v76_v30 = vld [vmem:[%s2084_s1 + $0x20] sm:$0xff]  ;;  %v37_v34 = vld [vmem:[%s2085_s0 + $0x28] sm:$0xff]  ;;  %v78_v36 = vld [vmem:[%s2084_s1 + $0x30] sm:$0xff] }
   0xd   :  { %431 = vmatpush.msra.mxu1 %v66_v13  ;;  %v36_v31 = vld [vmem:[%s2085_s0 + $0x20] sm:$0xff]  ;;  %v38_v37 = vld [vmem:[%s2085_s0 + $0x30] sm:$0xff]  ;;  %v538_v38 = vld [vmem:[%s2083_s2 + $0x38] sm:$0xff] }
   0xe   :  { %223 = vmatpush.msra.mxu0 %v105_v14  ;;  %v79_v39 = vld [vmem:[%s2084_s1 + $0x38] sm:$0xff]  ;;  %v539_v41 = vld [vmem:[%s2083_s2 + $0x40] sm:$0xff]  ;;  %v540_v44 = vld [vmem:[%s2083_s2 + $0x48] sm:$0xff] }
   0xf   :  { %432 = vmatpush.msra.mxu1 %v65_v15  ;;  %1226 = vmatmul.msk.f32.gmra.mxu2 %vm564_vm1, %v532_v20  ;;  %v39_v40 = vld [vmem:[%s2085_s0 + $0x38] sm:$0xff]  ;;  %v80_v42 = vld [vmem:[%s2084_s1 + $0x40] sm:$0xff]  ;;  %v81_v45 = vld [vmem:[%s2084_s1 + $0x48] sm:$0xff] }
  0x10   :  { %224 = vmatpush.msra.mxu0 %v104_v16  ;;  %v40_v43 = vld [vmem:[%s2085_s0 + $0x40] sm:$0xff]  ;;  %v41_v46 = vld [vmem:[%s2085_s0 + $0x48] sm:$0xff]  ;;  %v541_v47 = vld [vmem:[%s2083_s2 + $0x50] sm:$0xff] }
  0x11   :  { %433 = vmatpush.msra.mxu1 %v64_v17  ;;  %1160 = vmatmul.msk.f32.vlgmr.msra.gmra.mxu0 %vm112_vm2, %v72_v18  ;;  %v82_v48 = vld [vmem:[%s2084_s1 + $0x50] sm:$0xff]  ;;  %v542_v50 = vld [vmem:[%s2083_s2 + $0x58] sm:$0xff]  ;;  %v543_v53 = vld [vmem:[%s2083_s2 + $0x60] sm:$0xff] }
  0x12   :  { %1192 = vmatmul.msk.f32.vlgmr.msra.gmra.mxu1 %vm112_vm2, %v32_v19  ;;  %v42_v49 = vld [vmem:[%s2085_s0 + $0x50] sm:$0xff]  ;;  %v83_v51 = vld [vmem:[%s2084_s1 + $0x58] sm:$0xff]  ;;  %v84_v54 = vld [vmem:[%s2084_s1 + $0x60] sm:$0xff] }
  0x13   :  { %v43_v52 = vld [vmem:[%s2085_s0 + $0x58] sm:$0xff]  ;;  %v44_v55 = vld [vmem:[%s2085_s0 + $0x60] sm:$0xff]  ;;  %v544_v56 = vld [vmem:[%s2083_s2 + $0x68] sm:$0xff] }
  0x14   :  { %v909_v57 = vld [vmem:[%s2086_s7 + $0x18] sm:$0xff]  ;;  %v908_v58 = vld [vmem:[%s2086_s7 + $0x10] sm:$0xff]  ;;  %v907_v59 = vld [vmem:[%s2086_s7 + $0x8] sm:$0xff] }
  0x15   :  { %1023 = vmatpush.msra.mxu3 %v909_v57  ;;  %v906_v60 = vld [vmem:[%s2086_s7] sm:$0xff]  ;;  %v85_v61 = vld [vmem:[%s2084_s1 + $0x68] sm:$0xff]  ;;  %v545_v63 = vld [vmem:[%s2083_s2 + $0x70] sm:$0xff] }
  0x16   :  { %v45_v62 = vld [vmem:[%s2085_s0 + $0x68] sm:$0xff]  ;;  %v86_v0 = vld [vmem:[%s2084_s1 + $0x70] sm:$0xff]  ;;  %v546_v2 = vld [vmem:[%s2083_s2 + $0x78] sm:$0xff] }
  0x17   :  { %1227 = vmatmul.msk.f32.gmra.mxu2 %vm564_vm1, %v533_v23  ;;  %1024 = vmatpush.msra.mxu3 %v908_v58  ;;  %v46_v1 = vld [vmem:[%s2085_s0 + $0x70] sm:$0xff]  ;;  %v87_v3 = vld [vmem:[%s2084_s1 + $0x78] sm:$0xff]  ;;  %v547_v5 = vld [vmem:[%s2083_s2 + $0x80] sm:$0xff] }
  0x18   :  { %v47_v4 = vld [vmem:[%s2085_s0 + $0x78] sm:$0xff]  ;;  %v88_v9 = vld [vmem:[%s2084_s1 + $0x80] sm:$0xff]  ;;  %v548_v12 = vld [vmem:[%s2083_s2 + $0x88] sm:$0xff] }
  0x19   :  { %1161 = vmatmul.msk.f32.gmra.mxu0 %vm112_vm2, %v73_v21  ;;  %1025 = vmatpush.msra.mxu3 %v907_v59  ;;  %v48_v10 = vld [vmem:[%s2085_s0 + $0x80] sm:$0xff]  ;;  %v89_v20 = vld [vmem:[%s2084_s1 + $0x88] sm:$0xff]  ;;  %v549_v23 = vld [vmem:[%s2083_s2 + $0x90] sm:$0xff] }
  0x1a   :  { %1193 = vmatmul.msk.f32.gmra.mxu1 %vm112_vm2, %v33_v22  ;;  %v810_v13 = vld [vmem:[%s2087_s3] sm:$0xff]  ;;  %v49_v21 = vld [vmem:[%s2085_s0 + $0x88] sm:$0xff] }
  0x1b   :  { %1026 = vmatpush.msra.mxu3 %v906_v60  ;;  %v814_v57 = vld [vmem:[%s2087_s3 + $0x20] sm:$0xff] }
  0x1f   :  { %1228 = vmatmul.msk.f32.gmra.mxu2 %vm564_vm1, %v534_v26 }
  0x21   :  { %1162 = vmatmul.msk.f32.gmra.mxu0 %vm112_vm2, %v74_v24  ;;  %v811_v24 = vld [vmem:[%s2087_s3 + $0x8] sm:$0xff] }
  0x22   :  { %1194 = vmatmul.msk.f32.gmra.mxu1 %vm112_vm2, %v34_v25 }
  0x27   :  { %1229 = vmatmul.msk.f32.gmra.mxu2 %vm564_vm1, %v535_v29 }
  0x29   :  { %1163 = vmatmul.msk.f32.gmra.mxu0 %vm112_vm2, %v75_v27 }
  0x2a   :  { %1195 = vmatmul.msk.f32.gmra.mxu1 %vm112_vm2, %v35_v28 }
  0x2f   :  { %1230 = vmatmul.msk.f32.gmra.mxu2 %vm564_vm1, %v536_v32  ;;  %v50_v32 = vld [vmem:[%s2085_s0 + $0x90] sm:$0xff] }
  0x31   :  { %1164 = vmatmul.msk.f32.gmra.mxu0 %vm112_vm2, %v76_v30 }
  0x32   :  { %1196 = vmatmul.msk.f32.gmra.mxu1 %vm112_vm2, %v36_v31  ;;  %v90_v31 = vld [vmem:[%s2084_s1 + $0x90] sm:$0xff] }
  0x37   :  { %1231 = vmatmul.msk.f32.gmra.mxu2 %vm564_vm1, %v537_v35  ;;  %v812_v35 = vld [vmem:[%s2087_s3 + $0x10] sm:$0xff] }
  0x39   :  { %1165 = vmatmul.msk.f32.gmra.mxu0 %vm112_vm2, %v77_v33 }
  0x3a   :  { %1197 = vmatmul.msk.f32.gmra.mxu1 %vm112_vm2, %v37_v34  ;;  %v550_v34 = vld [vmem:[%s2083_s2 + $0x98] sm:$0xff] }
  0x3f   :  { %1232 = vmatmul.msk.f32.gmra.mxu2 %vm564_vm1, %v538_v38 }
  0x41   :  { %1166 = vmatmul.msk.f32.gmra.mxu0 %vm112_vm2, %v78_v36 }
  0x42   :  { %1198 = vmatmul.msk.f32.gmra.mxu1 %vm112_vm2, %v38_v37 }
  0x47   :  { %1233 = vmatmul.msk.f32.gmra.mxu2 %vm564_vm1, %v539_v41 }
  0x49   :  { %1167 = vmatmul.msk.f32.gmra.mxu0 %vm112_vm2, %v79_v39 }
  0x4a   :  { %1199 = vmatmul.msk.f32.gmra.mxu1 %vm112_vm2, %v39_v40 }
  0x4f   :  { %1234 = vmatmul.msk.f32.gmra.mxu2 %vm564_vm1, %v540_v44 }
  0x51   :  { %1168 = vmatmul.msk.f32.gmra.mxu0 %vm112_vm2, %v80_v42  ;;  %v91_v42 = vld [vmem:[%s2084_s1 + $0x98] sm:$0xff] }
  0x52   :  { %1200 = vmatmul.msk.f32.gmra.mxu1 %vm112_vm2, %v40_v43  ;;  %v51_v43 = vld [vmem:[%s2085_s0 + $0x98] sm:$0xff] }
  0x57   :  { %1235 = vmatmul.msk.f32.gmra.mxu2 %vm564_vm1, %v541_v47 }
  0x59   :  { %1169 = vmatmul.msk.f32.gmra.mxu0 %vm112_vm2, %v81_v45  ;;  %v551_v45 = vld [vmem:[%s2083_s2 + $0xa0] sm:$0xff] }
  0x5a   :  { %1201 = vmatmul.msk.f32.gmra.mxu1 %vm112_vm2, %v41_v46  ;;  %v813_v46 = vld [vmem:[%s2087_s3 + $0x18] sm:$0xff] }
  0x5f   :  { %1236 = vmatmul.msk.f32.gmra.mxu2 %vm564_vm1, %v542_v50 }
  0x61   :  { %1170 = vmatmul.msk.f32.gmra.mxu0 %vm112_vm2, %v82_v48 }
  0x62   :  { %1202 = vmatmul.msk.f32.gmra.mxu1 %vm112_vm2, %v42_v49 }
  0x67   :  { %1237 = vmatmul.msk.f32.gmra.mxu2 %vm564_vm1, %v543_v53  ;;  %v92_v53 = vld [vmem:[%s2084_s1 + $0xa0] sm:$0xff] }
  0x69   :  { %1171 = vmatmul.msk.f32.gmra.mxu0 %vm112_vm2, %v83_v51 }
  0x6a   :  { %1203 = vmatmul.msk.f32.gmra.mxu1 %vm112_vm2, %v43_v52 }
  0x6f   :  { %1238 = vmatmul.msk.f32.gmra.mxu2 %vm564_vm1, %v544_v56  ;;  %v552_v56 = vld [vmem:[%s2083_s2 + $0xa8] sm:$0xff] }
  0x71   :  { %1172 = vmatmul.msk.f32.gmra.mxu0 %vm112_vm2, %v84_v54  ;;  %v52_v54 = vld [vmem:[%s2085_s0 + $0xa0] sm:$0xff] }
  0x72   :  { %1204 = vmatmul.msk.f32.gmra.mxu1 %vm112_vm2, %v44_v55 }
  0x77   :  { %1239 = vmatmul.msk.f32.gmra.mxu2 %vm564_vm1, %v545_v63 }
  0x79   :  { %1173 = vmatmul.msk.f32.gmra.mxu0 %vm112_vm2, %v85_v61 }
  0x7a   :  { %1205 = vmatmul.msk.f32.gmra.mxu1 %vm112_vm2, %v45_v62 }
  0x7f   :  { %1240 = vmatmul.msk.f32.gmra.mxu2 %vm564_vm1, %v546_v2 }
  0x81   :  { %1174 = vmatmul.msk.f32.gmra.mxu0 %vm112_vm2, %v86_v0  ;;  %v93_v0 = vld [vmem:[%s2084_s1 + $0xa8] sm:$0xff] }
  0x82   :  { %1206 = vmatmul.msk.f32.gmra.mxu1 %vm112_vm2, %v46_v1  ;;  %v53_v1 = vld [vmem:[%s2085_s0 + $0xa8] sm:$0xff] }
  0x87   :  { %1241 = vmatmul.msk.f32.gmra.mxu2 %vm564_vm1, %v547_v5 }
  0x89   :  { %1175 = vmatmul.msk.f32.gmra.mxu0 %vm112_vm2, %v87_v3  ;;  %v553_v3 = vld [vmem:[%s2083_s2 + $0xb0] sm:$0xff] }
  0x8a   :  { %1207 = vmatmul.msk.f32.gmra.mxu1 %vm112_vm2, %v47_v4  ;;  %v682_v6 = vpop.f32.mrf.mxu2  ;;  %v815_v4 = vld [vmem:[%s2087_s3 + $0x28] sm:$0xff] }
  0x8e   :  { %v226_v7 = vpop.f32.mrf.mxu0 }
  0x8f   :  { %v435_v8 = vpop.f32.mrf.mxu1  ;;  %1242 = vmatmul.msk.f32.gmra.mxu2 %vm564_vm1, %v548_v12  ;;  %v54_v12 = vld [vmem:[%s2085_s0 + $0xb0] sm:$0xff] }
  0x90   :  { %v436_v11 = vadd.f32 %v435_v8, %v226_v7 }
  0x91   :  { %1176 = vmatmul.msk.f32.gmra.mxu0 %vm112_vm2, %v88_v9 }
  0x92   :  { %v778_v14 = vadd.f32 %v682_v6, %v436_v11  ;;  %1208 = vmatmul.msk.f32.gmra.mxu1 %vm112_vm2, %v48_v10  ;;  %v685_v17 = vpop.f32.mrf.mxu2  ;;  %v94_v11 = vld [vmem:[%s2084_s1 + $0xb0] sm:$0xff] }
  0x94   :  { %v842_v15 = vadd.f32 %v810_v13, %v778_v14  ;;  %v554_v14 = vld [vmem:[%s2083_s2 + $0xb8] sm:$0xff] }
  0x96   :  { %v874_v16 = vmax.f32 %v842_v15, 0.0  ;;  %v229_v18 = vpop.f32.mrf.mxu0  ;;  %v816_v15 = vld [vmem:[%s2087_s3 + $0x30] sm:$0xff] }
  0x97   :  { %v438_v19 = vpop.f32.mrf.mxu1  ;;  %1243 = vmatmul.msk.f32.gmra.mxu2 %vm564_vm1, %v549_v23  ;;  %v55_v23 = vld [vmem:[%s2085_s0 + $0xb8] sm:$0xff] }
  0x98   :  { %v439_v22 = vadd.f32 %v438_v19, %v229_v18  ;;  %1257 = vmatmul.msk.f32.vlgmr.msra.gmra.mxu3 %vm914_vm3, %v874_v16 }
  0x99   :  { %1177 = vmatmul.msk.f32.gmra.mxu0 %vm112_vm2, %v89_v20 }
  0x9a   :  { %v779_v25 = vadd.f32 %v685_v17, %v439_v22  ;;  %1209 = vmatmul.msk.f32.gmra.mxu1 %vm112_vm2, %v49_v21  ;;  %v688_v28 = vpop.f32.mrf.mxu2  ;;  %v95_v22 = vld [vmem:[%s2084_s1 + $0xb8] sm:$0xff] }
  0x9c   :  { %v843_v26 = vadd.f32 %v811_v24, %v779_v25  ;;  %v555_v25 = vld [vmem:[%s2083_s2 + $0xc0] sm:$0xff] }
  0x9e   :  { %v875_v27 = vmax.f32 %v843_v26, 0.0  ;;  %v232_v29 = vpop.f32.mrf.mxu0  ;;  %v817_v26 = vld [vmem:[%s2087_s3 + $0x38] sm:$0xff] }
  0x9f   :  { %v441_v30 = vpop.f32.mrf.mxu1  ;;  %1244 = vmatmul.msk.f32.gmra.mxu2 %vm564_vm1, %v550_v34  ;;  %v56_v34 = vld [vmem:[%s2085_s0 + $0xc0] sm:$0xff] }
  0xa0   :  { %v442_v33 = vadd.f32 %v441_v30, %v232_v29  ;;  %1258 = vmatmul.msk.f32.gmra.mxu3 %vm914_vm3, %v875_v27 }
  0xa1   :  { %1178 = vmatmul.msk.f32.gmra.mxu0 %vm112_vm2, %v90_v31 }
  0xa2   :  { %v780_v36 = vadd.f32 %v688_v28, %v442_v33  ;;  %1210 = vmatmul.msk.f32.gmra.mxu1 %vm112_vm2, %v50_v32  ;;  %v691_v39 = vpop.f32.mrf.mxu2  ;;  %v96_v33 = vld [vmem:[%s2084_s1 + $0xc0] sm:$0xff] }
  0xa4   :  { %v844_v37 = vadd.f32 %v812_v35, %v780_v36  ;;  %v556_v36 = vld [vmem:[%s2083_s2 + $0xc8] sm:$0xff] }
  0xa6   :  { %v876_v38 = vmax.f32 %v844_v37, 0.0  ;;  %v235_v40 = vpop.f32.mrf.mxu0  ;;  %v818_v37 = vld [vmem:[%s2087_s3 + $0x40] sm:$0xff] }
  0xa7   :  { %v444_v41 = vpop.f32.mrf.mxu1  ;;  %1245 = vmatmul.msk.f32.gmra.mxu2 %vm564_vm1, %v551_v45  ;;  %v57_v45 = vld [vmem:[%s2085_s0 + $0xc8] sm:$0xff] }
  0xa8   :  { %v445_v44 = vadd.f32 %v444_v41, %v235_v40  ;;  %1259 = vmatmul.msk.f32.gmra.mxu3 %vm914_vm3, %v876_v38 }
  0xa9   :  { %1179 = vmatmul.msk.f32.gmra.mxu0 %vm112_vm2, %v91_v42 }
  0xaa   :  { %v781_v47 = vadd.f32 %v691_v39, %v445_v44  ;;  %1211 = vmatmul.msk.f32.gmra.mxu1 %vm112_vm2, %v51_v43  ;;  %v694_v50 = vpop.f32.mrf.mxu2  ;;  %v97_v44 = vld [vmem:[%s2084_s1 + $0xc8] sm:$0xff] }
  0xac   :  { %v845_v48 = vadd.f32 %v813_v46, %v781_v47  ;;  %v557_v47 = vld [vmem:[%s2083_s2 + $0xd0] sm:$0xff] }
  0xae   :  { %v877_v49 = vmax.f32 %v845_v48, 0.0  ;;  %v238_v51 = vpop.f32.mrf.mxu0  ;;  %v819_v48 = vld [vmem:[%s2087_s3 + $0x48] sm:$0xff] }
  0xaf   :  { %v447_v52 = vpop.f32.mrf.mxu1  ;;  %1246 = vmatmul.msk.f32.gmra.mxu2 %vm564_vm1, %v552_v56  ;;  %v58_v56 = vld [vmem:[%s2085_s0 + $0xd0] sm:$0xff] }
  0xb0   :  { %v448_v55 = vadd.f32 %v447_v52, %v238_v51  ;;  %1260 = vmatmul.msk.f32.gmra.mxu3 %vm914_vm3, %v877_v49 }
  0xb1   :  { %1180 = vmatmul.msk.f32.gmra.mxu0 %vm112_vm2, %v92_v53 }
  0xb2   :  { %v782_v58 = vadd.f32 %v694_v50, %v448_v55  ;;  %1212 = vmatmul.msk.f32.gmra.mxu1 %vm112_vm2, %v52_v54  ;;  %v697_v61 = vpop.f32.mrf.mxu2  ;;  %v98_v55 = vld [vmem:[%s2084_s1 + $0xd0] sm:$0xff] }
  0xb4   :  { %v846_v59 = vadd.f32 %v814_v57, %v782_v58  ;;  %v558_v58 = vld [vmem:[%s2083_s2 + $0xd8] sm:$0xff] }
  0xb6   :  { %v878_v60 = vmax.f32 %v846_v59, 0.0  ;;  %v241_v62 = vpop.f32.mrf.mxu0  ;;  %v820_v59 = vld [vmem:[%s2087_s3 + $0x50] sm:$0xff] }
  0xb7   :  { %v450_v63 = vpop.f32.mrf.mxu1  ;;  %1247 = vmatmul.msk.f32.gmra.mxu2 %vm564_vm1, %v553_v3  ;;  %v59_v3 = vld [vmem:[%s2085_s0 + $0xd8] sm:$0xff] }
  0xb8   :  { %v451_v2 = vadd.f32 %v450_v63, %v241_v62  ;;  %1261 = vmatmul.msk.f32.gmra.mxu3 %vm914_vm3, %v878_v60 }
  0xb9   :  { %1181 = vmatmul.msk.f32.gmra.mxu0 %vm112_vm2, %v93_v0 }
  0xba   :  { %v783_v5 = vadd.f32 %v697_v61, %v451_v2  ;;  %1213 = vmatmul.msk.f32.gmra.mxu1 %vm112_vm2, %v53_v1  ;;  %v700_v8 = vpop.f32.mrf.mxu2  ;;  %v99_v2 = vld [vmem:[%s2084_s1 + $0xd8] sm:$0xff] }
  0xbc   :  { %v847_v6 = vadd.f32 %v815_v4, %v783_v5  ;;  %v559_v5 = vld [vmem:[%s2083_s2 + $0xe0] sm:$0xff] }
  0xbe   :  { %v879_v7 = vmax.f32 %v847_v6, 0.0  ;;  %v244_v9 = vpop.f32.mrf.mxu0  ;;  %v821_v6 = vld [vmem:[%s2087_s3 + $0x58] sm:$0xff] }
  0xbf   :  { %v453_v10 = vpop.f32.mrf.mxu1  ;;  %1248 = vmatmul.msk.f32.gmra.mxu2 %vm564_vm1, %v554_v14  ;;  %v60_v14 = vld [vmem:[%s2085_s0 + $0xe0] sm:$0xff] }
  0xc0   :  { %v454_v13 = vadd.f32 %v453_v10, %v244_v9  ;;  %1262 = vmatmul.msk.f32.gmra.mxu3 %vm914_vm3, %v879_v7 }
  0xc1   :  { %1182 = vmatmul.msk.f32.gmra.mxu0 %vm112_vm2, %v94_v11 }
  0xc2   :  { %v784_v16 = vadd.f32 %v700_v8, %v454_v13  ;;  %1214 = vmatmul.msk.f32.gmra.mxu1 %vm112_vm2, %v54_v12  ;;  %v703_v19 = vpop.f32.mrf.mxu2  ;;  %v100_v13 = vld [vmem:[%s2084_s1 + $0xe0] sm:$0xff] }
  0xc4   :  { %v848_v17 = vadd.f32 %v816_v15, %v784_v16  ;;  %v560_v16 = vld [vmem:[%s2083_s2 + $0xe8] sm:$0xff] }
  0xc6   :  { %v880_v18 = vmax.f32 %v848_v17, 0.0  ;;  %v247_v20 = vpop.f32.mrf.mxu0  ;;  %v822_v17 = vld [vmem:[%s2087_s3 + $0x60] sm:$0xff] }
  0xc7   :  { %v456_v21 = vpop.f32.mrf.mxu1  ;;  %1249 = vmatmul.msk.f32.gmra.mxu2 %vm564_vm1, %v555_v25  ;;  %v61_v25 = vld [vmem:[%s2085_s0 + $0xe8] sm:$0xff] }
  0xc8   :  { %v457_v24 = vadd.f32 %v456_v21, %v247_v20  ;;  %1263 = vmatmul.msk.f32.gmra.mxu3 %vm914_vm3, %v880_v18 }
  0xc9   :  { %1183 = vmatmul.msk.f32.gmra.mxu0 %vm112_vm2, %v95_v22 }
  0xca   :  { %v785_v27 = vadd.f32 %v703_v19, %v457_v24  ;;  %1215 = vmatmul.msk.f32.gmra.mxu1 %vm112_vm2, %v55_v23  ;;  %v706_v30 = vpop.f32.mrf.mxu2  ;;  %v101_v24 = vld [vmem:[%s2084_s1 + $0xe8] sm:$0xff] }
  0xcc   :  { %v849_v28 = vadd.f32 %v817_v26, %v785_v27  ;;  %v561_v27 = vld [vmem:[%s2083_s2 + $0xf0] sm:$0xff] }
  0xce   :  { %v881_v29 = vmax.f32 %v849_v28, 0.0  ;;  %v250_v31 = vpop.f32.mrf.mxu0  ;;  %v823_v28 = vld [vmem:[%s2087_s3 + $0x68] sm:$0xff] }
  0xcf   :  { %v459_v32 = vpop.f32.mrf.mxu1  ;;  %1250 = vmatmul.msk.f32.gmra.mxu2 %vm564_vm1, %v556_v36  ;;  %v62_v36 = vld [vmem:[%s2085_s0 + $0xf0] sm:$0xff] }
  0xd0   :  { %v460_v35 = vadd.f32 %v459_v32, %v250_v31  ;;  %1264 = vmatmul.msk.f32.gmra.mxu3 %vm914_vm3, %v881_v29 }
  0xd1   :  { %1184 = vmatmul.msk.f32.gmra.mxu0 %vm112_vm2, %v96_v33 }
  0xd2   :  { %v786_v38 = vadd.f32 %v706_v30, %v460_v35  ;;  %1216 = vmatmul.msk.f32.gmra.mxu1 %vm112_vm2, %v56_v34  ;;  %v709_v41 = vpop.f32.mrf.mxu2  ;;  %v102_v35 = vld [vmem:[%s2084_s1 + $0xf0] sm:$0xff] }
  0xd4   :  { %v850_v39 = vadd.f32 %v818_v37, %v786_v38  ;;  %v562_v38 = vld [vmem:[%s2083_s2 + $0xf8] sm:$0xff] }
  0xd6   :  { %v882_v40 = vmax.f32 %v850_v39, 0.0  ;;  %v253_v42 = vpop.f32.mrf.mxu0  ;;  %v824_v39 = vld [vmem:[%s2087_s3 + $0x70] sm:$0xff] }
  0xd7   :  { %v462_v43 = vpop.f32.mrf.mxu1  ;;  %1251 = vmatmul.msk.f32.gmra.mxu2 %vm564_vm1, %v557_v47  ;;  %v63_v47 = vld [vmem:[%s2085_s0 + $0xf8] sm:$0xff] }
  0xd8   :  { %v463_v46 = vadd.f32 %v462_v43, %v253_v42  ;;  %1265 = vmatmul.msk.f32.gmra.mxu3 %vm914_vm3, %v882_v40 }
  0xd9   :  { %1185 = vmatmul.msk.f32.gmra.mxu0 %vm112_vm2, %v97_v44 }
  0xda   :  { %v787_v49 = vadd.f32 %v709_v41, %v463_v46  ;;  %1217 = vmatmul.msk.f32.gmra.mxu1 %vm112_vm2, %v57_v45  ;;  %v712_v52 = vpop.f32.mrf.mxu2  ;;  %v103_v46 = vld [vmem:[%s2084_s1 + $0xf8] sm:$0xff] }
  0xdc   :  { %v851_v50 = vadd.f32 %v819_v48, %v787_v49  ;;  %v825_v49 = vld [vmem:[%s2087_s3 + $0x78] sm:$0xff] }
  0xde   :  { %v883_v51 = vmax.f32 %v851_v50, 0.0  ;;  %v256_v53 = vpop.f32.mrf.mxu0 }
  0xdf   :  { %v465_v54 = vpop.f32.mrf.mxu1  ;;  %1252 = vmatmul.msk.f32.gmra.mxu2 %vm564_vm1, %v558_v58 }
  0xe0   :  { %v466_v57 = vadd.f32 %v465_v54, %v256_v53  ;;  %1266 = vmatmul.msk.f32.gmra.mxu3 %vm914_vm3, %v883_v51 }
  0xe1   :  { %1186 = vmatmul.msk.f32.gmra.mxu0 %vm112_vm2, %v98_v55 }
  0xe2   :  { %v788_v60 = vadd.f32 %v712_v52, %v466_v57  ;;  %1218 = vmatmul.msk.f32.gmra.mxu1 %vm112_vm2, %v58_v56  ;;  %v715_v63 = vpop.f32.mrf.mxu2  ;;  %v826_v57 = vld [vmem:[%s2087_s3 + $0x80] sm:$0xff] }
  0xe4   :  { %v852_v61 = vadd.f32 %v820_v59, %v788_v60 }
  0xe6   :  { %v884_v62 = vmax.f32 %v852_v61, 0.0  ;;  %v259_v0 = vpop.f32.mrf.mxu0 }
  0xe7   :  { %v468_v1 = vpop.f32.mrf.mxu1  ;;  %1253 = vmatmul.msk.f32.gmra.mxu2 %vm564_vm1, %v559_v5 }
  0xe8   :  { %v469_v4 = vadd.f32 %v468_v1, %v259_v0  ;;  %1267 = vmatmul.msk.f32.gmra.mxu3 %vm914_vm3, %v884_v62  ;;  %v1858_v1 = vld [vmem:[%s2088_s8] ss:$0 sm:$0xff] }
  0xe9   :  { %1187 = vmatmul.msk.f32.gmra.mxu0 %vm112_vm2, %v99_v2  ;;  %v827_v2 = vld [vmem:[%s2087_s3 + $0x88] sm:$0xff] }
  0xea   :  { %v789_v7 = vadd.f32 %v715_v63, %v469_v4  ;;  %1219 = vmatmul.msk.f32.gmra.mxu1 %vm112_vm2, %v59_v3  ;;  %v718_v10 = vpop.f32.mrf.mxu2 }
  0xec   :  { %v853_v8 = vadd.f32 %v821_v6, %v789_v7 }
  0xee   :  { %v885_v9 = vmax.f32 %v853_v8, 0.0  ;;  %v262_v11 = vpop.f32.mrf.mxu0 }
  0xef   :  { %v471_v12 = vpop.f32.mrf.mxu1  ;;  %1254 = vmatmul.msk.f32.gmra.mxu2 %vm564_vm1, %v560_v16 }
  0xf0   :  { %v472_v15 = vadd.f32 %v471_v12, %v262_v11  ;;  %1268 = vmatmul.msk.f32.gmra.mxu3 %vm914_vm3, %v885_v9  ;;  %v828_v12 = vld [vmem:[%s2087_s3 + $0x90] sm:$0xff] }
  0xf1   :  { %1188 = vmatmul.msk.f32.gmra.mxu0 %vm112_vm2, %v100_v13 }
  0xf2   :  { %v790_v18 = vadd.f32 %v718_v10, %v472_v15  ;;  %1220 = vmatmul.msk.f32.gmra.mxu1 %vm112_vm2, %v60_v14  ;;  %v721_v21 = vpop.f32.mrf.mxu2 }
  0xf4   :  { %v854_v19 = vadd.f32 %v822_v17, %v790_v18 }
  0xf6   :  { %v886_v20 = vmax.f32 %v854_v19, 0.0  ;;  %v265_v22 = vpop.f32.mrf.mxu0 }
  0xf7   :  { %v474_v23 = vpop.f32.mrf.mxu1  ;;  %1255 = vmatmul.msk.f32.gmra.mxu2 %vm564_vm1, %v561_v27 }
  0xf8   :  { %v475_v26 = vadd.f32 %v474_v23, %v265_v22  ;;  %1269 = vmatmul.msk.f32.gmra.mxu3 %vm914_vm3, %v886_v20  ;;  %v829_v22 = vld [vmem:[%s2087_s3 + $0x98] sm:$0xff] }
  0xf9   :  { %1189 = vmatmul.msk.f32.gmra.mxu0 %vm112_vm2, %v101_v24 }
  0xfa   :  { %v791_v29 = vadd.f32 %v721_v21, %v475_v26  ;;  %1221 = vmatmul.msk.f32.gmra.mxu1 %vm112_vm2, %v61_v25  ;;  %v724_v32 = vpop.f32.mrf.mxu2 }
  0xfc   :  { %v855_v30 = vadd.f32 %v823_v28, %v791_v29 }
  0xfe   :  { %v887_v31 = vmax.f32 %v855_v30, 0.0  ;;  %v268_v33 = vpop.f32.mrf.mxu0 }
  0xff   :  { %v477_v34 = vpop.f32.mrf.mxu1  ;;  %1256 = vmatmul.msk.f32.gmra.mxu2 %vm564_vm1, %v562_v38 }
 0x100   :  { %v478_v37 = vadd.f32 %v477_v34, %v268_v33  ;;  %1270 = vmatmul.msk.f32.gmra.mxu3 %vm914_vm3, %v887_v31 }
 0x101   :  { %1190 = vmatmul.msk.f32.gmra.mxu0 %vm112_vm2, %v102_v35 }
 0x102   :  { %v792_v40 = vadd.f32 %v724_v32, %v478_v37  ;;  %1222 = vmatmul.msk.f32.gmra.mxu1 %vm112_vm2, %v62_v36  ;;  %v727_v43 = vpop.f32.mrf.mxu2  ;;  %v830_v32 = vld [vmem:[%s2087_s3 + $0xa0] sm:$0xff] }
 0x104   :  { %v856_v41 = vadd.f32 %v824_v39, %v792_v40 }
 0x106   :  { %v888_v42 = vmax.f32 %v856_v41, 0.0  ;;  %v271_v44 = vpop.f32.mrf.mxu0 }
 0x107   :  { %v480_v45 = vpop.f32.mrf.mxu1 }
 0x108   :  { %v481_v48 = vadd.f32 %v480_v45, %v271_v44  ;;  %1271 = vmatmul.msk.f32.gmra.mxu3 %vm914_vm3, %v888_v42  ;;  %v831_v42 = vld [vmem:[%s2087_s3 + $0xa8] sm:$0xff] }
 0x109   :  { %1191 = vmatmul.msk.f32.gmra.mxu0 %vm112_vm2, %v103_v46 }
 0x10a   :  { %v793_v50 = vadd.f32 %v727_v43, %v481_v48  ;;  %1223 = vmatmul.msk.f32.gmra.mxu1 %vm112_vm2, %v63_v47  ;;  %v730_v53 = vpop.f32.mrf.mxu2 }
 0x10c   :  { %v857_v51 = vadd.f32 %v825_v49, %v793_v50 }
 0x10e   :  { %v889_v52 = vmax.f32 %v857_v51, 0.0  ;;  %v274_v54 = vpop.f32.mrf.mxu0 }
 0x10f   :  { %v483_v55 = vpop.f32.mrf.mxu1 }
 0x110   :  { %v484_v56 = vadd.f32 %v483_v55, %v274_v54  ;;  %1272 = vmatmul.msk.f32.gmra.mxu3 %vm914_vm3, %v889_v52  ;;  %v832_v52 = vld [vmem:[%s2087_s3 + $0xb0] sm:$0xff] }
 0x112   :  { %v794_v58 = vadd.f32 %v730_v53, %v484_v56  ;;  %v733_v61 = vpop.f32.mrf.mxu2 }
 0x114   :  { %v858_v59 = vadd.f32 %v826_v57, %v794_v58 }
 0x116   :  { %v890_v60 = vmax.f32 %v858_v59, 0.0  ;;  %v277_v62 = vpop.f32.mrf.mxu0 }
 0x117   :  { %v486_v63 = vpop.f32.mrf.mxu1 }
 0x118   :  { %v487_v0 = vadd.f32 %v486_v63, %v277_v62  ;;  %1273 = vmatmul.msk.f32.gmra.mxu3 %vm914_vm3, %v890_v60  ;;  %v833_v62 = vld [vmem:[%s2087_s3 + $0xb8] sm:$0xff] }
 0x11a   :  { %v795_v3 = vadd.f32 %v733_v61, %v487_v0  ;;  %v736_v8 = vpop.f32.mrf.mxu2 }
 0x11b   :  { %v1028_v4 = vpop.f32.mrf.mxu3 }
 0x11c   :  { %v859_v5 = vadd.f32 %v827_v2, %v795_v3  ;;  %v1029_v6 = vadd.f32 %v1858_v1, %v1028_v4 }
 0x11e   :  { %v891_v7 = vmax.f32 %v859_v5, 0.0  ;;  %1124 = vst.msk [vmem:[%s2089_s9] sm:$0xff] %vm564_vm1, %v1029_v6  ;;  %v280_v9 = vpop.f32.mrf.mxu0 }
 0x11f   :  { %v489_v10 = vpop.f32.mrf.mxu1 }
 0x120   :  { %v490_v11 = vadd.f32 %v489_v10, %v280_v9  ;;  %1274 = vmatmul.msk.f32.gmra.mxu3 %vm914_vm3, %v891_v7  ;;  %v834_v9 = vld [vmem:[%s2087_s3 + $0xc0] sm:$0xff] }
 0x122   :  { %v796_v13 = vadd.f32 %v736_v8, %v490_v11  ;;  %v739_v18 = vpop.f32.mrf.mxu2 }
 0x123   :  { %v1031_v14 = vpop.f32.mrf.mxu3 }
 0x124   :  { %v860_v15 = vadd.f32 %v828_v12, %v796_v13  ;;  %v1032_v16 = vadd.f32 %v1858_v1, %v1031_v14 }
 0x126   :  { %v892_v17 = vmax.f32 %v860_v15, 0.0  ;;  %1125 = vst.msk [vmem:[%s2089_s9 + $0x8] sm:$0xff] %vm564_vm1, %v1032_v16  ;;  %v283_v19 = vpop.f32.mrf.mxu0 }
 0x127   :  { %v492_v20 = vpop.f32.mrf.mxu1 }
 0x128   :  { %v493_v21 = vadd.f32 %v492_v20, %v283_v19  ;;  %1275 = vmatmul.msk.f32.gmra.mxu3 %vm914_vm3, %v892_v17  ;;  %v835_v19 = vld [vmem:[%s2087_s3 + $0xc8] sm:$0xff] }
 0x12a   :  { %v797_v23 = vadd.f32 %v739_v18, %v493_v21  ;;  %v742_v28 = vpop.f32.mrf.mxu2 }
 0x12b   :  { %v1034_v24 = vpop.f32.mrf.mxu3 }
 0x12c   :  { %v861_v25 = vadd.f32 %v829_v22, %v797_v23  ;;  %v1035_v26 = vadd.f32 %v1858_v1, %v1034_v24 }
 0x12e   :  { %v893_v27 = vmax.f32 %v861_v25, 0.0  ;;  %1126 = vst.msk [vmem:[%s2089_s9 + $0x10] sm:$0xff] %vm564_vm1, %v1035_v26  ;;  %v286_v29 = vpop.f32.mrf.mxu0 }
 0x12f   :  { %v495_v30 = vpop.f32.mrf.mxu1 }
 0x130   :  { %v496_v31 = vadd.f32 %v495_v30, %v286_v29  ;;  %1276 = vmatmul.msk.f32.gmra.mxu3 %vm914_vm3, %v893_v27  ;;  %v836_v29 = vld [vmem:[%s2087_s3 + $0xd0] sm:$0xff] }
 0x132   :  { %v798_v33 = vadd.f32 %v742_v28, %v496_v31  ;;  %v745_v38 = vpop.f32.mrf.mxu2 }
 0x133   :  { %v1037_v34 = vpop.f32.mrf.mxu3 }
 0x134   :  { %v862_v35 = vadd.f32 %v830_v32, %v798_v33  ;;  %v1038_v36 = vadd.f32 %v1858_v1, %v1037_v34 }
 0x136   :  { %v894_v37 = vmax.f32 %v862_v35, 0.0  ;;  %1127 = vst.msk [vmem:[%s2089_s9 + $0x18] sm:$0xff] %vm564_vm1, %v1038_v36  ;;  %v289_v39 = vpop.f32.mrf.mxu0 }
 0x137   :  { %v498_v40 = vpop.f32.mrf.mxu1 }
 0x138   :  { %v499_v41 = vadd.f32 %v498_v40, %v289_v39  ;;  %1277 = vmatmul.msk.f32.gmra.mxu3 %vm914_vm3, %v894_v37  ;;  %v837_v39 = vld [vmem:[%s2087_s3 + $0xd8] sm:$0xff] }
 0x13a   :  { %v799_v43 = vadd.f32 %v745_v38, %v499_v41  ;;  %v748_v48 = vpop.f32.mrf.mxu2 }
 0x13b   :  { %v1040_v44 = vpop.f32.mrf.mxu3 }
 0x13c   :  { %v863_v45 = vadd.f32 %v831_v42, %v799_v43  ;;  %v1041_v46 = vadd.f32 %v1858_v1, %v1040_v44 }
 0x13e   :  { %v895_v47 = vmax.f32 %v863_v45, 0.0  ;;  %1128 = vst.msk [vmem:[%s2089_s9 + $0x20] sm:$0xff] %vm564_vm1, %v1041_v46  ;;  %v292_v49 = vpop.f32.mrf.mxu0 }
 0x13f   :  { %v501_v50 = vpop.f32.mrf.mxu1 }
 0x140   :  { %v502_v51 = vadd.f32 %v501_v50, %v292_v49  ;;  %1278 = vmatmul.msk.f32.gmra.mxu3 %vm914_vm3, %v895_v47  ;;  %v838_v49 = vld [vmem:[%s2087_s3 + $0xe0] sm:$0xff] }
 0x142   :  { %v800_v53 = vadd.f32 %v748_v48, %v502_v51  ;;  %v751_v58 = vpop.f32.mrf.mxu2 }
 0x143   :  { %v1043_v54 = vpop.f32.mrf.mxu3 }
 0x144   :  { %v864_v55 = vadd.f32 %v832_v52, %v800_v53  ;;  %v1044_v56 = vadd.f32 %v1858_v1, %v1043_v54 }
 0x146   :  { %v896_v57 = vmax.f32 %v864_v55, 0.0  ;;  %1129 = vst.msk [vmem:[%s2089_s9 + $0x28] sm:$0xff] %vm564_vm1, %v1044_v56  ;;  %v295_v59 = vpop.f32.mrf.mxu0 }
 0x147   :  { %v504_v60 = vpop.f32.mrf.mxu1 }
 0x148   :  { %v505_v61 = vadd.f32 %v504_v60, %v295_v59  ;;  %1279 = vmatmul.msk.f32.gmra.mxu3 %vm914_vm3, %v896_v57  ;;  %v839_v59 = vld [vmem:[%s2087_s3 + $0xe8] sm:$0xff] }
 0x14a   :  { %v801_v63 = vadd.f32 %v751_v58, %v505_v61  ;;  %v754_v5 = vpop.f32.mrf.mxu2 }
 0x14b   :  { %v1046_v0 = vpop.f32.mrf.mxu3 }
 0x14c   :  { %v865_v2 = vadd.f32 %v833_v62, %v801_v63  ;;  %v1047_v3 = vadd.f32 %v1858_v1, %v1046_v0 }
 0x14e   :  { %v897_v4 = vmax.f32 %v865_v2, 0.0  ;;  %1130 = vst.msk [vmem:[%s2089_s9 + $0x30] sm:$0xff] %vm564_vm1, %v1047_v3  ;;  %v298_v6 = vpop.f32.mrf.mxu0 }
 0x14f   :  { %v507_v7 = vpop.f32.mrf.mxu1 }
 0x150   :  { %v508_v8 = vadd.f32 %v507_v7, %v298_v6  ;;  %1280 = vmatmul.msk.f32.gmra.mxu3 %vm914_vm3, %v897_v4  ;;  %v840_v6 = vld [vmem:[%s2087_s3 + $0xf0] sm:$0xff] }
 0x152   :  { %v802_v10 = vadd.f32 %v754_v5, %v508_v8  ;;  %v757_v15 = vpop.f32.mrf.mxu2 }
 0x153   :  { %v1049_v11 = vpop.f32.mrf.mxu3 }
 0x154   :  { %v866_v12 = vadd.f32 %v834_v9, %v802_v10  ;;  %v1050_v13 = vadd.f32 %v1858_v1, %v1049_v11 }
 0x156   :  { %v898_v14 = vmax.f32 %v866_v12, 0.0  ;;  %1131 = vst.msk [vmem:[%s2089_s9 + $0x38] sm:$0xff] %vm564_vm1, %v1050_v13  ;;  %v301_v16 = vpop.f32.mrf.mxu0 }
 0x157   :  { %v510_v17 = vpop.f32.mrf.mxu1 }
 0x158   :  { %v511_v18 = vadd.f32 %v510_v17, %v301_v16  ;;  %1281 = vmatmul.msk.f32.gmra.mxu3 %vm914_vm3, %v898_v14  ;;  %v841_v16 = vld [vmem:[%s2087_s3 + $0xf8] sm:$0xff] }
 0x15a   :  { %v803_v20 = vadd.f32 %v757_v15, %v511_v18  ;;  %v760_v25 = vpop.f32.mrf.mxu2 }
 0x15b   :  { %v1052_v21 = vpop.f32.mrf.mxu3 }
 0x15c   :  { %v867_v22 = vadd.f32 %v835_v19, %v803_v20  ;;  %v1053_v23 = vadd.f32 %v1858_v1, %v1052_v21 }
 0x15e   :  { %v899_v24 = vmax.f32 %v867_v22, 0.0  ;;  %1132 = vst.msk [vmem:[%s2089_s9 + $0x40] sm:$0xff] %vm564_vm1, %v1053_v23  ;;  %v304_v26 = vpop.f32.mrf.mxu0 }
 0x15f   :  { %v513_v27 = vpop.f32.mrf.mxu1 }
 0x160   :  { %v514_v28 = vadd.f32 %v513_v27, %v304_v26  ;;  %1282 = vmatmul.msk.f32.gmra.mxu3 %vm914_vm3, %v899_v24 }
 0x162   :  { %v804_v30 = vadd.f32 %v760_v25, %v514_v28  ;;  %v763_v35 = vpop.f32.mrf.mxu2 }
 0x163   :  { %v1055_v31 = vpop.f32.mrf.mxu3 }
 0x164   :  { %v868_v32 = vadd.f32 %v836_v29, %v804_v30  ;;  %v1056_v33 = vadd.f32 %v1858_v1, %v1055_v31 }
 0x166   :  { %v900_v34 = vmax.f32 %v868_v32, 0.0  ;;  %1133 = vst.msk [vmem:[%s2089_s9 + $0x48] sm:$0xff] %vm564_vm1, %v1056_v33  ;;  %v307_v36 = vpop.f32.mrf.mxu0 }
 0x167   :  { %v516_v37 = vpop.f32.mrf.mxu1 }
 0x168   :  { %v517_v38 = vadd.f32 %v516_v37, %v307_v36  ;;  %1283 = vmatmul.msk.f32.gmra.mxu3 %vm914_vm3, %v900_v34 }
 0x16a   :  { %v805_v40 = vadd.f32 %v763_v35, %v517_v38  ;;  %v766_v45 = vpop.f32.mrf.mxu2 }
 0x16b   :  { %v1058_v41 = vpop.f32.mrf.mxu3 }
 0x16c   :  { %v869_v42 = vadd.f32 %v837_v39, %v805_v40  ;;  %v1059_v43 = vadd.f32 %v1858_v1, %v1058_v41 }
 0x16e   :  { %v901_v44 = vmax.f32 %v869_v42, 0.0  ;;  %1134 = vst.msk [vmem:[%s2089_s9 + $0x50] sm:$0xff] %vm564_vm1, %v1059_v43  ;;  %v310_v46 = vpop.f32.mrf.mxu0 }
 0x16f   :  { %v519_v47 = vpop.f32.mrf.mxu1 }
 0x170   :  { %v520_v48 = vadd.f32 %v519_v47, %v310_v46  ;;  %1284 = vmatmul.msk.f32.gmra.mxu3 %vm914_vm3, %v901_v44 }
 0x172   :  { %v806_v50 = vadd.f32 %v766_v45, %v520_v48  ;;  %v769_v55 = vpop.f32.mrf.mxu2 }
 0x173   :  { %v1061_v51 = vpop.f32.mrf.mxu3 }
 0x174   :  { %v870_v52 = vadd.f32 %v838_v49, %v806_v50  ;;  %v1062_v53 = vadd.f32 %v1858_v1, %v1061_v51 }
 0x176   :  { %v902_v54 = vmax.f32 %v870_v52, 0.0  ;;  %1135 = vst.msk [vmem:[%s2089_s9 + $0x58] sm:$0xff] %vm564_vm1, %v1062_v53  ;;  %v313_v56 = vpop.f32.mrf.mxu0 }
 0x177   :  { %v522_v57 = vpop.f32.mrf.mxu1 }
 0x178   :  { %v523_v58 = vadd.f32 %v522_v57, %v313_v56  ;;  %1285 = vmatmul.msk.f32.gmra.mxu3 %vm914_vm3, %v902_v54 }
 0x17a   :  { %v807_v60 = vadd.f32 %v769_v55, %v523_v58  ;;  %v772_v2 = vpop.f32.mrf.mxu2 }
 0x17b   :  { %v1064_v61 = vpop.f32.mrf.mxu3 }
 0x17c   :  { %v871_v62 = vadd.f32 %v839_v59, %v807_v60  ;;  %v1065_v63 = vadd.f32 %v1858_v1, %v1064_v61 }
 0x17e   :  { %v903_v0 = vmax.f32 %v871_v62, 0.0  ;;  %1136 = vst.msk [vmem:[%s2089_s9 + $0x60] sm:$0xff] %vm564_vm1, %v1065_v63  ;;  %v316_v3 = vpop.f32.mrf.mxu0 }
 0x17f   :  { %v525_v4 = vpop.f32.mrf.mxu1 }
 0x180   :  { %v526_v5 = vadd.f32 %v525_v4, %v316_v3  ;;  %1286 = vmatmul.msk.f32.gmra.mxu3 %vm914_vm3, %v903_v0 }
 0x182   :  { %v808_v7 = vadd.f32 %v772_v2, %v526_v5  ;;  %v775_v12 = vpop.f32.mrf.mxu2 }
 0x183   :  { %v1067_v8 = vpop.f32.mrf.mxu3 }
 0x184   :  { %v872_v9 = vadd.f32 %v840_v6, %v808_v7  ;;  %v1068_v10 = vadd.f32 %v1858_v1, %v1067_v8 }
 0x186   :  { %v904_v11 = vmax.f32 %v872_v9, 0.0  ;;  %1137 = vst.msk [vmem:[%s2089_s9 + $0x68] sm:$0xff] %vm564_vm1, %v1068_v10  ;;  %v319_v13 = vpop.f32.mrf.mxu0 }
 0x187   :  { %v528_v14 = vpop.f32.mrf.mxu1 }
 0x188   :  { %v529_v15 = vadd.f32 %v528_v14, %v319_v13  ;;  %1287 = vmatmul.msk.f32.gmra.mxu3 %vm914_vm3, %v904_v11 }
 0x18a   :  { %v809_v17 = vadd.f32 %v775_v12, %v529_v15 }
 0x18b   :  { %v1070_v18 = vpop.f32.mrf.mxu3 }
 0x18c   :  { %v873_v19 = vadd.f32 %v841_v16, %v809_v17  ;;  %v1071_v20 = vadd.f32 %v1858_v1, %v1070_v18 }
 0x18e   :  { %v905_v21 = vmax.f32 %v873_v19, 0.0  ;;  %1138 = vst.msk [vmem:[%s2089_s9 + $0x70] sm:$0xff] %vm564_vm1, %v1071_v20 }
 0x190   :  { %1288 = vmatmul.msk.f32.gmra.mxu3 %vm914_vm3, %v905_v21 }
 0x193   :  { %v1073_v22 = vpop.f32.mrf.mxu3 }
 0x194   :  { %v1074_v23 = vadd.f32 %v1858_v1, %v1073_v22 }
 0x196   :  { %1139 = vst.msk [vmem:[%s2089_s9 + $0x78] sm:$0xff] %vm564_vm1, %v1074_v23 }
 0x19b   :  { %v1076_v24 = vpop.f32.mrf.mxu3 }
 0x19c   :  { %v1077_v25 = vadd.f32 %v1858_v1, %v1076_v24 }
 0x19e   :  { %1140 = vst.msk [vmem:[%s2089_s9 + $0x80] sm:$0xff] %vm564_vm1, %v1077_v25 }
 0x1a3   :  { %v1079_v26 = vpop.f32.mrf.mxu3 }
 0x1a4   :  { %v1080_v27 = vadd.f32 %v1858_v1, %v1079_v26 }
 0x1a6   :  { %1141 = vst.msk [vmem:[%s2089_s9 + $0x88] sm:$0xff] %vm564_vm1, %v1080_v27 }
 0x1ab   :  { %v1082_v28 = vpop.f32.mrf.mxu3 }
 0x1ac   :  { %v1083_v29 = vadd.f32 %v1858_v1, %v1082_v28 }
 0x1ae   :  { %1142 = vst.msk [vmem:[%s2089_s9 + $0x90] sm:$0xff] %vm564_vm1, %v1083_v29 }
 0x1b3   :  { %v1085_v30 = vpop.f32.mrf.mxu3 }
 0x1b4   :  { %v1086_v31 = vadd.f32 %v1858_v1, %v1085_v30 }
 0x1b6   :  { %1143 = vst.msk [vmem:[%s2089_s9 + $0x98] sm:$0xff] %vm564_vm1, %v1086_v31 }
 0x1bb   :  { %v1088_v32 = vpop.f32.mrf.mxu3 }
 0x1bc   :  { %v1089_v33 = vadd.f32 %v1858_v1, %v1088_v32 }
 0x1be   :  { %1144 = vst.msk [vmem:[%s2089_s9 + $0xa0] sm:$0xff] %vm564_vm1, %v1089_v33 }
 0x1c3   :  { %v1091_v34 = vpop.f32.mrf.mxu3 }
 0x1c4   :  { %v1092_v35 = vadd.f32 %v1858_v1, %v1091_v34 }
 0x1c6   :  { %1145 = vst.msk [vmem:[%s2089_s9 + $0xa8] sm:$0xff] %vm564_vm1, %v1092_v35 }
 0x1cb   :  { %v1094_v36 = vpop.f32.mrf.mxu3 }
 0x1cc   :  { %v1095_v37 = vadd.f32 %v1858_v1, %v1094_v36 }
 0x1ce   :  { %1146 = vst.msk [vmem:[%s2089_s9 + $0xb0] sm:$0xff] %vm564_vm1, %v1095_v37 }
 0x1d3   :  { %v1097_v38 = vpop.f32.mrf.mxu3 }
 0x1d4   :  { %v1098_v39 = vadd.f32 %v1858_v1, %v1097_v38 }
 0x1d6   :  { %1147 = vst.msk [vmem:[%s2089_s9 + $0xb8] sm:$0xff] %vm564_vm1, %v1098_v39 }
 0x1db   :  { %v1100_v40 = vpop.f32.mrf.mxu3 }
 0x1dc   :  { %v1101_v41 = vadd.f32 %v1858_v1, %v1100_v40 }
 0x1de   :  { %1148 = vst.msk [vmem:[%s2089_s9 + $0xc0] sm:$0xff] %vm564_vm1, %v1101_v41 }
 0x1e3   :  { %v1103_v42 = vpop.f32.mrf.mxu3 }
 0x1e4   :  { %v1104_v43 = vadd.f32 %v1858_v1, %v1103_v42 }
 0x1e6   :  { %1149 = vst.msk [vmem:[%s2089_s9 + $0xc8] sm:$0xff] %vm564_vm1, %v1104_v43 }
 0x1eb   :  { %v1106_v44 = vpop.f32.mrf.mxu3 }
 0x1ec   :  { %v1107_v45 = vadd.f32 %v1858_v1, %v1106_v44 }
 0x1ee   :  { %1150 = vst.msk [vmem:[%s2089_s9 + $0xd0] sm:$0xff] %vm564_vm1, %v1107_v45 }
 0x1f3   :  { %v1109_v46 = vpop.f32.mrf.mxu3 }
 0x1f4   :  { %v1110_v47 = vadd.f32 %v1858_v1, %v1109_v46 }
 0x1f6   :  { %1151 = vst.msk [vmem:[%s2089_s9 + $0xd8] sm:$0xff] %vm564_vm1, %v1110_v47 }
 0x1fb   :  { %v1112_v48 = vpop.f32.mrf.mxu3 }
 0x1fc   :  { %v1113_v49 = vadd.f32 %v1858_v1, %v1112_v48 }
 0x1fe   :  { %1152 = vst.msk [vmem:[%s2089_s9 + $0xe0] sm:$0xff] %vm564_vm1, %v1113_v49 }
 0x203   :  { %v1115_v50 = vpop.f32.mrf.mxu3 }
 0x204   :  { %v1116_v51 = vadd.f32 %v1858_v1, %v1115_v50 }
 0x206   :  { %1153 = vst.msk [vmem:[%s2089_s9 + $0xe8] sm:$0xff] %vm564_vm1, %v1116_v51 }
 0x20b   :  { %v1118_v52 = vpop.f32.mrf.mxu3 }
 0x20c   :  { %v1119_v53 = vadd.f32 %v1858_v1, %v1118_v52 }
 0x20e   :  { %1154 = vst.msk [vmem:[%s2089_s9 + $0xf0] sm:$0xff] %vm564_vm1, %v1119_v53 }
 0x213   :  { %v1121_v54 = vpop.f32.mrf.mxu3 }
 0x214   :  { %v1122_v55 = vadd.f32 %v1858_v1, %v1121_v54 }
 0x216   :  { %1155 = vst.msk [vmem:[%s2089_s9 + $0xf8] sm:$0xff] %vm564_vm1, %v1122_v55 }

// kernel: grinet_forward.2
= control target key start
LH: loop header
LB: loop body
LE: loop exit
PB: predicated region body
PF: predicated region fallthrough
CT: control target
= control target key end

     0   :  { %s9935_s0 = inlined_call_operand.vmem [shape: f32[2,8,16,4], index: 0, kind: input, shape index: {}]   ;;  %s9936_s1 = inlined_call_operand.vmem [shape: f32[2,8,16,4], index: 1, kind: input, shape index: {}]   ;;  %s9937_s2 = inlined_call_operand.vmem [shape: f32[32,16], index: 2, kind: input, shape index: {}]   ;;  %s9938_s3 = inlined_call_operand.vmem [shape: f32[32,32], index: 3, kind: input, shape index: {}]   ;;  %s9939_s4 = inlined_call_operand.vmem [shape: f32[2,2,8,16,32], index: 4, kind: input, shape index: {}]   ;;  %s9940_s5 = inlined_call_operand.vmem [shape: f32[2,2,8,16,96], index: 5, kind: input, shape index: {}]   ;;  %s9941_s6 = inlined_call_operand.vmem [shape: f32[2,16,32], index: 6, kind: input, shape index: {}]   ;;  %s9942_s7 = inlined_call_operand.vmem [shape: f32[2,32,4], index: 7, kind: input, shape index: {}]   ;;  %s9943_s8 = inlined_call_operand.vmem [shape: f32[2,1,4], index: 8, kind: input, shape index: {}]   ;;  %s9944_s9 = inlined_call_operand.vmem [shape: f32[2,4,32], index: 9, kind: input, shape index: {}]   ;;  %s9945_s10 = inlined_call_operand.vmem [shape: f32[2,32,32], index: 10, kind: input, shape index: {}]   ;;  %s9946_s11 = inlined_call_operand.vmem [shape: f32[2,64,32], index: 11, kind: input, shape index: {}]   ;;  %s9947_s12 = inlined_call_operand.vmem [shape: f32[2,1,32], index: 12, kind: input, shape index: {}]   ;;  %s9948_s13 = inlined_call_operand.vmem [shape: f32[2,32,32], index: 13, kind: input, shape index: {}]   ;;  %s9949_s14 = inlined_call_operand.vmem [shape: f32[2,32,32], index: 14, kind: input, shape index: {}]   ;;  %s9950_s15 = inlined_call_operand.vmem [shape: f32[2,1,32], index: 15, kind: input, shape index: {}]   ;;  %s9951_s16 = inlined_call_operand.vmem [shape: f32[2,32,4], index: 16, kind: input, shape index: {}]   ;;  %s9952_s17 = inlined_call_operand.vmem [shape: f32[2,32,4], index: 17, kind: input, shape index: {}]   ;;  %s9953_s18 = inlined_call_operand.vmem [shape: f32[2,1,4], index: 18, kind: input, shape index: {}]   ;;  %s9954_s19 = inlined_call_operand.vmem [shape: f32[2,144,96], index: 19, kind: input, shape index: {}]   ;;  %s9955_s20 = inlined_call_operand.vmem [shape: f32[2,128,32], index: 20, kind: input, shape index: {}]   ;;  %s9956_s21 = inlined_call_operand.vmem [shape: f32[2], index: 21, kind: input, shape index: {}]   ;;  %s9957_s22 = inlined_call_operand.vmem [shape: f32[2,2,8,16,64], index: 22, kind: output, shape index: {}]  }
   0x1   :  { %10082 = sst [smem:[#allocation47_spill]] %s9935_s0 }
   0x2   :  { %10083 = sst [smem:[#allocation48_spill]] %s9936_s1 }
   0x3   :  { %10084 = sst [smem:[#allocation49_spill]] %s9937_s2 }
   0x4   :  { %10085 = sst [smem:[#allocation50_spill]] %s9938_s3 }
   0x5   :  { %10086 = sst [smem:[#allocation51_spill]] %s9939_s4 }
   0x6   :  { %10087 = sst [smem:[#allocation52_spill]] %s9940_s5 }
   0x7   :  { %10088 = sst [smem:[#allocation53_spill]] %s9941_s6 }
   0x8   :  { %10089 = sst [smem:[#allocation54_spill]] %s9942_s7 }
   0x9   :  { %10090 = sst [smem:[#allocation55_spill]] %s9943_s8 }
   0xa   :  { %10091 = sst [smem:[#allocation56_spill]] %s9944_s9 }
   0xb   :  { %10092 = sst [smem:[#allocation57_spill]] %s9945_s10 }
   0xc   :  { %10093 = sst [smem:[#allocation58_spill]] %s9946_s11 }
   0xd   :  { %10094 = sst [smem:[#allocation59_spill]] %s9947_s12 }
   0xe   :  { %10095 = sst [smem:[#allocation60_spill]] %s9948_s13 }
   0xf   :  { %10096 = sst [smem:[#allocation61_spill]] %s9949_s14 }
  0x10   :  { %10097 = sst [smem:[#allocation62_spill]] %s9950_s15 }
  0x11   :  { %10098 = sst [smem:[#allocation63_spill]] %s9951_s16 }
  0x12   :  { %10099 = sst [smem:[#allocation64_spill]] %s9952_s17 }
  0x13   :  { %10100 = sst [smem:[#allocation65_spill]] %s9953_s18 }
  0x14   :  { %10101 = sst [smem:[#allocation66_spill]] %s9954_s19 }
  0x15   :  { %10102 = sst [smem:[#allocation67_spill]] %s9955_s20 }
  0x16   :  { %10103 = sst [smem:[#allocation68_spill]] %s9956_s21 }
  0x17   :  { %10104 = sst [smem:[#allocation69_spill]] %s9957_s22 }
  0x18   :  { %27 = vsyncpa [#allocation3], 0  ;;  %s6925_s3 = smov 0   ;;  %s6927_s28 = smov 0  }
  0x19   :  { %s6929_s29 = smov 0   ;;  %s6931_s30 = smov 0  }
  0x1a   :  { %s6933_s4 = smov 0  }
  0x1b LB: > { %10105 = sst [smem:[#allocation5_spill]] %s6791_s29  ;;  %s5889_s0 = sadd.s32 4294967295, %s6799_s4   ;;  %s6799_s4 = sphi %s6933_s4, %s33_s4   ;;  %s6795_s30 = sphi %s6931_s30, %s10321_s30   ;;  %s6791_s29 = sphi %s6929_s29, %s10320_s29   ;;  %s6787_s28 = sphi %s6927_s28, %s10319_s28   ;;  %s6783_s3 = sphi %s6925_s3, %s10318_s3  }
  0x1c   : > { %10106 = sst [smem:[#allocation6_spill]] %s6795_s30  ;;  %s42_s23 = sadd.s32 1, %s6791_s29 }
  0x1d   : > { %10107 = sst [smem:[#allocation7_spill]] %s6799_s4  ;;  %p43_p0 = scmp.ge.s32.totalorder %s42_s23, 2 }
  0x1e   : > { %s45_s1 = sadd.s32 1, %s6795_s30  ;;  %p5891_p1 = scmp.ge.s32.totalorder %s6799_s4, 1 }
  0x1f   : > { %p564_p2 = scmp.lt.s32.totalorder %s6799_s4, 5  ;;  %s10323_s23 = smov (%p43_p0, %s42_s23), 0 }
  0x20   : > { %10108 = sst [smem:[#allocation8_spill]] %s10323_s23  ;;  %s10325_s1 = smov (!%p43_p0, %s45_s1), %s6795_s30 }
  0x21   : > { %p565_p3 = pnand %p5891_p1, %p564_p2  ;;  %p47_p4 = scmp.ge.s32.totalorder %s10325_s1, 2 }
  0x22   : > { %p6327_p5 = scmp.eq.s32.totalorder %s5889_s0, 0  ;;  %s10109_s21 = sld [smem:[#allocation68_spill]] }
  0x23   : > { %p6323_p6 = pneg %p565_p3  ;;  %s10327_s1 = smov (%p47_p4, %s10325_s1), 0 }
  0x24   : > { %10110 = sst [smem:[#allocation9_spill]] %s10327_s1  ;;  %s6801_s25 = smov [#allocation2]  }
  0x25   : > { %p6324_p7 = pnand %p6327_p5, %p6323_p6  ;;  %680 = sbr.rel (%p565_p3) target bundleno = 17927 (0x4607), region = 108 }
  0x28   : > { %s627_s6 = sshll.u32 %s10109_s21, 4  ;;  %s628_s6 = int_to_ptr.vmem [resolvable:$true] %s627_s6 }
  0x29   : > { %6326 = dma.vmem_to_smem (!%p6324_p7), %s628_s6, 16, %s6801_s25, [#allocation3]  }
  0x2a   : > { %6778 = dma.done.wait (%p6327_p5), [#allocation3], 16  }
  0x2b   : > { %6780 = vsyncadd (%p6327_p5), [#allocation3], 4294967280 }
  0x2c   : > { %687 = sfence }
  0x2d   : > { %s6964_s26 = sshll.u32 %s6783_s3, 5  ;;  %s10111_s7 = sld [smem:[#allocation54_spill]]  ;;  %vm922_vm0 = vcmask 261120   ;;  %vm10004_vm1 = vcmask 1043456   ;;  %vm983_vm2 = vcmask 31744   ;;  %vm1022_vm3 = vcmask 130048  }
  0x2e   : > { %s6973_s5 = sshll.u32 %s6783_s3, 4  ;;  %s10114_s8 = sld [smem:[#allocation55_spill]]  ;;  %vm1077_vm4 = vcmask 523264   ;;  %vm1346_vm7 = vcmask 293888   ;;  %vm1349_vm8 = vcmask 588800   ;;  %vm1352_vm9 = vcmask 883712  }
  0x2f   : > { %10113 = sst [smem:[#allocation11_spill]] %s6973_s5  ;;  %p771_p8 = scmp.lt.s32.totalorder %s6787_s28, 1 }
  0x30   : > { %s10116_s10 = sld [smem:[#allocation57_spill]]  ;;  %p781_p9 = scmp.lt.s32.totalorder %s6783_s3, 1 }
  0x31   : > { %s10117_s9 = sld [smem:[#allocation56_spill]]  ;;  %s10329_s28 = smov (!%p771_p8, %s6787_s28), 1 }
  0x32   : > { %s10118_s6 = sld [smem:[#allocation48_spill]] }
  0x33   : > { %s6970_s0 = scalar_lea.vmem %s10111_s7, %s6964_s26  ;;  %s10115_s7 = sld [smem:[#allocation53_spill]] }
  0x34   : > { %10112 = sst [smem:[#allocation10_spill]] %s6970_s0  ;;  %v6976_v0 = vld [vmem:[%s6970_s0 + $0x18] sm:$0xff]  ;;  %v6979_v1 = vld [vmem:[%s6970_s0 + $0x10] sm:$0xff]  ;;  %s6986_s25 = scalar_lea.vmem %s10114_s8, %s6783_s3  ;;  %v6989_v2 = vld [vmem:[%s6970_s0 + $0x8] sm:$0xff] }
  0x35   : > { %941 = vmatpush.msra.mxu0 %v6976_v0  ;;  %v6997_v3 = vld [vmem:[%s6970_s0] sm:$0xff]  ;;  %s6305_s8 = sshll.u32 %s10329_s28, 7  ;;  %s10119_s23 = sld [smem:[#allocation47_spill]] }
  0x36   : > { %s7014_s2 = scalar_lea.vmem %s10116_s10, %s6964_s26  ;;  %v7071_v12 = vld [vmem:[%s6986_s25] ss:$0 sm:$0xff]  ;;  %s5900_s10 = sshll.u32 %s10329_s28, 4 }
  0x37   : > { %942 = vmatpush.msra.mxu0 %v6979_v1  ;;  %v7022_v6 = vld [vmem:[%s7014_s2 + $0x18] sm:$0xff]  ;;  %v7031_v8 = vld [vmem:[%s7014_s2 + $0x10] sm:$0xff]  ;;  %v7035_v9 = vld [vmem:[%s7014_s2 + $0x8] sm:$0xff]  ;;  %s10120_s24 = sld [smem:[#allocation51_spill]]  ;;  %s5912_s28 = sshll.u32 %s6783_s3, 6 }
  0x38   : > { %972 = vmatpush.msra.mxu1 %v7022_v6  ;;  %v7040_v10 = vld [vmem:[%s7014_s2] sm:$0xff]  ;;  %s7057_s27 = scalar_lea.vmem %s10118_s6, %s6305_s8  ;;  %s10122_s11 = sld [smem:[#allocation58_spill]] }
  0x39   : > { %s818_s21 = scalar_lea.vmem %s10115_s7, %s6973_s5  ;;  %943 = vmatpush.msra.mxu0 %v6989_v2  ;;  %s5911_s7 = sshll.u32 %s6783_s3, 2 }
  0x3a   : > { %v7000_v4 = vld [vmem:[%s818_s21] sm:$0xff]  ;;  %v7005_v5 = vld [vmem:[%s818_s21 + $0x8] sm:$0xff]  ;;  %s7019_s1 = scalar_lea.vmem %s10117_s9, %s5911_s7  ;;  %973 = vmatpush.msra.mxu1 %v7031_v8  ;;  %s7050_s21 = smul.u32 112, %s6783_s3 }
  0x3b   : > { %944 = vmatpush.msra.mxu0 %v6997_v3  ;;  %v7025_v7 = vld [vmem:[%s7019_s1] sm:$0xf]  ;;  %s7062_s30 = scalar_lea.vmem %s10119_s23, %s6305_s8  ;;  %s10123_s12 = sld [smem:[#allocation59_spill]] }
  0x3c   : > { %5915 = vmatmul.msk.f32.vlgmr.msra.gmra.mxu0 %vm922_vm0, %v7000_v4  ;;  %5919 = vmatpush.msk.msra.mxu2 %vm10004_vm1, %v7025_v7  ;;  %s916_s29 = scalar_lea.vmem %s7057_s27, %s7050_s21  ;;  %s913_s4 = scalar_lea.vmem %s7062_s30, %s7050_s21 }
  0x3d   : > { %974 = vmatpush.msra.mxu1 %v7035_v9  ;;  %v7068_v11 = vld [vmem:[%s916_s29] sm:$0xff]  ;;  %v7078_v19 = vld [vmem:[%s916_s29 + $0x8] sm:$0xff]  ;;  %s782_s9 = scalar_select %p781_p9, %s6783_s3, 1 }
  0x3e   : > { %v914_v13 = vld [vmem:[%s913_s4] sm:$0xff]  ;;  %v954_v14 = vsub.f32 1.0, %v7068_v11  ;;  %v915_v21 = vld [vmem:[%s913_s4 + $0x8] sm:$0xff]  ;;  %v955_v23 = vsub.f32 1.0, %v7078_v19  ;;  %s10125_s14 = sld [smem:[#allocation61_spill]] }
  0x3f   : > { %975 = vmatpush.msra.mxu1 %v7040_v10  ;;  %v952_v17 = vmul.f32 %v7068_v11, %v914_v13  ;;  %v953_v26 = vmul.f32 %v7078_v19, %v915_v21  ;;  %s5901_s29 = sshll.u32 %s782_s9, 5  ;;  %s10126_s13 = sld [smem:[#allocation60_spill]] }
  0x40   : > { %5917 = vmatmul.msk.f32.vlgmr.msra.gmra.mxu1 %vm922_vm0, %v7000_v4  ;;  %s787_s4 = sadd.s32 %s5901_s29, %s5900_s10  ;;  %s10121_s10 = sld [smem:[#allocation49_spill]] }
  0x41   : > { %s7096_s23 = sshll.u32 %s787_s4, 3  ;;  %s7138_s4 = scalar_lea.vmem %s10122_s11, %s5912_s28 }
  0x42   : > { %s7102_s6 = scalar_lea.vmem %s10120_s24, %s7096_s23  ;;  %v7141_v44 = vld [vmem:[%s7138_s4 + $0x38] sm:$0xff]  ;;  %v7144_v45 = vld [vmem:[%s7138_s4 + $0x30] sm:$0xff]  ;;  %v7149_v46 = vld [vmem:[%s7138_s4 + $0x28] sm:$0xff]  ;;  %s7179_s7 = scalar_lea.vmem %s10123_s12, %s6783_s3 }
  0x43   : > { %s1017_s5 = scalar_lea.vmem %s7102_s6, %s7050_s21  ;;  %1092 = vmatpush.msrb.mxu1 %v7141_v44  ;;  %6307 = vmatpush.msrb.mxu2 %v7141_v44  ;;  %v7154_v47 = vld [vmem:[%s7138_s4 + $0x20] sm:$0xff]  ;;  %v7159_v48 = vld [vmem:[%s7138_s4 + $0x18] sm:$0xff]  ;;  %v7164_v50 = vld [vmem:[%s7138_s4 + $0x10] sm:$0xff]  ;;  %10124 = sst [smem:[#allocation12_spill]] %s7179_s7 }
  0x44   : > { %5916 = vmatmul.msk.f32.gmra.mxu0 %vm922_vm0, %v7005_v5  ;;  %v1019_v34 = vld [vmem:[%s1017_s5 + $0x8] sm:$0xff]  ;;  %v1018_v37 = vld [vmem:[%s1017_s5] sm:$0xff]  ;;  %s9965_s24 = smov 32   ;;  %s7192_s29 = scalar_lea.vmem %s10125_s14, %s6964_s26 }
  0x45   : > { %1093 = vmatpush.msrb.mxu1 %v7144_v45  ;;  %6308 = vmatpush.msrb.mxu2 %v7144_v45  ;;  %v7169_v51 = vld [vmem:[%s7138_s4 + $0x8] sm:$0xff]  ;;  %v7184_v55 = vld [vmem:[%s7138_s4] sm:$0xff]  ;;  %s7198_s11 = scalar_lea.vmem %s10126_s13, %s6964_s26  ;;  %v7201_v56 = vld [vmem:[%s7192_s29 + $0x18] sm:$0xff]  ;;  %s10127_s15 = sld [smem:[#allocation62_spill]] }
  0x46   : > { %v7109_v40 = vld [vmem:[%s10121_s10] sm:$0xff]  ;;  %v7116_v41 = vld [vmem:[%s10121_s10 + $0x8] sm:$0xff]  ;;  %v7123_v42 = vld [vmem:[%s10121_s10 + $0x10] sm:$0xff]  ;;  %1119 = vmatpush.msrb.mxu0 %v7201_v56  ;;  %s10129_s17 = sld [smem:[#allocation64_spill]]  ;;  %s6803_s12 = smov 4  }
  0x47   : > { %v7130_v43 = vld [vmem:[%s10121_s10 + $0x18] sm:$0xff]  ;;  %1094 = vmatpush.msrb.mxu1 %v7149_v46  ;;  %6309 = vmatpush.msrb.mxu2 %v7149_v46  ;;  %v7207_v58 = vld [vmem:[%s7192_s29 + $0x10] sm:$0xff]  ;;  %v7221_v13 = vld [vmem:[%s7192_s29 + $0x8] sm:$0xff]  ;;  %s10131_s16 = sld [smem:[#allocation63_spill]]  ;;  %s873_s14 = smul.u32 144, %s6783_s3 }
  0x48   : > { %5918 = vmatmul.msk.f32.gmra.mxu1 %vm922_vm0, %v7005_v5  ;;  %v7204_v57 = vld [vmem:[%s7198_s11 + $0x18] sm:$0xff]  ;;  %v7212_v59 = vld [vmem:[%s7198_s11 + $0x10] sm:$0xff]  ;;  %1120 = vmatpush.msrb.mxu0 %v7207_v58  ;;  %s10132_s18 = sld [smem:[#allocation65_spill]] }
  0x49   : > { %1095 = vmatpush.msrb.mxu1 %v7154_v47  ;;  %6310 = vmatpush.msrb.mxu2 %v7154_v47  ;;  %s808_s13 = sld [smem:[#allocation2 + %s6783_s3]] }
  0x4a   : > { %1121 = vmatpush.msrb.mxu0 %v7221_v13  ;;  %s10138_s19 = sld [smem:[#allocation66_spill]] }
  0x4b   : > { %1096 = vmatpush.msrb.mxu1 %v7159_v48  ;;  %6311 = vmatpush.msrb.mxu2 %v7159_v48  ;;  %s7232_s5 = scalar_lea.vmem %s10127_s15, %s6783_s3  ;;  %s10156_s20 = sld [smem:[#allocation67_spill]] }
  0x4c   : > { %10128 = sst [smem:[#allocation13_spill]] %s7232_s5  ;;  %s7250_s28 = scalar_lea.vmem %s10129_s17, %s6964_s26 }
  0x4d   : > { %1097 = vmatpush.msrb.mxu1 %v7164_v50  ;;  %6312 = vmatpush.msrb.mxu2 %v7164_v50  ;;  %v7260_v21 = vld [vmem:[%s7250_s28 + $0x8] sm:$0xff]  ;;  %s7275_s8 = scalar_lea.vmem %s10131_s16, %s6964_s26  ;;  %s9994_s16 = smov 36  }
  0x4e   : > { %s7304_s9 = scalar_lea.vmem %s10132_s18, %s6783_s3  ;;  %s10147_s17 = smov 72  }
  0x4f   : > { %1098 = vmatpush.msrb.mxu1 %v7169_v51  ;;  %6313 = vmatpush.msrb.mxu2 %v7169_v51  ;;  %10133 = sst [smem:[#allocation15_spill]] %s7304_s9  ;;  %s7700_s26 = smul.u32 80, %s6783_s3 }
  0x50   : > { %s7391_s18 = scalar_lea.vmem %s10138_s19, %s873_s14  ;;  %s10155_s14 = sld [smem:[#allocation52_spill]] }
  0x51   : > { %1099 = vmatpush.msrb.mxu1 %v7184_v55  ;;  %6314 = vmatpush.msrb.mxu2 %v7184_v55  ;;  %s10159_s22 = sld [smem:[#allocation69_spill]]  ;;  %s10180_s19 = smov 36  }
  0x53   : > { %1148 = vmatpush.msra.mxu1 %v7204_v57 }
  0x55   : > { %1149 = vmatpush.msra.mxu1 %v7212_v59 }
  0x56   : > { %s7490_s15 = scalar_lea.vmem %s10155_s14, %s7096_s23 }
  0xb9   : > { %v946_v15 = vpop.f32.mrf.mxu0 }
  0xba   : > { %v947_v16 = vadd.f32 %v7071_v12, %v946_v15  ;;  %v7224_v15 = vld [vmem:[%s7198_s11 + $0x8] sm:$0xff] }
  0xbb   : > { %1150 = vmatpush.msra.mxu1 %v7224_v15 }
  0xbc   : > { %v956_v18 = vmul.f32 %v954_v14, %v947_v16  ;;  %v7235_v16 = vld [vmem:[%s7192_s29] sm:$0xff] }
  0xbd   : > { %v977_v30 = vpop.f32.mrf.mxu1  ;;  %1122 = vmatpush.msrb.mxu0 %v7235_v16 }
  0xbe   : > { %v958_v20 = vadd.f32 %v956_v18, %v952_v17  ;;  %v7238_v17 = vld [vmem:[%s7198_s11] sm:$0xff]  ;;  %5928 = vmatmul.msk.f32.vlgmr.msrb.gmra.mxu0 %vm922_vm0, %v7000_v4  ;;  %v7253_v18 = vld [vmem:[%s7250_s28 + $0x18] sm:$0xff] }
  0xbf   : > { %1151 = vmatpush.msra.mxu1 %v7238_v17 }
  0xc0   : > { %5920 = vmatmul.msk.f32.vlgmr.msra.gmra.mxu2 %vm983_vm2, %v958_v20  ;;  %v7082_v22 = vmul.f32 %v958_v20, %v7068_v11  ;;  %v7256_v20 = vld [vmem:[%s7250_s28 + $0x10] sm:$0xff] }
  0xc1   : > { %v949_v24 = vpop.f32.mrf.mxu0  ;;  %1183 = vmatpush.msra.mxu2 %v7253_v18 }
  0xc2   : > { %v950_v25 = vadd.f32 %v7071_v12, %v949_v24  ;;  %v7265_v24 = vld [vmem:[%s7179_s7] ss:$0 sm:$0xff] }
  0xc3   : > { %1184 = vmatpush.msra.mxu2 %v7256_v20  ;;  %10130 = vst [vmem:[#allocation14_spill] sm:$0xff] %v7265_v24 }
  0xc4   : > { %v957_v27 = vmul.f32 %v955_v23, %v950_v25 }
  0xc5   : > { %v980_v32 = vpop.f32.mrf.mxu1  ;;  %1185 = vmatpush.msra.mxu2 %v7260_v21 }
  0xc6   : > { %v959_v28 = vadd.f32 %v957_v27, %v953_v26  ;;  %5929 = vmatmul.msk.f32.gmra.mxu0 %vm922_vm0, %v7005_v5 }
  0xc8   : > { %5921 = vmatmul.msk.f32.gmra.mxu2 %vm983_vm2, %v959_v28  ;;  %v7091_v29 = vmul.f32 %v959_v28, %v7078_v19 }
 0x143   : > { %v1011_v31 = vpop.f32.mrf.mxu2 }
 0x144   : > { %v1012_v35 = vadd.f32 %v1011_v31, %v977_v30  ;;  %v7278_v30 = vld [vmem:[%s7250_s28] sm:$0xff]  ;;  %v7281_v31 = vld [vmem:[%s7275_s8 + $0x18] sm:$0xff] }
 0x145   : > { %1186 = vmatpush.msra.mxu2 %v7278_v30  ;;  %1212 = vmatpush.msra.mxu0 %v7281_v31 }
 0x146   : > { %v1020_v39 = vadd.f32 %v1018_v37, %v1012_v35  ;;  %v6378_v35 = vpack.i.bf16 %v7000_v4, %v7005_v5  ;;  %v7315_v37 = vld [vmem:[%s7232_s5] ss:$0 sm:$0xff] }
 0x147   : > { %10134 = vst [vmem:[#allocation16_spill] sm:$0xff] %v7315_v37 }
 0x148   : > { %6379 = vrot.lane.b32.xlu1 %v6378_v35, %s6803_s12  ;;  %s9971_s12 = smov 72  }
 0x14b   : > { %v1014_v33 = vpop.f32.mrf.mxu2 }
 0x14c   : > { %v1015_v36 = vadd.f32 %v1014_v33, %v980_v32  ;;  %v7288_v32 = vld [vmem:[%s7275_s8 + $0x10] sm:$0xff]  ;;  %v7293_v33 = vld [vmem:[%s7275_s8 + $0x8] sm:$0xff] }
 0x14d   : > { %1213 = vmatpush.msra.mxu0 %v7288_v32 }
 0x14e   : > { %v1021_v38 = vadd.f32 %v1019_v34, %v1015_v36  ;;  %v7298_v34 = vld [vmem:[%s7275_s8] sm:$0xff]  ;;  %v1124_v36 = vpop.f32.mrf.mxu0 }
 0x14f   : > { %1214 = vmatpush.msra.mxu0 %v7293_v33 }
 0x150   : > { %1049 = vmatpush.msra.mxu3 %v1021_v38 }
 0x151   : > { %1215 = vmatpush.msra.mxu0 %v7298_v34 }
 0x152   : > { %1050 = vmatpush.msra.mxu3 %v1020_v39 }
 0x153   : > { %5922 = vmatmul.msk.f32.vlgmr.msra.gmra.mxu3 %vm1022_vm3, %v7109_v40 }
 0x154   : > { %6315 = vmatpush.msrb.mxu3 %v7281_v31 }
 0x156   : > { %6316 = vmatpush.msrb.mxu3 %v7288_v32 }
 0x158   : > { %6317 = vmatpush.msrb.mxu3 %v7293_v33 }
 0x15a   : > { %6318 = vmatpush.msrb.mxu3 %v7298_v34 }
 0x15b   : > { %5923 = vmatmul.msk.f32.gmra.mxu3 %vm1022_vm3, %v7116_v41 }
 0x163   : > { %5924 = vmatmul.msk.f32.gmra.mxu3 %vm1022_vm3, %v7123_v42 }
 0x16b   : > { %5925 = vmatmul.msk.f32.gmra.mxu3 %vm1022_vm3, %v7130_v43 }
 0x1d6   : > { %v1052_v49 = vpop.f32.mrf.mxu3 }
 0x1de   : > { %v1055_v52 = vpop.f32.mrf.mxu3 }
 0x1e6   : > { %v1058_v53 = vpop.f32.mrf.mxu3 }
 0x1e7   : > { %1066 = vrot.lane.b32.xlu0 %v1058_v53, %s9965_s24 }
 0x1ee   : > { %v1061_v54 = vpop.f32.mrf.mxu3 }
 0x1ef   : > { %1068 = vrot.lane.b32.xlu0 %v1061_v54, %s9965_s24  ;;  %s10137_s24 = sld [smem:[#allocation50_spill]] }
 0x259   : > { %v1067_v60 = vpop.permute.xlu0 %1066 }
 0x25a   : > { %v1072_v61 = vsel %vm922_vm0, %v1052_v49, %v1067_v60  ;;  %v7317_v49 = vstv %s808_s13  ;;  %v1127_v60 = vpop.f32.mrf.mxu0  ;;  %s9998_s13 = smov 100  }
 0x25b   : > { %5926 = vmatmul.msk.f32.vlgmr.msrb.gmra.mxu1 %vm1077_vm4, %v1072_v61  ;;  %10135 = vst [vmem:[#allocation17_spill] sm:$0xff] %v7317_v49 }
 0x261   : > { %v1069_v62 = vpop.permute.xlu0 %1068 }
 0x262   : > { %v1073_v63 = vsel %vm922_vm0, %v1055_v52, %v1069_v62 }
 0x263   : > { %5927 = vmatmul.msk.f32.vlgmr.msrb.gmra.mxu2 %vm1077_vm4, %v1073_v63 }
 0x26b   : > { %5932 = vmatmul.msk.f32.vlgmr.msra.gmra.mxu2 %vm922_vm0, %v7000_v4 }
 0x273   : > { %5933 = vmatmul.msk.f32.gmra.mxu2 %vm922_vm0, %v7005_v5 }
 0x2d8   : > { %v1101_v25 = vpop.f32.mrf.mxu1 }
 0x2d9   : > { %v1102_v26 = vadd.f32 %v7265_v24, %v1101_v25 }
 0x2db   : > { %5930 = vmatmul.msk.f32.vlgmr.msra.gmra.mxu1 %vm922_vm0, %v1102_v26 }
 0x2e6   : > { %v1104_v27 = vpop.f32.mrf.mxu2 }
 0x2e7   : > { %v1105_v28 = vadd.f32 %v7265_v24, %v1104_v27  ;;  %v7448_v24 = vld [vmem:[%s7391_s18 + $0x18] sm:$0xff] }
 0x2e8   : > { %10151 = vst [vmem:[#allocation30_spill] sm:$0xff] %v7448_v24 }
 0x2e9   : > { %5931 = vmatmul.msk.f32.gmra.mxu1 %vm922_vm0, %v1105_v28 }
 0x2ee   : > { %v1188_v27 = vpop.f32.mrf.mxu2 }
 0x358   : > { %v1153_v38 = vpop.f32.mrf.mxu1 }
 0x359   : > { %v1154_v39 = vadd.f32 %v1153_v38, %v1124_v36  ;;  %v7332_v36 = vld [vmem:[%s7304_s9] ss:$0 sm:$0xff]  ;;  %v1191_v38 = vpop.f32.mrf.mxu2 }
 0x35a   : > { %10136 = vst [vmem:[#allocation18_spill] sm:$0xff] %v7332_v36 }
 0x35b   : > { %v1162_v52 = vadd.f32 %v7315_v37, %v1154_v39 }
 0x35d   : > { %v1167_v53 = vmul.f32 %v7317_v49, %v1162_v52  ;;  %vm1164_vm5 = vcmp.ge.f32.partialorder %v1162_v52, 0.0 }
 0x35f   : > { %v7321_v54 = vsel %vm1164_vm5, %v1162_v52, %v1167_v53 }
 0x360   : > { %5934 = vmatmul.msk.f32.vlgmr.msra.gmra.mxu0 %vm922_vm0, %v7321_v54 }
 0x366   : > { %v1156_v61 = vpop.f32.mrf.mxu1 }
 0x367   : > { %v1157_v62 = vadd.f32 %v1156_v61, %v1127_v60 }
 0x369   : > { %v1163_v63 = vadd.f32 %v7315_v37, %v1157_v62  ;;  %v6380_v62 = vpop.permute.xlu1 %6379 }
 0x36b   : > { %vm1165_vm6 = vcmp.ge.f32.partialorder %v1163_v63, 0.0  ;;  %v1168_v25 = vmul.f32 %v7317_v49, %v1163_v63  ;;  %v6382_v49 = vunpack.i.h.bf16 %v6380_v62 }
 0x36d   : > { %v7327_v26 = vsel %vm1165_vm6, %v1163_v63, %v1168_v25  ;;  %v6381_v63 = vunpack.i.l.bf16 %v6380_v62 }
 0x36e   : > { %5935 = vmatmul.msk.f32.vlgmr.msrb.gmra.mxu3 %vm922_vm0, %v7327_v26 }
 0x3dd   : > { %v1217_v28 = vpop.f32.mrf.mxu0 }
 0x3de   : > { %v1218_v35 = vadd.f32 %v1217_v28, %v1188_v27 }
 0x3e0   : > { %v1226_v39 = vadd.f32 %v7332_v36, %v1218_v35 }
 0x3e2   : > { %v1240_v60 = vmul.f32 %v1226_v39, %v954_v14  ;;  %v7397_v39 = vld [vmem:[%s7391_s18 + $0x70] sm:$0xff] }
 0x3e3   : > { %10139 = vst [vmem:[#allocation19_spill] sm:$0xff] %v7397_v39 }
 0x3e4   : > { %v1242_v28 = vadd.f32 %v1240_v60, %v7082_v22  ;;  %v7408_v60 = vld [vmem:[%s7391_s18 + $0x88] sm:$0xff] }
 0x3e5   : > { %1399 = vmatpush.msra.mxu3 %v7408_v60 }
 0x3e6   : > { %v1250_v35 = vsel %vm983_vm2, %v1242_v28, %v6382_v49  ;;  %v7383_v49 = vld [vmem:[%s10137_s24 + $0x18] sm:$0xff] }
 0x3e7   : > { %v7430_v28 = vld [vmem:[%s7391_s18 + $0x38] sm:$0xff] }
 0x3e8   : > { %10146 = vst [vmem:[#allocation26_spill] sm:$0xff] %v7430_v28 }
 0x3f1   : > { %v1220_v52 = vpop.f32.mrf.mxu3 }
 0x3f2   : > { %v1221_v53 = vadd.f32 %v1220_v52, %v1191_v38  ;;  %v7394_v38 = vld [vmem:[%s7391_s18 + $0x78] sm:$0xff]  ;;  %v7401_v52 = vld [vmem:[%s7391_s18 + $0x68] sm:$0xff] }
 0x3f3   : > { %1362 = vmatpush.msrb.mxu2 %v7394_v38  ;;  %10140 = vst [vmem:[#allocation20_spill] sm:$0xff] %v7401_v52 }
 0x3f4   : > { %v1227_v61 = vadd.f32 %v7332_v36, %v1221_v53  ;;  %v7405_v53 = vld [vmem:[%s7391_s18 + $0x60] sm:$0xff] }
 0x3f5   : > { %1363 = vmatpush.msrb.mxu2 %v7397_v39  ;;  %10141 = vst [vmem:[#allocation21_spill] sm:$0xff] %v7405_v53  ;;  %v7444_v36 = vld [vmem:[%s7391_s18 + $0x20] sm:$0xff] }
 0x3f6   : > { %v1241_v25 = vmul.f32 %v1227_v61, %v955_v23  ;;  %v7361_v23 = vld [vmem:[%s10137_s24] sm:$0xff]  ;;  %v7413_v61 = vld [vmem:[%s7391_s18 + $0x58] sm:$0xff]  ;;  %10150 = vst [vmem:[#allocation29_spill] sm:$0xff] %v7444_v36 }
 0x3f7   : > { %1364 = vmatpush.msrb.mxu2 %v7401_v52  ;;  %10142 = vst [vmem:[#allocation22_spill] sm:$0xff] %v7413_v61 }
 0x3f8   : > { %v1243_v27 = vadd.f32 %v1241_v25, %v7091_v29  ;;  %v7369_v29 = vld [vmem:[%s10137_s24 + $0x8] sm:$0xff] }
 0x3f9   : > { %1365 = vmatpush.msrb.mxu2 %v7405_v53  ;;  %v7422_v25 = vld [vmem:[%s7391_s18 + $0x48] sm:$0xff] }
 0x3fa   : > { %v1251_v37 = vsel %vm983_vm2, %v1243_v27, %v6381_v63  ;;  %v7418_v63 = vld [vmem:[%s7391_s18 + $0x50] sm:$0xff]  ;;  %10144 = vst [vmem:[#allocation24_spill] sm:$0xff] %v7422_v25  ;;  %v7426_v27 = vld [vmem:[%s7391_s18 + $0x40] sm:$0xff] }
 0x3fb   : > { %1266 = vmatpush.msrb.mxu0 %v1251_v37  ;;  %v7376_v37 = vld [vmem:[%s10137_s24 + $0x10] sm:$0xff]  ;;  %10143 = vst [vmem:[#allocation23_spill] sm:$0xff] %v7418_v63  ;;  %1366 = vmatpush.msrb.mxu2 %v7413_v61 }
 0x3fc   : > { %10145 = vst [vmem:[#allocation25_spill] sm:$0xff] %v7426_v27 }
 0x3fd   : > { %1267 = vmatpush.msrb.mxu0 %v1250_v35  ;;  %1367 = vmatpush.msrb.mxu2 %v7418_v63 }
 0x3fe   : > { %5936 = vmatmul.msk.f32.vlgmr.msrb.gmra.mxu0 %vm1022_vm3, %v7109_v40 }
 0x3ff   : > { %1368 = vmatpush.msrb.mxu2 %v7422_v25 }
 0x401   : > { %1369 = vmatpush.msrb.mxu2 %v7426_v27 }
 0x403   : > { %1370 = vmatpush.msrb.mxu2 %v7430_v28  ;;  %v7459_v28 = vld [vmem:[%s7391_s18 + $0x8] sm:$0xff] }
 0x404   : > { %10153 = vst [vmem:[#allocation32_spill] sm:$0xff] %v7459_v28 }
 0x406   : > { %5937 = vmatmul.msk.f32.gmra.mxu0 %vm1022_vm3, %v7116_v41 }
 0x40e   : > { %5938 = vmatmul.msk.f32.gmra.mxu0 %vm1022_vm3, %v7123_v42 }
 0x416   : > { %5939 = vmatmul.msk.f32.gmra.mxu0 %vm1022_vm3, %v7130_v43 }
 0x47b   : > { %v7352_v11 = vpop.f32.mrf.mxu0 }
 0x483   : > { %v7354_v14 = vpop.f32.mrf.mxu0 }
 0x48b   : > { %v1275_v19 = vpop.f32.mrf.mxu0 }
 0x48c   : > { %1332 = vrot.lane.b32.xlu2 %v1275_v19, %s9971_s12  ;;  %s9987_s12 = smov 108  }
 0x493   : > { %v1278_v22 = vpop.f32.mrf.mxu0 }
 0x494   : > { %1305 = vmatpush.msrb.mxu1 %v1278_v22 }
 0x496   : > { %1306 = vmatpush.msrb.mxu1 %v1275_v19  ;;  %v7436_v19 = vld [vmem:[%s7391_s18 + $0x30] sm:$0xff] }
 0x497   : > { %10148 = vst [vmem:[#allocation27_spill] sm:$0xff] %v7436_v19  ;;  %1371 = vmatpush.msrb.mxu2 %v7436_v19 }
 0x498   : > { %1307 = vmatpush.msrb.mxu1 %v7354_v14 }
 0x49a   : > { %1308 = vmatpush.msrb.mxu1 %v7352_v11 }
 0x49b   : > { %5940 = vmatmul.msk.f32.vlgmr.msrb.gmra.mxu1 %vm922_vm0, %v7361_v23 }
 0x4a3   : > { %5941 = vmatmul.msk.f32.gmra.mxu1 %vm922_vm0, %v7369_v29 }
 0x4ab   : > { %5942 = vmatmul.msk.f32.gmra.mxu1 %vm922_vm0, %v7376_v37 }
 0x4b3   : > { %5943 = vmatmul.msk.f32.gmra.mxu1 %vm922_vm0, %v7383_v49 }
 0x518   : > { %v1310_v62 = vpop.f32.mrf.mxu1 }
 0x519   : > { %1324 = vrot.lane.b32.xlu1 %v1310_v62, %s9994_s16  ;;  %v7440_v62 = vld [vmem:[%s7391_s18 + $0x28] sm:$0xff] }
 0x51a   : > { %10149 = vst [vmem:[#allocation28_spill] sm:$0xff] %v7440_v62  ;;  %1372 = vmatpush.msrb.mxu2 %v7440_v62  ;;  %v7463_v62 = vld [vmem:[%s7391_s18 + $0x80] sm:$0xff] }
 0x51b   : > { %1400 = vmatpush.msra.mxu3 %v7463_v62 }
 0x51c   : > { %1373 = vmatpush.msrb.mxu2 %v7444_v36  ;;  %v7467_v36 = vld [vmem:[%s7391_s18] sm:$0xff] }
 0x51d   : > { %10154 = vst [vmem:[#allocation33_spill] sm:$0xff] %v7467_v36 }
 0x51e   : > { %1374 = vmatpush.msrb.mxu2 %v7448_v24 }
 0x520   : > { %v1313_v35 = vpop.f32.mrf.mxu1 }
 0x521   : > { %1334 = vrot.lane.b32.xlu1 %v1278_v22, %s10147_s17  ;;  %1326 = vrot.lane.b32.xlu0 %v1313_v35, %s9994_s16  ;;  %v7453_v35 = vld [vmem:[%s7391_s18 + $0x10] sm:$0xff]  ;;  %s10158_s16 = smov 32  }
 0x522   : > { %10152 = vst [vmem:[#allocation31_spill] sm:$0xff] %v7453_v35  ;;  %1375 = vmatpush.msrb.mxu2 %v7453_v35 }
 0x524   : > { %1376 = vmatpush.msrb.mxu2 %v7459_v28 }
 0x526   : > { %1377 = vmatpush.msrb.mxu2 %v7467_v36 }
 0x528   : > { %v1316_v22 = vpop.f32.mrf.mxu1  ;;  %1619 = vmatpush.msra.mxu2 %v6976_v0 }
 0x529   : > { %1340 = vrot.lane.b32.xlu2 %v1316_v22, %s9987_s12 }
 0x52a   : > { %1620 = vmatpush.msra.mxu2 %v6979_v1 }
 0x52c   : > { %1621 = vmatpush.msra.mxu2 %v6989_v2 }
 0x52e   : > { %1622 = vmatpush.msra.mxu2 %v6997_v3 }
 0x530   : > { %v1319_v19 = vpop.f32.mrf.mxu1 }
 0x531   : > { %1342 = vrot.lane.b32.xlu2 %v1319_v19, %s9987_s12  ;;  %v1333_v19 = vpop.permute.xlu2 %1332  ;;  %s1355_s12 = scalar_lea.vmem %s7490_s15, %s7050_s21  ;;  %s10000_s21 = smov 64  }
 0x583   : > { %v1341_v22 = vpop.permute.xlu2 %1340 }
 0x584   : > { %5944 = vmatmul.msk.f32.vlgmr.msra.gmra.mxu3 %vm1022_vm3, %v1341_v22 }
 0x58b   : > { %v1325_v28 = vpop.permute.xlu1 %1324  ;;  %v1343_v35 = vpop.permute.xlu2 %1342 }
 0x58c   : > { %v1347_v0 = vsel %vm1346_vm7, %v7352_v11, %v1325_v28  ;;  %5945 = vmatmul.msk.f32.gmra.mxu3 %vm1022_vm3, %v1343_v35  ;;  %v1356_v11 = vld [vmem:[%s1355_s12] sm:$0xff] }
 0x58d   : > { %v1350_v1 = vsel %vm1349_vm8, %v1347_v0, %v1333_v19 }
 0x58e   : > { %v1353_v2 = vsel %vm1352_vm9, %v1350_v1, %v1341_v22 }
 0x58f   : > { %1378 = vmatmul.f32.vlgmr.msrb.gmra.mxu2 %v1353_v2 }
 0x590   : > { %5966 = vmatpush.msk.msrb.mxu2 %vm10004_vm1, %v7025_v7 }
 0x593   : > { %v1335_v3 = vpop.permute.xlu1 %1334  ;;  %v1327_v36 = vpop.permute.xlu0 %1326 }
 0x594   : > { %v1348_v24 = vsel %vm1346_vm7, %v7354_v14, %v1327_v36  ;;  %v1357_v14 = vld [vmem:[%s1355_s12 + $0x8] sm:$0xff]  ;;  %s5913_s12 = sshll.u32 %s6783_s3, 7 }
 0x595   : > { %v1351_v27 = vsel %vm1349_vm8, %v1348_v24, %v1335_v3  ;;  %s7548_s14 = scalar_lea.vmem %s10156_s20, %s5913_s12  ;;  %s9996_s12 = smov 96  }
 0x596   : > { %v1354_v25 = vsel %vm1352_vm9, %v1351_v27, %v1343_v35  ;;  %10157 = sst [smem:[#allocation34_spill]] %s7548_s14  ;;  %s10181_s20 = smov 108  }
 0x597   : > { %1381 = vmatmul.f32.gmra.mxu2 %v1354_v25 }
 0x607   : > { %v1402_v28 = vpop.f32.mrf.mxu3 }
 0x60f   : > { %v1405_v25 = vpop.f32.mrf.mxu3 }
 0x612   : > { %v1379_v7 = vpop.f32.mrf.mxu2 }
 0x613   : > { %v1380_v19 = vadd.f32 %v1379_v7, %v1356_v11 }
 0x615   : > { %v7494_v22 = vadd.f32 %v1402_v28, %v1380_v19 }
 0x617   : > { %v5946_v36 = vmul.f32 -1.442695, %v7494_v22 }
 0x619   : > { %6417 = vpow2.f32 %v5946_v36 }
 0x61a   : > { %v1382_v24 = vpop.f32.mrf.mxu2 }
 0x61b   : > { %v1383_v27 = vadd.f32 %v1382_v24, %v1357_v14 }
 0x61d   : > { %v7497_v35 = vadd.f32 %v1405_v25, %v1383_v27 }
 0x61f   : > { %v6418_v0 = vpop.eup %6417  ;;  %v5947_v1 = vmul.f32 -1.442695, %v7497_v35 }
 0x620   : > { %v1414_v2 = vadd.f32 1.0, %v6418_v0 }
 0x621   : > { %6419 = vpow2.f32 %v5947_v1 }
 0x622   : > { %6421 = vrcp.f32 %v1414_v2  ;;  %vm1421_vm11 = vweird.f32 %v1414_v2  ;;  %v1427_v27 = vand.u32 2147483648, %v1414_v2  ;;  %v1425_v1 = vand.u32 2147483647, %v1414_v2 }
 0x624   : > { %vm1426_vm6 = vcmp.eq.f32.partialorder %v1425_v1, 8.507059e+37  ;;  %v7613_v1 = vld [vmem:[%s7548_s14 + $0x8] sm:$0xff] }
 0x627   : > { %v6420_v3 = vpop.eup %6419 }
 0x628   : > { %v6422_v63 = vpop.eup %6421  ;;  %v1415_v11 = vadd.f32 1.0, %v6420_v3 }
 0x629   : > { %v1417_v28 = vmul.f32 %v6422_v63, %v1414_v2  ;;  %vm1422_vm10 = vweird.f32 %v6422_v63 }
 0x62a   : > { %6423 = vrcp.f32 %v1415_v11  ;;  %v1442_v24 = vand.u32 2147483648, %v1415_v11  ;;  %v1440_v0 = vand.u32 2147483647, %v1415_v11  ;;  %vm1423_vm13 = vmor %vm1421_vm11, %vm1422_vm10  ;;  %vm1436_vm14 = vweird.f32 %v1415_v11 }
 0x62b   : > { %v1418_v7 = vsub.f32 1.0, %v1417_v28  ;;  %v1428_v28 = vor.u32 1.1754944e-38, %v1427_v27  ;;  %v7600_v27 = vld [vmem:[%s7548_s14 + $0x20] sm:$0xff]  ;;  %vm1534_vm10 = vcmask 785408  }
 0x62c   : > { %v1443_v39 = vor.u32 1.1754944e-38, %v1442_v24  ;;  %vm1441_vm5 = vcmp.eq.f32.partialorder %v1440_v0, 8.507059e+37  ;;  %v7597_v24 = vld [vmem:[%s7548_s14 + $0x28] sm:$0xff]  ;;  %v7608_v0 = vld [vmem:[%s7548_s14 + $0x10] sm:$0xff] }
 0x62d   : > { %v1419_v19 = vmul.f32 %v6422_v63, %v1418_v7 }
 0x62f   : > { %v1420_v14 = vadd.f32 %v6422_v63, %v1419_v19 }
 0x630   : > { %v6424_v61 = vpop.eup %6423 }
 0x631   : > { %v1432_v36 = vmul.f32 %v6424_v61, %v1415_v11  ;;  %vm1437_vm12 = vweird.f32 %v6424_v61  ;;  %v1424_v3 = vsel %vm1423_vm13, %v6422_v63, %v1420_v14  ;;  %v7589_v11 = vld [vmem:[%s7548_s14 + $0x30] sm:$0xff] }
 0x632   : > { %vm1438_vm15 = vmor %vm1436_vm14, %vm1437_vm12  ;;  %v7502_v19 = vsel %vm1426_vm6, %v1428_v28, %v1424_v3 }
 0x633   : > { %v1433_v53 = vsub.f32 1.0, %v1432_v36  ;;  %v1446_v2 = vmul.f32 %v7502_v19, %v7000_v4 }
 0x635   : > { %v1434_v25 = vmul.f32 %v6424_v61, %v1433_v53 }
 0x637   : > { %v1435_v52 = vadd.f32 %v6424_v61, %v1434_v25  ;;  %v7604_v25 = vld [vmem:[%s7548_s14 + $0x18] sm:$0xff] }
 0x639   : > { %v1439_v7 = vsel %vm1438_vm15, %v6424_v61, %v1435_v52 }
 0x63a   : > { %v7500_v36 = vsel %vm1441_vm5, %v1443_v39, %v1439_v7 }
 0x63b   : > { %v1447_v53 = vmul.f32 %v7500_v36, %v7005_v5 }
 0x63d   : > { %1462 = vmatpush.msrb.mxu3 %v1447_v53 }
 0x63f   : > { %1463 = vmatpush.msrb.mxu3 %v1446_v2 }
 0x640   : > { %5948 = vmatmul.msk.f32.vlgmr.msrb.gmra.mxu3 %vm1022_vm3, %v7109_v40 }
 0x648   : > { %5949 = vmatmul.msk.f32.gmra.mxu3 %vm1022_vm3, %v7116_v41 }
 0x650   : > { %5950 = vmatmul.msk.f32.gmra.mxu3 %vm1022_vm3, %v7123_v42 }
 0x658   : > { %5951 = vmatmul.msk.f32.gmra.mxu3 %vm1022_vm3, %v7130_v43 }
 0x6c3   : > { %v7516_v39 = vpop.f32.mrf.mxu3 }
 0x6cb   : > { %v7518_v52 = vpop.f32.mrf.mxu3 }
 0x6d3   : > { %v1471_v61 = vpop.f32.mrf.mxu3 }
 0x6d4   : > { %1516 = vrot.lane.b32.xlu1 %v1471_v61, %s10000_s21 }
 0x6db   : > { %v1474_v63 = vpop.f32.mrf.mxu3 }
 0x6dc   : > { %1518 = vrot.lane.b32.xlu1 %v1474_v63, %s10000_s21  ;;  %1489 = vmatpush.msra.mxu0 %v1474_v63 }
 0x6de   : > { %1490 = vmatpush.msra.mxu0 %v1471_v61 }
 0x6e0   : > { %1491 = vmatpush.msra.mxu0 %v7518_v52 }
 0x6e2   : > { %1492 = vmatpush.msra.mxu0 %v7516_v39 }
 0x6e3   : > { %5952 = vmatmul.msk.f32.vlgmr.msra.gmra.mxu0 %vm922_vm0, %v7361_v23 }
 0x6e4   : > { %1748 = vmatpush.msrb.mxu0 %v7141_v44 }
 0x6e6   : > { %1749 = vmatpush.msrb.mxu0 %v7144_v45  ;;  %v7552_v45 = vld [vmem:[%s7548_s14 + $0x78] sm:$0xff] }
 0x6e7   : > { %1537 = vmatpush.msra.mxu1 %v7552_v45 }
 0x6e8   : > { %1750 = vmatpush.msrb.mxu0 %v7149_v46  ;;  %v7555_v46 = vld [vmem:[%s7548_s14 + $0x70] sm:$0xff] }
 0x6e9   : > { %1538 = vmatpush.msra.mxu1 %v7555_v46 }
 0x6ea   : > { %1751 = vmatpush.msrb.mxu0 %v7154_v47  ;;  %v7559_v47 = vld [vmem:[%s7548_s14 + $0x68] sm:$0xff] }
 0x6eb   : > { %5953 = vmatmul.msk.f32.gmra.mxu0 %vm922_vm0, %v7369_v29  ;;  %1539 = vmatpush.msra.mxu1 %v7559_v47 }
 0x6ec   : > { %1752 = vmatpush.msrb.mxu0 %v7159_v48  ;;  %v7563_v48 = vld [vmem:[%s7548_s14 + $0x60] sm:$0xff] }
 0x6ed   : > { %1540 = vmatpush.msra.mxu1 %v7563_v48 }
 0x6ee   : > { %1753 = vmatpush.msrb.mxu0 %v7164_v50  ;;  %v7567_v50 = vld [vmem:[%s7548_s14 + $0x58] sm:$0xff] }
 0x6ef   : > { %1541 = vmatpush.msra.mxu1 %v7567_v50 }
 0x6f0   : > { %1754 = vmatpush.msrb.mxu0 %v7169_v51 }
 0x6f2   : > { %1755 = vmatpush.msrb.mxu0 %v7184_v55  ;;  %v7572_v55 = vld [vmem:[%s7548_s14 + $0x50] sm:$0xff] }
 0x6f3   : > { %5954 = vmatmul.msk.f32.gmra.mxu0 %vm922_vm0, %v7376_v37  ;;  %1542 = vmatpush.msra.mxu1 %v7572_v55 }
 0x6f4   : > { %1835 = vmatpush.msra.mxu0 %v7253_v18  ;;  %v7576_v18 = vld [vmem:[%s7548_s14 + $0x48] sm:$0xff] }
 0x6f5   : > { %1543 = vmatpush.msra.mxu1 %v7576_v18 }
 0x6f6   : > { %1836 = vmatpush.msra.mxu0 %v7256_v20  ;;  %v7580_v20 = vld [vmem:[%s7548_s14 + $0x40] sm:$0xff] }
 0x6f7   : > { %1544 = vmatpush.msra.mxu1 %v7580_v20 }
 0x6f8   : > { %1837 = vmatpush.msra.mxu0 %v7260_v21  ;;  %v7584_v21 = vld [vmem:[%s7548_s14 + $0x38] sm:$0xff] }
 0x6f9   : > { %1545 = vmatpush.msra.mxu1 %v7584_v21 }
 0x6fa   : > { %1838 = vmatpush.msra.mxu0 %v7278_v30 }
 0x6fb   : > { %5955 = vmatmul.msk.f32.gmra.mxu0 %vm922_vm0, %v7383_v49  ;;  %1546 = vmatpush.msra.mxu1 %v7589_v11 }
 0x6fd   : > { %1547 = vmatpush.msra.mxu1 %v7597_v24 }
 0x6ff   : > { %1548 = vmatpush.msra.mxu1 %v7600_v27 }
 0x701   : > { %1549 = vmatpush.msra.mxu1 %v7604_v25 }
 0x703   : > { %1550 = vmatpush.msra.mxu1 %v7608_v0 }
 0x705   : > { %1551 = vmatpush.msra.mxu1 %v7613_v1 }
 0x746   : > { %v1517_v28 = vpop.permute.xlu1 %1516 }
 0x760   : > { %v1494_v44 = vpop.f32.mrf.mxu0 }
 0x761   : > { %1508 = vrot.lane.b32.xlu0 %v1494_v44, %s10158_s16 }
 0x768   : > { %v1497_v51 = vpop.f32.mrf.mxu0 }
 0x769   : > { %1510 = vrot.lane.b32.xlu0 %v1497_v51, %s10158_s16 }
 0x770   : > { %v1500_v30 = vpop.f32.mrf.mxu0 }
 0x771   : > { %1524 = vrot.lane.b32.xlu2 %v1500_v30, %s9996_s12 }
 0x778   : > { %v1503_v14 = vpop.f32.mrf.mxu0 }
 0x779   : > { %1526 = vrot.lane.b32.xlu2 %v1503_v14, %s9996_s12  ;;  %s7633_s12 = scalar_lea.vmem %s10159_s22, %s7096_s23  ;;  %s10160_s23 = smov 96  }
 0x77a   : > { %s5738_s22 = scalar_lea.vmem %s7490_s15, %s7700_s26 }
 0x781   : > { %1228 = vrot.lane.b32.xlu2 %v7000_v4, %s10158_s16  ;;  %v7617_v4 = vld [vmem:[%s7548_s14] sm:$0xff] }
 0x782   : > { %1552 = vmatpush.msra.mxu1 %v7617_v4 }
 0x784   : > { %1650 = vmatpush.msrb.mxu1 %v7022_v6 }
 0x786   : > { %1651 = vmatpush.msrb.mxu1 %v7031_v8 }
 0x788   : > { %1652 = vmatpush.msrb.mxu1 %v7035_v9  ;;  %v1519_v9 = vpop.permute.xlu1 %1518 }
 0x78a   : > { %1653 = vmatpush.msrb.mxu1 %v7040_v10 }
 0x7cb   : > { %v1525_v3 = vpop.permute.xlu2 %1524 }
 0x7d3   : > { %v1509_v7 = vpop.permute.xlu0 %1508  ;;  %v1527_v53 = vpop.permute.xlu2 %1526 }
 0x7d4   : > { %v1530_v2 = vsel %vm922_vm0, %v7516_v39, %v1509_v7 }
 0x7d5   : > { %v1532_v61 = vsel %vm1077_vm4, %v1530_v2, %v1517_v28 }
 0x7d6   : > { %v1535_v63 = vsel %vm1534_vm10, %v1532_v61, %v1525_v3 }
 0x7d7   : > { %1553 = vmatmul.f32.vlgmr.msra.gmra.mxu1 %v1535_v63 }
 0x7d8   : > { %1775 = vmatpush.msra.mxu1 %v7201_v56 }
 0x7da   : > { %1776 = vmatpush.msra.mxu1 %v7207_v58 }
 0x7db   : > { %v1511_v6 = vpop.permute.xlu0 %1510  ;;  %v1229_v8 = vpop.permute.xlu2 %1228 }
 0x7dc   : > { %v1531_v10 = vsel %vm922_vm0, %v7518_v52, %v1511_v6  ;;  %v1234_v39 = vsel %vm922_vm0, %v7321_v54, %v1229_v8  ;;  %1777 = vmatpush.msra.mxu1 %v7221_v13 }
 0x7dd   : > { %1236 = vst.msk [vmem:[%s7633_s12] sm:$0xff] %vm1077_vm4, %v1234_v39  ;;  %v1533_v56 = vsel %vm1077_vm4, %v1531_v10, %v1519_v9 }
 0x7de   : > { %v1536_v44 = vsel %vm1534_vm10, %v1533_v56, %v1527_v53  ;;  %1778 = vmatpush.msra.mxu1 %v7235_v16 }
 0x7df   : > { %1556 = vmatmul.f32.gmra.mxu1 %v1536_v44 }
 0x854   : > { %v1554_v58 = vpop.f32.mrf.mxu1 }
 0x855   : > { %1562 = vrot.lane.b32.xlu0 %v1554_v58, %s10000_s21 }
 0x85c   : > { %v1557_v51 = vpop.f32.mrf.mxu1 }
 0x85d   : > { %1564 = vrot.lane.b32.xlu1 %v1557_v51, %s10000_s21  ;;  %s5726_s21 = scalar_lea.vmem %s7062_s30, %s7700_s26 }
 0x865   : > { %1230 = vrot.lane.b32.xlu1 %v7005_v5, %s10158_s16  ;;  %v1575_v5 = vsub.f32 1.0, %v7500_v36 }
 0x8c7   : > { %v1563_v13 = vpop.permute.xlu0 %1562 }
 0x8c8   : > { %v1568_v54 = vadd.f32 %v1563_v13, %v7494_v22 }
 0x8ca   : > { %6425 = vtanh.f32 %v1568_v54 }
 0x8cf   : > { %v1565_v52 = vpop.permute.xlu1 %1564 }
 0x8d0   : > { %v6426_v30 = vpop.eup %6425  ;;  %v1569_v14 = vadd.f32 %v1565_v52, %v7497_v35  ;;  %v1574_v35 = vsub.f32 1.0, %v7502_v19 }
 0x8d1   : > { %1578 = vrot.lane.b32.xlu0 %v6426_v30, %s10160_s23 }
 0x8d2   : > { %6427 = vtanh.f32 %v1569_v14 }
 0x8d7   : > { %v1231_v16 = vpop.permute.xlu1 %1230 }
 0x8d8   : > { %v6428_v3 = vpop.eup %6427  ;;  %v1235_v28 = vsel %vm922_vm0, %v7327_v26, %v1231_v16  ;;  %v1573_v7 = vmul.f32 %v7500_v36, %v1231_v16  ;;  %v1572_v26 = vmul.f32 %v7502_v19, %v1229_v8 }
 0x8d9   : > { %1237 = vst.msk [vmem:[%s7633_s12 + $0x8] sm:$0xff] %vm1077_vm4, %v1235_v28  ;;  %1580 = vrot.lane.b32.xlu2 %v6428_v3, %s10160_s23 }
 0x933   : > { %v1581_v22 = vpop.permute.xlu2 %1580 }
 0x934   : > { %v1585_v53 = vmul.f32 %v1581_v22, %v1575_v5 }
 0x936   : > { %v7660_v2 = vadd.f32 %v1585_v53, %v1573_v7 }
 0x938   : > { %1601 = vrot.lane.b32.xlu1 %v7660_v2, %s10160_s23 }
 0x943   : > { %v1579_v61 = vpop.permute.xlu0 %1578 }
 0x944   : > { %v1584_v63 = vmul.f32 %v1579_v61, %v1574_v35 }
 0x946   : > { %v7666_v6 = vadd.f32 %v1584_v63, %v1572_v26  ;;  %v10164_v63 = vld [vmem:[#allocation22_spill] sm:$0xff] }
 0x948   : > { %1599 = vrot.lane.b32.xlu0 %v7666_v6, %s10160_s23  ;;  %v6383_v36 = vpack.i.bf16 %v7666_v6, %v7660_v2 }
 0x94a   : > { %6384 = vrot.lane.b32.xlu1 %v6383_v36, %s9998_s13  ;;  %s5730_s13 = scalar_lea.vmem %s7057_s27, %s7700_s26  ;;  %v10165_v36 = vld [vmem:[#allocation23_spill] sm:$0xff] }
 0x9aa   : > { %v7685_v19 = vpop.permute.xlu1 %1601 }
 0x9ba   : > { %v7673_v9 = vpop.permute.xlu0 %1599 }
 0x9bb   : > { %5962 = vmatmul.msk.f32.vlgmr.msra.gmra.mxu2 %vm922_vm0, %v7673_v9  ;;  %5964 = vmatmul.msk.f32.vlgmr.msrb.gmra.mxu1 %vm922_vm0, %v7673_v9 }
 0x9bc   : > { %1804 = vmatpush.msra.mxu2 %v7204_v57  ;;  %1864 = vmatpush.msrb.mxu1 %v7281_v31  ;;  %v7706_v57 = vld [vmem:[%s5730_s13 + $0x10] sm:$0xff] }
 0x9be   : > { %1805 = vmatpush.msra.mxu2 %v7212_v59  ;;  %1865 = vmatpush.msrb.mxu1 %v7288_v32  ;;  %v5957_v59 = vld [vmem:[%s5726_s21 + $0x10] sm:$0xff] }
 0x9bf   : > { %v1630_v32 = vmul.f32 %v7706_v57, %v5957_v59  ;;  %v10166_v59 = vld [vmem:[#allocation24_spill] sm:$0xff] }
 0x9c0   : > { %1806 = vmatpush.msra.mxu2 %v7224_v15  ;;  %1866 = vmatpush.msrb.mxu1 %v7293_v33  ;;  %v1632_v15 = vsub.f32 1.0, %v7706_v57 }
 0x9c2   : > { %1807 = vmatpush.msra.mxu2 %v7238_v17  ;;  %1867 = vmatpush.msrb.mxu1 %v7298_v34  ;;  %v7713_v34 = vld [vmem:[%s5730_s13 + $0x18] sm:$0xff]  ;;  %s8103_s13 = smul.u32 48, %s6783_s3 }
 0x9c3   : > { %5963 = vmatmul.msk.f32.gmra.mxu2 %vm922_vm0, %v7685_v19  ;;  %5965 = vmatmul.msk.f32.gmra.mxu1 %vm922_vm0, %v7685_v19  ;;  %v1633_v10 = vsub.f32 1.0, %v7713_v34 }
 0x9cb   : > { %5978 = vmatmul.msk.f32.vlgmr.msra.gmra.mxu1 %vm922_vm0, %v7673_v9 }
 0x9cc   : > { %2028 = vmatpush.msra.mxu1 %v7408_v60 }
 0x9ce   : > { %2029 = vmatpush.msra.mxu1 %v7463_v62  ;;  %v5958_v62 = vld [vmem:[%s5726_s21 + $0x18] sm:$0xff]  ;;  %s5734_s21 = scalar_lea.vmem %s7102_s6, %s7700_s26  ;;  %s10183_s26 = smov 100  }
 0x9cf   : > { %v1631_v44 = vmul.f32 %v7713_v34, %v5958_v62  ;;  %v5971_v16 = vld [vmem:[%s5734_s21 + $0x18] sm:$0xff]  ;;  %v10173_v62 = vld [vmem:[#allocation31_spill] sm:$0xff] }
 0x9d3   : > { %5979 = vmatmul.msk.f32.gmra.mxu1 %vm922_vm0, %v7685_v19 }
 0xa38   : > { %v1655_v54 = vpop.f32.mrf.mxu1 }
 0xa3e   : > { %v1624_v17 = vpop.f32.mrf.mxu2 }
 0xa3f   : > { %v1625_v31 = vadd.f32 %v7071_v12, %v1624_v17  ;;  %v10167_v17 = vld [vmem:[#allocation25_spill] sm:$0xff] }
 0xa40   : > { %v1658_v30 = vpop.f32.mrf.mxu1 }
 0xa41   : > { %v1634_v33 = vmul.f32 %v1632_v15, %v1625_v31  ;;  %v10168_v31 = vld [vmem:[#allocation26_spill] sm:$0xff] }
 0xa43   : > { %v1636_v60 = vadd.f32 %v1634_v33, %v1630_v32  ;;  %v10169_v32 = vld [vmem:[#allocation27_spill] sm:$0xff]  ;;  %v10171_v33 = vld [vmem:[#allocation29_spill] sm:$0xff] }
 0xa45   : > { %v7716_v8 = vmul.f32 %v7706_v57, %v1636_v60  ;;  %5967 = vmatmul.msk.f32.vlgmr.msrb.gmra.mxu2 %vm983_vm2, %v1636_v60  ;;  %v10172_v60 = vld [vmem:[#allocation30_spill] sm:$0xff]  ;;  %v7811_v57 = vld [vmem:[%s10121_s10] sm:$0xff] }
 0xa46   : > { %v1627_v39 = vpop.f32.mrf.mxu2 }
 0xa47   : > { %v1628_v56 = vadd.f32 %v7071_v12, %v1627_v39  ;;  %v5970_v12 = vld [vmem:[%s5734_s21 + $0x10] sm:$0xff]  ;;  %v10174_v39 = vld [vmem:[#allocation32_spill] sm:$0xff]  ;;  %s5746_s21 = scalar_lea.vmem %s7057_s27, %s8103_s13 }
 0xa49   : > { %v1635_v58 = vmul.f32 %v1633_v10, %v1628_v56 }
 0xa4b   : > { %v1637_v51 = vadd.f32 %v1635_v58, %v1631_v44  ;;  %v10175_v58 = vld [vmem:[#allocation33_spill] sm:$0xff] }
 0xa4d   : > { %5968 = vmatmul.msk.f32.gmra.mxu2 %vm983_vm2, %v1637_v51  ;;  %v7726_v13 = vmul.f32 %v7713_v34, %v1637_v51  ;;  %v7763_v51 = vld [vmem:[%s6970_s0 + $0x18] sm:$0xff]  ;;  %v7825_v34 = vld [vmem:[%s10121_s10 + $0x10] sm:$0xff] }
 0xac8   : > { %v1684_v52 = vpop.f32.mrf.mxu2 }
 0xac9   : > { %v1685_v3 = vadd.f32 %v1684_v52, %v1655_v54  ;;  %v7767_v54 = vld [vmem:[%s6970_s0 + $0x10] sm:$0xff]  ;;  %v7771_v52 = vld [vmem:[%s6970_s0 + $0x8] sm:$0xff] }
 0xacb   : > { %v1693_v22 = vadd.f32 %v5970_v12, %v1685_v3 }
 0xad0   : > { %v1687_v14 = vpop.f32.mrf.mxu2 }
 0xad1   : > { %v1688_v28 = vadd.f32 %v1687_v14, %v1658_v30  ;;  %v7775_v30 = vld [vmem:[%s6970_s0] sm:$0xff]  ;;  %s10182_s0 = smov 64  }
 0xad3   : > { %v1694_v5 = vadd.f32 %v5971_v16, %v1688_v28  ;;  %v10176_v16 = vld [vmem:[#allocation14_spill] sm:$0xff] }
 0xad5   : > { %1709 = vmatpush.msra.mxu3 %v1694_v5  ;;  %v1780_v5 = vpop.f32.mrf.mxu1 }
 0xad7   : > { %1710 = vmatpush.msra.mxu3 %v1693_v22 }
 0xad8   : > { %5972 = vmatmul.msk.f32.vlgmr.msra.gmra.mxu3 %vm1022_vm3, %v7109_v40 }
 0xae0   : > { %5973 = vmatmul.msk.f32.gmra.mxu3 %vm1022_vm3, %v7116_v41  ;;  %v10161_v41 = vld [vmem:[#allocation19_spill] sm:$0xff] }
 0xae8   : > { %5974 = vmatmul.msk.f32.gmra.mxu3 %vm1022_vm3, %v7123_v42  ;;  %v10162_v42 = vld [vmem:[#allocation20_spill] sm:$0xff] }
 0xaf0   : > { %5975 = vmatmul.msk.f32.gmra.mxu3 %vm1022_vm3, %v7130_v43  ;;  %v10163_v43 = vld [vmem:[#allocation21_spill] sm:$0xff] }
 0xb5b   : > { %v1712_v7 = vpop.f32.mrf.mxu3 }
 0xb63   : > { %v1715_v53 = vpop.f32.mrf.mxu3 }
 0xb6b   : > { %v1718_v35 = vpop.f32.mrf.mxu3 }
 0xb6c   : > { %1726 = vrot.lane.b32.xlu2 %v1718_v35, %s10158_s16 }
 0xb73   : > { %v1721_v61 = vpop.f32.mrf.mxu3 }
 0xb74   : > { %1728 = vrot.lane.b32.xlu0 %v1721_v61, %s10158_s16  ;;  %v10178_v61 = vld [vmem:[#allocation17_spill] sm:$0xff] }
 0xbc6   : > { %v1727_v26 = vpop.permute.xlu2 %1726 }
 0xbc7   : > { %v1732_v40 = vsel %vm922_vm0, %v1712_v7, %v1727_v26 }
 0xbc8   : > { %5976 = vmatmul.msk.f32.vlgmr.msrb.gmra.mxu0 %vm1077_vm4, %v1732_v40 }
 0xbc9   : > { %1991 = vmatpush.msrb.mxu0 %v7394_v38  ;;  %v10170_v38 = vld [vmem:[#allocation28_spill] sm:$0xff] }
 0xbcb   : > { %1992 = vmatpush.msrb.mxu0 %v10161_v41 }
 0xbcd   : > { %1993 = vmatpush.msrb.mxu0 %v10162_v42  ;;  %v1783_v42 = vpop.f32.mrf.mxu1 }
 0xbcf   : > { %1994 = vmatpush.msrb.mxu0 %v10163_v43 }
 0xbd1   : > { %1995 = vmatpush.msrb.mxu0 %v10164_v63 }
 0xbd3   : > { %1996 = vmatpush.msrb.mxu0 %v10165_v36 }
 0xbd5   : > { %1997 = vmatpush.msrb.mxu0 %v10166_v59 }
 0xbd7   : > { %1998 = vmatpush.msrb.mxu0 %v10167_v17 }
 0xbd9   : > { %1999 = vmatpush.msrb.mxu0 %v10168_v31 }
 0xbdb   : > { %2000 = vmatpush.msrb.mxu0 %v10169_v32 }
 0xbdd   : > { %2001 = vmatpush.msrb.mxu0 %v10170_v38 }
 0xbdf   : > { %2002 = vmatpush.msrb.mxu0 %v10171_v33 }
 0xbe1   : > { %2003 = vmatpush.msrb.mxu0 %v10172_v60  ;;  %v10179_v60 = vld [vmem:[#allocation18_spill] sm:$0xff] }
 0xbe3   : > { %2004 = vmatpush.msrb.mxu0 %v10173_v62 }
 0xbe5   : > { %2005 = vmatpush.msrb.mxu0 %v10174_v39 }
 0xbe6   : > { %v1729_v56 = vpop.permute.xlu0 %1728 }
 0xbe7   : > { %v1733_v44 = vsel %vm922_vm0, %v1715_v53, %v1729_v56  ;;  %2006 = vmatpush.msrb.mxu0 %v10175_v58  ;;  %v10177_v53 = vld [vmem:[#allocation16_spill] sm:$0xff] }
 0xbe8   : > { %5977 = vmatmul.msk.f32.gmra.mxu0 %vm1077_vm4, %v1733_v44 }
 0xbf0   : > { %5982 = vmatmul.msk.f32.vlgmr.msra.gmra.mxu0 %vm922_vm0, %v7673_v9 }
 0xbf1   : > { %2249 = vmatpush.msra.mxu0 %v7763_v51 }
 0xbf3   : > { %2250 = vmatpush.msra.mxu0 %v7767_v54 }
 0xbf5   : > { %2251 = vmatpush.msra.mxu0 %v7771_v52 }
 0xbf7   : > { %2252 = vmatpush.msra.mxu0 %v7775_v30 }
 0xbf8   : > { %5983 = vmatmul.msk.f32.gmra.mxu0 %vm922_vm0, %v7685_v19 }
 0xc45   : > { %v1757_v14 = vpop.f32.mrf.mxu0 }
 0xc46   : > { %v1758_v3 = vadd.f32 %v10176_v16, %v1757_v14 }
 0xc48   : > { %5980 = vmatmul.msk.f32.vlgmr.msra.gmra.mxu2 %vm922_vm0, %v1758_v3 }
 0xc65   : > { %v1760_v28 = vpop.f32.mrf.mxu0 }
 0xc66   : > { %v1761_v12 = vadd.f32 %v10176_v16, %v1760_v28  ;;  %v6385_v16 = vpop.permute.xlu1 %6384 }
 0xc67   : > { %v6386_v28 = vunpack.i.l.bf16 %v6385_v16 }
 0xc68   : > { %5981 = vmatmul.msk.f32.gmra.mxu2 %vm922_vm0, %v1761_v12 }
 0xc6d   : > { %v1840_v32 = vpop.f32.mrf.mxu0 }
 0xc75   : > { %v1843_v39 = vpop.f32.mrf.mxu0 }
 0xccb   : > { %v1809_v22 = vpop.f32.mrf.mxu2 }
 0xccc   : > { %v1810_v7 = vadd.f32 %v1809_v22, %v1780_v5  ;;  %v6387_v22 = vunpack.i.h.bf16 %v6385_v16 }
 0xcce   : > { %v1815_v35 = vadd.f32 %v10177_v53, %v1810_v7 }
 0xcd0   : > { %v1819_v26 = vmul.f32 %v1815_v35, %v10178_v61  ;;  %vm1817_vm11 = vcmp.ge.f32.partialorder %v1815_v35, 0.0 }
 0xcd2   : > { %v1821_v40 = vsel %vm1817_vm11, %v1815_v35, %v1819_v26 }
 0xcd3   : > { %5984 = vmatmul.msk.f32.vlgmr.msrb.gmra.mxu1 %vm922_vm0, %v1821_v40  ;;  %v1877_v41 = vsel %vm922_vm0, %v1821_v40, %v7666_v6 }
 0xcd4   : > { %5986 = vst.msk [vmem:[%s7633_s12 + $0x10] sm:$0xff] %vm1077_vm4, %v1877_v41  ;;  %v5997_v41 = vld [vmem:[%s5738_s22 + $0x10] sm:$0xff] }
 0xceb   : > { %v1812_v43 = vpop.f32.mrf.mxu2 }
 0xcec   : > { %v1813_v63 = vadd.f32 %v1812_v43, %v1783_v42 }
 0xcee   : > { %v1816_v36 = vadd.f32 %v10177_v53, %v1813_v63 }
 0xcf0   : > { %vm1818_vm12 = vcmp.ge.f32.partialorder %v1816_v36, 0.0  ;;  %v1820_v59 = vmul.f32 %v1816_v36, %v10178_v61 }
 0xcf2   : > { %v1822_v17 = vsel %vm1818_vm12, %v1816_v36, %v1820_v59 }
 0xcf3   : > { %5985 = vmatmul.msk.f32.gmra.mxu1 %vm922_vm0, %v1822_v17  ;;  %v1878_v31 = vsel %vm922_vm0, %v1822_v17, %v7660_v2  ;;  %v5998_v17 = vld [vmem:[%s5738_s22 + $0x18] sm:$0xff]  ;;  %s5742_s22 = scalar_lea.vmem %s7062_s30, %s8103_s13 }
 0xcf4   : > { %5987 = vst.msk [vmem:[%s7633_s12 + $0x18] sm:$0xff] %vm1077_vm4, %v1878_v31 }
 0xd50   : > { %v1869_v38 = vpop.f32.mrf.mxu1 }
 0xd51   : > { %v1870_v33 = vadd.f32 %v1869_v38, %v1840_v32 }
 0xd53   : > { %v1875_v62 = vadd.f32 %v10179_v60, %v1870_v33 }
 0xd55   : > { %v1884_v58 = vmul.f32 %v1875_v62, %v1632_v15  ;;  %v7818_v15 = vld [vmem:[%s10121_s10 + $0x8] sm:$0xff] }
 0xd57   : > { %v1886_v5 = vadd.f32 %v1884_v58, %v7716_v8  ;;  %v7832_v8 = vld [vmem:[%s10121_s10 + $0x18] sm:$0xff] }
 0xd59   : > { %v1894_v53 = vsel %vm983_vm2, %v1886_v5, %v6387_v22 }
 0xd70   : > { %v1872_v56 = vpop.f32.mrf.mxu1 }
 0xd71   : > { %v1873_v44 = vadd.f32 %v1872_v56, %v1843_v39 }
 0xd73   : > { %v1876_v14 = vadd.f32 %v10179_v60, %v1873_v44 }
 0xd75   : > { %v1885_v3 = vmul.f32 %v1876_v14, %v1633_v10 }
 0xd77   : > { %v1887_v12 = vadd.f32 %v1885_v3, %v7726_v13 }
 0xd79   : > { %v1895_v7 = vsel %vm983_vm2, %v1887_v12, %v6386_v28 }
 0xd7a   : > { %1910 = vmatpush.msrb.mxu2 %v1895_v7 }
 0xd7c   : > { %1911 = vmatpush.msrb.mxu2 %v1894_v53 }
 0xd7d   : > { %5988 = vmatmul.msk.f32.vlgmr.msrb.gmra.mxu2 %vm1022_vm3, %v7811_v57 }
 0xd85   : > { %5989 = vmatmul.msk.f32.gmra.mxu2 %vm1022_vm3, %v7818_v15 }
 0xd8d   : > { %5990 = vmatmul.msk.f32.gmra.mxu2 %vm1022_vm3, %v7825_v34 }
 0xd95   : > { %5991 = vmatmul.msk.f32.gmra.mxu2 %vm1022_vm3, %v7832_v8 }
 0xe00   : > { %v1913_v10 = vpop.f32.mrf.mxu2 }
 0xe08   : > { %v1916_v13 = vpop.f32.mrf.mxu2 }
 0xe10   : > { %v1919_v35 = vpop.f32.mrf.mxu2 }
 0xe11   : > { %1964 = vrot.lane.b32.xlu0 %v1919_v35, %s10147_s17 }
 0xe18   : > { %v1922_v26 = vpop.f32.mrf.mxu2 }
 0xe19   : > { %1966 = vrot.lane.b32.xlu0 %v1922_v26, %s10147_s17  ;;  %1937 = vmatpush.msrb.mxu3 %v1922_v26 }
 0xe1b   : > { %1938 = vmatpush.msrb.mxu3 %v1919_v35 }
 0xe1d   : > { %1939 = vmatpush.msrb.mxu3 %v1916_v13 }
 0xe1f   : > { %1940 = vmatpush.msrb.mxu3 %v1913_v10 }
 0xe20   : > { %5992 = vmatmul.msk.f32.vlgmr.msrb.gmra.mxu3 %vm922_vm0, %v7361_v23  ;;  %v7863_v23 = vld [vmem:[%s7014_s2 + $0x18] sm:$0xff] }
 0xe21   : > { %2167 = vmatpush.msra.mxu3 %v7552_v45 }
 0xe23   : > { %2168 = vmatpush.msra.mxu3 %v7555_v46 }
 0xe25   : > { %2169 = vmatpush.msra.mxu3 %v7559_v47 }
 0xe27   : > { %2170 = vmatpush.msra.mxu3 %v7563_v48 }
 0xe28   : > { %5993 = vmatmul.msk.f32.gmra.mxu3 %vm922_vm0, %v7369_v29  ;;  %v7867_v29 = vld [vmem:[%s7014_s2 + $0x10] sm:$0xff] }
 0xe29   : > { %2171 = vmatpush.msra.mxu3 %v7567_v50 }
 0xe2b   : > { %2172 = vmatpush.msra.mxu3 %v7572_v55 }
 0xe2d   : > { %2173 = vmatpush.msra.mxu3 %v7576_v18 }
 0xe2f   : > { %2174 = vmatpush.msra.mxu3 %v7580_v20 }
 0xe30   : > { %5994 = vmatmul.msk.f32.gmra.mxu3 %vm922_vm0, %v7376_v37  ;;  %v7871_v37 = vld [vmem:[%s7014_s2 + $0x8] sm:$0xff] }
 0xe31   : > { %2175 = vmatpush.msra.mxu3 %v7584_v21 }
 0xe33   : > { %2176 = vmatpush.msra.mxu3 %v7589_v11 }
 0xe35   : > { %2177 = vmatpush.msra.mxu3 %v7597_v24 }
 0xe37   : > { %2178 = vmatpush.msra.mxu3 %v7600_v27  ;;  %v7887_v27 = vld [vmem:[%s7019_s1] sm:$0xf] }
 0xe38   : > { %5995 = vmatmul.msk.f32.gmra.mxu3 %vm922_vm0, %v7383_v49  ;;  %v7875_v49 = vld [vmem:[%s7014_s2] sm:$0xff] }
 0xe39   : > { %2179 = vmatpush.msra.mxu3 %v7604_v25 }
 0xe3b   : > { %2180 = vmatpush.msra.mxu3 %v7608_v0 }
 0xe3d   : > { %2181 = vmatpush.msra.mxu3 %v7613_v1 }
 0xe3f   : > { %2182 = vmatpush.msra.mxu3 %v7617_v4 }
 0xe41   : > { %2280 = vmatpush.msrb.mxu3 %v7863_v23 }
 0xe43   : > { %2281 = vmatpush.msrb.mxu3 %v7867_v29 }
 0xe45   : > { %2282 = vmatpush.msrb.mxu3 %v7871_v37 }
 0xe47   : > { %2283 = vmatpush.msrb.mxu3 %v7875_v49 }
 0xe83   : > { %v1965_v55 = vpop.permute.xlu0 %1964 }
 0xe8b   : > { %v1967_v0 = vpop.permute.xlu0 %1966 }
 0xea3   : > { %v1942_v45 = vpop.f32.mrf.mxu3 }
 0xea4   : > { %1956 = vrot.lane.b32.xlu2 %v1942_v45, %s10180_s19 }
 0xeab   : > { %v1945_v46 = vpop.f32.mrf.mxu3 }
 0xeac   : > { %1958 = vrot.lane.b32.xlu2 %v1945_v46, %s10180_s19 }
 0xeb3   : > { %v1948_v47 = vpop.f32.mrf.mxu3 }
 0xeb4   : > { %1972 = vrot.lane.b32.xlu1 %v1948_v47, %s10181_s20 }
 0xebb   : > { %v1951_v48 = vpop.f32.mrf.mxu3 }
 0xebc   : > { %1974 = vrot.lane.b32.xlu1 %v1951_v48, %s10181_s20 }
 0xefe   : > { %v1957_v50 = vpop.permute.xlu2 %1956 }
 0xeff   : > { %v1978_v18 = vsel %vm1346_vm7, %v1913_v10, %v1957_v50 }
 0xf00   : > { %v1980_v20 = vsel %vm1349_vm8, %v1978_v18, %v1965_v55 }
 0xf06   : > { %v1959_v24 = vpop.permute.xlu2 %1958 }
 0xf07   : > { %v1979_v25 = vsel %vm1346_vm7, %v1916_v13, %v1959_v24  ;;  %v7924_v24 = vld [vmem:[%s10137_s24] sm:$0xff] }
 0xf08   : > { %v1981_v4 = vsel %vm1349_vm8, %v1979_v25, %v1967_v0  ;;  %v7929_v25 = vld [vmem:[%s7138_s4 + $0x38] sm:$0xff]  ;;  %v7933_v0 = vld [vmem:[%s7138_s4 + $0x30] sm:$0xff] }
 0xf26   : > { %v1973_v21 = vpop.permute.xlu1 %1972 }
 0xf27   : > { %v1982_v11 = vsel %vm1352_vm9, %v1980_v20, %v1973_v21  ;;  %5999 = vmatmul.msk.f32.vlgmr.msra.gmra.mxu1 %vm1022_vm3, %v1973_v21 }
 0xf28   : > { %2007 = vmatmul.f32.vlgmr.msrb.gmra.mxu0 %v1982_v11 }
 0xf29   : > { %6021 = vmatpush.msk.msrb.mxu0 %vm10004_vm1, %v7887_v27 }
 0xf2e   : > { %v1975_v1 = vpop.permute.xlu1 %1974 }
 0xf2f   : > { %6000 = vmatmul.msk.f32.gmra.mxu1 %vm1022_vm3, %v1975_v1  ;;  %v1983_v40 = vsel %vm1352_vm9, %v1981_v4, %v1975_v1  ;;  %v7937_v1 = vld [vmem:[%s7138_s4 + $0x28] sm:$0xff]  ;;  %v7941_v4 = vld [vmem:[%s7138_s4 + $0x20] sm:$0xff] }
 0xf30   : > { %2010 = vmatmul.f32.gmra.mxu0 %v1983_v40  ;;  %v7947_v40 = vld [vmem:[%s10137_s24 + $0x8] sm:$0xff] }
 0xfa4   : > { %v2031_v42 = vpop.f32.mrf.mxu1 }
 0xfa5   : > { %v2008_v43 = vpop.f32.mrf.mxu0 }
 0xfa6   : > { %v2009_v63 = vadd.f32 %v5997_v41, %v2008_v43  ;;  %v7952_v41 = vld [vmem:[%s7138_s4 + $0x18] sm:$0xff]  ;;  %v7960_v43 = vld [vmem:[%s7138_s4 + $0x8] sm:$0xff] }
 0xfa8   : > { %v7897_v36 = vadd.f32 %v2031_v42, %v2009_v63  ;;  %v7956_v42 = vld [vmem:[%s7138_s4 + $0x10] sm:$0xff]  ;;  %v7964_v63 = vld [vmem:[%s7138_s4] sm:$0xff] }
 0xfaa   : > { %v6001_v59 = vmul.f32 -1.442695, %v7897_v36 }
 0xfac   : > { %6429 = vpow2.f32 %v6001_v59  ;;  %v2034_v38 = vpop.f32.mrf.mxu1  ;;  %v7970_v59 = vld [vmem:[%s10137_s24 + $0x10] sm:$0xff] }
 0xfad   : > { %v2011_v31 = vpop.f32.mrf.mxu0 }
 0xfae   : > { %v2012_v32 = vadd.f32 %v5998_v17, %v2011_v31  ;;  %v7975_v17 = vld [vmem:[%s7250_s28 + $0x18] sm:$0xff]  ;;  %v7979_v31 = vld [vmem:[%s7250_s28 + $0x10] sm:$0xff] }
 0xfb0   : > { %v7900_v33 = vadd.f32 %v2034_v38, %v2012_v32  ;;  %v7983_v32 = vld [vmem:[%s7250_s28 + $0x8] sm:$0xff]  ;;  %v7987_v38 = vld [vmem:[%s7250_s28] sm:$0xff] }
 0xfb2   : > { %v6430_v60 = vpop.eup %6429  ;;  %v6002_v62 = vmul.f32 -1.442695, %v7900_v33 }
 0xfb3   : > { %v2043_v39 = vadd.f32 1.0, %v6430_v60  ;;  %v7993_v60 = vld [vmem:[%s10137_s24 + $0x18] sm:$0xff] }
 0xfb4   : > { %6431 = vpow2.f32 %v6002_v62 }
 0xfb5   : > { %6433 = vrcp.f32 %v2043_v39  ;;  %vm2050_vm14 = vweird.f32 %v2043_v39  ;;  %v2056_v53 = vand.u32 2147483648, %v2043_v39  ;;  %v2054_v35 = vand.u32 2147483647, %v2043_v39 }
 0xfb7   : > { %v2057_v47 = vor.u32 1.1754944e-38, %v2056_v53  ;;  %vm2055_vm1 = vcmp.eq.f32.partialorder %v2054_v35, 8.507059e+37  ;;  %v8010_v53 = vld [vmem:[%s7192_s29 + $0x10] sm:$0xff] }
 0xfba   : > { %v6432_v56 = vpop.eup %6431 }
 0xfbb   : > { %v6434_v44 = vpop.eup %6433  ;;  %v2044_v58 = vadd.f32 1.0, %v6432_v56 }
 0xfbc   : > { %v2046_v14 = vmul.f32 %v6434_v44, %v2043_v39  ;;  %vm2051_vm13 = vweird.f32 %v6434_v44 }
 0xfbd   : > { %6435 = vrcp.f32 %v2044_v58  ;;  %v2071_v7 = vand.u32 2147483648, %v2044_v58  ;;  %v2069_v13 = vand.u32 2147483647, %v2044_v58  ;;  %vm2052_vm5 = vmor %vm2050_vm14, %vm2051_vm13  ;;  %vm2065_vm6 = vweird.f32 %v2044_v58 }
 0xfbe   : > { %v2047_v16 = vsub.f32 1.0, %v2046_v14  ;;  %vm10216_vm14 = vcmask 1043456  }
 0xfbf   : > { %v2072_v46 = vor.u32 1.1754944e-38, %v2071_v7  ;;  %vm2070_vm12 = vcmp.eq.f32.partialorder %v2069_v13, 8.507059e+37  ;;  %v8014_v13 = vld [vmem:[%s7192_s29 + $0x8] sm:$0xff] }
 0xfc0   : > { %v2048_v3 = vmul.f32 %v6434_v44, %v2047_v16 }
 0xfc2   : > { %v2049_v22 = vadd.f32 %v6434_v44, %v2048_v3 }
 0xfc3   : > { %v6436_v28 = vpop.eup %6435 }
 0xfc4   : > { %v2061_v12 = vmul.f32 %v6436_v28, %v2044_v58  ;;  %vm2066_vm15 = vweird.f32 %v6436_v28  ;;  %v2053_v45 = vsel %vm2052_vm5, %v6434_v44, %v2049_v22  ;;  %v8005_v22 = vld [vmem:[%s7192_s29 + $0x18] sm:$0xff] }
 0xfc5   : > { %vm2067_vm11 = vmor %vm2065_vm6, %vm2066_vm15  ;;  %v7905_v55 = vsel %vm2055_vm1, %v2057_v47, %v2053_v45 }
 0xfc6   : > { %v2062_v5 = vsub.f32 1.0, %v2061_v12  ;;  %v2077_v20 = vmul.f32 %v7905_v55, %v7673_v9 }
 0xfc8   : > { %v2063_v10 = vmul.f32 %v6436_v28, %v2062_v5 }
 0xfca   : > { %v2064_v26 = vadd.f32 %v6436_v28, %v2063_v10 }
 0xfcc   : > { %v2068_v48 = vsel %vm2067_vm11, %v6436_v28, %v2064_v26 }
 0xfcd   : > { %v7903_v50 = vsel %vm2070_vm12, %v2072_v46, %v2068_v48  ;;  %v8020_v46 = vld [vmem:[%s7192_s29] sm:$0xff] }
 0xfce   : > { %v2078_v18 = vmul.f32 %v7903_v50, %v7685_v19 }
 0xfd0   : > { %2093 = vmatpush.msrb.mxu1 %v2078_v18 }
 0xfd2   : > { %2094 = vmatpush.msrb.mxu1 %v2077_v20 }
 0xfd3   : > { %6003 = vmatmul.msk.f32.vlgmr.msrb.gmra.mxu1 %vm1022_vm3, %v7811_v57 }
 0xfdb   : > { %6004 = vmatmul.msk.f32.gmra.mxu1 %vm1022_vm3, %v7818_v15 }
 0xfe3   : > { %6005 = vmatmul.msk.f32.gmra.mxu1 %vm1022_vm3, %v7825_v34 }
 0xfeb   : > { %6006 = vmatmul.msk.f32.gmra.mxu1 %vm1022_vm3, %v7832_v8 }
0x1050   : > { %v2096_v19 = vpop.f32.mrf.mxu1 }
0x1058   : > { %v2099_v21 = vpop.f32.mrf.mxu1 }
0x1060   : > { %v2102_v11 = vpop.f32.mrf.mxu1 }
0x1061   : > { %2147 = vrot.lane.b32.xlu0 %v2102_v11, %s10182_s0 }
0x1068   : > { %v2105_v9 = vpop.f32.mrf.mxu1 }
0x1069   : > { %2149 = vrot.lane.b32.xlu0 %v2105_v9, %s10182_s0  ;;  %2120 = vmatpush.msra.mxu2 %v2105_v9 }
0x106b   : > { %2121 = vmatpush.msra.mxu2 %v2102_v11 }
0x106d   : > { %2122 = vmatpush.msra.mxu2 %v2099_v21 }
0x106f   : > { %2123 = vmatpush.msra.mxu2 %v2096_v19 }
0x1070   : > { %6007 = vmatmul.msk.f32.vlgmr.msra.gmra.mxu2 %vm922_vm0, %v7924_v24 }
0x1071   : > { %2378 = vmatpush.msrb.mxu2 %v7929_v25 }
0x1073   : > { %2379 = vmatpush.msrb.mxu2 %v7933_v0 }
0x1075   : > { %2380 = vmatpush.msrb.mxu2 %v7937_v1 }
0x1077   : > { %2381 = vmatpush.msrb.mxu2 %v7941_v4 }
0x1078   : > { %6008 = vmatmul.msk.f32.gmra.mxu2 %vm922_vm0, %v7947_v40 }
0x1079   : > { %2382 = vmatpush.msrb.mxu2 %v7952_v41 }
0x107b   : > { %2383 = vmatpush.msrb.mxu2 %v7956_v42 }
0x107d   : > { %2384 = vmatpush.msrb.mxu2 %v7960_v43 }
0x107f   : > { %2385 = vmatpush.msrb.mxu2 %v7964_v63 }
0x1080   : > { %6009 = vmatmul.msk.f32.gmra.mxu2 %vm922_vm0, %v7970_v59 }
0x1081   : > { %2465 = vmatpush.msra.mxu2 %v7975_v17 }
0x1083   : > { %2466 = vmatpush.msra.mxu2 %v7979_v31 }
0x1085   : > { %2467 = vmatpush.msra.mxu2 %v7983_v32 }
0x1087   : > { %2468 = vmatpush.msra.mxu2 %v7987_v38 }
0x1088   : > { %6010 = vmatmul.msk.f32.gmra.mxu2 %vm922_vm0, %v7993_v60 }
0x10d3   : > { %v2148_v14 = vpop.permute.xlu0 %2147 }
0x10db   : > { %v2150_v10 = vpop.permute.xlu0 %2149 }
0x10f3   : > { %v2125_v62 = vpop.f32.mrf.mxu2 }
0x10f4   : > { %2139 = vrot.lane.b32.xlu2 %v2125_v62, %s10158_s16  ;;  %v2204_v62 = vsub.f32 1.0, %v7905_v55 }
0x10fb   : > { %v2128_v39 = vpop.f32.mrf.mxu2 }
0x10fc   : > { %2141 = vrot.lane.b32.xlu2 %v2128_v39, %s10158_s16 }
0x1103   : > { %v2131_v56 = vpop.f32.mrf.mxu2 }
0x1104   : > { %2155 = vrot.lane.b32.xlu1 %v2131_v56, %s10160_s23  ;;  %v2202_v56 = vmul.f32 %v7905_v55, %v7666_v6 }
0x110b   : > { %v2134_v44 = vpop.f32.mrf.mxu2 }
0x110c   : > { %2157 = vrot.lane.b32.xlu1 %v2134_v44, %s10160_s23 }
0x114e   : > { %v2140_v58 = vpop.permute.xlu2 %2139 }
0x114f   : > { %v2161_v16 = vsel %vm922_vm0, %v2096_v19, %v2140_v58 }
0x1150   : > { %v2163_v3 = vsel %vm1077_vm4, %v2161_v16, %v2148_v14  ;;  %v2203_v14 = vmul.f32 %v7903_v50, %v7660_v2  ;;  %v8053_v2 = vld [vmem:[%s7198_s11 + $0x18] sm:$0xff] }
0x1156   : > { %v2142_v5 = vpop.permute.xlu2 %2141 }
0x1157   : > { %v2162_v7 = vsel %vm922_vm0, %v2099_v21, %v2142_v5  ;;  %v8069_v5 = vld [vmem:[%s7198_s11 + $0x8] sm:$0xff] }
0x1158   : > { %v2164_v26 = vsel %vm1077_vm4, %v2162_v7, %v2150_v10  ;;  %v8073_v7 = vld [vmem:[%s7275_s8 + $0x8] sm:$0xff] }
0x1176   : > { %v2156_v28 = vpop.permute.xlu1 %2155 }
0x1177   : > { %v2165_v12 = vsel %vm1534_vm10, %v2163_v3, %v2156_v28  ;;  %v8061_v28 = vld [vmem:[%s7198_s11 + $0x10] sm:$0xff] }
0x1178   : > { %2183 = vmatmul.f32.vlgmr.msra.gmra.mxu3 %v2165_v12  ;;  %v8065_v12 = vld [vmem:[%s7275_s8 + $0x10] sm:$0xff] }
0x1179   : > { %2405 = vmatpush.msra.mxu3 %v8005_v22 }
0x117b   : > { %2406 = vmatpush.msra.mxu3 %v8010_v53 }
0x117d   : > { %2407 = vmatpush.msra.mxu3 %v8014_v13 }
0x117e   : > { %v2158_v35 = vpop.permute.xlu1 %2157 }
0x117f   : > { %v2166_v45 = vsel %vm1534_vm10, %v2164_v26, %v2158_v35  ;;  %2408 = vmatpush.msra.mxu3 %v8020_v46  ;;  %v8079_v35 = vld [vmem:[%s7198_s11] sm:$0xff] }
0x1180   : > { %2186 = vmatmul.f32.gmra.mxu3 %v2166_v45  ;;  %v8083_v26 = vld [vmem:[%s7275_s8] sm:$0xff]  ;;  %v8093_v45 = vld [vmem:[%s7391_s18 + $0x88] sm:$0xff] }
0x1181   : > { %10184 = vst [vmem:[#allocation19_spill] sm:$0xff] %v8083_v26 }
0x1182   : > { %10185 = vst [vmem:[#allocation20_spill] sm:$0xff] %v8093_v45 }
0x11fb   : > { %v2184_v47 = vpop.f32.mrf.mxu3 }
0x11fc   : > { %2192 = vrot.lane.b32.xlu2 %v2184_v47, %s10182_s0  ;;  %v8097_v47 = vld [vmem:[%s7391_s18 + $0x80] sm:$0xff] }
0x11fd   : > { %10186 = vst [vmem:[#allocation21_spill] sm:$0xff] %v8097_v47 }
0x1203   : > { %v2187_v48 = vpop.f32.mrf.mxu3 }
0x1204   : > { %2194 = vrot.lane.b32.xlu0 %v2187_v48, %s10182_s0  ;;  %v8109_v48 = vld [vmem:[%s5746_s21 + $0x20] sm:$0xff] }
0x1256   : > { %v2193_v18 = vpop.permute.xlu2 %2192 }
0x1257   : > { %v2198_v20 = vadd.f32 %v2193_v18, %v7897_v36  ;;  %v6012_v18 = vld [vmem:[%s5742_s22 + $0x20] sm:$0xff] }
0x1259   : > { %6437 = vtanh.f32 %v2198_v20  ;;  %v10005_v20 = vsub.f32 1.0, %v8109_v48 }
0x125f   : > { %v6438_v19 = vpop.eup %6437 }
0x1260   : > { %2208 = vrot.lane.b32.xlu1 %v6438_v19, %s10160_s23 }
0x1276   : > { %v2195_v21 = vpop.permute.xlu0 %2194 }
0x1277   : > { %v2199_v11 = vadd.f32 %v2195_v21, %v7900_v33  ;;  %v2205_v33 = vsub.f32 1.0, %v7903_v50  ;;  %v8057_v50 = vld [vmem:[%s7275_s8 + $0x18] sm:$0xff]  ;;  %v8113_v21 = vld [vmem:[%s6986_s25] ss:$0 sm:$0xff] }
0x1278   : > { %10187 = vst [vmem:[#allocation22_spill] sm:$0xff] %v8113_v21 }
0x1279   : > { %6439 = vtanh.f32 %v2199_v11 }
0x127f   : > { %v6440_v9 = vpop.eup %6439 }
0x1280   : > { %2210 = vrot.lane.b32.xlu2 %v6440_v9, %s10160_s23  ;;  %v2260_v9 = vmul.f32 %v8109_v48, %v6012_v18 }
0x12d2   : > { %v2209_v39 = vpop.permute.xlu1 %2208 }
0x12d3   : > { %v2214_v44 = vmul.f32 %v2209_v39, %v2204_v62  ;;  %v8119_v39 = vld [vmem:[%s5746_s21 + $0x28] sm:$0xff]  ;;  %s5750_s21 = scalar_lea.vmem %s7102_s6, %s8103_s13 }
0x12d5   : > { %v8032_v36 = vadd.f32 %v2214_v44, %v2202_v56  ;;  %v6013_v44 = vld [vmem:[%s5742_s22 + $0x28] sm:$0xff]  ;;  %s5754_s22 = scalar_lea.vmem %s7490_s15, %s8103_s13  ;;  %s10217_s13 = sld [smem:[#allocation11_spill]] }
0x12d7   : > { %2229 = vrot.lane.b32.xlu0 %v8032_v36, %s10160_s23 }
0x12da   : > { %v2211_v58 = vpop.permute.xlu2 %2210 }
0x12db   : > { %v2215_v16 = vmul.f32 %v2211_v58, %v2205_v33  ;;  %v10011_v58 = vsub.f32 1.0, %v8119_v39 }
0x12dd   : > { %v8039_v3 = vadd.f32 %v2215_v16, %v2203_v14 }
0x12df   : > { %2231 = vrot.lane.b32.xlu1 %v8039_v3, %s10160_s23  ;;  %v6388_v6 = vpack.i.bf16 %v8032_v36, %v8039_v3 }
0x12e7   : > { %6389 = vrot.lane.b32.xlu1 %v6388_v6, %s10183_s26  ;;  %v2261_v6 = vmul.f32 %v8119_v39, %v6013_v44 }
0x1349   : > { %v8046_v55 = vpop.permute.xlu0 %2229 }
0x134a   : > { %6017 = vmatmul.msk.f32.vlgmr.msra.gmra.mxu0 %vm922_vm0, %v8046_v55  ;;  %6019 = vmatmul.msk.f32.vlgmr.msrb.gmra.mxu3 %vm922_vm0, %v8046_v55 }
0x134b   : > { %2434 = vmatpush.msra.mxu0 %v8053_v2  ;;  %2494 = vmatpush.msrb.mxu3 %v8057_v50 }
0x134d   : > { %2435 = vmatpush.msra.mxu0 %v8061_v28  ;;  %2495 = vmatpush.msrb.mxu3 %v8065_v12 }
0x134f   : > { %2436 = vmatpush.msra.mxu0 %v8069_v5  ;;  %2496 = vmatpush.msrb.mxu3 %v8073_v7 }
0x1351   : > { %v8076_v10 = vpop.permute.xlu1 %2231  ;;  %2437 = vmatpush.msra.mxu0 %v8079_v35  ;;  %2497 = vmatpush.msrb.mxu3 %v8083_v26 }
0x1352   : > { %6018 = vmatmul.msk.f32.gmra.mxu0 %vm922_vm0, %v8076_v10  ;;  %6020 = vmatmul.msk.f32.gmra.mxu3 %vm922_vm0, %v8076_v10 }
0x135a   : > { %6033 = vmatmul.msk.f32.vlgmr.msra.gmra.mxu3 %vm922_vm0, %v8046_v55 }
0x135b   : > { %2658 = vmatpush.msra.mxu3 %v8093_v45 }
0x135d   : > { %2659 = vmatpush.msra.mxu3 %v8097_v47  ;;  %v6026_v47 = vld [vmem:[%s5750_s21 + $0x28] sm:$0xff] }
0x1362   : > { %6034 = vmatmul.msk.f32.gmra.mxu3 %vm922_vm0, %v8076_v10 }
0x13c7   : > { %v2254_v19 = vpop.f32.mrf.mxu0 }
0x13c8   : > { %v2255_v11 = vadd.f32 %v8113_v21, %v2254_v19 }
0x13ca   : > { %v2264_v62 = vmul.f32 %v10005_v20, %v2255_v11 }
0x13cc   : > { %v2266_v56 = vadd.f32 %v2264_v62, %v2260_v9 }
0x13cd   : > { %v2285_v9 = vpop.f32.mrf.mxu3 }
0x13ce   : > { %v8122_v33 = vmul.f32 %v8109_v48, %v2266_v56  ;;  %6022 = vmatmul.msk.f32.vlgmr.msrb.gmra.mxu0 %vm983_vm2, %v2266_v56 }
0x13cf   : > { %v2257_v14 = vpop.f32.mrf.mxu0 }
0x13d0   : > { %v2258_v16 = vadd.f32 %v8113_v21, %v2257_v14  ;;  %v6025_v14 = vld [vmem:[%s5750_s21 + $0x20] sm:$0xff]  ;;  %s5760_s21 = scalar_lea.vmem %s7057_s27, %s10217_s13 }
0x13d2   : > { %v2265_v18 = vmul.f32 %v10011_v58, %v2258_v16  ;;  %v8201_v58 = vld [vmem:[%s7391_s18 + $0x10] sm:$0xff] }
0x13d3   : > { %10197 = vst [vmem:[#allocation32_spill] sm:$0xff] %v8201_v58 }
0x13d4   : > { %v2267_v19 = vadd.f32 %v2265_v18, %v2261_v6  ;;  %v8149_v6 = vld [vmem:[%s7391_s18 + $0x78] sm:$0xff]  ;;  %v8153_v18 = vld [vmem:[%s7391_s18 + $0x70] sm:$0xff] }
0x13d5   : > { %v2288_v56 = vpop.f32.mrf.mxu3 }
0x13d6   : > { %6023 = vmatmul.msk.f32.gmra.mxu0 %vm983_vm2, %v2267_v19  ;;  %v8132_v11 = vmul.f32 %v8119_v39, %v2267_v19  ;;  %v8157_v19 = vld [vmem:[%s7391_s18 + $0x68] sm:$0xff] }
0x144b   : > { %v2314_v62 = vpop.f32.mrf.mxu0 }
0x144c   : > { %v2315_v45 = vadd.f32 %v2314_v62, %v2285_v9  ;;  %v8161_v9 = vld [vmem:[%s7391_s18 + $0x60] sm:$0xff]  ;;  %v8165_v62 = vld [vmem:[%s7391_s18 + $0x58] sm:$0xff] }
0x144d   : > { %10188 = vst [vmem:[#allocation23_spill] sm:$0xff] %v8165_v62 }
0x144e   : > { %v2323_v44 = vadd.f32 %v6025_v14, %v2315_v45  ;;  %v8173_v14 = vld [vmem:[%s7391_s18 + $0x48] sm:$0xff] }
0x144f   : > { %10190 = vst [vmem:[#allocation25_spill] sm:$0xff] %v8173_v14 }
0x1453   : > { %v2317_v20 = vpop.f32.mrf.mxu0 }
0x1454   : > { %v2318_v26 = vadd.f32 %v2317_v20, %v2288_v56  ;;  %v8169_v56 = vld [vmem:[%s7391_s18 + $0x50] sm:$0xff] }
0x1455   : > { %10189 = vst [vmem:[#allocation24_spill] sm:$0xff] %v8169_v56 }
0x1456   : > { %v2324_v21 = vadd.f32 %v6026_v47, %v2318_v26 }
0x1458   : > { %2339 = vmatpush.msra.mxu1 %v2324_v21 }
0x145a   : > { %2340 = vmatpush.msra.mxu1 %v2323_v44  ;;  %v8177_v44 = vld [vmem:[%s7391_s18 + $0x40] sm:$0xff] }
0x145b   : > { %6027 = vmatmul.msk.f32.vlgmr.msra.gmra.mxu1 %vm1022_vm3, %v7811_v57  ;;  %10191 = vst [vmem:[#allocation26_spill] sm:$0xff] %v8177_v44 }
0x1463   : > { %6028 = vmatmul.msk.f32.gmra.mxu1 %vm1022_vm3, %v7818_v15 }
0x146b   : > { %6029 = vmatmul.msk.f32.gmra.mxu1 %vm1022_vm3, %v7825_v34 }
0x1473   : > { %6030 = vmatmul.msk.f32.gmra.mxu1 %vm1022_vm3, %v7832_v8 }
0x14d8   : > { %v2342_v26 = vpop.f32.mrf.mxu1 }
0x14e0   : > { %v2345_v45 = vpop.f32.mrf.mxu1 }
0x14e8   : > { %v2348_v47 = vpop.f32.mrf.mxu1 }
0x14e9   : > { %2356 = vrot.lane.b32.xlu2 %v2348_v47, %s10158_s16  ;;  %v8185_v47 = vld [vmem:[%s7391_s18 + $0x30] sm:$0xff] }
0x14ea   : > { %10193 = vst [vmem:[#allocation28_spill] sm:$0xff] %v8185_v47 }
0x14f0   : > { %v2351_v20 = vpop.f32.mrf.mxu1 }
0x14f1   : > { %2358 = vrot.lane.b32.xlu0 %v2351_v20, %s10158_s16  ;;  %v8189_v20 = vld [vmem:[%s7391_s18 + $0x28] sm:$0xff] }
0x14f2   : > { %10194 = vst [vmem:[#allocation29_spill] sm:$0xff] %v8189_v20 }
0x1543   : > { %v2357_v21 = vpop.permute.xlu2 %2356 }
0x1544   : > { %v2362_v16 = vsel %vm922_vm0, %v2342_v26, %v2357_v21  ;;  %v8181_v26 = vld [vmem:[%s7391_s18 + $0x38] sm:$0xff]  ;;  %v8193_v21 = vld [vmem:[%s7391_s18 + $0x20] sm:$0xff] }
0x1545   : > { %6031 = vmatmul.msk.f32.vlgmr.msrb.gmra.mxu2 %vm1077_vm4, %v2362_v16  ;;  %10192 = vst [vmem:[#allocation27_spill] sm:$0xff] %v8181_v26  ;;  %v8197_v16 = vld [vmem:[%s7391_s18 + $0x18] sm:$0xff] }
0x1546   : > { %2621 = vmatpush.msrb.mxu2 %v8149_v6  ;;  %10195 = vst [vmem:[#allocation30_spill] sm:$0xff] %v8193_v21 }
0x1547   : > { %10196 = vst [vmem:[#allocation31_spill] sm:$0xff] %v8197_v16 }
0x1548   : > { %2622 = vmatpush.msrb.mxu2 %v8153_v18 }
0x154a   : > { %2623 = vmatpush.msrb.mxu2 %v8157_v19 }
0x154c   : > { %2624 = vmatpush.msrb.mxu2 %v8161_v9 }
0x154e   : > { %2625 = vmatpush.msrb.mxu2 %v8165_v62 }
0x1550   : > { %2626 = vmatpush.msrb.mxu2 %v8169_v56 }
0x1552   : > { %2627 = vmatpush.msrb.mxu2 %v8173_v14  ;;  %v6390_v14 = vpop.permute.xlu1 %6389 }
0x1554   : > { %2628 = vmatpush.msrb.mxu2 %v8177_v44  ;;  %v8210_v44 = vld [vmem:[%s7391_s18] sm:$0xff] }
0x1555   : > { %10199 = vst [vmem:[#allocation14_spill] sm:$0xff] %v8210_v44 }
0x1556   : > { %2629 = vmatpush.msrb.mxu2 %v8181_v26  ;;  %v8205_v26 = vld [vmem:[%s7391_s18 + $0x8] sm:$0xff] }
0x1557   : > { %10198 = vst [vmem:[#allocation33_spill] sm:$0xff] %v8205_v26 }
0x1558   : > { %2630 = vmatpush.msrb.mxu2 %v8185_v47 }
0x155a   : > { %2631 = vmatpush.msrb.mxu2 %v8189_v20 }
0x155c   : > { %2632 = vmatpush.msrb.mxu2 %v8193_v21 }
0x155e   : > { %2633 = vmatpush.msrb.mxu2 %v8197_v16 }
0x1560   : > { %2634 = vmatpush.msrb.mxu2 %v8201_v58 }
0x1562   : > { %2635 = vmatpush.msrb.mxu2 %v8205_v26 }
0x1563   : > { %v2359_v47 = vpop.permute.xlu0 %2358 }
0x1564   : > { %v2363_v20 = vsel %vm922_vm0, %v2345_v45, %v2359_v47  ;;  %2636 = vmatpush.msrb.mxu2 %v8210_v44  ;;  %v8223_v47 = vld [vmem:[%s7179_s7] ss:$0 sm:$0xff]  ;;  %s10224_s7 = sld [smem:[#allocation10_spill]] }
0x1565   : > { %6032 = vmatmul.msk.f32.gmra.mxu2 %vm1077_vm4, %v2363_v20  ;;  %10200 = vst [vmem:[#allocation16_spill] sm:$0xff] %v8223_v47 }
0x156d   : > { %6037 = vmatmul.msk.f32.vlgmr.msra.gmra.mxu2 %vm922_vm0, %v8046_v55 }
0x156e   : > { %2878 = vmatpush.msra.mxu2 %v7763_v51 }
0x1570   : > { %2879 = vmatpush.msra.mxu2 %v7767_v54  ;;  %v2410_v54 = vpop.f32.mrf.mxu3 }
0x1572   : > { %2880 = vmatpush.msra.mxu2 %v7771_v52 }
0x1574   : > { %2881 = vmatpush.msra.mxu2 %v7775_v30  ;;  %v8230_v30 = vld [vmem:[%s7232_s5] ss:$0 sm:$0xff] }
0x1575   : > { %6038 = vmatmul.msk.f32.gmra.mxu2 %vm922_vm0, %v8076_v10  ;;  %10201 = vst [vmem:[#allocation18_spill] sm:$0xff] %v8230_v30 }
0x15c8   : > { %v2387_v45 = vpop.f32.mrf.mxu2 }
0x15c9   : > { %v2388_v20 = vadd.f32 %v8223_v47, %v2387_v45 }
0x15cb   : > { %6035 = vmatmul.msk.f32.vlgmr.msra.gmra.mxu0 %vm922_vm0, %v2388_v20 }
0x15e8   : > { %v2390_v44 = vpop.f32.mrf.mxu2 }
0x15e9   : > { %v2391_v51 = vadd.f32 %v8223_v47, %v2390_v44  ;;  %v2413_v44 = vpop.f32.mrf.mxu3 }
0x15eb   : > { %6036 = vmatmul.msk.f32.gmra.mxu0 %vm922_vm0, %v2391_v51 }
0x1648   : > { %v2439_v52 = vpop.f32.mrf.mxu0 }
0x1649   : > { %v2440_v26 = vadd.f32 %v2439_v52, %v2410_v54 }
0x164b   : > { %v2445_v58 = vadd.f32 %v8230_v30, %v2440_v26 }
0x164d   : > { %vm2447_vm1 = vcmp.ge.f32.partialorder %v2445_v58, 0.0  ;;  %v2449_v16 = vmul.f32 %v2445_v58, %v10178_v61 }
0x164f   : > { %v2451_v21 = vsel %vm2447_vm1, %v2445_v58, %v2449_v16  ;;  %v2470_v16 = vpop.f32.mrf.mxu2 }
0x1650   : > { %v2507_v45 = vsel %vm922_vm0, %v2451_v21, %v8032_v36  ;;  %6039 = vmatmul.msk.f32.vlgmr.msrb.gmra.mxu3 %vm922_vm0, %v2451_v21 }
0x1651   : > { %6041 = vst.msk [vmem:[%s7633_s12 + $0x20] sm:$0xff] %vm1077_vm4, %v2507_v45  ;;  %v8247_v45 = vld [vmem:[%s7304_s9] ss:$0 sm:$0xff] }
0x1668   : > { %v2442_v20 = vpop.f32.mrf.mxu0 }
0x1669   : > { %v2443_v51 = vadd.f32 %v2442_v20, %v2413_v44  ;;  %v2473_v20 = vpop.f32.mrf.mxu2 }
0x166b   : > { %v2446_v54 = vadd.f32 %v8230_v30, %v2443_v51 }
0x166d   : > { %vm2448_vm13 = vcmp.ge.f32.partialorder %v2446_v54, 0.0  ;;  %v2450_v26 = vmul.f32 %v2446_v54, %v10178_v61  ;;  %v10202_v61 = vsub.f32 1.0, %v8109_v48 }
0x166f   : > { %v2452_v52 = vsel %vm2448_vm13, %v2446_v54, %v2450_v26 }
0x1670   : > { %6040 = vmatmul.msk.f32.gmra.mxu3 %vm922_vm0, %v2452_v52  ;;  %v2508_v58 = vsel %vm922_vm0, %v2452_v52, %v8039_v3  ;;  %v10203_v52 = vsub.f32 1.0, %v8119_v39 }
0x1671   : > { %6042 = vst.msk [vmem:[%s7633_s12 + $0x28] sm:$0xff] %vm1077_vm4, %v2508_v58  ;;  %v6391_v58 = vunpack.i.l.bf16 %v6390_v14 }
0x16d3   : > { %v2499_v21 = vpop.f32.mrf.mxu3 }
0x16d4   : > { %v2500_v47 = vadd.f32 %v2499_v21, %v2470_v16  ;;  %v6392_v21 = vunpack.i.h.bf16 %v6390_v14  ;;  %v8287_v14 = vld [vmem:[%s7548_s14 + $0x60] sm:$0xff] }
0x16d6   : > { %v2505_v44 = vadd.f32 %v8247_v45, %v2500_v47 }
0x16d8   : > { %v2514_v54 = vmul.f32 %v2505_v44, %v10202_v61  ;;  %v8297_v44 = vld [vmem:[%s7548_s14 + $0x50] sm:$0xff] }
0x16d9   : > { %10205 = vst [vmem:[#allocation36_spill] sm:$0xff] %v8297_v44 }
0x16da   : > { %v2516_v16 = vadd.f32 %v2514_v54, %v8122_v33  ;;  %v8305_v54 = vld [vmem:[%s7548_s14 + $0x40] sm:$0xff] }
0x16db   : > { %10207 = vst [vmem:[#allocation38_spill] sm:$0xff] %v8305_v54 }
0x16f3   : > { %v2502_v51 = vpop.f32.mrf.mxu3 }
0x16f4   : > { %v2503_v30 = vadd.f32 %v2502_v51, %v2473_v20  ;;  %v2524_v20 = vsel %vm983_vm2, %v2516_v16, %v6392_v21  ;;  %v8301_v51 = vld [vmem:[%s7548_s14 + $0x48] sm:$0xff]  ;;  %v8323_v16 = vld [vmem:[%s7548_s14 + $0x20] sm:$0xff]  ;;  %v8329_v21 = vld [vmem:[%s7548_s14 + $0x18] sm:$0xff] }
0x16f5   : > { %10206 = vst [vmem:[#allocation37_spill] sm:$0xff] %v8301_v51 }
0x16f6   : > { %v2506_v26 = vadd.f32 %v8247_v45, %v2503_v30  ;;  %v8293_v30 = vld [vmem:[%s7548_s14 + $0x58] sm:$0xff]  ;;  %10211 = vst [vmem:[#allocation42_spill] sm:$0xff] %v8323_v16 }
0x16f7   : > { %10204 = vst [vmem:[#allocation35_spill] sm:$0xff] %v8293_v30 }
0x16f8   : > { %v2515_v56 = vmul.f32 %v2506_v26, %v10203_v52  ;;  %v8311_v26 = vld [vmem:[%s7548_s14 + $0x38] sm:$0xff]  ;;  %v8315_v52 = vld [vmem:[%s7548_s14 + $0x30] sm:$0xff]  ;;  %10212 = vst [vmem:[#allocation43_spill] sm:$0xff] %v8329_v21 }
0x16f9   : > { %10208 = vst [vmem:[#allocation39_spill] sm:$0xff] %v8311_v26 }
0x16fa   : > { %v2517_v62 = vadd.f32 %v2515_v56, %v8132_v11  ;;  %v8275_v11 = vld [vmem:[%s7548_s14 + $0x78] sm:$0xff]  ;;  %v8283_v56 = vld [vmem:[%s7548_s14 + $0x68] sm:$0xff]  ;;  %10209 = vst [vmem:[#allocation40_spill] sm:$0xff] %v8315_v52 }
0x16fc   : > { %v2525_v47 = vsel %vm983_vm2, %v2517_v62, %v6391_v58  ;;  %v8279_v62 = vld [vmem:[%s7548_s14 + $0x70] sm:$0xff]  ;;  %v8319_v58 = vld [vmem:[%s7548_s14 + $0x28] sm:$0xff] }
0x16fd   : > { %2540 = vmatpush.msrb.mxu0 %v2525_v47  ;;  %10210 = vst [vmem:[#allocation41_spill] sm:$0xff] %v8319_v58  ;;  %v8333_v47 = vld [vmem:[%s7548_s14 + $0x10] sm:$0xff] }
0x16fe   : > { %10213 = vst [vmem:[#allocation44_spill] sm:$0xff] %v8333_v47 }
0x16ff   : > { %2541 = vmatpush.msrb.mxu0 %v2524_v20  ;;  %v8337_v20 = vld [vmem:[%s7548_s14 + $0x8] sm:$0xff] }
0x1700   : > { %6043 = vmatmul.msk.f32.vlgmr.msrb.gmra.mxu0 %vm1022_vm3, %v7811_v57  ;;  %10214 = vst [vmem:[#allocation45_spill] sm:$0xff] %v8337_v20 }
0x1708   : > { %6044 = vmatmul.msk.f32.gmra.mxu0 %vm1022_vm3, %v7818_v15 }
0x1710   : > { %6045 = vmatmul.msk.f32.gmra.mxu0 %vm1022_vm3, %v7825_v34 }
0x1718   : > { %6046 = vmatmul.msk.f32.gmra.mxu0 %vm1022_vm3, %v7832_v8 }
0x177d   : > { %v2543_v61 = vpop.f32.mrf.mxu0 }
0x1785   : > { %v8267_v48 = vpop.f32.mrf.mxu0 }
0x178d   : > { %v2549_v39 = vpop.f32.mrf.mxu0 }
0x178e   : > { %2594 = vrot.lane.b32.xlu0 %v2549_v39, %s10147_s17 }
0x1795   : > { %v2552_v33 = vpop.f32.mrf.mxu0 }
0x1796   : > { %2596 = vrot.lane.b32.xlu0 %v2552_v33, %s10147_s17  ;;  %2567 = vmatpush.msrb.mxu1 %v2552_v33 }
0x1798   : > { %2568 = vmatpush.msrb.mxu1 %v2549_v39  ;;  %v8341_v39 = vld [vmem:[%s7548_s14] sm:$0xff]  ;;  %s5766_s14 = scalar_lea.vmem %s7490_s15, %s10217_s13 }
0x1799   : > { %10215 = vst [vmem:[#allocation46_spill] sm:$0xff] %v8341_v39 }
0x179a   : > { %2569 = vmatpush.msrb.mxu1 %v8267_v48 }
0x179c   : > { %2570 = vmatpush.msrb.mxu1 %v2543_v61 }
0x179d   : > { %6047 = vmatmul.msk.f32.vlgmr.msrb.gmra.mxu1 %vm922_vm0, %v7924_v24 }
0x179e   : > { %2797 = vmatpush.msra.mxu1 %v8275_v11 }
0x17a0   : > { %2798 = vmatpush.msra.mxu1 %v8279_v62 }
0x17a2   : > { %2799 = vmatpush.msra.mxu1 %v8283_v56 }
0x17a4   : > { %2800 = vmatpush.msra.mxu1 %v8287_v14 }
0x17a5   : > { %6048 = vmatmul.msk.f32.gmra.mxu1 %vm922_vm0, %v7947_v40 }
0x17a6   : > { %2801 = vmatpush.msra.mxu1 %v8293_v30 }
0x17a8   : > { %2802 = vmatpush.msra.mxu1 %v8297_v44 }
0x17aa   : > { %2803 = vmatpush.msra.mxu1 %v8301_v51 }
0x17ac   : > { %2804 = vmatpush.msra.mxu1 %v8305_v54 }
0x17ad   : > { %6049 = vmatmul.msk.f32.gmra.mxu1 %vm922_vm0, %v7970_v59 }
0x17ae   : > { %2805 = vmatpush.msra.mxu1 %v8311_v26 }
0x17b0   : > { %2806 = vmatpush.msra.mxu1 %v8315_v52 }
0x17b2   : > { %2807 = vmatpush.msra.mxu1 %v8319_v58 }
0x17b4   : > { %2808 = vmatpush.msra.mxu1 %v8323_v16 }
0x17b5   : > { %6050 = vmatmul.msk.f32.gmra.mxu1 %vm922_vm0, %v7993_v60 }
0x17b6   : > { %2809 = vmatpush.msra.mxu1 %v8329_v21 }
0x17b8   : > { %2810 = vmatpush.msra.mxu1 %v8333_v47 }
0x17ba   : > { %2811 = vmatpush.msra.mxu1 %v8337_v20 }
0x17bc   : > { %2812 = vmatpush.msra.mxu1 %v8341_v39 }
0x17be   : > { %2909 = vmatpush.msrb.mxu1 %v7863_v23 }
0x17c0   : > { %2910 = vmatpush.msrb.mxu1 %v7867_v29 }
0x17c2   : > { %2911 = vmatpush.msrb.mxu1 %v7871_v37 }
0x17c4   : > { %2912 = vmatpush.msrb.mxu1 %v7875_v49 }
0x1800   : > { %v2595_v23 = vpop.permute.xlu0 %2594 }
0x181a   : > { %v2572_v33 = vpop.f32.mrf.mxu1 }
0x181b   : > { %2586 = vrot.lane.b32.xlu2 %v2572_v33, %s10180_s19 }
0x1822   : > { %v2575_v47 = vpop.f32.mrf.mxu1 }
0x1823   : > { %2588 = vrot.lane.b32.xlu2 %v2575_v47, %s10180_s19 }
0x182a   : > { %v2578_v21 = vpop.f32.mrf.mxu1 }
0x182b   : > { %2602 = vrot.lane.b32.xlu1 %v2578_v21, %s10181_s20 }
0x1832   : > { %v2581_v20 = vpop.f32.mrf.mxu1 }
0x1833   : > { %2604 = vrot.lane.b32.xlu1 %v2581_v20, %s10181_s20  ;;  %v2597_v20 = vpop.permute.xlu0 %2596 }
0x1875   : > { %v2587_v39 = vpop.permute.xlu2 %2586 }
0x1876   : > { %v2608_v29 = vsel %vm1346_vm7, %v2543_v61, %v2587_v39  ;;  %v6052_v39 = vld [vmem:[%s5754_s22 + $0x20] sm:$0xff] }
0x1877   : > { %v2610_v37 = vsel %vm1349_vm8, %v2608_v29, %v2595_v23 }
0x187d   : > { %v2589_v47 = vpop.permute.xlu2 %2588 }
0x187e   : > { %v2609_v21 = vsel %vm1346_vm7, %v8267_v48, %v2589_v47 }
0x187f   : > { %v2611_v58 = vsel %vm1349_vm8, %v2609_v21, %v2597_v20 }
0x189d   : > { %v2603_v49 = vpop.permute.xlu1 %2602 }
0x189e   : > { %v2612_v33 = vsel %vm1352_vm9, %v2610_v37, %v2603_v49  ;;  %6054 = vmatmul.msk.f32.vlgmr.msra.gmra.mxu3 %vm1022_vm3, %v2603_v49 }
0x189f   : > { %2637 = vmatmul.f32.vlgmr.msrb.gmra.mxu2 %v2612_v33  ;;  %v6053_v33 = vld [vmem:[%s5754_s22 + $0x28] sm:$0xff]  ;;  %s5757_s22 = scalar_lea.vmem %s7062_s30, %s10217_s13 }
0x18a0   : > { %6076 = vmatpush.msk.msrb.mxu2 %vm10216_vm14, %v7887_v27 }
0x18a5   : > { %v2605_v16 = vpop.permute.xlu1 %2604 }
0x18a6   : > { %6055 = vmatmul.msk.f32.gmra.mxu3 %vm1022_vm3, %v2605_v16  ;;  %v2613_v61 = vsel %vm1352_vm9, %v2611_v58, %v2605_v16 }
0x18a7   : > { %2640 = vmatmul.f32.gmra.mxu2 %v2613_v61 }
0x1921   : > { %v2661_v23 = vpop.f32.mrf.mxu3 }
0x1922   : > { %v2638_v29 = vpop.f32.mrf.mxu2 }
0x1923   : > { %v2639_v37 = vadd.f32 %v6052_v39, %v2638_v29 }
0x1925   : > { %v8365_v49 = vadd.f32 %v2661_v23, %v2639_v37 }
0x1927   : > { %v6056_v27 = vmul.f32 -1.442695, %v8365_v49 }
0x1929   : > { %6441 = vpow2.f32 %v6056_v27  ;;  %v2664_v52 = vpop.f32.mrf.mxu3 }
0x192a   : > { %v2641_v48 = vpop.f32.mrf.mxu2 }
0x192b   : > { %v2642_v47 = vadd.f32 %v6053_v33, %v2641_v48 }
0x192d   : > { %v8368_v21 = vadd.f32 %v2664_v52, %v2642_v47 }
0x192f   : > { %v6442_v20 = vpop.eup %6441  ;;  %v6057_v58 = vmul.f32 -1.442695, %v8368_v21 }
0x1930   : > { %v2673_v16 = vadd.f32 1.0, %v6442_v20 }
0x1931   : > { %6443 = vpow2.f32 %v6057_v58 }
0x1932   : > { %6445 = vrcp.f32 %v2673_v16  ;;  %vm2680_vm5 = vweird.f32 %v2673_v16  ;;  %v2686_v48 = vand.u32 2147483648, %v2673_v16  ;;  %v2684_v58 = vand.u32 2147483647, %v2673_v16 }
0x1934   : > { %vm2685_vm14 = vcmp.eq.f32.partialorder %v2684_v58, 8.507059e+37 }
0x1937   : > { %v6444_v61 = vpop.eup %6443 }
0x1938   : > { %v6446_v26 = vpop.eup %6445  ;;  %v2674_v39 = vadd.f32 1.0, %v6444_v61 }
0x1939   : > { %v2676_v23 = vmul.f32 %v6446_v26, %v2673_v16  ;;  %vm2681_vm15 = vweird.f32 %v6446_v26 }
0x193a   : > { %6447 = vrcp.f32 %v2674_v39  ;;  %v2701_v52 = vand.u32 2147483648, %v2674_v39  ;;  %v2699_v20 = vand.u32 2147483647, %v2674_v39  ;;  %vm2682_vm11 = vmor %vm2680_vm5, %vm2681_vm15  ;;  %vm2695_vm12 = vweird.f32 %v2674_v39 }
0x193b   : > { %v2677_v29 = vsub.f32 1.0, %v2676_v23  ;;  %v2687_v23 = vor.u32 1.1754944e-38, %v2686_v48 }
0x193c   : > { %v2702_v30 = vor.u32 1.1754944e-38, %v2701_v52  ;;  %vm2700_vm13 = vcmp.eq.f32.partialorder %v2699_v20, 8.507059e+37 }
0x193d   : > { %v2678_v37 = vmul.f32 %v6446_v26, %v2677_v29 }
0x193f   : > { %v2679_v33 = vadd.f32 %v6446_v26, %v2678_v37 }
0x1940   : > { %v6448_v54 = vpop.eup %6447 }
0x1941   : > { %v2691_v27 = vmul.f32 %v6448_v54, %v2674_v39  ;;  %vm2696_vm6 = vweird.f32 %v6448_v54  ;;  %v2683_v61 = vsel %vm2682_vm11, %v6446_v26, %v2679_v33 }
0x1942   : > { %vm2697_vm1 = vmor %vm2695_vm12, %vm2696_vm6  ;;  %v8373_v37 = vsel %vm2685_vm14, %v2687_v23, %v2683_v61  ;;  %v10218_v61 = vld [vmem:[#allocation19_spill] sm:$0xff]  ;;  %vm10250_vm6 = vcmask 1043456  }
0x1943   : > { %v2692_v51 = vsub.f32 1.0, %v2691_v27  ;;  %v2707_v16 = vmul.f32 %v8373_v37, %v8046_v55  ;;  %v2832_v39 = vmul.f32 %v8373_v37, %v8032_v36 }
0x1945   : > { %v2693_v47 = vmul.f32 %v6448_v54, %v2692_v51 }
0x1947   : > { %v2694_v44 = vadd.f32 %v6448_v54, %v2693_v47 }
0x1949   : > { %v2698_v29 = vsel %vm2697_vm1, %v6448_v54, %v2694_v44 }
0x194a   : > { %v8371_v27 = vsel %vm2700_vm13, %v2702_v30, %v2698_v29 }
0x194b   : > { %v2708_v51 = vmul.f32 %v8371_v27, %v8076_v10 }
0x194d   : > { %2723 = vmatpush.msrb.mxu3 %v2708_v51 }
0x194f   : > { %2724 = vmatpush.msrb.mxu3 %v2707_v16  ;;  %v6068_v16 = vld [vmem:[%s5757_s22 + $0x38] sm:$0xff] }
0x1950   : > { %6058 = vmatmul.msk.f32.vlgmr.msrb.gmra.mxu3 %vm1022_vm3, %v7811_v57 }
0x1958   : > { %6059 = vmatmul.msk.f32.gmra.mxu3 %vm1022_vm3, %v7818_v15 }
0x1960   : > { %6060 = vmatmul.msk.f32.gmra.mxu3 %vm1022_vm3, %v7825_v34 }
0x1968   : > { %6061 = vmatmul.msk.f32.gmra.mxu3 %vm1022_vm3, %v7832_v8 }
0x19d3   : > { %v2726_v30 = vpop.f32.mrf.mxu3 }
0x19db   : > { %v2729_v44 = vpop.f32.mrf.mxu3 }
0x19e3   : > { %v2732_v10 = vpop.f32.mrf.mxu3 }
0x19e4   : > { %2777 = vrot.lane.b32.xlu0 %v2732_v10, %s10182_s0 }
0x19eb   : > { %v2735_v54 = vpop.f32.mrf.mxu3 }
0x19ec   : > { %2779 = vrot.lane.b32.xlu0 %v2735_v54, %s10182_s0  ;;  %2750 = vmatpush.msra.mxu0 %v2735_v54 }
0x19ee   : > { %2751 = vmatpush.msra.mxu0 %v2732_v10 }
0x19f0   : > { %2752 = vmatpush.msra.mxu0 %v2729_v44 }
0x19f2   : > { %2753 = vmatpush.msra.mxu0 %v2726_v30 }
0x19f3   : > { %6062 = vmatmul.msk.f32.vlgmr.msra.gmra.mxu0 %vm922_vm0, %v7924_v24 }
0x19f4   : > { %3007 = vmatpush.msrb.mxu0 %v7929_v25 }
0x19f6   : > { %3008 = vmatpush.msrb.mxu0 %v7933_v0 }
0x19f8   : > { %3009 = vmatpush.msrb.mxu0 %v7937_v1 }
0x19fa   : > { %3010 = vmatpush.msrb.mxu0 %v7941_v4 }
0x19fb   : > { %6063 = vmatmul.msk.f32.gmra.mxu0 %vm922_vm0, %v7947_v40 }
0x19fc   : > { %3011 = vmatpush.msrb.mxu0 %v7952_v41 }
0x19fe   : > { %3012 = vmatpush.msrb.mxu0 %v7956_v42 }
0x1a00   : > { %3013 = vmatpush.msrb.mxu0 %v7960_v43 }
0x1a02   : > { %3014 = vmatpush.msrb.mxu0 %v7964_v63 }
0x1a03   : > { %6064 = vmatmul.msk.f32.gmra.mxu0 %vm922_vm0, %v7970_v59 }
0x1a04   : > { %3094 = vmatpush.msra.mxu0 %v7975_v17 }
0x1a06   : > { %3095 = vmatpush.msra.mxu0 %v7979_v31 }
0x1a08   : > { %3096 = vmatpush.msra.mxu0 %v7983_v32 }
0x1a0a   : > { %3097 = vmatpush.msra.mxu0 %v7987_v38 }
0x1a0b   : > { %6065 = vmatmul.msk.f32.gmra.mxu0 %vm922_vm0, %v7993_v60 }
0x1a56   : > { %v2778_v25 = vpop.permute.xlu0 %2777 }
0x1a5e   : > { %v2780_v43 = vpop.permute.xlu0 %2779 }
0x1a70   : > { %v2755_v57 = vpop.f32.mrf.mxu0 }
0x1a71   : > { %2769 = vrot.lane.b32.xlu2 %v2755_v57, %s10158_s16 }
0x1a78   : > { %v2758_v15 = vpop.f32.mrf.mxu0 }
0x1a79   : > { %2771 = vrot.lane.b32.xlu2 %v2758_v15, %s10158_s16 }
0x1a80   : > { %v2761_v34 = vpop.f32.mrf.mxu0 }
0x1a81   : > { %2785 = vrot.lane.b32.xlu1 %v2761_v34, %s10160_s23 }
0x1a88   : > { %v2764_v8 = vpop.f32.mrf.mxu0 }
0x1a89   : > { %2787 = vrot.lane.b32.xlu1 %v2764_v8, %s10160_s23 }
0x1acb   : > { %v2770_v24 = vpop.permute.xlu2 %2769 }
0x1acc   : > { %v2791_v0 = vsel %vm922_vm0, %v2726_v30, %v2770_v24 }
0x1acd   : > { %v2793_v1 = vsel %vm1077_vm4, %v2791_v0, %v2778_v25 }
0x1ad3   : > { %v2772_v41 = vpop.permute.xlu2 %2771 }
0x1ad4   : > { %v2792_v42 = vsel %vm922_vm0, %v2729_v44, %v2772_v41 }
0x1ad5   : > { %v2794_v59 = vsel %vm1077_vm4, %v2792_v42, %v2780_v43 }
0x1af3   : > { %v2786_v4 = vpop.permute.xlu1 %2785 }
0x1af4   : > { %v2795_v40 = vsel %vm1534_vm10, %v2793_v1, %v2786_v4 }
0x1af5   : > { %2813 = vmatmul.f32.vlgmr.msra.gmra.mxu1 %v2795_v40 }
0x1af6   : > { %3034 = vmatpush.msra.mxu1 %v8005_v22 }
0x1af8   : > { %3035 = vmatpush.msra.mxu1 %v8010_v53 }
0x1afa   : > { %3036 = vmatpush.msra.mxu1 %v8014_v13 }
0x1afb   : > { %v2788_v63 = vpop.permute.xlu1 %2787 }
0x1afc   : > { %v2796_v17 = vsel %vm1534_vm10, %v2794_v59, %v2788_v63  ;;  %3037 = vmatpush.msra.mxu1 %v8020_v46  ;;  %v2834_v46 = vsub.f32 1.0, %v8373_v37  ;;  %v8483_v37 = vld [vmem:[%s5760_s21 + $0x38] sm:$0xff]  ;;  %v8503_v59 = vld [vmem:[%s10121_s10] sm:$0xff] }
0x1afd   : > { %2816 = vmatmul.f32.gmra.mxu1 %v2796_v17  ;;  %v2892_v44 = vsub.f32 1.0, %v8483_v37  ;;  %v2890_v57 = vmul.f32 %v8483_v37, %v6068_v16  ;;  %v8510_v17 = vld [vmem:[%s10121_s10 + $0x8] sm:$0xff] }
0x1b72   : > { %v2814_v31 = vpop.f32.mrf.mxu1 }
0x1b73   : > { %2822 = vrot.lane.b32.xlu2 %v2814_v31, %s10182_s0  ;;  %v8517_v31 = vld [vmem:[%s10121_s10 + $0x10] sm:$0xff] }
0x1b7a   : > { %v2817_v32 = vpop.f32.mrf.mxu1 }
0x1b7b   : > { %2824 = vrot.lane.b32.xlu0 %v2817_v32, %s10182_s0  ;;  %v8524_v32 = vld [vmem:[%s10121_s10 + $0x18] sm:$0xff] }
0x1bcd   : > { %v2823_v38 = vpop.permute.xlu2 %2822 }
0x1bce   : > { %v2828_v60 = vadd.f32 %v2823_v38, %v8365_v49  ;;  %v2835_v49 = vsub.f32 1.0, %v8371_v27 }
0x1bd0   : > { %6449 = vtanh.f32 %v2828_v60 }
0x1bd6   : > { %v6450_v22 = vpop.eup %6449 }
0x1bd7   : > { %2838 = vrot.lane.b32.xlu1 %v6450_v22, %s10160_s23 }
0x1bed   : > { %v2825_v53 = vpop.permute.xlu0 %2824 }
0x1bee   : > { %v2829_v13 = vadd.f32 %v2825_v53, %v8368_v21  ;;  %v2833_v21 = vmul.f32 %v8371_v27, %v8039_v3 }
0x1bf0   : > { %6451 = vtanh.f32 %v2829_v13 }
0x1bf6   : > { %v6452_v55 = vpop.eup %6451 }
0x1bf7   : > { %2840 = vrot.lane.b32.xlu2 %v6452_v55, %s10160_s23 }
0x1c49   : > { %v2839_v26 = vpop.permute.xlu1 %2838 }
0x1c4a   : > { %v2844_v33 = vmul.f32 %v2839_v26, %v2834_v46  ;;  %v10222_v46 = vld [vmem:[#allocation23_spill] sm:$0xff]  ;;  %v10223_v26 = vld [vmem:[#allocation24_spill] sm:$0xff] }
0x1c4c   : > { %v8432_v52 = vadd.f32 %v2844_v33, %v2832_v39  ;;  %v10225_v39 = vld [vmem:[#allocation25_spill] sm:$0xff]  ;;  %v10226_v33 = vld [vmem:[#allocation26_spill] sm:$0xff] }
0x1c4e   : > { %2858 = vrot.lane.b32.xlu0 %v8432_v52, %s10160_s23 }
0x1c51   : > { %v2841_v48 = vpop.permute.xlu2 %2840 }
0x1c52   : > { %v2845_v47 = vmul.f32 %v2841_v48, %v2835_v49  ;;  %v10227_v49 = vld [vmem:[#allocation27_spill] sm:$0xff]  ;;  %v10228_v48 = vld [vmem:[#allocation28_spill] sm:$0xff] }
0x1c54   : > { %v8439_v20 = vadd.f32 %v2845_v47, %v2833_v21  ;;  %v10233_v21 = vld [vmem:[#allocation33_spill] sm:$0xff] }
0x1c56   : > { %2860 = vrot.lane.b32.xlu1 %v8439_v20, %s10160_s23  ;;  %v6393_v36 = vpack.i.bf16 %v8432_v52, %v8439_v20 }
0x1c5e   : > { %6394 = vrot.lane.b32.xlu1 %v6393_v36, %s10183_s26 }
0x1cc0   : > { %v8446_v58 = vpop.permute.xlu0 %2858 }
0x1cc1   : > { %6072 = vmatmul.msk.f32.vlgmr.msra.gmra.mxu2 %vm922_vm0, %v8446_v58  ;;  %6074 = vmatmul.msk.f32.vlgmr.msrb.gmra.mxu1 %vm922_vm0, %v8446_v58 }
0x1cc2   : > { %3063 = vmatpush.msra.mxu2 %v8053_v2  ;;  %3123 = vmatpush.msrb.mxu1 %v8057_v50  ;;  %v10219_v2 = vld [vmem:[#allocation20_spill] sm:$0xff]  ;;  %v10220_v50 = vld [vmem:[#allocation21_spill] sm:$0xff] }
0x1cc4   : > { %3064 = vmatpush.msra.mxu2 %v8061_v28  ;;  %3124 = vmatpush.msrb.mxu1 %v8065_v12  ;;  %v8476_v28 = vld [vmem:[%s5760_s21 + $0x30] sm:$0xff]  ;;  %s5763_s21 = scalar_lea.vmem %s7102_s6, %s10217_s13  ;;  %s3477_s13 = ssub.s32 4, %s6783_s3 }
0x1cc5   : > { %v6067_v12 = vld [vmem:[%s5757_s22 + $0x30] sm:$0xff]  ;;  %v6081_v4 = vld [vmem:[%s5763_s21 + $0x38] sm:$0xff]  ;;  %s8873_s22 = sshll.u32 %s3477_s13, 4  ;;  %s10268_s13 = sld [smem:[#allocation13_spill]] }
0x1cc6   : > { %3065 = vmatpush.msra.mxu2 %v8069_v5  ;;  %3125 = vmatpush.msrb.mxu1 %v8073_v7  ;;  %v2891_v5 = vsub.f32 1.0, %v8476_v28  ;;  %v2889_v29 = vmul.f32 %v8476_v28, %v6067_v12  ;;  %v6080_v42 = vld [vmem:[%s5763_s21 + $0x30] sm:$0xff]  ;;  %v8561_v12 = vld [vmem:[%s10224_s7 + $0x8] sm:$0xff]  ;;  %s3482_s5 = scalar_lea.vmem %s7057_s27, %s8873_s22  ;;  %s3479_s9 = scalar_lea.vmem %s7062_s30, %s8873_s22 }
0x1cc7   : > { %s3578_s21 = scalar_lea.vmem %s7102_s6, %s8873_s22 }
0x1cc8   : > { %v8458_v3 = vpop.permute.xlu1 %2860  ;;  %3066 = vmatpush.msra.mxu2 %v8079_v35  ;;  %3126 = vmatpush.msrb.mxu1 %v10218_v61  ;;  %v10221_v35 = vld [vmem:[#allocation22_spill] sm:$0xff]  ;;  %v10234_v61 = vld [vmem:[#allocation14_spill] sm:$0xff] }
0x1cc9   : > { %6073 = vmatmul.msk.f32.gmra.mxu2 %vm922_vm0, %v8458_v3  ;;  %6075 = vmatmul.msk.f32.gmra.mxu1 %vm922_vm0, %v8458_v3 }
0x1cd1   : > { %6088 = vmatmul.msk.f32.vlgmr.msra.gmra.mxu1 %vm922_vm0, %v8446_v58 }
0x1cd2   : > { %3287 = vmatpush.msra.mxu1 %v10219_v2  ;;  %v8553_v2 = vld [vmem:[%s10224_s7 + $0x18] sm:$0xff] }
0x1cd4   : > { %3288 = vmatpush.msra.mxu1 %v10220_v50  ;;  %v8557_v50 = vld [vmem:[%s10224_s7 + $0x10] sm:$0xff] }
0x1cd9   : > { %6089 = vmatmul.msk.f32.gmra.mxu1 %vm922_vm0, %v8458_v3 }
0x1d3e   : > { %v2914_v24 = vpop.f32.mrf.mxu1 }
0x1d44   : > { %v2883_v7 = vpop.f32.mrf.mxu2 }
0x1d45   : > { %v2884_v23 = vadd.f32 %v10221_v35, %v2883_v7  ;;  %v8565_v7 = vld [vmem:[%s10224_s7] sm:$0xff] }
0x1d46   : > { %v2917_v0 = vpop.f32.mrf.mxu1 }
0x1d47   : > { %v2893_v27 = vmul.f32 %v2891_v5, %v2884_v23  ;;  %v10235_v23 = vld [vmem:[#allocation16_spill] sm:$0xff] }
0x1d49   : > { %v2895_v51 = vadd.f32 %v2893_v27, %v2889_v29 }
0x1d4b   : > { %v8486_v30 = vmul.f32 %v8476_v28, %v2895_v51  ;;  %6077 = vmatmul.msk.f32.vlgmr.msrb.gmra.mxu2 %vm983_vm2, %v2895_v51 }
0x1d4c   : > { %v2886_v10 = vpop.f32.mrf.mxu2 }
0x1d4d   : > { %v2887_v54 = vadd.f32 %v10221_v35, %v2886_v10 }
0x1d4e   : > { %v3039_v16 = vpop.f32.mrf.mxu1 }
0x1d4f   : > { %v2894_v15 = vmul.f32 %v2892_v44, %v2887_v54 }
0x1d51   : > { %v2896_v34 = vadd.f32 %v2894_v15, %v2890_v57  ;;  %v10236_v57 = vld [vmem:[#allocation18_spill] sm:$0xff] }
0x1d53   : > { %v8495_v8 = vmul.f32 %v8483_v37, %v2896_v34  ;;  %6078 = vmatmul.msk.f32.gmra.mxu2 %vm983_vm2, %v2896_v34  ;;  %v10237_v34 = vld [vmem:[#allocation17_spill] sm:$0xff] }
0x1dce   : > { %v2943_v25 = vpop.f32.mrf.mxu2 }
0x1dcf   : > { %v2944_v40 = vadd.f32 %v2943_v25, %v2914_v24 }
0x1dd1   : > { %v2952_v63 = vadd.f32 %v6080_v42, %v2944_v40 }
0x1dd6   : > { %v2946_v1 = vpop.f32.mrf.mxu2 }
0x1dd7   : > { %v2947_v41 = vadd.f32 %v2946_v1, %v2917_v0  ;;  %v3042_v1 = vpop.f32.mrf.mxu1 }
0x1dd9   : > { %v2953_v43 = vadd.f32 %v6081_v4, %v2947_v41 }
0x1ddb   : > { %2968 = vmatpush.msra.mxu3 %v2953_v43 }
0x1ddd   : > { %2969 = vmatpush.msra.mxu3 %v2952_v63 }
0x1dde   : > { %6082 = vmatmul.msk.f32.vlgmr.msra.gmra.mxu3 %vm1022_vm3, %v8503_v59 }
0x1de6   : > { %6083 = vmatmul.msk.f32.gmra.mxu3 %vm1022_vm3, %v8510_v17 }
0x1dee   : > { %6084 = vmatmul.msk.f32.gmra.mxu3 %vm1022_vm3, %v8517_v31 }
0x1df6   : > { %6085 = vmatmul.msk.f32.gmra.mxu3 %vm1022_vm3, %v8524_v32 }
0x1e61   : > { %v2971_v38 = vpop.f32.mrf.mxu3 }
0x1e69   : > { %v2974_v60 = vpop.f32.mrf.mxu3 }
0x1e71   : > { %v2977_v22 = vpop.f32.mrf.mxu3 }
0x1e72   : > { %2985 = vrot.lane.b32.xlu2 %v2977_v22, %s10158_s16 }
0x1e79   : > { %v2980_v53 = vpop.f32.mrf.mxu3 }
0x1e7a   : > { %2987 = vrot.lane.b32.xlu0 %v2980_v53, %s10158_s16 }
0x1ecc   : > { %v2986_v13 = vpop.permute.xlu2 %2985 }
0x1ecd   : > { %v2991_v55 = vsel %vm922_vm0, %v2971_v38, %v2986_v13 }
0x1ece   : > { %6086 = vmatmul.msk.f32.vlgmr.msrb.gmra.mxu0 %vm1077_vm4, %v2991_v55 }
0x1ecf   : > { %3250 = vmatpush.msrb.mxu0 %v8149_v6  ;;  %v10229_v6 = vld [vmem:[#allocation29_spill] sm:$0xff] }
0x1ed1   : > { %3251 = vmatpush.msrb.mxu0 %v8153_v18  ;;  %v10230_v18 = vld [vmem:[#allocation30_spill] sm:$0xff] }
0x1ed3   : > { %3252 = vmatpush.msrb.mxu0 %v8157_v19  ;;  %v10231_v19 = vld [vmem:[#allocation31_spill] sm:$0xff] }
0x1ed5   : > { %3253 = vmatpush.msrb.mxu0 %v8161_v9  ;;  %v10232_v9 = vld [vmem:[#allocation32_spill] sm:$0xff] }
0x1ed7   : > { %3254 = vmatpush.msrb.mxu0 %v10222_v46 }
0x1ed9   : > { %3255 = vmatpush.msrb.mxu0 %v10223_v26 }
0x1edb   : > { %3256 = vmatpush.msrb.mxu0 %v10225_v39 }
0x1edd   : > { %3257 = vmatpush.msrb.mxu0 %v10226_v33  ;;  %v6395_v33 = vpop.permute.xlu1 %6394 }
0x1edf   : > { %3258 = vmatpush.msrb.mxu0 %v10227_v49 }
0x1ee1   : > { %3259 = vmatpush.msrb.mxu0 %v10228_v48  ;;  %v6396_v48 = vunpack.i.l.bf16 %v6395_v33 }
0x1ee3   : > { %3260 = vmatpush.msrb.mxu0 %v10229_v6 }
0x1ee5   : > { %3261 = vmatpush.msrb.mxu0 %v10230_v18 }
0x1ee7   : > { %3262 = vmatpush.msrb.mxu0 %v10231_v19  ;;  %v6397_v19 = vunpack.i.h.bf16 %v6395_v33 }
0x1ee9   : > { %3263 = vmatpush.msrb.mxu0 %v10232_v9 }
0x1eeb   : > { %3264 = vmatpush.msrb.mxu0 %v10233_v21 }
0x1eec   : > { %v2988_v47 = vpop.permute.xlu0 %2987 }
0x1eed   : > { %v2992_v36 = vsel %vm922_vm0, %v2974_v60, %v2988_v47  ;;  %3265 = vmatpush.msrb.mxu0 %v10234_v61  ;;  %v10239_v47 = vld [vmem:[#allocation36_spill] sm:$0xff]  ;;  %v10244_v61 = vld [vmem:[#allocation41_spill] sm:$0xff] }
0x1eee   : > { %6087 = vmatmul.msk.f32.gmra.mxu0 %vm1077_vm4, %v2992_v36  ;;  %v10243_v36 = vld [vmem:[#allocation40_spill] sm:$0xff] }
0x1ef6   : > { %6092 = vmatmul.msk.f32.vlgmr.msra.gmra.mxu0 %vm922_vm0, %v8446_v58 }
0x1ef7   : > { %3507 = vmatpush.msra.mxu0 %v8553_v2 }
0x1ef9   : > { %3508 = vmatpush.msra.mxu0 %v8557_v50 }
0x1efb   : > { %3509 = vmatpush.msra.mxu0 %v8561_v12 }
0x1efd   : > { %3510 = vmatpush.msra.mxu0 %v8565_v7 }
0x1efe   : > { %6093 = vmatmul.msk.f32.gmra.mxu0 %vm922_vm0, %v8458_v3 }
0x1f4b   : > { %v3016_v35 = vpop.f32.mrf.mxu0 }
0x1f4c   : > { %v3017_v29 = vadd.f32 %v10235_v23, %v3016_v35  ;;  %v10245_v35 = vld [vmem:[#allocation42_spill] sm:$0xff] }
0x1f4e   : > { %6090 = vmatmul.msk.f32.vlgmr.msra.gmra.mxu2 %vm922_vm0, %v3017_v29  ;;  %v10246_v29 = vld [vmem:[#allocation43_spill] sm:$0xff] }
0x1f6b   : > { %v3019_v27 = vpop.f32.mrf.mxu0 }
0x1f6c   : > { %v3020_v51 = vadd.f32 %v10235_v23, %v3019_v27  ;;  %v8644_v23 = vld [vmem:[%s10137_s24 + $0x18] sm:$0xff]  ;;  %v10247_v27 = vld [vmem:[#allocation44_spill] sm:$0xff] }
0x1f6e   : > { %6091 = vmatmul.msk.f32.gmra.mxu2 %vm922_vm0, %v3020_v51  ;;  %v10248_v51 = vld [vmem:[#allocation45_spill] sm:$0xff] }
0x1f73   : > { %v3099_v38 = vpop.f32.mrf.mxu0 }
0x1f7b   : > { %v3102_v13 = vpop.f32.mrf.mxu0 }
0x1fd1   : > { %v3068_v10 = vpop.f32.mrf.mxu2 }
0x1fd2   : > { %v3069_v54 = vadd.f32 %v3068_v10, %v3039_v16  ;;  %v10249_v16 = vld [vmem:[#allocation46_spill] sm:$0xff]  ;;  %v8653_v10 = vld [vmem:[%s7014_s2 + $0x18] sm:$0xff] }
0x1fd4   : > { %v3074_v15 = vadd.f32 %v10236_v57, %v3069_v54  ;;  %v8657_v54 = vld [vmem:[%s7014_s2 + $0x10] sm:$0xff] }
0x1fd6   : > { %vm3076_vm15 = vcmp.ge.f32.partialorder %v3074_v15, 0.0  ;;  %v3078_v24 = vmul.f32 %v3074_v15, %v10237_v34 }
0x1fd8   : > { %v3080_v25 = vsel %vm3076_vm15, %v3074_v15, %v3078_v24  ;;  %v8665_v15 = vld [vmem:[%s7014_s2] sm:$0xff] }
0x1fd9   : > { %v3136_v0 = vsel %vm922_vm0, %v3080_v25, %v8432_v52  ;;  %6094 = vmatmul.msk.f32.vlgmr.msrb.gmra.mxu1 %vm922_vm0, %v3080_v25 }
0x1fda   : > { %6096 = vst.msk [vmem:[%s7633_s12 + $0x30] sm:$0xff] %vm1077_vm4, %v3136_v0 }
0x1ff1   : > { %v3071_v4 = vpop.f32.mrf.mxu2 }
0x1ff2   : > { %v3072_v40 = vadd.f32 %v3071_v4, %v3042_v1 }
0x1ff4   : > { %v3075_v41 = vadd.f32 %v10236_v57, %v3072_v40  ;;  %v8661_v57 = vld [vmem:[%s7014_s2 + $0x8] sm:$0xff] }
0x1ff6   : > { %vm3077_vm5 = vcmp.ge.f32.partialorder %v3075_v41, 0.0  ;;  %v3079_v42 = vmul.f32 %v3075_v41, %v10237_v34 }
0x1ff8   : > { %v3081_v43 = vsel %vm3077_vm5, %v3075_v41, %v3079_v42 }
0x1ff9   : > { %6095 = vmatmul.msk.f32.gmra.mxu1 %vm922_vm0, %v3081_v43  ;;  %v3137_v63 = vsel %vm922_vm0, %v3081_v43, %v8439_v20 }
0x1ffa   : > { %6097 = vst.msk [vmem:[%s7633_s12 + $0x38] sm:$0xff] %vm1077_vm4, %v3137_v63 }
0x2056   : > { %v3128_v60 = vpop.f32.mrf.mxu1 }
0x2057   : > { %v3129_v22 = vadd.f32 %v3128_v60, %v3099_v38  ;;  %v8677_v60 = vld [vmem:[%s7019_s1] sm:$0xf] }
0x2059   : > { %v3134_v53 = vadd.f32 %v8247_v45, %v3129_v22 }
0x205b   : > { %v3143_v26 = vmul.f32 %v3134_v53, %v2891_v5 }
0x205d   : > { %v3145_v18 = vadd.f32 %v3143_v26, %v8486_v30  ;;  %v8611_v30 = vld [vmem:[%s10137_s24] sm:$0xff]  ;;  %v6107_v26 = vld [vmem:[%s5766_s14 + $0x30] sm:$0xff] }
0x205f   : > { %v3153_v21 = vsel %vm983_vm2, %v3145_v18, %v6397_v19  ;;  %v6108_v18 = vld [vmem:[%s5766_s14 + $0x38] sm:$0xff]  ;;  %s10265_s14 = sld [smem:[#allocation12_spill]] }
0x2076   : > { %v3131_v55 = vpop.f32.mrf.mxu1 }
0x2077   : > { %v3132_v46 = vadd.f32 %v3131_v55, %v3102_v13 }
0x2079   : > { %v3135_v39 = vadd.f32 %v8247_v45, %v3132_v46 }
0x207b   : > { %v3144_v49 = vmul.f32 %v3135_v39, %v2892_v44  ;;  %v8622_v44 = vld [vmem:[%s10137_s24 + $0x8] sm:$0xff] }
0x207d   : > { %v3146_v6 = vadd.f32 %v3144_v49, %v8495_v8  ;;  %v10238_v8 = vld [vmem:[#allocation35_spill] sm:$0xff] }
0x207f   : > { %v3154_v9 = vsel %vm983_vm2, %v3146_v6, %v6396_v48 }
0x2080   : > { %3169 = vmatpush.msrb.mxu2 %v3154_v9 }
0x2082   : > { %3170 = vmatpush.msrb.mxu2 %v3153_v21 }
0x2083   : > { %6098 = vmatmul.msk.f32.vlgmr.msrb.gmra.mxu2 %vm1022_vm3, %v8503_v59 }
0x208b   : > { %6099 = vmatmul.msk.f32.gmra.mxu2 %vm1022_vm3, %v8510_v17 }
0x2093   : > { %6100 = vmatmul.msk.f32.gmra.mxu2 %vm1022_vm3, %v8517_v31 }
0x209b   : > { %6101 = vmatmul.msk.f32.gmra.mxu2 %vm1022_vm3, %v8524_v32 }
0x2106   : > { %v3172_v45 = vpop.f32.mrf.mxu2 }
0x210e   : > { %v3175_v28 = vpop.f32.mrf.mxu2 }
0x2116   : > { %v3178_v5 = vpop.f32.mrf.mxu2 }
0x2117   : > { %3223 = vrot.lane.b32.xlu0 %v3178_v5, %s10147_s17 }
0x211e   : > { %v3181_v37 = vpop.f32.mrf.mxu2 }
0x211f   : > { %3225 = vrot.lane.b32.xlu0 %v3181_v37, %s10147_s17  ;;  %3196 = vmatpush.msrb.mxu3 %v3181_v37 }
0x2121   : > { %3197 = vmatpush.msrb.mxu3 %v3178_v5 }
0x2123   : > { %3198 = vmatpush.msrb.mxu3 %v3175_v28 }
0x2125   : > { %3199 = vmatpush.msrb.mxu3 %v3172_v45 }
0x2126   : > { %6102 = vmatmul.msk.f32.vlgmr.msrb.gmra.mxu3 %vm922_vm0, %v8611_v30 }
0x2127   : > { %3426 = vmatpush.msra.mxu3 %v8275_v11  ;;  %v10240_v11 = vld [vmem:[#allocation37_spill] sm:$0xff] }
0x2129   : > { %3427 = vmatpush.msra.mxu3 %v8279_v62  ;;  %v10241_v62 = vld [vmem:[#allocation38_spill] sm:$0xff] }
0x212b   : > { %3428 = vmatpush.msra.mxu3 %v8283_v56  ;;  %v8633_v56 = vld [vmem:[%s10137_s24 + $0x10] sm:$0xff] }
0x212d   : > { %3429 = vmatpush.msra.mxu3 %v8287_v14  ;;  %v10242_v14 = vld [vmem:[#allocation39_spill] sm:$0xff] }
0x212e   : > { %6103 = vmatmul.msk.f32.gmra.mxu3 %vm922_vm0, %v8622_v44 }
0x212f   : > { %3430 = vmatpush.msra.mxu3 %v10238_v8 }
0x2131   : > { %3431 = vmatpush.msra.mxu3 %v10239_v47 }
0x2133   : > { %3432 = vmatpush.msra.mxu3 %v10240_v11 }
0x2135   : > { %3433 = vmatpush.msra.mxu3 %v10241_v62 }
0x2136   : > { %6104 = vmatmul.msk.f32.gmra.mxu3 %vm922_vm0, %v8633_v56 }
0x2137   : > { %3434 = vmatpush.msra.mxu3 %v10242_v14 }
0x2139   : > { %3435 = vmatpush.msra.mxu3 %v10243_v36 }
0x213b   : > { %3436 = vmatpush.msra.mxu3 %v10244_v61 }
0x213d   : > { %3437 = vmatpush.msra.mxu3 %v10245_v35 }
0x213e   : > { %6105 = vmatmul.msk.f32.gmra.mxu3 %vm922_vm0, %v8644_v23 }
0x213f   : > { %3438 = vmatpush.msra.mxu3 %v10246_v29 }
0x2141   : > { %3439 = vmatpush.msra.mxu3 %v10247_v27 }
0x2143   : > { %3440 = vmatpush.msra.mxu3 %v10248_v51 }
0x2145   : > { %3441 = vmatpush.msra.mxu3 %v10249_v16 }
0x2147   : > { %3538 = vmatpush.msrb.mxu3 %v8653_v10 }
0x2149   : > { %3539 = vmatpush.msrb.mxu3 %v8657_v54 }
0x214b   : > { %3540 = vmatpush.msrb.mxu3 %v8661_v57 }
0x214d   : > { %3541 = vmatpush.msrb.mxu3 %v8665_v15 }
0x2189   : > { %v3224_v40 = vpop.permute.xlu0 %3223 }
0x2191   : > { %v3226_v53 = vpop.permute.xlu0 %3225 }
0x21a9   : > { %v3201_v24 = vpop.f32.mrf.mxu3 }
0x21aa   : > { %3215 = vrot.lane.b32.xlu2 %v3201_v24, %s10180_s19 }
0x21b1   : > { %v3204_v25 = vpop.f32.mrf.mxu3 }
0x21b2   : > { %3217 = vrot.lane.b32.xlu2 %v3204_v25, %s10180_s19 }
0x21b9   : > { %v3207_v0 = vpop.f32.mrf.mxu3 }
0x21ba   : > { %3231 = vrot.lane.b32.xlu1 %v3207_v0, %s10181_s20 }
0x21c1   : > { %v3210_v1 = vpop.f32.mrf.mxu3 }
0x21c2   : > { %3233 = vrot.lane.b32.xlu1 %v3210_v1, %s10181_s20 }
0x2204   : > { %v3216_v4 = vpop.permute.xlu2 %3215 }
0x2205   : > { %v3237_v41 = vsel %vm1346_vm7, %v3172_v45, %v3216_v4 }
0x2206   : > { %v3239_v42 = vsel %vm1349_vm8, %v3237_v41, %v3224_v40 }
0x220c   : > { %v3218_v38 = vpop.permute.xlu2 %3217 }
0x220d   : > { %v3238_v22 = vsel %vm1346_vm7, %v3175_v28, %v3218_v38 }
0x220e   : > { %v3240_v55 = vsel %vm1349_vm8, %v3238_v22, %v3226_v53 }
0x222c   : > { %v3232_v43 = vpop.permute.xlu1 %3231 }
0x222d   : > { %v3241_v63 = vsel %vm1352_vm9, %v3239_v42, %v3232_v43  ;;  %6109 = vmatmul.msk.f32.vlgmr.msra.gmra.mxu1 %vm1022_vm3, %v3232_v43 }
0x222e   : > { %3266 = vmatmul.f32.vlgmr.msrb.gmra.mxu0 %v3241_v63 }
0x222f   : > { %6126 = vmatpush.msk.msrb.mxu0 %vm10250_vm6, %v8677_v60 }
0x2234   : > { %v3234_v13 = vpop.permute.xlu1 %3233 }
0x2235   : > { %6110 = vmatmul.msk.f32.gmra.mxu1 %vm1022_vm3, %v3234_v13  ;;  %v3242_v46 = vsel %vm1352_vm9, %v3240_v55, %v3234_v13  ;;  %v8714_v55 = vld [vmem:[%s7138_s4 + $0x38] sm:$0xff] }
0x2236   : > { %3269 = vmatmul.f32.gmra.mxu0 %v3242_v46  ;;  %v8718_v46 = vld [vmem:[%s7138_s4 + $0x30] sm:$0xff] }
0x22aa   : > { %v3290_v39 = vpop.f32.mrf.mxu1 }
0x22ab   : > { %v3267_v33 = vpop.f32.mrf.mxu0 }
0x22ac   : > { %v3268_v49 = vadd.f32 %v6107_v26, %v3267_v33  ;;  %v8722_v26 = vld [vmem:[%s7138_s4 + $0x28] sm:$0xff]  ;;  %v8732_v33 = vld [vmem:[%s7138_s4 + $0x18] sm:$0xff] }
0x22ae   : > { %v8687_v48 = vadd.f32 %v3290_v39, %v3268_v49  ;;  %v8726_v39 = vld [vmem:[%s7138_s4 + $0x20] sm:$0xff]  ;;  %v8736_v49 = vld [vmem:[%s7138_s4 + $0x10] sm:$0xff] }
0x22b0   : > { %v6111_v6 = vmul.f32 -1.442695, %v8687_v48 }
0x22b2   : > { %6453 = vpow2.f32 %v6111_v6  ;;  %v3293_v21 = vpop.f32.mrf.mxu1  ;;  %v8740_v6 = vld [vmem:[%s7138_s4 + $0x8] sm:$0xff] }
0x22b3   : > { %v3270_v19 = vpop.f32.mrf.mxu0 }
0x22b4   : > { %v3271_v9 = vadd.f32 %v6108_v18, %v3270_v19  ;;  %v8744_v18 = vld [vmem:[%s7138_s4] sm:$0xff]  ;;  %v8750_v19 = vld [vmem:[%s7250_s28 + $0x18] sm:$0xff] }
0x22b6   : > { %v8690_v45 = vadd.f32 %v3293_v21, %v3271_v9  ;;  %v8754_v9 = vld [vmem:[%s7250_s28 + $0x10] sm:$0xff]  ;;  %v8758_v21 = vld [vmem:[%s7250_s28 + $0x8] sm:$0xff] }
0x22b8   : > { %v6454_v28 = vpop.eup %6453  ;;  %v6112_v5 = vmul.f32 -1.442695, %v8690_v45 }
0x22b9   : > { %v3302_v37 = vadd.f32 1.0, %v6454_v28  ;;  %v8762_v28 = vld [vmem:[%s7250_s28] sm:$0xff] }
0x22ba   : > { %6455 = vpow2.f32 %v6112_v5 }
0x22bb   : > { %6457 = vrcp.f32 %v3302_v37  ;;  %vm3309_vm12 = vweird.f32 %v3302_v37  ;;  %v3315_v16 = vand.u32 2147483648, %v3302_v37  ;;  %v3313_v0 = vand.u32 2147483647, %v3302_v37 }
0x22bd   : > { %v3316_v41 = vor.u32 1.1754944e-38, %v3315_v16  ;;  %vm3314_vm6 = vcmp.eq.f32.partialorder %v3313_v0, 8.507059e+37  ;;  %v8780_v16 = vld [vmem:[%s7192_s29 + $0x10] sm:$0xff] }
0x22c0   : > { %v6456_v8 = vpop.eup %6455 }
0x22c1   : > { %v6458_v47 = vpop.eup %6457  ;;  %v3303_v11 = vadd.f32 1.0, %v6456_v8 }
0x22c2   : > { %v3305_v62 = vmul.f32 %v6458_v47, %v3302_v37  ;;  %vm3310_vm11 = vweird.f32 %v6458_v47 }
0x22c3   : > { %6459 = vrcp.f32 %v3303_v11  ;;  %v3330_v51 = vand.u32 2147483648, %v3303_v11  ;;  %v3328_v25 = vand.u32 2147483647, %v3303_v11  ;;  %vm3311_vm13 = vmor %vm3309_vm12, %vm3310_vm11  ;;  %vm3324_vm14 = vweird.f32 %v3303_v11 }
0x22c4   : > { %v3306_v14 = vsub.f32 1.0, %v3305_v62 }
0x22c5   : > { %v3331_v40 = vor.u32 1.1754944e-38, %v3330_v51  ;;  %vm3329_vm5 = vcmp.eq.f32.partialorder %v3328_v25, 8.507059e+37  ;;  %v8784_v25 = vld [vmem:[%s7192_s29 + $0x8] sm:$0xff] }
0x22c6   : > { %v3307_v36 = vmul.f32 %v6458_v47, %v3306_v14 }
0x22c8   : > { %v3308_v27 = vadd.f32 %v6458_v47, %v3307_v36 }
0x22c9   : > { %v6460_v61 = vpop.eup %6459 }
0x22ca   : > { %v3320_v35 = vmul.f32 %v6460_v61, %v3303_v11  ;;  %vm3325_vm1 = vweird.f32 %v6460_v61  ;;  %v3312_v4 = vsel %vm3311_vm13, %v6458_v47, %v3308_v27  ;;  %v8775_v27 = vld [vmem:[%s7192_s29 + $0x18] sm:$0xff] }
0x22cb   : > { %vm3326_vm15 = vmor %vm3324_vm14, %vm3325_vm1  ;;  %v8695_v63 = vsel %vm3314_vm6, %v3316_v41, %v3312_v4  ;;  %vm10283_vm1 = vcmask 1043456  }
0x22cc   : > { %v3321_v29 = vsub.f32 1.0, %v3320_v35  ;;  %v3336_v22 = vmul.f32 %v8695_v63, %v8446_v58 }
0x22ce   : > { %v3322_v24 = vmul.f32 %v6460_v61, %v3321_v29 }
0x22d0   : > { %v3323_v1 = vadd.f32 %v6460_v61, %v3322_v24 }
0x22d2   : > { %v3327_v42 = vsel %vm3326_vm15, %v6460_v61, %v3323_v1 }
0x22d3   : > { %v8693_v43 = vsel %vm3329_vm5, %v3331_v40, %v3327_v42  ;;  %v8790_v40 = vld [vmem:[%s7192_s29] sm:$0xff] }
0x22d4   : > { %v3337_v38 = vmul.f32 %v8693_v43, %v8458_v3 }
0x22d6   : > { %3352 = vmatpush.msrb.mxu1 %v3337_v38 }
0x22d8   : > { %3353 = vmatpush.msrb.mxu1 %v3336_v22 }
0x22d9   : > { %6113 = vmatmul.msk.f32.vlgmr.msrb.gmra.mxu1 %vm1022_vm3, %v8503_v59 }
0x22e1   : > { %6114 = vmatmul.msk.f32.gmra.mxu1 %vm1022_vm3, %v8510_v17 }
0x22e9   : > { %6115 = vmatmul.msk.f32.gmra.mxu1 %vm1022_vm3, %v8517_v31 }
0x22f1   : > { %6116 = vmatmul.msk.f32.gmra.mxu1 %vm1022_vm3, %v8524_v32 }
0x2356   : > { %v3355_v3 = vpop.f32.mrf.mxu1 }
0x235e   : > { %v3358_v53 = vpop.f32.mrf.mxu1 }
0x2366   : > { %v3361_v58 = vpop.f32.mrf.mxu1 }
0x2367   : > { %3406 = vrot.lane.b32.xlu0 %v3361_v58, %s10182_s0 }
0x236e   : > { %v3364_v13 = vpop.f32.mrf.mxu1 }
0x236f   : > { %3408 = vrot.lane.b32.xlu0 %v3364_v13, %s10182_s0  ;;  %3379 = vmatpush.msra.mxu2 %v3364_v13 }
0x2371   : > { %3380 = vmatpush.msra.mxu2 %v3361_v58 }
0x2373   : > { %3381 = vmatpush.msra.mxu2 %v3358_v53 }
0x2375   : > { %3382 = vmatpush.msra.mxu2 %v3355_v3 }
0x2376   : > { %6117 = vmatmul.msk.f32.vlgmr.msra.gmra.mxu2 %vm922_vm0, %v8611_v30 }
0x2377   : > { %3636 = vmatpush.msrb.mxu2 %v8714_v55 }
0x2379   : > { %3637 = vmatpush.msrb.mxu2 %v8718_v46 }
0x237b   : > { %3638 = vmatpush.msrb.mxu2 %v8722_v26 }
0x237d   : > { %3639 = vmatpush.msrb.mxu2 %v8726_v39 }
0x237e   : > { %6118 = vmatmul.msk.f32.gmra.mxu2 %vm922_vm0, %v8622_v44 }
0x237f   : > { %3640 = vmatpush.msrb.mxu2 %v8732_v33 }
0x2381   : > { %3641 = vmatpush.msrb.mxu2 %v8736_v49 }
0x2383   : > { %3642 = vmatpush.msrb.mxu2 %v8740_v6 }
0x2385   : > { %3643 = vmatpush.msrb.mxu2 %v8744_v18 }
0x2386   : > { %6119 = vmatmul.msk.f32.gmra.mxu2 %vm922_vm0, %v8633_v56 }
0x2387   : > { %3723 = vmatpush.msra.mxu2 %v8750_v19 }
0x2389   : > { %3724 = vmatpush.msra.mxu2 %v8754_v9 }
0x238b   : > { %3725 = vmatpush.msra.mxu2 %v8758_v21 }
0x238d   : > { %3726 = vmatpush.msra.mxu2 %v8762_v28 }
0x238e   : > { %6120 = vmatmul.msk.f32.gmra.mxu2 %vm922_vm0, %v8644_v23 }
0x23d9   : > { %v3407_v62 = vpop.permute.xlu0 %3406 }
0x23e1   : > { %v3409_v24 = vpop.permute.xlu0 %3408 }
0x23f9   : > { %v3384_v5 = vpop.f32.mrf.mxu2 }
0x23fa   : > { %3398 = vrot.lane.b32.xlu2 %v3384_v5, %s10158_s16  ;;  %v3463_v5 = vsub.f32 1.0, %v8695_v63 }
0x2401   : > { %v3387_v37 = vpop.f32.mrf.mxu2 }
0x2402   : > { %3400 = vrot.lane.b32.xlu2 %v3387_v37, %s10158_s16 }
0x2409   : > { %v3390_v8 = vpop.f32.mrf.mxu2 }
0x240a   : > { %3414 = vrot.lane.b32.xlu1 %v3390_v8, %s10160_s23  ;;  %v3461_v8 = vmul.f32 %v8695_v63, %v8432_v52 }
0x2411   : > { %v3393_v47 = vpop.f32.mrf.mxu2 }
0x2412   : > { %3416 = vrot.lane.b32.xlu1 %v3393_v47, %s10160_s23 }
0x2454   : > { %v3399_v11 = vpop.permute.xlu2 %3398 }
0x2455   : > { %v3420_v14 = vsel %vm922_vm0, %v3355_v3, %v3399_v11 }
0x2456   : > { %v3422_v36 = vsel %vm1077_vm4, %v3420_v14, %v3407_v62  ;;  %v3462_v62 = vmul.f32 %v8693_v43, %v8439_v20  ;;  %v8823_v20 = vld [vmem:[%s7198_s11 + $0x18] sm:$0xff] }
0x245c   : > { %v3401_v29 = vpop.permute.xlu2 %3400 }
0x245d   : > { %v3421_v51 = vsel %vm922_vm0, %v3358_v53, %v3401_v29  ;;  %v8839_v29 = vld [vmem:[%s7198_s11 + $0x8] sm:$0xff] }
0x245e   : > { %v3423_v1 = vsel %vm1077_vm4, %v3421_v51, %v3409_v24  ;;  %v8843_v51 = vld [vmem:[%s7275_s8 + $0x8] sm:$0xff] }
0x247c   : > { %v3415_v61 = vpop.permute.xlu1 %3414 }
0x247d   : > { %v3424_v35 = vsel %vm1534_vm10, %v3422_v36, %v3415_v61  ;;  %v8831_v61 = vld [vmem:[%s7198_s11 + $0x10] sm:$0xff] }
0x247e   : > { %3442 = vmatmul.f32.vlgmr.msra.gmra.mxu3 %v3424_v35  ;;  %v8835_v35 = vld [vmem:[%s7275_s8 + $0x10] sm:$0xff] }
0x247f   : > { %3663 = vmatpush.msra.mxu3 %v8775_v27 }
0x2481   : > { %3664 = vmatpush.msra.mxu3 %v8780_v16 }
0x2483   : > { %3665 = vmatpush.msra.mxu3 %v8784_v25 }
0x2484   : > { %v3417_v0 = vpop.permute.xlu1 %3416 }
0x2485   : > { %v3425_v4 = vsel %vm1534_vm10, %v3423_v1, %v3417_v0  ;;  %3666 = vmatpush.msra.mxu3 %v8790_v40  ;;  %v8849_v0 = vld [vmem:[%s7198_s11] sm:$0xff] }
0x2486   : > { %3445 = vmatmul.f32.gmra.mxu3 %v3425_v4  ;;  %v8853_v1 = vld [vmem:[%s7275_s8] sm:$0xff]  ;;  %v8863_v4 = vld [vmem:[%s7391_s18 + $0x88] sm:$0xff] }
0x2487   : > { %10251 = vst [vmem:[#allocation19_spill] sm:$0xff] %v8853_v1 }
0x2488   : > { %10252 = vst [vmem:[#allocation20_spill] sm:$0xff] %v8863_v4 }
0x2501   : > { %v3443_v41 = vpop.f32.mrf.mxu3 }
0x2502   : > { %3451 = vrot.lane.b32.xlu2 %v3443_v41, %s10182_s0  ;;  %v8867_v41 = vld [vmem:[%s7391_s18 + $0x80] sm:$0xff] }
0x2503   : > { %10253 = vst [vmem:[#allocation21_spill] sm:$0xff] %v8867_v41 }
0x2509   : > { %v3446_v42 = vpop.f32.mrf.mxu3 }
0x250a   : > { %3453 = vrot.lane.b32.xlu0 %v3446_v42, %s10182_s0  ;;  %v8879_v42 = vld [vmem:[%s3482_s5] sm:$0xff] }
0x255c   : > { %v3452_v38 = vpop.permute.xlu2 %3451 }
0x255d   : > { %v3457_v22 = vadd.f32 %v3452_v38, %v8687_v48  ;;  %v3480_v38 = vld [vmem:[%s3479_s9] sm:$0xff] }
0x255f   : > { %6461 = vtanh.f32 %v3457_v22  ;;  %v10049_v22 = vsub.f32 1.0, %v8879_v42 }
0x2565   : > { %v6462_v3 = vpop.eup %6461 }
0x2566   : > { %3467 = vrot.lane.b32.xlu1 %v6462_v3, %s10160_s23 }
0x257c   : > { %v3454_v53 = vpop.permute.xlu0 %3453 }
0x257d   : > { %v3458_v58 = vadd.f32 %v3454_v53, %v8690_v45  ;;  %v3464_v45 = vsub.f32 1.0, %v8693_v43  ;;  %v8827_v43 = vld [vmem:[%s7275_s8 + $0x18] sm:$0xff]  ;;  %v8883_v53 = vld [vmem:[%s6986_s25] ss:$0 sm:$0xff] }
0x257e   : > { %10254 = vst [vmem:[#allocation22_spill] sm:$0xff] %v8883_v53 }
0x257f   : > { %6463 = vtanh.f32 %v3458_v58 }
0x2585   : > { %v6464_v13 = vpop.eup %6463 }
0x2586   : > { %3469 = vrot.lane.b32.xlu2 %v6464_v13, %s10160_s23  ;;  %v3518_v13 = vmul.f32 %v8879_v42, %v3480_v38 }
0x25d8   : > { %v3468_v37 = vpop.permute.xlu1 %3467 }
0x25d9   : > { %v3473_v47 = vmul.f32 %v3468_v37, %v3463_v5  ;;  %v8889_v37 = vld [vmem:[%s3482_s5 + $0x8] sm:$0xff]  ;;  %s10271_s5 = sld [smem:[#allocation15_spill]] }
0x25db   : > { %v8802_v48 = vadd.f32 %v3473_v47, %v3461_v8  ;;  %v3481_v47 = vld [vmem:[%s3479_s9 + $0x8] sm:$0xff]  ;;  %s10274_s9 = sld [smem:[#allocation34_spill]] }
0x25dd   : > { %3487 = vrot.lane.b32.xlu0 %v8802_v48, %s10160_s23 }
0x25e0   : > { %v3470_v11 = vpop.permute.xlu2 %3469 }
0x25e1   : > { %v3474_v14 = vmul.f32 %v3470_v11, %v3464_v45  ;;  %v10055_v11 = vsub.f32 1.0, %v8889_v37 }
0x25e3   : > { %v8809_v36 = vadd.f32 %v3474_v14, %v3462_v62 }
0x25e5   : > { %3489 = vrot.lane.b32.xlu1 %v8809_v36, %s10160_s23  ;;  %v6398_v52 = vpack.i.bf16 %v8802_v48, %v8809_v36 }
0x25ed   : > { %6399 = vrot.lane.b32.xlu1 %v6398_v52, %s10183_s26  ;;  %v3519_v52 = vmul.f32 %v8889_v37, %v3481_v47 }
0x264f   : > { %v8816_v63 = vpop.permute.xlu0 %3487 }
0x2650   : > { %6122 = vmatmul.msk.f32.vlgmr.msra.gmra.mxu0 %vm922_vm0, %v8816_v63  ;;  %6124 = vmatmul.msk.f32.vlgmr.msrb.gmra.mxu3 %vm922_vm0, %v8816_v63 }
0x2651   : > { %3692 = vmatpush.msra.mxu0 %v8823_v20  ;;  %3752 = vmatpush.msrb.mxu3 %v8827_v43 }
0x2653   : > { %3693 = vmatpush.msra.mxu0 %v8831_v61  ;;  %3753 = vmatpush.msrb.mxu3 %v8835_v35 }
0x2655   : > { %3694 = vmatpush.msra.mxu0 %v8839_v29  ;;  %3754 = vmatpush.msrb.mxu3 %v8843_v51 }
0x2657   : > { %v8846_v24 = vpop.permute.xlu1 %3489  ;;  %3695 = vmatpush.msra.mxu0 %v8849_v0  ;;  %3755 = vmatpush.msrb.mxu3 %v8853_v1 }
0x2658   : > { %6123 = vmatmul.msk.f32.gmra.mxu0 %vm922_vm0, %v8846_v24  ;;  %6125 = vmatmul.msk.f32.gmra.mxu3 %vm922_vm0, %v8846_v24 }
0x2660   : > { %6135 = vmatmul.msk.f32.vlgmr.msra.gmra.mxu3 %vm922_vm0, %v8816_v63 }
0x2661   : > { %3916 = vmatpush.msra.mxu3 %v8863_v4 }
0x2663   : > { %3917 = vmatpush.msra.mxu3 %v8867_v41  ;;  %v3580_v41 = vld [vmem:[%s3578_s21 + $0x8] sm:$0xff] }
0x2668   : > { %6136 = vmatmul.msk.f32.gmra.mxu3 %vm922_vm0, %v8846_v24 }
0x26cd   : > { %v3512_v3 = vpop.f32.mrf.mxu0 }
0x26ce   : > { %v3513_v58 = vadd.f32 %v8883_v53, %v3512_v3 }
0x26d0   : > { %v3522_v5 = vmul.f32 %v10049_v22, %v3513_v58 }
0x26d2   : > { %v3524_v8 = vadd.f32 %v3522_v5, %v3518_v13 }
0x26d3   : > { %v3543_v13 = vpop.f32.mrf.mxu3 }
0x26d4   : > { %v8892_v45 = vmul.f32 %v3524_v8, %v8879_v42  ;;  %6127 = vmatmul.msk.f32.vlgmr.msrb.gmra.mxu0 %vm983_vm2, %v3524_v8 }
0x26d5   : > { %v3515_v62 = vpop.f32.mrf.mxu0 }
0x26d6   : > { %v3516_v14 = vadd.f32 %v8883_v53, %v3515_v62  ;;  %v3579_v62 = vld [vmem:[%s3578_s21] sm:$0xff]  ;;  %s3872_s21 = scalar_lea.vmem %s7490_s15, %s8873_s22 }
0x26d8   : > { %v3523_v38 = vmul.f32 %v10055_v11, %v3516_v14  ;;  %v8971_v11 = vld [vmem:[%s7391_s18 + $0x10] sm:$0xff] }
0x26d9   : > { %10264 = vst [vmem:[#allocation32_spill] sm:$0xff] %v8971_v11 }
0x26da   : > { %v3525_v3 = vadd.f32 %v3523_v38, %v3519_v52  ;;  %v8919_v52 = vld [vmem:[%s7391_s18 + $0x78] sm:$0xff]  ;;  %v8923_v38 = vld [vmem:[%s7391_s18 + $0x70] sm:$0xff] }
0x26db   : > { %v3546_v8 = vpop.f32.mrf.mxu3 }
0x26dc   : > { %v8901_v58 = vmul.f32 %v3525_v3, %v8889_v37  ;;  %6128 = vmatmul.msk.f32.gmra.mxu0 %vm983_vm2, %v3525_v3  ;;  %v8927_v3 = vld [vmem:[%s7391_s18 + $0x68] sm:$0xff] }
0x2751   : > { %v3572_v5 = vpop.f32.mrf.mxu0 }
0x2752   : > { %v3573_v4 = vadd.f32 %v3572_v5, %v3543_v13  ;;  %v8931_v13 = vld [vmem:[%s7391_s18 + $0x60] sm:$0xff]  ;;  %v8935_v5 = vld [vmem:[%s7391_s18 + $0x58] sm:$0xff] }
0x2753   : > { %10255 = vst [vmem:[#allocation23_spill] sm:$0xff] %v8935_v5 }
0x2754   : > { %v3581_v47 = vadd.f32 %v3579_v62, %v3573_v4  ;;  %v8943_v62 = vld [vmem:[%s7391_s18 + $0x48] sm:$0xff] }
0x2755   : > { %10257 = vst [vmem:[#allocation25_spill] sm:$0xff] %v8943_v62 }
0x2759   : > { %v3575_v22 = vpop.f32.mrf.mxu0 }
0x275a   : > { %v3576_v1 = vadd.f32 %v3575_v22, %v3546_v8  ;;  %v8939_v8 = vld [vmem:[%s7391_s18 + $0x50] sm:$0xff] }
0x275b   : > { %10256 = vst [vmem:[#allocation24_spill] sm:$0xff] %v8939_v8 }
0x275c   : > { %v3582_v53 = vadd.f32 %v3580_v41, %v3576_v1 }
0x275e   : > { %3597 = vmatpush.msra.mxu1 %v3582_v53 }
0x2760   : > { %3598 = vmatpush.msra.mxu1 %v3581_v47  ;;  %v8947_v47 = vld [vmem:[%s7391_s18 + $0x40] sm:$0xff] }
0x2761   : > { %6129 = vmatmul.msk.f32.vlgmr.msra.gmra.mxu1 %vm1022_vm3, %v8503_v59  ;;  %10258 = vst [vmem:[#allocation26_spill] sm:$0xff] %v8947_v47 }
0x2769   : > { %6130 = vmatmul.msk.f32.gmra.mxu1 %vm1022_vm3, %v8510_v17 }
0x2771   : > { %6131 = vmatmul.msk.f32.gmra.mxu1 %vm1022_vm3, %v8517_v31 }
0x2779   : > { %6132 = vmatmul.msk.f32.gmra.mxu1 %vm1022_vm3, %v8524_v32 }
0x27de   : > { %v3600_v1 = vpop.f32.mrf.mxu1 }
0x27e6   : > { %v3603_v4 = vpop.f32.mrf.mxu1 }
0x27ee   : > { %v3606_v41 = vpop.f32.mrf.mxu1 }
0x27ef   : > { %3614 = vrot.lane.b32.xlu2 %v3606_v41, %s10158_s16  ;;  %v8955_v41 = vld [vmem:[%s7391_s18 + $0x30] sm:$0xff] }
0x27f0   : > { %10260 = vst [vmem:[#allocation28_spill] sm:$0xff] %v8955_v41 }
0x27f6   : > { %v3609_v22 = vpop.f32.mrf.mxu1 }
0x27f7   : > { %3616 = vrot.lane.b32.xlu0 %v3609_v22, %s10158_s16  ;;  %v8959_v22 = vld [vmem:[%s7391_s18 + $0x28] sm:$0xff] }
0x27f8   : > { %10261 = vst [vmem:[#allocation29_spill] sm:$0xff] %v8959_v22 }
0x2849   : > { %v3615_v53 = vpop.permute.xlu2 %3614 }
0x284a   : > { %v3620_v14 = vsel %vm922_vm0, %v3600_v1, %v3615_v53  ;;  %v8951_v1 = vld [vmem:[%s7391_s18 + $0x38] sm:$0xff]  ;;  %v8963_v53 = vld [vmem:[%s7391_s18 + $0x20] sm:$0xff] }
0x284b   : > { %6133 = vmatmul.msk.f32.vlgmr.msrb.gmra.mxu2 %vm1077_vm4, %v3620_v14  ;;  %10259 = vst [vmem:[#allocation27_spill] sm:$0xff] %v8951_v1  ;;  %v8967_v14 = vld [vmem:[%s7391_s18 + $0x18] sm:$0xff] }
0x284c   : > { %3879 = vmatpush.msrb.mxu2 %v8919_v52  ;;  %10262 = vst [vmem:[#allocation30_spill] sm:$0xff] %v8963_v53 }
0x284d   : > { %10263 = vst [vmem:[#allocation31_spill] sm:$0xff] %v8967_v14 }
0x284e   : > { %3880 = vmatpush.msrb.mxu2 %v8923_v38 }
0x2850   : > { %3881 = vmatpush.msrb.mxu2 %v8927_v3 }
0x2852   : > { %3882 = vmatpush.msrb.mxu2 %v8931_v13 }
0x2854   : > { %3883 = vmatpush.msrb.mxu2 %v8935_v5 }
0x2856   : > { %3884 = vmatpush.msrb.mxu2 %v8939_v8 }
0x2858   : > { %3885 = vmatpush.msrb.mxu2 %v8943_v62  ;;  %v6400_v62 = vpop.permute.xlu1 %6399 }
0x285a   : > { %3886 = vmatpush.msrb.mxu2 %v8947_v47  ;;  %v8980_v47 = vld [vmem:[%s7391_s18] sm:$0xff] }
0x285b   : > { %10267 = vst [vmem:[#allocation14_spill] sm:$0xff] %v8980_v47 }
0x285c   : > { %3887 = vmatpush.msrb.mxu2 %v8951_v1  ;;  %v8975_v1 = vld [vmem:[%s7391_s18 + $0x8] sm:$0xff] }
0x285d   : > { %10266 = vst [vmem:[#allocation33_spill] sm:$0xff] %v8975_v1 }
0x285e   : > { %3888 = vmatpush.msrb.mxu2 %v8955_v41 }
0x2860   : > { %3889 = vmatpush.msrb.mxu2 %v8959_v22 }
0x2862   : > { %3890 = vmatpush.msrb.mxu2 %v8963_v53 }
0x2864   : > { %3891 = vmatpush.msrb.mxu2 %v8967_v14 }
0x2866   : > { %3892 = vmatpush.msrb.mxu2 %v8971_v11 }
0x2868   : > { %3893 = vmatpush.msrb.mxu2 %v8975_v1 }
0x2869   : > { %v3617_v41 = vpop.permute.xlu0 %3616 }
0x286a   : > { %v3621_v22 = vsel %vm922_vm0, %v3603_v4, %v3617_v41  ;;  %3894 = vmatpush.msrb.mxu2 %v8980_v47  ;;  %v8993_v41 = vld [vmem:[%s10265_s14] ss:$0 sm:$0xff]  ;;  %s9263_s14 = smul.u32 4294967248, %s6783_s3 }
0x286b   : > { %6134 = vmatmul.msk.f32.gmra.mxu2 %vm1077_vm4, %v3621_v22  ;;  %10269 = vst [vmem:[#allocation16_spill] sm:$0xff] %v8993_v41 }
0x2873   : > { %6139 = vmatmul.msk.f32.vlgmr.msra.gmra.mxu2 %vm922_vm0, %v8816_v63 }
0x2874   : > { %4137 = vmatpush.msra.mxu2 %v8553_v2 }
0x2876   : > { %4138 = vmatpush.msra.mxu2 %v8557_v50  ;;  %v3668_v50 = vpop.f32.mrf.mxu3 }
0x2878   : > { %4139 = vmatpush.msra.mxu2 %v8561_v12 }
0x287a   : > { %4140 = vmatpush.msra.mxu2 %v8565_v7  ;;  %v9000_v7 = vld [vmem:[%s10268_s13] ss:$0 sm:$0xff]  ;;  %s5782_s13 = scalar_lea.vmem %s7057_s27, %s9263_s14 }
0x287b   : > { %6140 = vmatmul.msk.f32.gmra.mxu2 %vm922_vm0, %v8846_v24  ;;  %10270 = vst [vmem:[#allocation18_spill] sm:$0xff] %v9000_v7 }
0x28ce   : > { %v3645_v4 = vpop.f32.mrf.mxu2 }
0x28cf   : > { %v3646_v22 = vadd.f32 %v8993_v41, %v3645_v4 }
0x28d1   : > { %6137 = vmatmul.msk.f32.vlgmr.msra.gmra.mxu0 %vm922_vm0, %v3646_v22 }
0x28ee   : > { %v3648_v47 = vpop.f32.mrf.mxu2 }
0x28ef   : > { %v3649_v2 = vadd.f32 %v8993_v41, %v3648_v47  ;;  %v3671_v47 = vpop.f32.mrf.mxu3 }
0x28f1   : > { %6138 = vmatmul.msk.f32.gmra.mxu0 %vm922_vm0, %v3649_v2 }
0x294e   : > { %v3697_v12 = vpop.f32.mrf.mxu0 }
0x294f   : > { %v3698_v1 = vadd.f32 %v3697_v12, %v3668_v50 }
0x2951   : > { %v3703_v11 = vadd.f32 %v9000_v7, %v3698_v1 }
0x2953   : > { %vm3705_vm11 = vcmp.ge.f32.partialorder %v3703_v11, 0.0  ;;  %v3707_v14 = vmul.f32 %v3703_v11, %v10237_v34 }
0x2955   : > { %v3709_v53 = vsel %vm3705_vm11, %v3703_v11, %v3707_v14  ;;  %v3728_v14 = vpop.f32.mrf.mxu2 }
0x2956   : > { %v3765_v4 = vsel %vm922_vm0, %v3709_v53, %v8802_v48  ;;  %6141 = vmatmul.msk.f32.vlgmr.msrb.gmra.mxu3 %vm922_vm0, %v3709_v53 }
0x2957   : > { %6143 = vst.msk [vmem:[%s7633_s12 + $0x40] sm:$0xff] %vm1077_vm4, %v3765_v4  ;;  %v9017_v4 = vld [vmem:[%s10271_s5] ss:$0 sm:$0xff]  ;;  %s5778_s5 = scalar_lea.vmem %s7062_s30, %s9263_s14 }
0x296e   : > { %v3700_v22 = vpop.f32.mrf.mxu0 }
0x296f   : > { %v3701_v2 = vadd.f32 %v3700_v22, %v3671_v47  ;;  %v3731_v22 = vpop.f32.mrf.mxu2 }
0x2971   : > { %v3704_v50 = vadd.f32 %v9000_v7, %v3701_v2 }
0x2973   : > { %vm3706_vm12 = vcmp.ge.f32.partialorder %v3704_v50, 0.0  ;;  %v3708_v1 = vmul.f32 %v3704_v50, %v10237_v34  ;;  %v10272_v34 = vsub.f32 1.0, %v8879_v42 }
0x2975   : > { %v3710_v12 = vsel %vm3706_vm12, %v3704_v50, %v3708_v1 }
0x2976   : > { %6142 = vmatmul.msk.f32.gmra.mxu3 %vm922_vm0, %v3710_v12  ;;  %v3766_v11 = vsel %vm922_vm0, %v3710_v12, %v8809_v36  ;;  %v10273_v12 = vsub.f32 1.0, %v8889_v37 }
0x2977   : > { %6144 = vst.msk [vmem:[%s7633_s12 + $0x48] sm:$0xff] %vm1077_vm4, %v3766_v11  ;;  %v6401_v11 = vunpack.i.l.bf16 %v6400_v62 }
0x29d9   : > { %v3757_v53 = vpop.f32.mrf.mxu3 }
0x29da   : > { %v3758_v41 = vadd.f32 %v3757_v53, %v3728_v14  ;;  %v6402_v53 = vunpack.i.h.bf16 %v6400_v62  ;;  %v9075_v62 = vld [vmem:[%s10274_s9 + $0x40] sm:$0xff] }
0x29dc   : > { %v3763_v47 = vadd.f32 %v9017_v4, %v3758_v41 }
0x29de   : > { %v3772_v50 = vmul.f32 %v3763_v47, %v10272_v34  ;;  %v9085_v47 = vld [vmem:[%s10274_s9 + $0x30] sm:$0xff] }
0x29df   : > { %10276 = vst [vmem:[#allocation36_spill] sm:$0xff] %v9085_v47 }
0x29e0   : > { %v3774_v14 = vadd.f32 %v3772_v50, %v8892_v45  ;;  %v9093_v50 = vld [vmem:[%s10274_s9 + $0x20] sm:$0xff] }
0x29e1   : > { %10278 = vst [vmem:[#allocation38_spill] sm:$0xff] %v9093_v50 }
0x29f9   : > { %v3760_v2 = vpop.f32.mrf.mxu3 }
0x29fa   : > { %v3761_v7 = vadd.f32 %v3760_v2, %v3731_v22  ;;  %v3782_v22 = vsel %vm983_vm2, %v3774_v14, %v6402_v53  ;;  %v9089_v2 = vld [vmem:[%s10274_s9 + $0x28] sm:$0xff]  ;;  %v9111_v14 = vld [vmem:[%s10274_s9] sm:$0xff] }
0x29fb   : > { %10277 = vst [vmem:[#allocation37_spill] sm:$0xff] %v9089_v2 }
0x29fc   : > { %v3764_v1 = vadd.f32 %v9017_v4, %v3761_v7  ;;  %v9081_v7 = vld [vmem:[%s10274_s9 + $0x38] sm:$0xff]  ;;  %10282 = vst [vmem:[#allocation42_spill] sm:$0xff] %v9111_v14 }
0x29fd   : > { %10275 = vst [vmem:[#allocation35_spill] sm:$0xff] %v9081_v7 }
0x29fe   : > { %v3773_v8 = vmul.f32 %v3764_v1, %v10273_v12  ;;  %v9099_v1 = vld [vmem:[%s10274_s9 + $0x18] sm:$0xff]  ;;  %v9103_v12 = vld [vmem:[%s10274_s9 + $0x10] sm:$0xff] }
0x29ff   : > { %10279 = vst [vmem:[#allocation39_spill] sm:$0xff] %v9099_v1 }
0x2a00   : > { %v3775_v5 = vadd.f32 %v3773_v8, %v8901_v58  ;;  %v9063_v58 = vld [vmem:[%s10274_s9 + $0x58] sm:$0xff]  ;;  %v9071_v8 = vld [vmem:[%s10274_s9 + $0x48] sm:$0xff]  ;;  %10280 = vst [vmem:[#allocation40_spill] sm:$0xff] %v9103_v12 }
0x2a02   : > { %v3783_v41 = vsel %vm983_vm2, %v3775_v5, %v6401_v11  ;;  %v9067_v5 = vld [vmem:[%s10274_s9 + $0x50] sm:$0xff]  ;;  %v9107_v11 = vld [vmem:[%s10274_s9 + $0x8] sm:$0xff] }
0x2a03   : > { %3798 = vmatpush.msrb.mxu0 %v3783_v41  ;;  %10281 = vst [vmem:[#allocation41_spill] sm:$0xff] %v9107_v11 }
0x2a05   : > { %3799 = vmatpush.msrb.mxu0 %v3782_v22 }
0x2a06   : > { %6145 = vmatmul.msk.f32.vlgmr.msrb.gmra.mxu0 %vm1022_vm3, %v8503_v59  ;;  %v9045_v59 = vld [vmem:[%s10274_s9 + $0x78] sm:$0xff] }
0x2a0e   : > { %6146 = vmatmul.msk.f32.gmra.mxu0 %vm1022_vm3, %v8510_v17  ;;  %v9049_v17 = vld [vmem:[%s10274_s9 + $0x70] sm:$0xff] }
0x2a16   : > { %6147 = vmatmul.msk.f32.gmra.mxu0 %vm1022_vm3, %v8517_v31  ;;  %v9053_v31 = vld [vmem:[%s10274_s9 + $0x68] sm:$0xff] }
0x2a1e   : > { %6148 = vmatmul.msk.f32.gmra.mxu0 %vm1022_vm3, %v8524_v32  ;;  %v9057_v32 = vld [vmem:[%s10274_s9 + $0x60] sm:$0xff]  ;;  %s5786_s9 = scalar_lea.vmem %s7102_s6, %s9263_s14 }
0x2a83   : > { %v3801_v34 = vpop.f32.mrf.mxu0 }
0x2a8b   : > { %v9037_v42 = vpop.f32.mrf.mxu0 }
0x2a93   : > { %v3807_v37 = vpop.f32.mrf.mxu0 }
0x2a94   : > { %3852 = vrot.lane.b32.xlu0 %v3807_v37, %s10147_s17 }
0x2a9b   : > { %v3810_v45 = vpop.f32.mrf.mxu0 }
0x2a9c   : > { %3854 = vrot.lane.b32.xlu0 %v3810_v45, %s10147_s17  ;;  %3825 = vmatpush.msrb.mxu1 %v3810_v45 }
0x2a9e   : > { %3826 = vmatpush.msrb.mxu1 %v3807_v37 }
0x2aa0   : > { %3827 = vmatpush.msrb.mxu1 %v9037_v42 }
0x2aa2   : > { %3828 = vmatpush.msrb.mxu1 %v3801_v34 }
0x2aa3   : > { %6149 = vmatmul.msk.f32.vlgmr.msrb.gmra.mxu1 %vm922_vm0, %v8611_v30 }
0x2aa4   : > { %4055 = vmatpush.msra.mxu1 %v9045_v59 }
0x2aa6   : > { %4056 = vmatpush.msra.mxu1 %v9049_v17 }
0x2aa8   : > { %4057 = vmatpush.msra.mxu1 %v9053_v31 }
0x2aaa   : > { %4058 = vmatpush.msra.mxu1 %v9057_v32 }
0x2aab   : > { %6150 = vmatmul.msk.f32.gmra.mxu1 %vm922_vm0, %v8622_v44 }
0x2aac   : > { %4059 = vmatpush.msra.mxu1 %v9063_v58 }
0x2aae   : > { %4060 = vmatpush.msra.mxu1 %v9067_v5 }
0x2ab0   : > { %4061 = vmatpush.msra.mxu1 %v9071_v8 }
0x2ab2   : > { %4062 = vmatpush.msra.mxu1 %v9075_v62 }
0x2ab3   : > { %6151 = vmatmul.msk.f32.gmra.mxu1 %vm922_vm0, %v8633_v56 }
0x2ab4   : > { %4063 = vmatpush.msra.mxu1 %v9081_v7 }
0x2ab6   : > { %4064 = vmatpush.msra.mxu1 %v9085_v47 }
0x2ab8   : > { %4065 = vmatpush.msra.mxu1 %v9089_v2 }
0x2aba   : > { %4066 = vmatpush.msra.mxu1 %v9093_v50 }
0x2abb   : > { %6152 = vmatmul.msk.f32.gmra.mxu1 %vm922_vm0, %v8644_v23 }
0x2abc   : > { %4067 = vmatpush.msra.mxu1 %v9099_v1 }
0x2abe   : > { %4068 = vmatpush.msra.mxu1 %v9103_v12 }
0x2ac0   : > { %4069 = vmatpush.msra.mxu1 %v9107_v11 }
0x2ac2   : > { %4070 = vmatpush.msra.mxu1 %v9111_v14 }
0x2ac4   : > { %4168 = vmatpush.msrb.mxu1 %v8653_v10 }
0x2ac6   : > { %4169 = vmatpush.msrb.mxu1 %v8657_v54 }
0x2ac8   : > { %4170 = vmatpush.msrb.mxu1 %v8661_v57 }
0x2aca   : > { %4171 = vmatpush.msrb.mxu1 %v8665_v15 }
0x2b06   : > { %v3853_v10 = vpop.permute.xlu0 %3852 }
0x2b20   : > { %v3830_v53 = vpop.f32.mrf.mxu1 }
0x2b21   : > { %3844 = vrot.lane.b32.xlu2 %v3830_v53, %s10180_s19 }
0x2b28   : > { %v3833_v41 = vpop.f32.mrf.mxu1 }
0x2b29   : > { %3846 = vrot.lane.b32.xlu2 %v3833_v41, %s10180_s19 }
0x2b30   : > { %v3836_v22 = vpop.f32.mrf.mxu1 }
0x2b31   : > { %3860 = vrot.lane.b32.xlu1 %v3836_v22, %s10181_s20 }
0x2b38   : > { %v3839_v37 = vpop.f32.mrf.mxu1 }
0x2b39   : > { %3862 = vrot.lane.b32.xlu1 %v3839_v37, %s10181_s20  ;;  %v3855_v37 = vpop.permute.xlu0 %3854 }
0x2b7b   : > { %v3845_v45 = vpop.permute.xlu2 %3844 }
0x2b7c   : > { %v3866_v54 = vsel %vm1346_vm7, %v3801_v34, %v3845_v45  ;;  %v3873_v45 = vld [vmem:[%s3872_s21] sm:$0xff] }
0x2b7d   : > { %v3868_v57 = vsel %vm1349_vm8, %v3866_v54, %v3853_v10 }
0x2b83   : > { %v3847_v41 = vpop.permute.xlu2 %3846 }
0x2b84   : > { %v3867_v22 = vsel %vm1346_vm7, %v9037_v42, %v3847_v41 }
0x2b85   : > { %v3869_v11 = vsel %vm1349_vm8, %v3867_v22, %v3855_v37 }
0x2ba3   : > { %v3861_v15 = vpop.permute.xlu1 %3860 }
0x2ba4   : > { %v3870_v53 = vsel %vm1352_vm9, %v3868_v57, %v3861_v15  ;;  %6153 = vmatmul.msk.f32.vlgmr.msra.gmra.mxu3 %vm1022_vm3, %v3861_v15 }
0x2ba5   : > { %3895 = vmatmul.f32.vlgmr.msrb.gmra.mxu2 %v3870_v53  ;;  %v3874_v53 = vld [vmem:[%s3872_s21 + $0x8] sm:$0xff] }
0x2ba6   : > { %6175 = vmatpush.msk.msrb.mxu2 %vm10283_vm1, %v8677_v60 }
0x2bab   : > { %v3863_v14 = vpop.permute.xlu1 %3862 }
0x2bac   : > { %6154 = vmatmul.msk.f32.gmra.mxu3 %vm1022_vm3, %v3863_v14  ;;  %v3871_v34 = vsel %vm1352_vm9, %v3869_v11, %v3863_v14 }
0x2bad   : > { %3898 = vmatmul.f32.gmra.mxu2 %v3871_v34 }
0x2c27   : > { %v3919_v10 = vpop.f32.mrf.mxu3 }
0x2c28   : > { %v3896_v54 = vpop.f32.mrf.mxu2 }
0x2c29   : > { %v3897_v57 = vadd.f32 %v3896_v54, %v3873_v45 }
0x2c2b   : > { %v9135_v15 = vadd.f32 %v3919_v10, %v3897_v57 }
0x2c2d   : > { %v6155_v60 = vmul.f32 -1.442695, %v9135_v15 }
0x2c2f   : > { %6465 = vpow2.f32 %v6155_v60  ;;  %v3922_v12 = vpop.f32.mrf.mxu3 }
0x2c30   : > { %v3899_v42 = vpop.f32.mrf.mxu2 }
0x2c31   : > { %v3900_v41 = vadd.f32 %v3899_v42, %v3874_v53 }
0x2c33   : > { %v9138_v22 = vadd.f32 %v3922_v12, %v3900_v41 }
0x2c35   : > { %v6466_v37 = vpop.eup %6465  ;;  %v6156_v11 = vmul.f32 -1.442695, %v9138_v22 }
0x2c36   : > { %v3931_v14 = vadd.f32 1.0, %v6466_v37 }
0x2c37   : > { %6467 = vpow2.f32 %v6156_v11 }
0x2c38   : > { %6469 = vrcp.f32 %v3931_v14  ;;  %vm3938_vm14 = vweird.f32 %v3931_v14  ;;  %v3944_v42 = vand.u32 2147483648, %v3931_v14  ;;  %v3942_v11 = vand.u32 2147483647, %v3931_v14 }
0x2c3a   : > { %vm3943_vm1 = vcmp.eq.f32.partialorder %v3942_v11, 8.507059e+37 }
0x2c3d   : > { %v6468_v34 = vpop.eup %6467 }
0x2c3e   : > { %v6470_v1 = vpop.eup %6469  ;;  %v3932_v45 = vadd.f32 1.0, %v6468_v34 }
0x2c3f   : > { %v3934_v10 = vmul.f32 %v6470_v1, %v3931_v14  ;;  %vm3939_vm13 = vweird.f32 %v6470_v1 }
0x2c40   : > { %6471 = vrcp.f32 %v3932_v45  ;;  %v3959_v12 = vand.u32 2147483648, %v3932_v45  ;;  %v3957_v37 = vand.u32 2147483647, %v3932_v45  ;;  %vm3940_vm5 = vmor %vm3938_vm14, %vm3939_vm13  ;;  %vm3953_vm6 = vweird.f32 %v3932_v45 }
0x2c41   : > { %v3935_v54 = vsub.f32 1.0, %v3934_v10  ;;  %v3945_v10 = vor.u32 1.1754944e-38, %v3944_v42 }
0x2c42   : > { %v3960_v7 = vor.u32 1.1754944e-38, %v3959_v12  ;;  %vm3958_vm12 = vcmp.eq.f32.partialorder %v3957_v37, 8.507059e+37 }
0x2c43   : > { %v3936_v57 = vmul.f32 %v6470_v1, %v3935_v54 }
0x2c45   : > { %v3937_v53 = vadd.f32 %v6470_v1, %v3936_v57 }
0x2c46   : > { %v6472_v50 = vpop.eup %6471 }
0x2c47   : > { %v3949_v60 = vmul.f32 %v6472_v50, %v3932_v45  ;;  %vm3954_vm15 = vweird.f32 %v6472_v50  ;;  %v3941_v34 = vsel %vm3940_vm5, %v6470_v1, %v3937_v53  ;;  %v9152_v1 = vld [vmem:[%s10121_s10] sm:$0xff] }
0x2c48   : > { %vm3955_vm11 = vmor %vm3953_vm6, %vm3954_vm15  ;;  %v9143_v57 = vsel %vm3943_vm1, %v3945_v10, %v3941_v34  ;;  %vm10311_vm15 = vcmask 1043456  }
0x2c49   : > { %v3950_v2 = vsub.f32 1.0, %v3949_v60  ;;  %v3965_v14 = vmul.f32 %v9143_v57, %v8816_v63  ;;  %v9166_v63 = vld [vmem:[%s10121_s10 + $0x10] sm:$0xff]  ;;  %v4090_v10 = vmul.f32 %v9143_v57, %v8802_v48 }
0x2c4b   : > { %v3951_v41 = vmul.f32 %v6472_v50, %v3950_v2 }
0x2c4d   : > { %v3952_v47 = vadd.f32 %v6472_v50, %v3951_v41 }
0x2c4f   : > { %v3956_v54 = vsel %vm3955_vm11, %v6472_v50, %v3952_v47 }
0x2c50   : > { %v9141_v60 = vsel %vm3958_vm12, %v3960_v7, %v3956_v54  ;;  %v9159_v7 = vld [vmem:[%s10121_s10 + $0x8] sm:$0xff] }
0x2c51   : > { %v3966_v2 = vmul.f32 %v9141_v60, %v8846_v24  ;;  %v9173_v24 = vld [vmem:[%s10121_s10 + $0x18] sm:$0xff] }
0x2c53   : > { %3981 = vmatpush.msrb.mxu3 %v3966_v2 }
0x2c55   : > { %3982 = vmatpush.msrb.mxu3 %v3965_v14 }
0x2c56   : > { %6157 = vmatmul.msk.f32.vlgmr.msrb.gmra.mxu3 %vm1022_vm3, %v9152_v1 }
0x2c5e   : > { %6158 = vmatmul.msk.f32.gmra.mxu3 %vm1022_vm3, %v9159_v7 }
0x2c66   : > { %6159 = vmatmul.msk.f32.gmra.mxu3 %vm1022_vm3, %v9166_v63 }
0x2c6e   : > { %6160 = vmatmul.msk.f32.gmra.mxu3 %vm1022_vm3, %v9173_v24 }
0x2cd9   : > { %v3984_v47 = vpop.f32.mrf.mxu3 }
0x2ce1   : > { %v3987_v50 = vpop.f32.mrf.mxu3 }
0x2ce9   : > { %v3990_v45 = vpop.f32.mrf.mxu3 }
0x2cea   : > { %4035 = vrot.lane.b32.xlu0 %v3990_v45, %s10182_s0 }
0x2cf1   : > { %v3993_v53 = vpop.f32.mrf.mxu3 }
0x2cf2   : > { %4037 = vrot.lane.b32.xlu0 %v3993_v53, %s10182_s0  ;;  %4008 = vmatpush.msra.mxu0 %v3993_v53 }
0x2cf4   : > { %4009 = vmatpush.msra.mxu0 %v3990_v45 }
0x2cf6   : > { %4010 = vmatpush.msra.mxu0 %v3987_v50 }
0x2cf8   : > { %4011 = vmatpush.msra.mxu0 %v3984_v47 }
0x2cf9   : > { %6161 = vmatmul.msk.f32.vlgmr.msra.gmra.mxu0 %vm922_vm0, %v8611_v30 }
0x2cfa   : > { %4266 = vmatpush.msrb.mxu0 %v8714_v55 }
0x2cfc   : > { %4267 = vmatpush.msrb.mxu0 %v8718_v46 }
0x2cfe   : > { %4268 = vmatpush.msrb.mxu0 %v8722_v26 }
0x2d00   : > { %4269 = vmatpush.msrb.mxu0 %v8726_v39 }
0x2d01   : > { %6162 = vmatmul.msk.f32.gmra.mxu0 %vm922_vm0, %v8622_v44 }
0x2d02   : > { %4270 = vmatpush.msrb.mxu0 %v8732_v33 }
0x2d04   : > { %4271 = vmatpush.msrb.mxu0 %v8736_v49 }
0x2d06   : > { %4272 = vmatpush.msrb.mxu0 %v8740_v6 }
0x2d08   : > { %4273 = vmatpush.msrb.mxu0 %v8744_v18 }
0x2d09   : > { %6163 = vmatmul.msk.f32.gmra.mxu0 %vm922_vm0, %v8633_v56 }
0x2d0a   : > { %4353 = vmatpush.msra.mxu0 %v8750_v19 }
0x2d0c   : > { %4354 = vmatpush.msra.mxu0 %v8754_v9 }
0x2d0e   : > { %4355 = vmatpush.msra.mxu0 %v8758_v21 }
0x2d10   : > { %4356 = vmatpush.msra.mxu0 %v8762_v28 }
0x2d11   : > { %6164 = vmatmul.msk.f32.gmra.mxu0 %vm922_vm0, %v8644_v23 }
0x2d5c   : > { %v4036_v26 = vpop.permute.xlu0 %4035 }
0x2d64   : > { %v4038_v19 = vpop.permute.xlu0 %4037 }
0x2d76   : > { %v4013_v30 = vpop.f32.mrf.mxu0 }
0x2d77   : > { %4027 = vrot.lane.b32.xlu2 %v4013_v30, %s10158_s16 }
0x2d7e   : > { %v4016_v44 = vpop.f32.mrf.mxu0 }
0x2d7f   : > { %4029 = vrot.lane.b32.xlu2 %v4016_v44, %s10158_s16  ;;  %v9276_v44 = vld [vmem:[%s5782_s13 + $0x58] sm:$0xff] }
0x2d86   : > { %v4019_v55 = vpop.f32.mrf.mxu0 }
0x2d87   : > { %4043 = vrot.lane.b32.xlu1 %v4019_v55, %s10160_s23 }
0x2d8e   : > { %v4022_v56 = vpop.f32.mrf.mxu0 }
0x2d8f   : > { %4045 = vrot.lane.b32.xlu1 %v4022_v56, %s10160_s23  ;;  %v6167_v56 = vld [vmem:[%s5778_s5 + $0x58] sm:$0xff] }
0x2dd1   : > { %v4028_v46 = vpop.permute.xlu2 %4027 }
0x2dd2   : > { %v4049_v39 = vsel %vm922_vm0, %v3984_v47, %v4028_v46 }
0x2dd3   : > { %v4051_v33 = vsel %vm1077_vm4, %v4049_v39, %v4036_v26  ;;  %v4151_v26 = vsub.f32 1.0, %v9276_v44 }
0x2dd9   : > { %v4030_v6 = vpop.permute.xlu2 %4029 }
0x2dda   : > { %v4050_v18 = vsel %vm922_vm0, %v3987_v50, %v4030_v6 }
0x2ddb   : > { %v4052_v21 = vsel %vm1077_vm4, %v4050_v18, %v4038_v19 }
0x2df9   : > { %v4044_v49 = vpop.permute.xlu1 %4043 }
0x2dfa   : > { %v4053_v23 = vsel %vm1534_vm10, %v4051_v33, %v4044_v49  ;;  %v4149_v49 = vmul.f32 %v9276_v44, %v6167_v56  ;;  %v10300_v56 = vld [vmem:[#allocation16_spill] sm:$0xff] }
0x2dfb   : > { %4071 = vmatmul.f32.vlgmr.msra.gmra.mxu1 %v4053_v23 }
0x2dfc   : > { %4293 = vmatpush.msra.mxu1 %v8775_v27 }
0x2dfe   : > { %4294 = vmatpush.msra.mxu1 %v8780_v16 }
0x2e00   : > { %4295 = vmatpush.msra.mxu1 %v8784_v25 }
0x2e01   : > { %v4046_v9 = vpop.permute.xlu1 %4045 }
0x2e02   : > { %v4054_v28 = vsel %vm1534_vm10, %v4052_v21, %v4046_v9  ;;  %4296 = vmatpush.msra.mxu1 %v8790_v40  ;;  %v4092_v40 = vsub.f32 1.0, %v9143_v57 }
0x2e03   : > { %4074 = vmatmul.f32.gmra.mxu1 %v4054_v28 }
0x2e78   : > { %v4072_v12 = vpop.f32.mrf.mxu1 }
0x2e79   : > { %4080 = vrot.lane.b32.xlu2 %v4072_v12, %s10182_s0  ;;  %v6180_v12 = vld [vmem:[%s5786_s9 + $0x58] sm:$0xff] }
0x2e80   : > { %v4075_v42 = vpop.f32.mrf.mxu1 }
0x2e81   : > { %4082 = vrot.lane.b32.xlu0 %v4075_v42, %s10182_s0 }
0x2ed3   : > { %v4081_v27 = vpop.permute.xlu2 %4080 }
0x2ed4   : > { %v4086_v16 = vadd.f32 %v4081_v27, %v9135_v15  ;;  %v4093_v15 = vsub.f32 1.0, %v9141_v60 }
0x2ed6   : > { %6473 = vtanh.f32 %v4086_v16  ;;  %v6179_v16 = vld [vmem:[%s5786_s9 + $0x50] sm:$0xff]  ;;  %s10315_s9 = sld [smem:[#allocation34_spill]] }
0x2edc   : > { %v6474_v41 = vpop.eup %6473 }
0x2edd   : > { %4096 = vrot.lane.b32.xlu1 %v6474_v41, %s10160_s23 }
0x2ef3   : > { %v4083_v25 = vpop.permute.xlu0 %4082 }
0x2ef4   : > { %v4087_v37 = vadd.f32 %v4083_v25, %v9138_v22  ;;  %v4091_v22 = vmul.f32 %v9141_v60, %v8809_v36  ;;  %v10284_v60 = vld [vmem:[#allocation19_spill] sm:$0xff] }
0x2ef6   : > { %6475 = vtanh.f32 %v4087_v37 }
0x2efc   : > { %v6476_v11 = vpop.eup %6475 }
0x2efd   : > { %4098 = vrot.lane.b32.xlu2 %v6476_v11, %s10160_s23 }
0x2f4f   : > { %v4097_v34 = vpop.permute.xlu1 %4096 }
0x2f50   : > { %v4102_v54 = vmul.f32 %v4097_v34, %v4092_v40 }
0x2f52   : > { %v9222_v2 = vadd.f32 %v4102_v54, %v4090_v10 }
0x2f54   : > { %4117 = vrot.lane.b32.xlu0 %v9222_v2, %s10160_s23 }
0x2f57   : > { %v4099_v14 = vpop.permute.xlu2 %4098 }
0x2f58   : > { %v4103_v47 = vmul.f32 %v4099_v14, %v4093_v15  ;;  %v10288_v15 = vld [vmem:[#allocation23_spill] sm:$0xff]  ;;  %v10289_v14 = vld [vmem:[#allocation24_spill] sm:$0xff] }
0x2f5a   : > { %v9229_v50 = vadd.f32 %v4103_v47, %v4091_v22  ;;  %v10290_v22 = vld [vmem:[#allocation25_spill] sm:$0xff]  ;;  %v10291_v47 = vld [vmem:[#allocation26_spill] sm:$0xff] }
0x2f5c   : > { %4119 = vrot.lane.b32.xlu1 %v9229_v50, %s10160_s23  ;;  %v6403_v48 = vpack.i.bf16 %v9222_v2, %v9229_v50 }
0x2f64   : > { %6404 = vrot.lane.b32.xlu1 %v6403_v48, %s10183_s26  ;;  %v10292_v48 = vld [vmem:[#allocation27_spill] sm:$0xff] }
0x2fc6   : > { %v9236_v57 = vpop.permute.xlu0 %4117 }
0x2fc7   : > { %6171 = vmatmul.msk.f32.vlgmr.msra.gmra.mxu2 %vm922_vm0, %v9236_v57  ;;  %6173 = vmatmul.msk.f32.vlgmr.msrb.gmra.mxu1 %vm922_vm0, %v9236_v57 }
0x2fc8   : > { %4322 = vmatpush.msra.mxu2 %v8823_v20  ;;  %4382 = vmatpush.msrb.mxu1 %v8827_v43  ;;  %v10285_v20 = vld [vmem:[#allocation20_spill] sm:$0xff]  ;;  %v10286_v43 = vld [vmem:[#allocation21_spill] sm:$0xff] }
0x2fca   : > { %4323 = vmatpush.msra.mxu2 %v8831_v61  ;;  %4383 = vmatpush.msrb.mxu1 %v8835_v35  ;;  %v9269_v61 = vld [vmem:[%s5782_s13 + $0x50] sm:$0xff] }
0x2fcb   : > { %v6166_v35 = vld [vmem:[%s5778_s5 + $0x50] sm:$0xff] }
0x2fcc   : > { %4324 = vmatpush.msra.mxu2 %v8839_v29  ;;  %4384 = vmatpush.msrb.mxu1 %v8843_v51  ;;  %v4150_v29 = vsub.f32 1.0, %v9269_v61  ;;  %v4148_v53 = vmul.f32 %v9269_v61, %v6166_v35 }
0x2fce   : > { %v9248_v36 = vpop.permute.xlu1 %4119  ;;  %4325 = vmatpush.msra.mxu2 %v8849_v0  ;;  %4385 = vmatpush.msrb.mxu1 %v10284_v60  ;;  %v10287_v0 = vld [vmem:[#allocation22_spill] sm:$0xff]  ;;  %v10293_v60 = vld [vmem:[#allocation28_spill] sm:$0xff] }
0x2fcf   : > { %6172 = vmatmul.msk.f32.gmra.mxu2 %vm922_vm0, %v9248_v36  ;;  %6174 = vmatmul.msk.f32.gmra.mxu1 %vm922_vm0, %v9248_v36 }
0x2fd7   : > { %6187 = vmatmul.msk.f32.vlgmr.msra.gmra.mxu1 %vm922_vm0, %v9236_v57 }
0x2fd8   : > { %4546 = vmatpush.msra.mxu1 %v10285_v20  ;;  %v10298_v20 = vld [vmem:[#allocation33_spill] sm:$0xff] }
0x2fda   : > { %4547 = vmatpush.msra.mxu1 %v10286_v43 }
0x2fdf   : > { %6188 = vmatmul.msk.f32.gmra.mxu1 %vm922_vm0, %v9248_v36 }
0x3044   : > { %v4173_v19 = vpop.f32.mrf.mxu1 }
0x304a   : > { %v4142_v51 = vpop.f32.mrf.mxu2 }
0x304b   : > { %v4143_v45 = vadd.f32 %v10287_v0, %v4142_v51  ;;  %v10299_v51 = vld [vmem:[#allocation14_spill] sm:$0xff] }
0x304c   : > { %v4176_v21 = vpop.f32.mrf.mxu1 }
0x304d   : > { %v4152_v30 = vmul.f32 %v4150_v29, %v4143_v45  ;;  %v9330_v45 = vld [vmem:[%s10224_s7 + $0x10] sm:$0xff] }
0x304f   : > { %v4154_v55 = vadd.f32 %v4152_v30, %v4148_v53  ;;  %v9334_v53 = vld [vmem:[%s10224_s7 + $0x8] sm:$0xff]  ;;  %v9338_v30 = vld [vmem:[%s10224_s7] sm:$0xff] }
0x3051   : > { %v9279_v46 = vmul.f32 %v9269_v61, %v4154_v55  ;;  %6176 = vmatmul.msk.f32.vlgmr.msrb.gmra.mxu2 %vm983_vm2, %v4154_v55 }
0x3052   : > { %v4145_v39 = vpop.f32.mrf.mxu2 }
0x3053   : > { %v4146_v33 = vadd.f32 %v10287_v0, %v4145_v39  ;;  %v9326_v0 = vld [vmem:[%s10224_s7 + $0x18] sm:$0xff] }
0x3055   : > { %v4153_v23 = vmul.f32 %v4151_v26, %v4146_v33 }
0x3057   : > { %v4155_v6 = vadd.f32 %v4153_v23, %v4149_v49  ;;  %v4298_v23 = vpop.f32.mrf.mxu1 }
0x3059   : > { %v9288_v18 = vmul.f32 %v9276_v44, %v4155_v6  ;;  %6177 = vmatmul.msk.f32.gmra.mxu2 %vm983_vm2, %v4155_v6 }
0x30d4   : > { %v4202_v9 = vpop.f32.mrf.mxu2 }
0x30d5   : > { %v4203_v42 = vadd.f32 %v4202_v9, %v4173_v19  ;;  %v10301_v9 = vld [vmem:[#allocation18_spill] sm:$0xff] }
0x30d7   : > { %v4211_v25 = vadd.f32 %v6179_v16, %v4203_v42  ;;  %v4301_v16 = vpop.f32.mrf.mxu1 }
0x30dc   : > { %v4205_v28 = vpop.f32.mrf.mxu2 }
0x30dd   : > { %v4206_v27 = vadd.f32 %v4205_v28, %v4176_v21  ;;  %v10302_v28 = vld [vmem:[#allocation17_spill] sm:$0xff] }
0x30df   : > { %v4212_v41 = vadd.f32 %v6180_v12, %v4206_v27 }
0x30e1   : > { %4227 = vmatpush.msra.mxu3 %v4212_v41 }
0x30e3   : > { %4228 = vmatpush.msra.mxu3 %v4211_v25 }
0x30e4   : > { %6181 = vmatmul.msk.f32.vlgmr.msra.gmra.mxu3 %vm1022_vm3, %v9152_v1 }
0x30ec   : > { %6182 = vmatmul.msk.f32.gmra.mxu3 %vm1022_vm3, %v9159_v7 }
0x30f4   : > { %6183 = vmatmul.msk.f32.gmra.mxu3 %vm1022_vm3, %v9166_v63 }
0x30fc   : > { %6184 = vmatmul.msk.f32.gmra.mxu3 %vm1022_vm3, %v9173_v24 }
0x3167   : > { %v4230_v37 = vpop.f32.mrf.mxu3 }
0x316f   : > { %v4233_v11 = vpop.f32.mrf.mxu3 }
0x3177   : > { %v4236_v40 = vpop.f32.mrf.mxu3 }
0x3178   : > { %4244 = vrot.lane.b32.xlu2 %v4236_v40, %s10158_s16 }
0x317f   : > { %v4239_v34 = vpop.f32.mrf.mxu3 }
0x3180   : > { %4246 = vrot.lane.b32.xlu0 %v4239_v34, %s10158_s16 }
0x31d2   : > { %v4245_v10 = vpop.permute.xlu2 %4244 }
0x31d3   : > { %v4250_v54 = vsel %vm922_vm0, %v4230_v37, %v4245_v10 }
0x31d4   : > { %6185 = vmatmul.msk.f32.vlgmr.msrb.gmra.mxu0 %vm1077_vm4, %v4250_v54 }
0x31d5   : > { %4509 = vmatpush.msrb.mxu0 %v8919_v52  ;;  %v10294_v52 = vld [vmem:[#allocation29_spill] sm:$0xff] }
0x31d7   : > { %4510 = vmatpush.msrb.mxu0 %v8923_v38  ;;  %v10295_v38 = vld [vmem:[#allocation30_spill] sm:$0xff] }
0x31d9   : > { %4511 = vmatpush.msrb.mxu0 %v8927_v3  ;;  %v10296_v3 = vld [vmem:[#allocation31_spill] sm:$0xff] }
0x31db   : > { %4512 = vmatpush.msrb.mxu0 %v8931_v13  ;;  %v10297_v13 = vld [vmem:[#allocation32_spill] sm:$0xff] }
0x31dd   : > { %4513 = vmatpush.msrb.mxu0 %v10288_v15 }
0x31df   : > { %4514 = vmatpush.msrb.mxu0 %v10289_v14 }
0x31e1   : > { %4515 = vmatpush.msrb.mxu0 %v10290_v22 }
0x31e3   : > { %4516 = vmatpush.msrb.mxu0 %v10291_v47 }
0x31e5   : > { %4517 = vmatpush.msrb.mxu0 %v10292_v48 }
0x31e7   : > { %4518 = vmatpush.msrb.mxu0 %v10293_v60 }
0x31e9   : > { %4519 = vmatpush.msrb.mxu0 %v10294_v52 }
0x31eb   : > { %4520 = vmatpush.msrb.mxu0 %v10295_v38  ;;  %v6405_v38 = vpop.permute.xlu1 %6404 }
0x31ed   : > { %4521 = vmatpush.msrb.mxu0 %v10296_v3 }
0x31ef   : > { %4522 = vmatpush.msrb.mxu0 %v10297_v13  ;;  %v6406_v13 = vunpack.i.l.bf16 %v6405_v38 }
0x31f1   : > { %4523 = vmatpush.msrb.mxu0 %v10298_v20 }
0x31f2   : > { %v4247_v43 = vpop.permute.xlu0 %4246 }
0x31f3   : > { %v4251_v35 = vsel %vm922_vm0, %v4233_v11, %v4247_v43  ;;  %4524 = vmatpush.msrb.mxu0 %v10299_v51 }
0x31f4   : > { %6186 = vmatmul.msk.f32.gmra.mxu0 %vm1077_vm4, %v4251_v35  ;;  %v6407_v35 = vunpack.i.h.bf16 %v6405_v38 }
0x31fc   : > { %6191 = vmatmul.msk.f32.vlgmr.msra.gmra.mxu0 %vm922_vm0, %v9236_v57 }
0x31fd   : > { %4767 = vmatpush.msra.mxu0 %v9326_v0 }
0x31ff   : > { %4768 = vmatpush.msra.mxu0 %v9330_v45 }
0x3201   : > { %4769 = vmatpush.msra.mxu0 %v9334_v53 }
0x3203   : > { %4770 = vmatpush.msra.mxu0 %v9338_v30 }
0x3204   : > { %6192 = vmatmul.msk.f32.gmra.mxu0 %vm922_vm0, %v9248_v36 }
0x3251   : > { %v4275_v55 = vpop.f32.mrf.mxu0 }
0x3252   : > { %v4276_v39 = vadd.f32 %v10300_v56, %v4275_v55 }
0x3254   : > { %6189 = vmatmul.msk.f32.vlgmr.msra.gmra.mxu2 %vm922_vm0, %v4276_v39  ;;  %v9426_v39 = vld [vmem:[%s7014_s2 + $0x18] sm:$0xff] }
0x3271   : > { %v4278_v33 = vpop.f32.mrf.mxu0 }
0x3272   : > { %v4279_v49 = vadd.f32 %v10300_v56, %v4278_v33  ;;  %v10310_v56 = vld [vmem:[#allocation42_spill] sm:$0xff] }
0x3273   : > { %v9430_v33 = vld [vmem:[%s7014_s2 + $0x10] sm:$0xff] }
0x3274   : > { %6190 = vmatmul.msk.f32.gmra.mxu2 %vm922_vm0, %v4279_v49  ;;  %v9434_v49 = vld [vmem:[%s7014_s2 + $0x8] sm:$0xff] }
0x3279   : > { %v4358_v10 = vpop.f32.mrf.mxu0 }
0x3281   : > { %v4361_v22 = vpop.f32.mrf.mxu0 }
0x32d7   : > { %v4327_v6 = vpop.f32.mrf.mxu2 }
0x32d8   : > { %v4328_v19 = vadd.f32 %v4327_v6, %v4298_v23  ;;  %v9438_v23 = vld [vmem:[%s7014_s2] sm:$0xff]  ;;  %s5790_s2 = scalar_lea.vmem %s7490_s15, %s9263_s14 }
0x32d9   : > { %v6207_v38 = vld [vmem:[%s5790_s2 + $0x58] sm:$0xff] }
0x32da   : > { %v4333_v21 = vadd.f32 %v10301_v9, %v4328_v19 }
0x32dc   : > { %vm4335_vm13 = vcmp.ge.f32.partialorder %v4333_v21, 0.0  ;;  %v4337_v12 = vmul.f32 %v4333_v21, %v10302_v28 }
0x32de   : > { %v4339_v42 = vsel %vm4335_vm13, %v4333_v21, %v4337_v12 }
0x32df   : > { %v4395_v27 = vsel %vm922_vm0, %v4339_v42, %v9222_v2  ;;  %6193 = vmatmul.msk.f32.vlgmr.msrb.gmra.mxu1 %vm922_vm0, %v4339_v42 }
0x32e0   : > { %6195 = vst.msk [vmem:[%s7633_s12 + $0x50] sm:$0xff] %vm1077_vm4, %v4395_v27 }
0x32f7   : > { %v4330_v41 = vpop.f32.mrf.mxu2 }
0x32f8   : > { %v4331_v25 = vadd.f32 %v4330_v41, %v4301_v16 }
0x32fa   : > { %v4334_v37 = vadd.f32 %v10301_v9, %v4331_v25 }
0x32fc   : > { %v4338_v11 = vmul.f32 %v4334_v37, %v10302_v28  ;;  %vm4336_vm14 = vcmp.ge.f32.partialorder %v4334_v37, 0.0 }
0x32fe   : > { %v4340_v40 = vsel %vm4336_vm14, %v4334_v37, %v4338_v11  ;;  %v9450_v11 = vld [vmem:[%s7019_s1] sm:$0xf] }
0x32ff   : > { %6194 = vmatmul.msk.f32.gmra.mxu1 %vm922_vm0, %v4340_v40  ;;  %v4396_v34 = vsel %vm922_vm0, %v4340_v40, %v9229_v50 }
0x3300   : > { %6196 = vst.msk [vmem:[%s7633_s12 + $0x58] sm:$0xff] %vm1077_vm4, %v4396_v34 }
0x335c   : > { %v4387_v54 = vpop.f32.mrf.mxu1 }
0x335d   : > { %v4388_v15 = vadd.f32 %v4387_v54, %v4358_v10 }
0x335f   : > { %v4393_v14 = vadd.f32 %v9017_v4, %v4388_v15 }
0x3361   : > { %v4402_v60 = vmul.f32 %v4393_v14, %v4150_v29  ;;  %v6206_v14 = vld [vmem:[%s5790_s2 + $0x50] sm:$0xff] }
0x3363   : > { %v4404_v43 = vadd.f32 %v4402_v60, %v9279_v46  ;;  %v9384_v46 = vld [vmem:[%s10137_s24] sm:$0xff] }
0x3365   : > { %v4412_v55 = vsel %vm983_vm2, %v4404_v43, %v6407_v35 }
0x337c   : > { %v4390_v47 = vpop.f32.mrf.mxu1 }
0x337d   : > { %v4391_v48 = vadd.f32 %v4390_v47, %v4361_v22 }
0x337f   : > { %v4394_v52 = vadd.f32 %v9017_v4, %v4391_v48 }
0x3381   : > { %v4403_v3 = vmul.f32 %v4394_v52, %v4151_v26  ;;  %v9395_v26 = vld [vmem:[%s10137_s24 + $0x8] sm:$0xff] }
0x3383   : > { %v4405_v20 = vadd.f32 %v4403_v3, %v9288_v18  ;;  %v10309_v18 = vld [vmem:[#allocation41_spill] sm:$0xff] }
0x3385   : > { %v4413_v51 = vsel %vm983_vm2, %v4405_v20, %v6406_v13 }
0x3386   : > { %4428 = vmatpush.msrb.mxu2 %v4413_v51 }
0x3388   : > { %4429 = vmatpush.msrb.mxu2 %v4412_v55 }
0x3389   : > { %6197 = vmatmul.msk.f32.vlgmr.msrb.gmra.mxu2 %vm1022_vm3, %v9152_v1 }
0x3391   : > { %6198 = vmatmul.msk.f32.gmra.mxu2 %vm1022_vm3, %v9159_v7 }
0x3399   : > { %6199 = vmatmul.msk.f32.gmra.mxu2 %vm1022_vm3, %v9166_v63 }
0x33a1   : > { %6200 = vmatmul.msk.f32.gmra.mxu2 %vm1022_vm3, %v9173_v24 }
0x340c   : > { %v4431_v4 = vpop.f32.mrf.mxu2 }
0x3414   : > { %v4434_v61 = vpop.f32.mrf.mxu2 }
0x341c   : > { %v4437_v29 = vpop.f32.mrf.mxu2 }
0x341d   : > { %4482 = vrot.lane.b32.xlu0 %v4437_v29, %s10147_s17 }
0x3424   : > { %v4440_v44 = vpop.f32.mrf.mxu2 }
0x3425   : > { %4484 = vrot.lane.b32.xlu0 %v4440_v44, %s10147_s17  ;;  %4455 = vmatpush.msrb.mxu3 %v4440_v44 }
0x3427   : > { %4456 = vmatpush.msrb.mxu3 %v4437_v29 }
0x3429   : > { %4457 = vmatpush.msrb.mxu3 %v4434_v61 }
0x342b   : > { %4458 = vmatpush.msrb.mxu3 %v4431_v4 }
0x342c   : > { %6201 = vmatmul.msk.f32.vlgmr.msrb.gmra.mxu3 %vm922_vm0, %v9384_v46 }
0x342d   : > { %4685 = vmatpush.msra.mxu3 %v9045_v59  ;;  %v9406_v59 = vld [vmem:[%s10137_s24 + $0x10] sm:$0xff] }
0x342f   : > { %4686 = vmatpush.msra.mxu3 %v9049_v17  ;;  %v10303_v17 = vld [vmem:[#allocation35_spill] sm:$0xff] }
0x3431   : > { %4687 = vmatpush.msra.mxu3 %v9053_v31  ;;  %v10304_v31 = vld [vmem:[#allocation36_spill] sm:$0xff] }
0x3433   : > { %4688 = vmatpush.msra.mxu3 %v9057_v32  ;;  %v10305_v32 = vld [vmem:[#allocation37_spill] sm:$0xff] }
0x3434   : > { %6202 = vmatmul.msk.f32.gmra.mxu3 %vm922_vm0, %v9395_v26 }
0x3435   : > { %4689 = vmatpush.msra.mxu3 %v9063_v58  ;;  %v10306_v58 = vld [vmem:[#allocation38_spill] sm:$0xff] }
0x3437   : > { %4690 = vmatpush.msra.mxu3 %v9067_v5  ;;  %v9417_v5 = vld [vmem:[%s10137_s24 + $0x18] sm:$0xff] }
0x3439   : > { %4691 = vmatpush.msra.mxu3 %v9071_v8  ;;  %v10307_v8 = vld [vmem:[#allocation39_spill] sm:$0xff] }
0x343b   : > { %4692 = vmatpush.msra.mxu3 %v9075_v62  ;;  %v10308_v62 = vld [vmem:[#allocation40_spill] sm:$0xff] }
0x343c   : > { %6203 = vmatmul.msk.f32.gmra.mxu3 %vm922_vm0, %v9406_v59 }
0x343d   : > { %4693 = vmatpush.msra.mxu3 %v10303_v17 }
0x343f   : > { %4694 = vmatpush.msra.mxu3 %v10304_v31 }
0x3441   : > { %4695 = vmatpush.msra.mxu3 %v10305_v32 }
0x3443   : > { %4696 = vmatpush.msra.mxu3 %v10306_v58 }
0x3444   : > { %6204 = vmatmul.msk.f32.gmra.mxu3 %vm922_vm0, %v9417_v5 }
0x3445   : > { %4697 = vmatpush.msra.mxu3 %v10307_v8 }
0x3447   : > { %4698 = vmatpush.msra.mxu3 %v10308_v62 }
0x3449   : > { %4699 = vmatpush.msra.mxu3 %v10309_v18 }
0x344b   : > { %4700 = vmatpush.msra.mxu3 %v10310_v56 }
0x344d   : > { %4798 = vmatpush.msrb.mxu3 %v9426_v39 }
0x344f   : > { %4799 = vmatpush.msrb.mxu3 %v9430_v33 }
0x3451   : > { %4800 = vmatpush.msrb.mxu3 %v9434_v49 }
0x3453   : > { %4801 = vmatpush.msrb.mxu3 %v9438_v23 }
0x348f   : > { %v4483_v42 = vpop.permute.xlu0 %4482 }
0x3497   : > { %v4485_v34 = vpop.permute.xlu0 %4484 }
0x34af   : > { %v4460_v6 = vpop.f32.mrf.mxu3 }
0x34b0   : > { %4474 = vrot.lane.b32.xlu2 %v4460_v6, %s10180_s19 }
0x34b7   : > { %v4463_v19 = vpop.f32.mrf.mxu3 }
0x34b8   : > { %4476 = vrot.lane.b32.xlu2 %v4463_v19, %s10180_s19 }
0x34bf   : > { %v4466_v9 = vpop.f32.mrf.mxu3 }
0x34c0   : > { %4490 = vrot.lane.b32.xlu1 %v4466_v9, %s10181_s20 }
0x34c7   : > { %v4469_v21 = vpop.f32.mrf.mxu3 }
0x34c8   : > { %4492 = vrot.lane.b32.xlu1 %v4469_v21, %s10181_s20 }
0x350a   : > { %v4475_v12 = vpop.permute.xlu2 %4474 }
0x350b   : > { %v4496_v27 = vsel %vm1346_vm7, %v4431_v4, %v4475_v12 }
0x350c   : > { %v4498_v16 = vsel %vm1349_vm8, %v4496_v27, %v4483_v42 }
0x3512   : > { %v4477_v37 = vpop.permute.xlu2 %4476 }
0x3513   : > { %v4497_v40 = vsel %vm1346_vm7, %v4434_v61, %v4477_v37 }
0x3514   : > { %v4499_v54 = vsel %vm1349_vm8, %v4497_v40, %v4485_v34 }
0x3532   : > { %v4491_v41 = vpop.permute.xlu1 %4490 }
0x3533   : > { %v4500_v25 = vsel %vm1352_vm9, %v4498_v16, %v4491_v41  ;;  %6208 = vmatmul.msk.f32.vlgmr.msra.gmra.mxu1 %vm1022_vm3, %v4491_v41 }
0x3534   : > { %4525 = vmatmul.f32.vlgmr.msrb.gmra.mxu0 %v4500_v25 }
0x3535   : > { %6230 = vmatpush.msk.msrb.mxu0 %vm10311_vm15, %v9450_v11 }
0x353a   : > { %v4493_v10 = vpop.permute.xlu1 %4492 }
0x353b   : > { %6209 = vmatmul.msk.f32.gmra.mxu1 %vm1022_vm3, %v4493_v10  ;;  %v4501_v15 = vsel %vm1352_vm9, %v4499_v54, %v4493_v10  ;;  %v9487_v54 = vld [vmem:[%s7138_s4 + $0x38] sm:$0xff] }
0x353c   : > { %4528 = vmatmul.f32.gmra.mxu0 %v4501_v15  ;;  %v9491_v15 = vld [vmem:[%s7138_s4 + $0x30] sm:$0xff] }
0x35b0   : > { %v4549_v22 = vpop.f32.mrf.mxu1 }
0x35b1   : > { %v4526_v47 = vpop.f32.mrf.mxu0 }
0x35b2   : > { %v4527_v48 = vadd.f32 %v6206_v14, %v4526_v47  ;;  %v9495_v14 = vld [vmem:[%s7138_s4 + $0x28] sm:$0xff]  ;;  %v9505_v47 = vld [vmem:[%s7138_s4 + $0x18] sm:$0xff] }
0x35b4   : > { %v9460_v60 = vadd.f32 %v4549_v22, %v4527_v48  ;;  %v9499_v22 = vld [vmem:[%s7138_s4 + $0x20] sm:$0xff]  ;;  %v9509_v48 = vld [vmem:[%s7138_s4 + $0x10] sm:$0xff] }
0x35b6   : > { %v6210_v52 = vmul.f32 -1.442695, %v9460_v60 }
0x35b8   : > { %6477 = vpow2.f32 %v6210_v52  ;;  %v4552_v20 = vpop.f32.mrf.mxu1  ;;  %v9513_v52 = vld [vmem:[%s7138_s4 + $0x8] sm:$0xff] }
0x35b9   : > { %v4529_v3 = vpop.f32.mrf.mxu0 }
0x35ba   : > { %v4530_v13 = vadd.f32 %v6207_v38, %v4529_v3  ;;  %v9517_v38 = vld [vmem:[%s7138_s4] sm:$0xff]  ;;  %v6684_v3 = vld [vmem:[%s7250_s28 + $0x18] sm:$0xff] }
0x35bc   : > { %v9463_v43 = vadd.f32 %v4552_v20, %v4530_v13  ;;  %v6685_v13 = vld [vmem:[%s7250_s28 + $0x10] sm:$0xff]  ;;  %v6686_v20 = vld [vmem:[%s7250_s28 + $0x8] sm:$0xff] }
0x35be   : > { %v6478_v35 = vpop.eup %6477  ;;  %v6211_v51 = vmul.f32 -1.442695, %v9463_v43 }
0x35bf   : > { %v4561_v55 = vadd.f32 1.0, %v6478_v35  ;;  %v6687_v35 = vld [vmem:[%s7250_s28] sm:$0xff]  ;;  %s10313_s28 = sld [smem:[#allocation13_spill]] }
0x35c0   : > { %6479 = vpow2.f32 %v6211_v51 }
0x35c1   : > { %6481 = vrcp.f32 %v4561_v55  ;;  %vm4568_vm6 = vweird.f32 %v4561_v55  ;;  %v4574_v56 = vand.u32 2147483648, %v4561_v55  ;;  %v4572_v9 = vand.u32 2147483647, %v4561_v55 }
0x35c3   : > { %v4575_v27 = vor.u32 1.1754944e-38, %v4574_v56  ;;  %vm4573_vm15 = vcmp.eq.f32.partialorder %v4572_v9, 8.507059e+37  ;;  %v9541_v56 = vld [vmem:[%s7192_s29 + $0x10] sm:$0xff] }
0x35c6   : > { %v6480_v4 = vpop.eup %6479 }
0x35c7   : > { %v6482_v61 = vpop.eup %6481  ;;  %v4562_v29 = vadd.f32 1.0, %v6480_v4 }
0x35c8   : > { %v4564_v44 = vmul.f32 %v6482_v61, %v4561_v55  ;;  %vm4569_vm5 = vweird.f32 %v6482_v61 }
0x35c9   : > { %6483 = vrcp.f32 %v4562_v29  ;;  %v4589_v18 = vand.u32 2147483648, %v4562_v29  ;;  %v4587_v19 = vand.u32 2147483647, %v4562_v29  ;;  %vm4570_vm12 = vmor %vm4568_vm6, %vm4569_vm5  ;;  %vm4583_vm1 = vweird.f32 %v4562_v29 }
0x35ca   : > { %v4565_v17 = vsub.f32 1.0, %v4564_v44 }
0x35cb   : > { %v4590_v42 = vor.u32 1.1754944e-38, %v4589_v18  ;;  %vm4588_vm14 = vcmp.eq.f32.partialorder %v4587_v19, 8.507059e+37  ;;  %v9545_v19 = vld [vmem:[%s7192_s29 + $0x8] sm:$0xff] }
0x35cc   : > { %v4566_v31 = vmul.f32 %v6482_v61, %v4565_v17 }
0x35ce   : > { %v4567_v62 = vadd.f32 %v6482_v61, %v4566_v31 }
0x35cf   : > { %v6484_v32 = vpop.eup %6483 }
0x35d0   : > { %v4579_v58 = vmul.f32 %v6484_v32, %v4562_v29  ;;  %vm4584_vm11 = vweird.f32 %v6484_v32  ;;  %v4571_v12 = vsel %vm4570_vm12, %v6482_v61, %v4567_v62  ;;  %v9536_v62 = vld [vmem:[%s7192_s29 + $0x18] sm:$0xff] }
0x35d1   : > { %vm4585_vm13 = vmor %vm4583_vm1, %vm4584_vm11  ;;  %v9468_v25 = vsel %vm4573_vm15, %v4575_v27, %v4571_v12  ;;  %vm10316_vm11 = vcmask 1043456  }
0x35d2   : > { %v4580_v8 = vsub.f32 1.0, %v4579_v58  ;;  %v4595_v40 = vmul.f32 %v9468_v25, %v9236_v57 }
0x35d4   : > { %v4581_v6 = vmul.f32 %v6484_v32, %v4580_v8 }
0x35d6   : > { %v4582_v21 = vadd.f32 %v6484_v32, %v4581_v6 }
0x35d8   : > { %v4586_v16 = vsel %vm4585_vm13, %v6484_v32, %v4582_v21 }
0x35d9   : > { %v9466_v41 = vsel %vm4588_vm14, %v4590_v42, %v4586_v16  ;;  %v9551_v42 = vld [vmem:[%s7192_s29] sm:$0xff]  ;;  %s10312_s29 = sld [smem:[#allocation12_spill]] }
0x35da   : > { %v4596_v37 = vmul.f32 %v9466_v41, %v9248_v36 }
0x35dc   : > { %4611 = vmatpush.msrb.mxu1 %v4596_v37 }
0x35de   : > { %4612 = vmatpush.msrb.mxu1 %v4595_v40 }
0x35df   : > { %6212 = vmatmul.msk.f32.vlgmr.msrb.gmra.mxu1 %vm1022_vm3, %v9152_v1 }
0x35e7   : > { %6213 = vmatmul.msk.f32.gmra.mxu1 %vm1022_vm3, %v9159_v7 }
0x35ef   : > { %6214 = vmatmul.msk.f32.gmra.mxu1 %vm1022_vm3, %v9166_v63 }
0x35f7   : > { %6215 = vmatmul.msk.f32.gmra.mxu1 %vm1022_vm3, %v9173_v24 }
0x365c   : > { %v4614_v36 = vpop.f32.mrf.mxu1 }
0x3664   : > { %v4617_v34 = vpop.f32.mrf.mxu1 }
0x366c   : > { %v4620_v57 = vpop.f32.mrf.mxu1 }
0x366d   : > { %4665 = vrot.lane.b32.xlu0 %v4620_v57, %s10182_s0 }
0x3674   : > { %v4623_v10 = vpop.f32.mrf.mxu1 }
0x3675   : > { %4667 = vrot.lane.b32.xlu0 %v4623_v10, %s10182_s0  ;;  %4638 = vmatpush.msra.mxu2 %v4623_v10 }
0x3677   : > { %4639 = vmatpush.msra.mxu2 %v4620_v57 }
0x3679   : > { %4640 = vmatpush.msra.mxu2 %v4617_v34 }
0x367b   : > { %4641 = vmatpush.msra.mxu2 %v4614_v36 }
0x367c   : > { %6216 = vmatmul.msk.f32.vlgmr.msra.gmra.mxu2 %vm922_vm0, %v9384_v46 }
0x367d   : > { %4896 = vmatpush.msrb.mxu2 %v9487_v54 }
0x367f   : > { %4897 = vmatpush.msrb.mxu2 %v9491_v15 }
0x3681   : > { %4898 = vmatpush.msrb.mxu2 %v9495_v14 }
0x3683   : > { %4899 = vmatpush.msrb.mxu2 %v9499_v22 }
0x3684   : > { %6217 = vmatmul.msk.f32.gmra.mxu2 %vm922_vm0, %v9395_v26 }
0x3685   : > { %4900 = vmatpush.msrb.mxu2 %v9505_v47 }
0x3687   : > { %4901 = vmatpush.msrb.mxu2 %v9509_v48 }
0x3689   : > { %4902 = vmatpush.msrb.mxu2 %v9513_v52 }
0x368b   : > { %4903 = vmatpush.msrb.mxu2 %v9517_v38 }
0x368c   : > { %6218 = vmatmul.msk.f32.gmra.mxu2 %vm922_vm0, %v9406_v59 }
0x368d   : > { %4983 = vmatpush.msra.mxu2 %v6684_v3  ;;  %v4722_v3 = vsub.f32 1.0, %v9468_v25 }
0x368f   : > { %4984 = vmatpush.msra.mxu2 %v6685_v13 }
0x3691   : > { %4985 = vmatpush.msra.mxu2 %v6686_v20  ;;  %v4720_v20 = vmul.f32 %v9468_v25, %v9222_v2 }
0x3693   : > { %4986 = vmatpush.msra.mxu2 %v6687_v35 }
0x3694   : > { %6219 = vmatmul.msk.f32.gmra.mxu2 %vm922_vm0, %v9417_v5 }
0x36df   : > { %v4666_v44 = vpop.permute.xlu0 %4665 }
0x36e7   : > { %v4668_v6 = vpop.permute.xlu0 %4667 }
0x36ff   : > { %v4643_v51 = vpop.f32.mrf.mxu2 }
0x3700   : > { %4657 = vrot.lane.b32.xlu2 %v4643_v51, %s10158_s16 }
0x3707   : > { %v4646_v55 = vpop.f32.mrf.mxu2 }
0x3708   : > { %4659 = vrot.lane.b32.xlu2 %v4646_v55, %s10158_s16  ;;  %v4721_v55 = vmul.f32 %v9466_v41, %v9229_v50  ;;  %v9584_v50 = vld [vmem:[%s7198_s11 + $0x18] sm:$0xff] }
0x370f   : > { %v4649_v4 = vpop.f32.mrf.mxu2 }
0x3710   : > { %4673 = vrot.lane.b32.xlu1 %v4649_v4, %s10160_s23 }
0x3717   : > { %v4652_v61 = vpop.f32.mrf.mxu2 }
0x3718   : > { %4675 = vrot.lane.b32.xlu1 %v4652_v61, %s10160_s23 }
0x375a   : > { %v4658_v29 = vpop.permute.xlu2 %4657 }
0x375b   : > { %v4679_v17 = vsel %vm922_vm0, %v4614_v36, %v4658_v29  ;;  %v9589_v29 = vld [vmem:[%s7198_s11 + $0x10] sm:$0xff] }
0x375c   : > { %v4681_v31 = vsel %vm1077_vm4, %v4679_v17, %v4666_v44  ;;  %v6695_v44 = vld [vmem:[%s7275_s8 + $0x10] sm:$0xff]  ;;  %v9594_v17 = vld [vmem:[%s7198_s11 + $0x8] sm:$0xff] }
0x3762   : > { %v4660_v8 = vpop.permute.xlu2 %4659 }
0x3763   : > { %v4680_v18 = vsel %vm922_vm0, %v4617_v34, %v4660_v8  ;;  %v6699_v8 = vld [vmem:[%s7275_s8] sm:$0xff] }
0x3764   : > { %v4682_v21 = vsel %vm1077_vm4, %v4680_v18, %v4668_v6  ;;  %v6700_v18 = vld [vmem:[%s7391_s18 + $0x88] sm:$0xff]  ;;  %v6701_v6 = vld [vmem:[%s7391_s18 + $0x80] sm:$0xff] }
0x3782   : > { %v4674_v32 = vpop.permute.xlu1 %4673 }
0x3783   : > { %v4683_v58 = vsel %vm1534_vm10, %v4681_v31, %v4674_v32  ;;  %v6697_v31 = vld [vmem:[%s7275_s8 + $0x8] sm:$0xff] }
0x3784   : > { %4701 = vmatmul.f32.vlgmr.msra.gmra.mxu3 %v4683_v58  ;;  %v9601_v58 = vld [vmem:[%s7198_s11] sm:$0xff]  ;;  %s9616_s11 = smul.u32 4294967216, %s6783_s3 }
0x3785   : > { %4923 = vmatpush.msra.mxu3 %v9536_v62 }
0x3786   : > { %s5798_s1 = scalar_lea.vmem %s7057_s27, %s9616_s11  ;;  %s5794_s4 = scalar_lea.vmem %s7062_s30, %s9616_s11 }
0x3787   : > { %4924 = vmatpush.msra.mxu3 %v9541_v56 }
0x3789   : > { %4925 = vmatpush.msra.mxu3 %v9545_v19 }
0x378a   : > { %v4676_v9 = vpop.permute.xlu1 %4675 }
0x378b   : > { %v4684_v12 = vsel %vm1534_vm10, %v4682_v21, %v4676_v9  ;;  %4926 = vmatpush.msra.mxu3 %v9551_v42  ;;  %v9622_v9 = vld [vmem:[%s5798_s1 + $0x60] sm:$0xff] }
0x378c   : > { %4704 = vmatmul.f32.gmra.mxu3 %v4684_v12  ;;  %v6221_v21 = vld [vmem:[%s5794_s4 + $0x60] sm:$0xff]  ;;  %v4780_v12 = vsub.f32 1.0, %v9622_v9 }
0x3807   : > { %v4702_v27 = vpop.f32.mrf.mxu3 }
0x3808   : > { %4710 = vrot.lane.b32.xlu2 %v4702_v27, %s10182_s0 }
0x380f   : > { %v4705_v16 = vpop.f32.mrf.mxu3 }
0x3810   : > { %4712 = vrot.lane.b32.xlu0 %v4705_v16, %s10182_s0  ;;  %v9626_v16 = vld [vmem:[%s6986_s25] ss:$0 sm:$0xff]  ;;  %s5802_s25 = scalar_lea.vmem %s7102_s6, %s9616_s11 }
0x3862   : > { %v4711_v37 = vpop.permute.xlu2 %4710 }
0x3863   : > { %v4716_v40 = vadd.f32 %v4711_v37, %v9460_v60 }
0x3865   : > { %6485 = vtanh.f32 %v4716_v40  ;;  %v4778_v40 = vmul.f32 %v9622_v9, %v6221_v21  ;;  %v6234_v21 = vld [vmem:[%s5802_s25 + $0x60] sm:$0xff] }
0x386b   : > { %v6486_v36 = vpop.eup %6485 }
0x386c   : > { %4726 = vrot.lane.b32.xlu1 %v6486_v36, %s10160_s23 }
0x3882   : > { %v4713_v34 = vpop.permute.xlu0 %4712 }
0x3883   : > { %v4717_v57 = vadd.f32 %v4713_v34, %v9463_v43  ;;  %v4723_v43 = vsub.f32 1.0, %v9466_v41  ;;  %v6693_v41 = vld [vmem:[%s7275_s8 + $0x18] sm:$0xff]  ;;  %v9632_v34 = vld [vmem:[%s5798_s1 + $0x68] sm:$0xff] }
0x3885   : > { %6487 = vtanh.f32 %v4717_v57 }
0x388b   : > { %v6488_v10 = vpop.eup %6487 }
0x388c   : > { %4728 = vrot.lane.b32.xlu2 %v6488_v10, %s10160_s23  ;;  %v6222_v10 = vld [vmem:[%s5794_s4 + $0x68] sm:$0xff] }
0x38de   : > { %v4727_v13 = vpop.permute.xlu1 %4726 }
0x38df   : > { %v4732_v35 = vmul.f32 %v4727_v13, %v4722_v3  ;;  %v4781_v13 = vsub.f32 1.0, %v9632_v34 }
0x38e1   : > { %v9563_v60 = vadd.f32 %v4732_v35, %v4720_v20 }
0x38e3   : > { %4747 = vrot.lane.b32.xlu0 %v9563_v60, %s10160_s23 }
0x38e6   : > { %v4729_v51 = vpop.permute.xlu2 %4728 }
0x38e7   : > { %v4733_v4 = vmul.f32 %v4729_v51, %v4723_v43  ;;  %v4779_v43 = vmul.f32 %v9632_v34, %v6222_v10 }
0x38e9   : > { %v9570_v61 = vadd.f32 %v4733_v4, %v4721_v55 }
0x38eb   : > { %4749 = vrot.lane.b32.xlu1 %v9570_v61, %s10160_s23  ;;  %v6408_v2 = vpack.i.bf16 %v9563_v60, %v9570_v61 }
0x38f3   : > { %6409 = vrot.lane.b32.xlu1 %v6408_v2, %s10183_s26 }
0x3955   : > { %v9577_v25 = vpop.permute.xlu0 %4747 }
0x3956   : > { %6226 = vmatmul.msk.f32.vlgmr.msra.gmra.mxu0 %vm922_vm0, %v9577_v25  ;;  %6228 = vmatmul.msk.f32.vlgmr.msrb.gmra.mxu3 %vm922_vm0, %v9577_v25 }
0x3957   : > { %4952 = vmatpush.msra.mxu0 %v9584_v50  ;;  %5012 = vmatpush.msrb.mxu3 %v6693_v41 }
0x3959   : > { %4953 = vmatpush.msra.mxu0 %v9589_v29  ;;  %5013 = vmatpush.msrb.mxu3 %v6695_v44 }
0x395b   : > { %4954 = vmatpush.msra.mxu0 %v9594_v17  ;;  %5014 = vmatpush.msrb.mxu3 %v6697_v31 }
0x395d   : > { %v9598_v32 = vpop.permute.xlu1 %4749  ;;  %4955 = vmatpush.msra.mxu0 %v9601_v58  ;;  %5015 = vmatpush.msrb.mxu3 %v6699_v8  ;;  %v6235_v8 = vld [vmem:[%s5802_s25 + $0x68] sm:$0xff] }
0x395e   : > { %6227 = vmatmul.msk.f32.gmra.mxu0 %vm922_vm0, %v9598_v32  ;;  %6229 = vmatmul.msk.f32.gmra.mxu3 %vm922_vm0, %v9598_v32 }
0x3966   : > { %6242 = vmatmul.msk.f32.vlgmr.msra.gmra.mxu3 %vm922_vm0, %v9577_v25 }
0x3967   : > { %5176 = vmatpush.msra.mxu3 %v6700_v18 }
0x3969   : > { %5177 = vmatpush.msra.mxu3 %v6701_v6 }
0x396e   : > { %6243 = vmatmul.msk.f32.gmra.mxu3 %vm922_vm0, %v9598_v32 }
0x39d3   : > { %v4772_v27 = vpop.f32.mrf.mxu0 }
0x39d4   : > { %v4773_v37 = vadd.f32 %v9626_v16, %v4772_v27 }
0x39d6   : > { %v4782_v36 = vmul.f32 %v4780_v12, %v4773_v37 }
0x39d8   : > { %v4784_v57 = vadd.f32 %v4782_v36, %v4778_v40 }
0x39d9   : > { %v4803_v2 = vpop.f32.mrf.mxu3 }
0x39da   : > { %v9635_v3 = vmul.f32 %v9622_v9, %v4784_v57  ;;  %6231 = vmatmul.msk.f32.vlgmr.msrb.gmra.mxu0 %vm983_vm2, %v4784_v57  ;;  %v9723_v9 = vld [vmem:[%s10121_s10] sm:$0xff] }
0x39db   : > { %v4775_v20 = vpop.f32.mrf.mxu0 }
0x39dc   : > { %v4776_v35 = vadd.f32 %v9626_v16, %v4775_v20  ;;  %v6705_v20 = vld [vmem:[%s7391_s18 + $0x68] sm:$0xff] }
0x39de   : > { %v4783_v51 = vmul.f32 %v4781_v13, %v4776_v35  ;;  %v6706_v35 = vld [vmem:[%s7391_s18 + $0x60] sm:$0xff] }
0x39e0   : > { %v4785_v55 = vadd.f32 %v4783_v51, %v4779_v43  ;;  %v6707_v43 = vld [vmem:[%s7391_s18 + $0x58] sm:$0xff]  ;;  %v6708_v51 = vld [vmem:[%s7391_s18 + $0x50] sm:$0xff] }
0x39e1   : > { %v4806_v44 = vpop.f32.mrf.mxu3 }
0x39e2   : > { %v9644_v4 = vmul.f32 %v9632_v34, %v4785_v55  ;;  %6232 = vmatmul.msk.f32.gmra.mxu0 %vm983_vm2, %v4785_v55  ;;  %v6709_v55 = vld [vmem:[%s7391_s18 + $0x48] sm:$0xff]  ;;  %v9737_v34 = vld [vmem:[%s10121_s10 + $0x10] sm:$0xff] }
0x3a57   : > { %v4832_v41 = vpop.f32.mrf.mxu0 }
0x3a58   : > { %v4833_v18 = vadd.f32 %v4832_v41, %v4803_v2  ;;  %v6710_v2 = vld [vmem:[%s7391_s18 + $0x40] sm:$0xff]  ;;  %v6711_v41 = vld [vmem:[%s7391_s18 + $0x38] sm:$0xff] }
0x3a5a   : > { %v4841_v37 = vadd.f32 %v6234_v21, %v4833_v18  ;;  %v6715_v18 = vld [vmem:[%s7391_s18 + $0x18] sm:$0xff]  ;;  %v6717_v21 = vld [vmem:[%s7391_s18 + $0x8] sm:$0xff] }
0x3a5f   : > { %v4835_v31 = vpop.f32.mrf.mxu0 }
0x3a60   : > { %v4836_v6 = vadd.f32 %v4835_v31, %v4806_v44  ;;  %v6712_v44 = vld [vmem:[%s7391_s18 + $0x30] sm:$0xff]  ;;  %v6713_v31 = vld [vmem:[%s7391_s18 + $0x28] sm:$0xff] }
0x3a62   : > { %v4842_v27 = vadd.f32 %v6235_v8, %v4836_v6  ;;  %v6714_v8 = vld [vmem:[%s7391_s18 + $0x20] sm:$0xff]  ;;  %v6716_v6 = vld [vmem:[%s7391_s18 + $0x10] sm:$0xff] }
0x3a64   : > { %4857 = vmatpush.msra.mxu1 %v4842_v27 }
0x3a66   : > { %4858 = vmatpush.msra.mxu1 %v4841_v37 }
0x3a67   : > { %6236 = vmatmul.msk.f32.vlgmr.msra.gmra.mxu1 %vm1022_vm3, %v9152_v1 }
0x3a6f   : > { %6237 = vmatmul.msk.f32.gmra.mxu1 %vm1022_vm3, %v9159_v7 }
0x3a77   : > { %6238 = vmatmul.msk.f32.gmra.mxu1 %vm1022_vm3, %v9166_v63  ;;  %v6703_v63 = vld [vmem:[%s7391_s18 + $0x78] sm:$0xff] }
0x3a7f   : > { %6239 = vmatmul.msk.f32.gmra.mxu1 %vm1022_vm3, %v9173_v24  ;;  %v6704_v24 = vld [vmem:[%s7391_s18 + $0x70] sm:$0xff] }
0x3ae4   : > { %v4860_v40 = vpop.f32.mrf.mxu1 }
0x3aec   : > { %v4863_v36 = vpop.f32.mrf.mxu1 }
0x3af4   : > { %v4866_v57 = vpop.f32.mrf.mxu1 }
0x3af5   : > { %4874 = vrot.lane.b32.xlu2 %v4866_v57, %s10158_s16  ;;  %v9688_v57 = vld [vmem:[%s10312_s29] ss:$0 sm:$0xff] }
0x3afc   : > { %v4869_v10 = vpop.f32.mrf.mxu1 }
0x3afd   : > { %4876 = vrot.lane.b32.xlu0 %v4869_v10, %s10158_s16 }
0x3b4f   : > { %v4875_v1 = vpop.permute.xlu2 %4874 }
0x3b50   : > { %v4880_v7 = vsel %vm922_vm0, %v4860_v40, %v4875_v1  ;;  %v6718_v40 = vld [vmem:[%s7391_s18] sm:$0xff]  ;;  %s10314_s18 = sld [smem:[#allocation15_spill]] }
0x3b51   : > { %6240 = vmatmul.msk.f32.vlgmr.msrb.gmra.mxu2 %vm1077_vm4, %v4880_v7 }
0x3b52   : > { %5139 = vmatpush.msrb.mxu2 %v6703_v63 }
0x3b54   : > { %5140 = vmatpush.msrb.mxu2 %v6704_v24 }
0x3b56   : > { %5141 = vmatpush.msrb.mxu2 %v6705_v20 }
0x3b58   : > { %5142 = vmatpush.msrb.mxu2 %v6706_v35 }
0x3b5a   : > { %5143 = vmatpush.msrb.mxu2 %v6707_v43 }
0x3b5c   : > { %5144 = vmatpush.msrb.mxu2 %v6708_v51 }
0x3b5e   : > { %5145 = vmatpush.msrb.mxu2 %v6709_v55 }
0x3b60   : > { %5146 = vmatpush.msrb.mxu2 %v6710_v2 }
0x3b62   : > { %5147 = vmatpush.msrb.mxu2 %v6711_v41 }
0x3b64   : > { %5148 = vmatpush.msrb.mxu2 %v6712_v44 }
0x3b66   : > { %5149 = vmatpush.msrb.mxu2 %v6713_v31 }
0x3b68   : > { %5150 = vmatpush.msrb.mxu2 %v6714_v8 }
0x3b6a   : > { %5151 = vmatpush.msrb.mxu2 %v6715_v18 }
0x3b6c   : > { %5152 = vmatpush.msrb.mxu2 %v6716_v6 }
0x3b6e   : > { %5153 = vmatpush.msrb.mxu2 %v6717_v21  ;;  %v6721_v21 = vld [vmem:[%s10314_s18] ss:$0 sm:$0xff] }
0x3b6f   : > { %v4877_v27 = vpop.permute.xlu0 %4876 }
0x3b70   : > { %v4881_v37 = vsel %vm922_vm0, %v4863_v36, %v4877_v27  ;;  %5154 = vmatpush.msrb.mxu2 %v6718_v40 }
0x3b71   : > { %6241 = vmatmul.msk.f32.gmra.mxu2 %vm1077_vm4, %v4881_v37 }
0x3b79   : > { %6246 = vmatmul.msk.f32.vlgmr.msra.gmra.mxu2 %vm922_vm0, %v9577_v25 }
0x3b7a   : > { %5397 = vmatpush.msra.mxu2 %v9326_v0 }
0x3b7c   : > { %5398 = vmatpush.msra.mxu2 %v9330_v45  ;;  %v4928_v45 = vpop.f32.mrf.mxu3 }
0x3b7e   : > { %5399 = vmatpush.msra.mxu2 %v9334_v53 }
0x3b80   : > { %5400 = vmatpush.msra.mxu2 %v9338_v30  ;;  %v9695_v30 = vld [vmem:[%s10313_s28] ss:$0 sm:$0xff] }
0x3b81   : > { %6247 = vmatmul.msk.f32.gmra.mxu2 %vm922_vm0, %v9598_v32 }
0x3b84   : > { %v4931_v43 = vpop.f32.mrf.mxu3 }
0x3bd4   : > { %v4905_v36 = vpop.f32.mrf.mxu2 }
0x3bd5   : > { %v4906_v10 = vadd.f32 %v9688_v57, %v4905_v36 }
0x3bd7   : > { %6244 = vmatmul.msk.f32.vlgmr.msra.gmra.mxu0 %vm922_vm0, %v4906_v10 }
0x3bf4   : > { %v4908_v1 = vpop.f32.mrf.mxu2 }
0x3bf5   : > { %v4909_v0 = vadd.f32 %v9688_v57, %v4908_v1 }
0x3bf7   : > { %6245 = vmatmul.msk.f32.gmra.mxu0 %vm922_vm0, %v4909_v0  ;;  %v6410_v0 = vpop.permute.xlu1 %6409 }
0x3bfc   : > { %v4988_v8 = vpop.f32.mrf.mxu2 }
0x3c04   : > { %v4991_v37 = vpop.f32.mrf.mxu2 }
0x3c54   : > { %v4957_v53 = vpop.f32.mrf.mxu0 }
0x3c55   : > { %v4958_v7 = vadd.f32 %v4957_v53, %v4928_v45  ;;  %v6411_v53 = vunpack.i.l.bf16 %v6410_v0 }
0x3c57   : > { %v4963_v63 = vadd.f32 %v9695_v30, %v4958_v7 }
0x3c59   : > { %vm4965_vm5 = vcmp.ge.f32.partialorder %v4963_v63, 0.0  ;;  %v4967_v24 = vmul.f32 %v4963_v63, %v10302_v28 }
0x3c5b   : > { %v4969_v20 = vsel %vm4965_vm5, %v4963_v63, %v4967_v24  ;;  %v6412_v24 = vunpack.i.h.bf16 %v6410_v0  ;;  %v6741_v0 = vld [vmem:[%s10315_s9] sm:$0xff] }
0x3c5c   : > { %v5025_v35 = vsel %vm922_vm0, %v4969_v20, %v9563_v60  ;;  %6248 = vmatmul.msk.f32.vlgmr.msrb.gmra.mxu3 %vm922_vm0, %v4969_v20 }
0x3c5d   : > { %6250 = vst.msk [vmem:[%s7633_s12 + $0x60] sm:$0xff] %vm1077_vm4, %v5025_v35 }
0x3c74   : > { %v4960_v51 = vpop.f32.mrf.mxu0 }
0x3c75   : > { %v4961_v55 = vadd.f32 %v4960_v51, %v4931_v43 }
0x3c77   : > { %v4964_v2 = vadd.f32 %v9695_v30, %v4961_v55  ;;  %v6726_v55 = vld [vmem:[%s10315_s9 + $0x78] sm:$0xff] }
0x3c79   : > { %v4968_v41 = vmul.f32 %v4964_v2, %v10302_v28  ;;  %vm4966_vm6 = vcmp.ge.f32.partialorder %v4964_v2, 0.0 }
0x3c7b   : > { %v4970_v44 = vsel %vm4966_vm6, %v4964_v2, %v4968_v41  ;;  %v6727_v2 = vld [vmem:[%s10315_s9 + $0x70] sm:$0xff]  ;;  %v6728_v41 = vld [vmem:[%s10315_s9 + $0x68] sm:$0xff] }
0x3c7c   : > { %6249 = vmatmul.msk.f32.gmra.mxu3 %vm922_vm0, %v4970_v44  ;;  %v5026_v31 = vsel %vm922_vm0, %v4970_v44, %v9570_v61  ;;  %v6729_v44 = vld [vmem:[%s10315_s9 + $0x60] sm:$0xff] }
0x3c7d   : > { %6251 = vst.msk [vmem:[%s7633_s12 + $0x68] sm:$0xff] %vm1077_vm4, %v5026_v31  ;;  %v6730_v31 = vld [vmem:[%s10315_s9 + $0x58] sm:$0xff] }
0x3cdf   : > { %v5017_v18 = vpop.f32.mrf.mxu3 }
0x3ce0   : > { %v5018_v6 = vadd.f32 %v5017_v18, %v4988_v8  ;;  %v6731_v8 = vld [vmem:[%s10315_s9 + $0x50] sm:$0xff]  ;;  %v6732_v18 = vld [vmem:[%s10315_s9 + $0x48] sm:$0xff] }
0x3ce2   : > { %v5023_v27 = vadd.f32 %v6721_v21, %v5018_v6  ;;  %v6733_v6 = vld [vmem:[%s10315_s9 + $0x40] sm:$0xff] }
0x3ce4   : > { %v5032_v10 = vmul.f32 %v5023_v27, %v4780_v12  ;;  %v9730_v12 = vld [vmem:[%s10121_s10 + $0x8] sm:$0xff]  ;;  %v6735_v27 = vld [vmem:[%s10315_s9 + $0x30] sm:$0xff] }
0x3ce6   : > { %v5034_v63 = vadd.f32 %v5032_v10, %v9635_v3  ;;  %v9744_v3 = vld [vmem:[%s10121_s10 + $0x18] sm:$0xff]  ;;  %v6739_v10 = vld [vmem:[%s10315_s9 + $0x10] sm:$0xff] }
0x3ce8   : > { %v5042_v35 = vsel %vm983_vm2, %v5034_v63, %v6412_v24 }
0x3cff   : > { %v5020_v40 = vpop.f32.mrf.mxu3 }
0x3d00   : > { %v5021_v36 = vadd.f32 %v5020_v40, %v4991_v37  ;;  %v6736_v37 = vld [vmem:[%s10315_s9 + $0x28] sm:$0xff]  ;;  %v6737_v40 = vld [vmem:[%s10315_s9 + $0x20] sm:$0xff] }
0x3d02   : > { %v5024_v1 = vadd.f32 %v6721_v21, %v5021_v36  ;;  %v6734_v21 = vld [vmem:[%s10315_s9 + $0x38] sm:$0xff] }
0x3d03   : > { %v6738_v36 = vld [vmem:[%s10315_s9 + $0x18] sm:$0xff] }
0x3d04   : > { %v5033_v45 = vmul.f32 %v5024_v1, %v4781_v13  ;;  %v6740_v1 = vld [vmem:[%s10315_s9 + $0x8] sm:$0xff] }
0x3d06   : > { %v5035_v7 = vadd.f32 %v5033_v45, %v9644_v4 }
0x3d08   : > { %v5043_v20 = vsel %vm983_vm2, %v5035_v7, %v6411_v53 }
0x3d09   : > { %5058 = vmatpush.msrb.mxu0 %v5043_v20 }
0x3d0b   : > { %5059 = vmatpush.msrb.mxu0 %v5042_v35 }
0x3d0c   : > { %6252 = vmatmul.msk.f32.vlgmr.msrb.gmra.mxu0 %vm1022_vm3, %v9723_v9 }
0x3d14   : > { %6253 = vmatmul.msk.f32.gmra.mxu0 %vm1022_vm3, %v9730_v12 }
0x3d1c   : > { %6254 = vmatmul.msk.f32.gmra.mxu0 %vm1022_vm3, %v9737_v34 }
0x3d24   : > { %6255 = vmatmul.msk.f32.gmra.mxu0 %vm1022_vm3, %v9744_v3 }
0x3d89   : > { %v5061_v13 = vpop.f32.mrf.mxu0 }
0x3d91   : > { %v9748_v4 = vpop.f32.mrf.mxu0 }
0x3d99   : > { %v5067_v43 = vpop.f32.mrf.mxu0 }
0x3d9a   : > { %5112 = vrot.lane.b32.xlu0 %v5067_v43, %s10147_s17 }
0x3da1   : > { %v5070_v51 = vpop.f32.mrf.mxu0 }
0x3da2   : > { %5114 = vrot.lane.b32.xlu0 %v5070_v51, %s10147_s17  ;;  %5085 = vmatpush.msrb.mxu1 %v5070_v51  ;;  %s5806_s17 = scalar_lea.vmem %s7490_s15, %s9616_s11  ;;  %s6275_s15 = smul.u32 4294967184, %s6783_s3 }
0x3da4   : > { %5086 = vmatpush.msrb.mxu1 %v5067_v43  ;;  %s5818_s3 = scalar_lea.vmem %s7102_s6, %s6275_s15 }
0x3da6   : > { %5087 = vmatpush.msrb.mxu1 %v9748_v4 }
0x3da8   : > { %5088 = vmatpush.msrb.mxu1 %v5061_v13 }
0x3da9   : > { %6256 = vmatmul.msk.f32.vlgmr.msrb.gmra.mxu1 %vm922_vm0, %v9384_v46 }
0x3daa   : > { %5315 = vmatpush.msra.mxu1 %v6726_v55 }
0x3dac   : > { %5316 = vmatpush.msra.mxu1 %v6727_v2 }
0x3dae   : > { %5317 = vmatpush.msra.mxu1 %v6728_v41  ;;  %v6261_v41 = vld [vmem:[%s5806_s17 + $0x60] sm:$0xff] }
0x3db0   : > { %5318 = vmatpush.msra.mxu1 %v6729_v44 }
0x3db1   : > { %6257 = vmatmul.msk.f32.gmra.mxu1 %vm922_vm0, %v9395_v26 }
0x3db2   : > { %5319 = vmatpush.msra.mxu1 %v6730_v31 }
0x3db4   : > { %5320 = vmatpush.msra.mxu1 %v6731_v8 }
0x3db6   : > { %5321 = vmatpush.msra.mxu1 %v6732_v18 }
0x3db8   : > { %5322 = vmatpush.msra.mxu1 %v6733_v6  ;;  %v6262_v6 = vld [vmem:[%s5806_s17 + $0x68] sm:$0xff] }
0x3db9   : > { %6258 = vmatmul.msk.f32.gmra.mxu1 %vm922_vm0, %v9406_v59 }
0x3dba   : > { %5323 = vmatpush.msra.mxu1 %v6734_v21 }
0x3dbc   : > { %5324 = vmatpush.msra.mxu1 %v6735_v27 }
0x3dbe   : > { %5325 = vmatpush.msra.mxu1 %v6736_v37 }
0x3dc0   : > { %5326 = vmatpush.msra.mxu1 %v6737_v40 }
0x3dc1   : > { %6259 = vmatmul.msk.f32.gmra.mxu1 %vm922_vm0, %v9417_v5 }
0x3dc2   : > { %5327 = vmatpush.msra.mxu1 %v6738_v36 }
0x3dc4   : > { %5328 = vmatpush.msra.mxu1 %v6739_v10 }
0x3dc6   : > { %5329 = vmatpush.msra.mxu1 %v6740_v1 }
0x3dc8   : > { %5330 = vmatpush.msra.mxu1 %v6741_v0 }
0x3dca   : > { %5428 = vmatpush.msrb.mxu1 %v9426_v39 }
0x3dcc   : > { %5429 = vmatpush.msrb.mxu1 %v9430_v33 }
0x3dce   : > { %5430 = vmatpush.msrb.mxu1 %v9434_v49 }
0x3dd0   : > { %5431 = vmatpush.msrb.mxu1 %v9438_v23 }
0x3e0c   : > { %v5113_v39 = vpop.permute.xlu0 %5112 }
0x3e14   : > { %v5115_v51 = vpop.permute.xlu0 %5114 }
0x3e26   : > { %v5090_v45 = vpop.f32.mrf.mxu1 }
0x3e27   : > { %5104 = vrot.lane.b32.xlu2 %v5090_v45, %s10180_s19 }
0x3e2e   : > { %v5093_v53 = vpop.f32.mrf.mxu1 }
0x3e2f   : > { %5106 = vrot.lane.b32.xlu2 %v5093_v53, %s10180_s19  ;;  %s5810_s19 = scalar_lea.vmem %s7062_s30, %s6275_s15 }
0x3e36   : > { %v5096_v7 = vpop.f32.mrf.mxu1 }
0x3e37   : > { %5120 = vrot.lane.b32.xlu1 %v5096_v7, %s10181_s20 }
0x3e3e   : > { %v5099_v63 = vpop.f32.mrf.mxu1 }
0x3e3f   : > { %5122 = vrot.lane.b32.xlu1 %v5099_v63, %s10181_s20 }
0x3e81   : > { %v5105_v24 = vpop.permute.xlu2 %5104 }
0x3e82   : > { %v5126_v33 = vsel %vm1346_vm7, %v5061_v13, %v5105_v24 }
0x3e83   : > { %v5128_v49 = vsel %vm1349_vm8, %v5126_v33, %v5113_v39 }
0x3e89   : > { %v5107_v35 = vpop.permute.xlu2 %5106 }
0x3e8a   : > { %v5127_v43 = vsel %vm1346_vm7, %v9748_v4, %v5107_v35 }
0x3e8b   : > { %v5129_v2 = vsel %vm1349_vm8, %v5127_v43, %v5115_v51 }
0x3ea9   : > { %v5121_v23 = vpop.permute.xlu1 %5120 }
0x3eaa   : > { %v5130_v20 = vsel %vm1352_vm9, %v5128_v49, %v5121_v23  ;;  %6263 = vmatmul.msk.f32.vlgmr.msra.gmra.mxu3 %vm1022_vm3, %v5121_v23 }
0x3eab   : > { %5155 = vmatmul.f32.vlgmr.msrb.gmra.mxu2 %v5130_v20 }
0x3eac   : > { %6285 = vmatpush.msk.msrb.mxu2 %vm10316_vm11, %v9450_v11 }
0x3eb1   : > { %v5123_v55 = vpop.permute.xlu1 %5122 }
0x3eb2   : > { %6264 = vmatmul.msk.f32.gmra.mxu3 %vm1022_vm3, %v5123_v55  ;;  %v5131_v13 = vsel %vm1352_vm9, %v5129_v2, %v5123_v55 }
0x3eb3   : > { %5158 = vmatmul.f32.gmra.mxu2 %v5131_v13 }
0x3f2d   : > { %v5179_v44 = vpop.f32.mrf.mxu3 }
0x3f2e   : > { %v5156_v31 = vpop.f32.mrf.mxu2 }
0x3f2f   : > { %v5157_v8 = vadd.f32 %v6261_v41, %v5156_v31 }
0x3f31   : > { %v9798_v18 = vadd.f32 %v5179_v44, %v5157_v8 }
0x3f33   : > { %v6265_v11 = vmul.f32 -1.442695, %v9798_v18 }
0x3f35   : > { %6489 = vpow2.f32 %v6265_v11  ;;  %v5182_v27 = vpop.f32.mrf.mxu3 }
0x3f36   : > { %v5159_v4 = vpop.f32.mrf.mxu2 }
0x3f37   : > { %v5160_v21 = vadd.f32 %v6262_v6, %v5159_v4 }
0x3f39   : > { %v9801_v37 = vadd.f32 %v5182_v27, %v5160_v21 }
0x3f3b   : > { %v6490_v40 = vpop.eup %6489  ;;  %v6266_v36 = vmul.f32 -1.442695, %v9801_v37 }
0x3f3c   : > { %v5191_v10 = vadd.f32 1.0, %v6490_v40 }
0x3f3d   : > { %6491 = vpow2.f32 %v6266_v36 }
0x3f3e   : > { %6493 = vrcp.f32 %v5191_v10  ;;  %vm5198_vm8 = vweird.f32 %v5191_v10  ;;  %v5204_v20 = vand.u32 2147483648, %v5191_v10  ;;  %v5202_v51 = vand.u32 2147483647, %v5191_v10 }
0x3f40   : > { %v5205_v41 = vor.u32 1.1754944e-38, %v5204_v20  ;;  %vm5203_vm15 = vcmp.eq.f32.partialorder %v5202_v51, 8.507059e+37 }
0x3f43   : > { %v6492_v1 = vpop.eup %6491 }
0x3f44   : > { %v6494_v0 = vpop.eup %6493  ;;  %v5192_v45 = vadd.f32 1.0, %v6492_v1 }
0x3f45   : > { %v5194_v53 = vmul.f32 %v6494_v0, %v5191_v10  ;;  %vm5199_vm7 = vweird.f32 %v6494_v0 }
0x3f46   : > { %6495 = vrcp.f32 %v5192_v45  ;;  %v5219_v23 = vand.u32 2147483648, %v5192_v45  ;;  %v5217_v43 = vand.u32 2147483647, %v5192_v45  ;;  %vm5200_vm12 = vmor %vm5198_vm8, %vm5199_vm7  ;;  %vm5213_vm1 = vweird.f32 %v5192_v45 }
0x3f47   : > { %v5195_v7 = vsub.f32 1.0, %v5194_v53 }
0x3f48   : > { %v5220_v13 = vor.u32 1.1754944e-38, %v5219_v23  ;;  %vm5218_vm14 = vcmp.eq.f32.partialorder %v5217_v43, 8.507059e+37 }
0x3f49   : > { %v5196_v63 = vmul.f32 %v6494_v0, %v5195_v7 }
0x3f4b   : > { %v5197_v49 = vadd.f32 %v6494_v0, %v5196_v63 }
0x3f4c   : > { %v6496_v24 = vpop.eup %6495 }
0x3f4d   : > { %v5209_v39 = vmul.f32 %v6496_v24, %v5192_v45  ;;  %vm5214_vm9 = vweird.f32 %v6496_v24  ;;  %v5201_v2 = vsel %vm5200_vm12, %v6494_v0, %v5197_v49 }
0x3f4e   : > { %vm5215_vm13 = vmor %vm5213_vm1, %vm5214_vm9  ;;  %v9806_v8 = vsel %vm5203_vm15, %v5205_v41, %v5201_v2 }
0x3f4f   : > { %v5210_v33 = vsub.f32 1.0, %v5209_v39  ;;  %v5225_v6 = vmul.f32 %v9806_v8, %v9577_v25 }
0x3f51   : > { %v5211_v35 = vmul.f32 %v6496_v24, %v5210_v33 }
0x3f53   : > { %v5212_v55 = vadd.f32 %v6496_v24, %v5211_v35 }
0x3f55   : > { %v5216_v44 = vsel %vm5215_vm13, %v6496_v24, %v5212_v55  ;;  %v5350_v24 = vmul.f32 %v9806_v8, %v9563_v60 }
0x3f56   : > { %v9804_v31 = vsel %vm5218_vm14, %v5220_v13, %v5216_v44  ;;  %v6277_v13 = vld [vmem:[%s5810_s19 + $0x78] sm:$0xff] }
0x3f57   : > { %v5226_v11 = vmul.f32 %v9804_v31, %v9598_v32 }
0x3f59   : > { %5241 = vmatpush.msrb.mxu3 %v5226_v11 }
0x3f5b   : > { %5242 = vmatpush.msrb.mxu3 %v5225_v6 }
0x3f5c   : > { %6267 = vmatmul.msk.f32.vlgmr.msrb.gmra.mxu3 %vm1022_vm3, %v9723_v9 }
0x3f64   : > { %6268 = vmatmul.msk.f32.gmra.mxu3 %vm1022_vm3, %v9730_v12 }
0x3f6c   : > { %6269 = vmatmul.msk.f32.gmra.mxu3 %vm1022_vm3, %v9737_v34 }
0x3f74   : > { %6270 = vmatmul.msk.f32.gmra.mxu3 %vm1022_vm3, %v9744_v3 }
0x3fdf   : > { %v5244_v4 = vpop.f32.mrf.mxu3 }
0x3fe7   : > { %v5247_v21 = vpop.f32.mrf.mxu3 }
0x3fef   : > { %v5250_v32 = vpop.f32.mrf.mxu3 }
0x3ff0   : > { %5295 = vrot.lane.b32.xlu0 %v5250_v32, %s10182_s0 }
0x3ff7   : > { %v5253_v27 = vpop.f32.mrf.mxu3 }
0x3ff8   : > { %5297 = vrot.lane.b32.xlu0 %v5253_v27, %s10182_s0  ;;  %5268 = vmatpush.msra.mxu0 %v5253_v27 }
0x3ffa   : > { %5269 = vmatpush.msra.mxu0 %v5250_v32 }
0x3ffc   : > { %5270 = vmatpush.msra.mxu0 %v5247_v21 }
0x3ffe   : > { %5271 = vmatpush.msra.mxu0 %v5244_v4 }
0x3fff   : > { %6271 = vmatmul.msk.f32.vlgmr.msra.gmra.mxu0 %vm922_vm0, %v9384_v46 }
0x4000   : > { %5526 = vmatpush.msrb.mxu0 %v9487_v54 }
0x4002   : > { %5527 = vmatpush.msrb.mxu0 %v9491_v15 }
0x4004   : > { %5528 = vmatpush.msrb.mxu0 %v9495_v14 }
0x4006   : > { %5529 = vmatpush.msrb.mxu0 %v9499_v22 }
0x4007   : > { %6272 = vmatmul.msk.f32.gmra.mxu0 %vm922_vm0, %v9395_v26 }
0x4008   : > { %5530 = vmatpush.msrb.mxu0 %v9505_v47 }
0x400a   : > { %5531 = vmatpush.msrb.mxu0 %v9509_v48 }
0x400c   : > { %5532 = vmatpush.msrb.mxu0 %v9513_v52 }
0x400e   : > { %5533 = vmatpush.msrb.mxu0 %v9517_v38 }
0x400f   : > { %6273 = vmatmul.msk.f32.gmra.mxu0 %vm922_vm0, %v9406_v59 }
0x4017   : > { %6274 = vmatmul.msk.f32.gmra.mxu0 %vm922_vm0, %v9417_v5 }
0x4062   : > { %v5296_v22 = vpop.permute.xlu0 %5295 }
0x406a   : > { %v5298_v25 = vpop.permute.xlu0 %5297 }
0x407c   : > { %v5273_v46 = vpop.f32.mrf.mxu0 }
0x407d   : > { %5287 = vrot.lane.b32.xlu2 %v5273_v46, %s10158_s16  ;;  %v6290_v46 = vld [vmem:[%s5818_s3 + $0x78] sm:$0xff] }
0x4084   : > { %v5276_v54 = vpop.f32.mrf.mxu0 }
0x4085   : > { %5289 = vrot.lane.b32.xlu2 %v5276_v54, %s10158_s16 }
0x408c   : > { %v5279_v26 = vpop.f32.mrf.mxu0 }
0x408d   : > { %5303 = vrot.lane.b32.xlu1 %v5279_v26, %s10160_s23 }
0x4094   : > { %v5282_v15 = vpop.f32.mrf.mxu0 }
0x4095   : > { %5305 = vrot.lane.b32.xlu1 %v5282_v15, %s10160_s23  ;;  %v6289_v15 = vld [vmem:[%s5818_s3 + $0x70] sm:$0xff] }
0x40d7   : > { %v5288_v14 = vpop.permute.xlu2 %5287 }
0x40d8   : > { %v5309_v47 = vsel %vm922_vm0, %v5244_v4, %v5288_v14 }
0x40d9   : > { %v5311_v59 = vsel %vm1077_vm4, %v5309_v47, %v5296_v22 }
0x40df   : > { %v5290_v52 = vpop.permute.xlu2 %5289 }
0x40e0   : > { %v5310_v38 = vsel %vm922_vm0, %v5247_v21, %v5290_v52 }
0x40e1   : > { %v5312_v36 = vsel %vm1077_vm4, %v5310_v38, %v5298_v25 }
0x40ff   : > { %v5304_v48 = vpop.permute.xlu1 %5303 }
0x4100   : > { %v5313_v5 = vsel %vm1534_vm10, %v5311_v59, %v5304_v48 }
0x4101   : > { %5331 = vmatmul.f32.vlgmr.msra.gmra.mxu1 %v5313_v5 }
0x4102   : > { %5553 = vmatpush.msra.mxu1 %v9536_v62 }
0x4104   : > { %5554 = vmatpush.msra.mxu1 %v9541_v56 }
0x4106   : > { %5555 = vmatpush.msra.mxu1 %v9545_v19 }
0x4107   : > { %v5306_v40 = vpop.permute.xlu1 %5305 }
0x4108   : > { %v5314_v10 = vsel %vm1534_vm10, %v5312_v36, %v5306_v40  ;;  %5556 = vmatpush.msra.mxu1 %v9551_v42  ;;  %v5352_v42 = vsub.f32 1.0, %v9806_v8 }
0x4109   : > { %5334 = vmatmul.f32.gmra.mxu1 %v5314_v10 }
0x417e   : > { %v5332_v1 = vpop.f32.mrf.mxu1 }
0x417f   : > { %5340 = vrot.lane.b32.xlu2 %v5332_v1, %s10182_s0 }
0x4186   : > { %v5335_v0 = vpop.f32.mrf.mxu1 }
0x4187   : > { %5342 = vrot.lane.b32.xlu0 %v5335_v0, %s10182_s0 }
0x41d9   : > { %v5341_v62 = vpop.permute.xlu2 %5340 }
0x41da   : > { %v5346_v56 = vadd.f32 %v5341_v62, %v9798_v18  ;;  %v5353_v18 = vsub.f32 1.0, %v9804_v31 }
0x41dc   : > { %6497 = vtanh.f32 %v5346_v56 }
0x41e2   : > { %v6498_v45 = vpop.eup %6497 }
0x41e3   : > { %5356 = vrot.lane.b32.xlu1 %v6498_v45, %s10160_s23 }
0x41f9   : > { %v5343_v19 = vpop.permute.xlu0 %5342 }
0x41fa   : > { %v5347_v53 = vadd.f32 %v5343_v19, %v9801_v37  ;;  %v5351_v37 = vmul.f32 %v9804_v31, %v9570_v61 }
0x41fc   : > { %6499 = vtanh.f32 %v5347_v53 }
0x4202   : > { %v6500_v7 = vpop.eup %6499 }
0x4203   : > { %5358 = vrot.lane.b32.xlu2 %v6500_v7, %s10160_s23 }
0x4255   : > { %v5357_v63 = vpop.permute.xlu1 %5356 }
0x4256   : > { %v5362_v39 = vmul.f32 %v5357_v63, %v5352_v42 }
0x4258   : > { %v9861_v33 = vadd.f32 %v5362_v39, %v5350_v24 }
0x425a   : > { %5377 = vrot.lane.b32.xlu0 %v9861_v33, %s10160_s23 }
0x425d   : > { %v5359_v49 = vpop.permute.xlu2 %5358 }
0x425e   : > { %v5363_v23 = vmul.f32 %v5359_v49, %v5353_v18 }
0x4260   : > { %v9868_v20 = vadd.f32 %v5363_v23, %v5351_v37 }
0x4262   : > { %5379 = vrot.lane.b32.xlu1 %v9868_v20, %s10160_s23  ;;  %s5814_s23 = scalar_lea.vmem %s7057_s27, %s6275_s15 }
0x4263   : > { %v6279_v35 = vld [vmem:[%s5814_s23 + $0x70] sm:$0xff]  ;;  %v6280_v55 = vld [vmem:[%s5814_s23 + $0x78] sm:$0xff] }
0x4264   : > { %v5410_v43 = vsub.f32 1.0, %v6279_v35  ;;  %v5411_v41 = vsub.f32 1.0, %v6280_v55  ;;  %v5409_v8 = vmul.f32 %v6280_v55, %v6277_v13 }
0x42cc   : > { %v5378_v60 = vpop.permute.xlu0 %5377 }
0x42cd   : > { %6281 = vmatmul.msk.f32.vlgmr.msra.gmra.mxu2 %vm922_vm0, %v5378_v60  ;;  %6283 = vmatmul.msk.f32.vlgmr.msrb.gmra.mxu1 %vm922_vm0, %v5378_v60 }
0x42ce   : > { %5582 = vmatpush.msra.mxu2 %v9584_v50  ;;  %v6276_v50 = vld [vmem:[%s5810_s19 + $0x70] sm:$0xff] }
0x42cf   : > { %v5408_v51 = vmul.f32 %v6279_v35, %v6276_v50 }
0x42d0   : > { %5583 = vmatpush.msra.mxu2 %v9589_v29 }
0x42d2   : > { %5584 = vmatpush.msra.mxu2 %v9594_v17 }
0x42d4   : > { %v5380_v61 = vpop.permute.xlu1 %5379  ;;  %5585 = vmatpush.msra.mxu2 %v9601_v58 }
0x42d5   : > { %6282 = vmatmul.msk.f32.gmra.mxu2 %vm922_vm0, %v5380_v61  ;;  %6284 = vmatmul.msk.f32.gmra.mxu1 %vm922_vm0, %v5380_v61 }
0x42dd   : > { %6297 = vmatmul.msk.f32.vlgmr.msra.gmra.mxu1 %vm922_vm0, %v5378_v60 }
0x42e5   : > { %6298 = vmatmul.msk.f32.gmra.mxu1 %vm922_vm0, %v5380_v61 }
0x434a   : > { %v5433_v4 = vpop.f32.mrf.mxu1 }
0x4350   : > { %v5402_v29 = vpop.f32.mrf.mxu2 }
0x4351   : > { %v5403_v17 = vadd.f32 %v9626_v16, %v5402_v29 }
0x4352   : > { %v5436_v32 = vpop.f32.mrf.mxu1 }
0x4353   : > { %v5412_v58 = vmul.f32 %v5410_v43, %v5403_v17 }
0x4355   : > { %v5414_v2 = vadd.f32 %v5412_v58, %v5408_v51 }
0x4357   : > { %6286 = vmatmul.msk.f32.vlgmr.msrb.gmra.mxu2 %vm983_vm2, %v5414_v2 }
0x4358   : > { %v5405_v44 = vpop.f32.mrf.mxu2 }
0x4359   : > { %v5406_v31 = vadd.f32 %v9626_v16, %v5405_v44 }
0x435a   : > { %v5558_v40 = vpop.f32.mrf.mxu1 }
0x435b   : > { %v5413_v11 = vmul.f32 %v5411_v41, %v5406_v31 }
0x435d   : > { %v5415_v6 = vadd.f32 %v5413_v11, %v5409_v8 }
0x435f   : > { %6287 = vmatmul.msk.f32.gmra.mxu2 %vm983_vm2, %v5415_v6 }
0x4362   : > { %v5561_v45 = vpop.f32.mrf.mxu1 }
0x43da   : > { %v5462_v21 = vpop.f32.mrf.mxu2 }
0x43db   : > { %v5463_v54 = vadd.f32 %v5462_v21, %v5433_v4 }
0x43dd   : > { %v5471_v22 = vadd.f32 %v6289_v15, %v5463_v54 }
0x43e2   : > { %v5465_v27 = vpop.f32.mrf.mxu2 }
0x43e3   : > { %v5466_v26 = vadd.f32 %v5465_v27, %v5436_v32 }
0x43e5   : > { %v5472_v14 = vadd.f32 %v6290_v46, %v5466_v26 }
0x43e7   : > { %5487 = vmatpush.msra.mxu3 %v5472_v14 }
0x43e9   : > { %5488 = vmatpush.msra.mxu3 %v5471_v22 }
0x43ea   : > { %6291 = vmatmul.msk.f32.vlgmr.msra.gmra.mxu3 %vm1022_vm3, %v9723_v9 }
0x43f2   : > { %6292 = vmatmul.msk.f32.gmra.mxu3 %vm1022_vm3, %v9730_v12 }
0x43fa   : > { %6293 = vmatmul.msk.f32.gmra.mxu3 %vm1022_vm3, %v9737_v34 }
0x4402   : > { %6294 = vmatmul.msk.f32.gmra.mxu3 %vm1022_vm3, %v9744_v3 }
0x446d   : > { %v5490_v16 = vpop.f32.mrf.mxu3 }
0x4475   : > { %v5493_v47 = vpop.f32.mrf.mxu3 }
0x447d   : > { %v5496_v59 = vpop.f32.mrf.mxu3 }
0x447e   : > { %5504 = vrot.lane.b32.xlu2 %v5496_v59, %s10158_s16 }
0x4485   : > { %v5499_v48 = vpop.f32.mrf.mxu3 }
0x4486   : > { %5506 = vrot.lane.b32.xlu0 %v5499_v48, %s10158_s16 }
0x44d8   : > { %v5505_v5 = vpop.permute.xlu2 %5504 }
0x44d9   : > { %v5510_v9 = vsel %vm922_vm0, %v5490_v16, %v5505_v5 }
0x44da   : > { %6295 = vmatmul.msk.f32.vlgmr.msrb.gmra.mxu0 %vm1077_vm4, %v5510_v9 }
0x44f8   : > { %v5507_v12 = vpop.permute.xlu0 %5506 }
0x44f9   : > { %v5511_v52 = vsel %vm922_vm0, %v5493_v47, %v5507_v12 }
0x44fa   : > { %6296 = vmatmul.msk.f32.gmra.mxu0 %vm1077_vm4, %v5511_v52 }
0x4557   : > { %v5535_v34 = vpop.f32.mrf.mxu0 }
0x4558   : > { %v5536_v3 = vadd.f32 %v9688_v57, %v5535_v34 }
0x455a   : > { %6299 = vmatmul.msk.f32.vlgmr.msra.gmra.mxu2 %vm922_vm0, %v5536_v3 }
0x4577   : > { %v5538_v38 = vpop.f32.mrf.mxu0 }
0x4578   : > { %v5539_v25 = vadd.f32 %v9688_v57, %v5538_v38 }
0x457a   : > { %6300 = vmatmul.msk.f32.gmra.mxu2 %vm922_vm0, %v5539_v25 }
0x45dd   : > { %v5587_v36 = vpop.f32.mrf.mxu2 }
0x45de   : > { %v5588_v10 = vadd.f32 %v5587_v36, %v5558_v40 }
0x45e0   : > { %v5593_v1 = vadd.f32 %v9695_v30, %v5588_v10 }
0x45e2   : > { %vm5595_vm2 = vcmp.ge.f32.partialorder %v5593_v1, 0.0  ;;  %v5597_v0 = vmul.f32 %v5593_v1, %v10302_v28 }
0x45e4   : > { %v5599_v62 = vsel %vm5595_vm2, %v5593_v1, %v5597_v0 }
0x45e5   : > { %v5601_v56 = vsel %vm922_vm0, %v5599_v62, %v9861_v33 }
0x45e6   : > { %6301 = vst.msk [vmem:[%s7633_s12 + $0x70] sm:$0xff] %vm1077_vm4, %v5601_v56 }
0x45fd   : > { %v5590_v19 = vpop.f32.mrf.mxu2 }
0x45fe   : > { %v5591_v57 = vadd.f32 %v5590_v19, %v5561_v45 }
0x4600   : > { %v5594_v53 = vadd.f32 %v9695_v30, %v5591_v57 }
0x4602   : > { %vm5596_vm3 = vcmp.ge.f32.partialorder %v5594_v53, 0.0  ;;  %v5598_v7 = vmul.f32 %v5594_v53, %v10302_v28 }
0x4604   : > { %v5600_v42 = vsel %vm5596_vm3, %v5594_v53, %v5598_v7 }
0x4605   : > { %v5602_v63 = vsel %vm922_vm0, %v5600_v42, %v9868_v20 }
0x4606   : > { %6302 = vst.msk [vmem:[%s7633_s12 + $0x78] sm:$0xff] %vm1077_vm4, %v5602_v63 }
0x4607 PF: > { %s10317_s30 = sld [smem:[#allocation7_spill]] }
0x4608   : > { %s10318_s3 = sld [smem:[#allocation5_spill]] }
0x4609   : > { %s10319_s28 = sld [smem:[#allocation6_spill]] }
0x460a   : > { %s10320_s29 = sld [smem:[#allocation8_spill]] }
0x460d   : > { %s33_s4 = sadd.s32 1, %s10317_s30   ;;  %s10321_s30 = sld [smem:[#allocation9_spill]] }
0x460e   : > { %p30_p10 = scmp.ge.s32.totalorder %s33_s4, 6  }
0x4610   :  { %32 = sbr.rel (!%p30_p10) target bundleno = 27 (0x1b), region = 205 }
0x4615   :  { %5635 = vsyncpa [#allocation3], 1 }
0x4616   :  { %5637 = vsyncpa [#allocation3 + $0x1], 1 }

</bundles_post_ra>
